<compile_context>
chip_gen: v7x
topology: tpu7x:2x2x1
jax: 0.10.0
libtpu: 0.0.40
codegen_flags: <defaults>
</compile_context>

<pallas_src>
import functools

import jax
import jax.numpy as jnp
from jax.experimental import pallas as pl
from jax.experimental.pallas import tpu as pltpu


# ---------------------------------------------------------------------------
# Model configuration (synthetic, deterministic init; no checkpoint loading)
# ---------------------------------------------------------------------------
IMG_SIZE = 64      # SAM uses 1024
PATCH = 8          # SAM uses 16
IN_CHANS = 3
EMBED_DIM = 256    # vit_h uses 1280
DEPTH = 2          # vit_h uses 32
NUM_HEADS = 2      # vit_h uses 16 (d_head kept at 128 -> lane dense)
MLP_RATIO = 4
OUT_CHANS = 128    # SAM neck uses 256

PIXEL_MEAN = jnp.array([123.675, 116.28, 103.53], jnp.float32)
PIXEL_STD = jnp.array([58.395, 57.12, 57.375], jnp.float32)


# ---------------------------------------------------------------------------
# Tiling helper
# ---------------------------------------------------------------------------
def _pick_tile(dim, cap, align):
    """Largest `align`-multiple divisor of `dim` that is <= cap (or dim itself)."""
    if dim <= cap:
        return dim
    best = None
    t = align
    while t <= cap:
        if dim % t == 0:
            best = t
        t += align
    return dim if best is None else best


# ---------------------------------------------------------------------------
# Fused tiled matmul kernel:  [LN_in] -> bf16 matmul (f32 acc) -> [bias] -> [GELU]
#                             -> [LN_out] -> [+residual]
# ---------------------------------------------------------------------------
def _fused_mm_kernel(*refs, nk, has_ln_in, has_bias, act, has_residual, has_ln_out):
    it = iter(refs)
    x_ref = next(it)
    w_ref = next(it)
    g_in = b_in = bias_ref = res_ref = g_out = b_out = None
    if has_ln_in:
        g_in = next(it)
        b_in = next(it)
    if has_bias:
        bias_ref = next(it)
    if has_residual:
        res_ref = next(it)
    if has_ln_out:
        g_out = next(it)
        b_out = next(it)
    o_ref = next(it)
    acc_ref = next(it)
    xn_ref = next(it) if has_ln_in else None

    j = pl.program_id(1)
    k = pl.program_id(2)

    @pl.when(k == 0)
    def _():
        acc_ref[...] = jnp.zeros_like(acc_ref)

    if has_ln_in:
        # LayerNorm over the full feature axis (wrapper guarantees tk == K here).
        # Computed once per row-block and cached in a bf16 scratch; the output-column
        # axis j is marked "arbitrary" so the cache is reused across j on the same core.
        @pl.when(j == 0)
        def _():
            xf = x_ref[...].astype(jnp.float32)
            mu = jnp.mean(xf, axis=-1, keepdims=True)
            var = jnp.mean(jnp.square(xf - mu), axis=-1, keepdims=True)
            xn = (xf - mu) * jax.lax.rsqrt(var + 1e-6) * g_in[...] + b_in[...]
            xn_ref[...] = xn.astype(jnp.bfloat16)

        x_mx = xn_ref[...]
    else:
        x_mx = x_ref[...].astype(jnp.bfloat16)      # no-op if already bf16

    acc_ref[...] += jnp.dot(
        x_mx,
        w_ref[...].astype(jnp.bfloat16),             # no-op: weights are stored bf16
        preferred_element_type=jnp.float32,
    )

    @pl.when(k == nk - 1)
    def _():
        y = acc_ref[...]
        if has_bias:
            y = y + bias_ref[...]
        if act == "gelu":
            # tanh-approx GELU (exact-erf nn.GELU differs by <1e-3 rel.)
            y = 0.5 * y * (1.0 + jnp.tanh(0.7978845608028654 * (y + 0.044715 * y * y * y)))
        if has_ln_out:
            # LayerNorm2d over channels (wrapper guarantees tn == N here).
            mu = jnp.mean(y, axis=-1, keepdims=True)
            var = jnp.mean(jnp.square(y - mu), axis=-1, keepdims=True)
            y = (y - mu) * jax.lax.rsqrt(var + 1e-6) * g_out[...] + b_out[...]
        if has_residual:
            y = y + res_ref[...].astype(jnp.float32)
        o_ref[...] = y.astype(o_ref.dtype)


def fused_matmul(x, w, bias=None, *, ln_in=None, act=None, residual=None,
                 ln_out=None, out_dtype=jnp.float32,
                 tm_cap=256, tn_cap=512, tk_cap=512):
    M, K = x.shape
    K2, N = w.shape
    assert K == K2

    tm = _pick_tile(M, tm_cap, 8)
    if M // tm < 2:
        # Prefer >= 2 row-blocks so v7x's second TensorCore gets work.
        tm2 = _pick_tile(M, max(8, M // 2), 8)
        if M // tm2 >= 2:
            tm = tm2
    tk = K if ln_in is not None else _pick_tile(K, tk_cap, 128)
    tn = N if ln_out is not None else _pick_tile(N, tn_cap, 128)
    nm, nn, nk = M // tm, N // tn, K // tk

    in_specs = [
        pl.BlockSpec((tm, tk), lambda i, j, k: (i, k)),
        pl.BlockSpec((tk, tn), lambda i, j, k: (k, j)),
    ]
    inputs = [x, w]   # passed through in their native dtypes (weights stored bf16)

    if ln_in is not None:
        g, b = ln_in
        in_specs += [pl.BlockSpec((1, tk), lambda i, j, k: (0, k)),
                     pl.BlockSpec((1, tk), lambda i, j, k: (0, k))]
        inputs += [g.reshape(1, K).astype(jnp.float32),
                   b.reshape(1, K).astype(jnp.float32)]
    if bias is not None:
        in_specs.append(pl.BlockSpec((1, tn), lambda i, j, k: (0, j)))
        inputs.append(bias.reshape(1, N).astype(jnp.float32))
    if residual is not None:
        in_specs.append(pl.BlockSpec((tm, tn), lambda i, j, k: (i, j)))
        inputs.append(residual)
    if ln_out is not None:
        g, b = ln_out
        in_specs += [pl.BlockSpec((1, tn), lambda i, j, k: (0, j)),
                     pl.BlockSpec((1, tn), lambda i, j, k: (0, j))]
        inputs += [g.reshape(1, N).astype(jnp.float32),
                   b.reshape(1, N).astype(jnp.float32)]

    scratch = [pltpu.VMEM((tm, tn), jnp.float32)]
    if ln_in is not None:
        scratch.append(pltpu.VMEM((tm, tk), jnp.bfloat16))   # cached normalized x
        dims = ("parallel", "arbitrary", "arbitrary")        # j reuses the LN cache
    else:
        dims = ("parallel", "parallel", "arbitrary")

    kern = functools.partial(
        _fused_mm_kernel, nk=nk,
        has_ln_in=ln_in is not None, has_bias=bias is not None, act=act,
        has_residual=residual is not None, has_ln_out=ln_out is not None)

    return pl.pallas_call(
        kern,
        out_shape=jax.ShapeDtypeStruct((M, N), out_dtype),
        grid=(nm, nn, nk),
        in_specs=in_specs,
        out_specs=pl.BlockSpec((tm, tn), lambda i, j, k: (i, j)),
        scratch_shapes=scratch,
        compiler_params=pltpu.CompilerParams(dimension_semantics=dims),
    )(*inputs)


# ---------------------------------------------------------------------------
# Multi-head attention over the packed (B, N, 3D) qkv activation
#   * nk == 1 (whole KV fits one block): plain-softmax fast path, no scratch.
#   * nk  > 1: flash-style online softmax with running max/denominator/accumulator.
# ---------------------------------------------------------------------------
def _attn_single_kv_kernel(q_ref, k_ref, v_ref, o_ref, *, num_heads, d_head):
    q_all = q_ref[0]   # (tq, H*d) bf16 -- attention scale already folded into w_qkv
    k_all = k_ref[0]
    v_all = v_ref[0]
    for h in range(num_heads):
        q = q_all[:, h * d_head:(h + 1) * d_head]
        kk = k_all[:, h * d_head:(h + 1) * d_head]
        v = v_all[:, h * d_head:(h + 1) * d_head]
        s = jax.lax.dot_general(q, kk, (((1,), (1,)), ((), ())),
                                preferred_element_type=jnp.float32)     # (tq, tk)
        m = jnp.max(s, axis=-1, keepdims=True)
        p = jnp.exp(s - m)
        l = jnp.sum(p, axis=-1, keepdims=True)
        o = jnp.dot(p.astype(jnp.bfloat16), v, preferred_element_type=jnp.float32)
        o_ref[0, :, h * d_head:(h + 1) * d_head] = (
            o * pl.reciprocal(l, approx=True)).astype(o_ref.dtype)


def _flash_attn_kernel(q_ref, k_ref, v_ref, o_ref, m_ref, l_ref, acc_ref,
                       *, num_heads, d_head):
    ki = pl.program_id(2)
    nk = pl.num_programs(2)

    @pl.when(ki == 0)
    def _():
        m_ref[...] = jnp.full_like(m_ref, -jnp.inf)
        l_ref[...] = jnp.zeros_like(l_ref)
        acc_ref[...] = jnp.zeros_like(acc_ref)

    q_all = q_ref[0]
    k_all = k_ref[0]
    v_all = v_ref[0]

    for h in range(num_heads):
        q = q_all[:, h * d_head:(h + 1) * d_head]
        kk = k_all[:, h * d_head:(h + 1) * d_head]
        v = v_all[:, h * d_head:(h + 1) * d_head]

        s = jax.lax.dot_general(q, kk, (((1,), (1,)), ((), ())),
                                preferred_element_type=jnp.float32)      # (tq, tk)

        m_prev = m_ref[h]
        m_new = jnp.maximum(m_prev, jnp.max(s, axis=-1, keepdims=True))
        alpha = jnp.exp(m_prev - m_new)
        p = jnp.exp(s - m_new)
        l_ref[h] = alpha * l_ref[h] + jnp.sum(p, axis=-1, keepdims=True)
        acc_ref[h] = alpha * acc_ref[h] + jnp.dot(
            p.astype(jnp.bfloat16), v, preferred_element_type=jnp.float32)
        m_ref[h] = m_new

    @pl.when(ki == nk - 1)
    def _():
        for h in range(num_heads):
            inv = pl.reciprocal(l_ref[h], approx=True)
            o_ref[0, :, h * d_head:(h + 1) * d_head] = (acc_ref[h] * inv).astype(o_ref.dtype)


def flash_attention(qkv, *, num_heads, tq_cap=256, tk_cap=512):
    """qkv: (B, N, 3*D) packed Q|K|V columns (bf16) -> attention output (B, N, D) bf16."""
    B, N, three_d = qkv.shape
    D = three_d // 3
    d_head = D // num_heads
    tq = _pick_tile(N, tq_cap, 8)
    tk = _pick_tile(N, tk_cap, 128)
    nq, nk = N // tq, N // tk
    qkv = qkv.astype(jnp.bfloat16)   # no-op in the fused pipeline (already bf16)

    common = dict(
        out_shape=jax.ShapeDtypeStruct((B, N, D), jnp.bfloat16),
        grid=(B, nq, nk),
        in_specs=[
            # Q / K / V column thirds of the same qkv tensor -> no host transposes.
            pl.BlockSpec((1, tq, D), lambda b, qi, ki: (b, qi, 0)),
            pl.BlockSpec((1, tk, D), lambda b, qi, ki: (b, ki, 1)),
            pl.BlockSpec((1, tk, D), lambda b, qi, ki: (b, ki, 2)),
        ],
        out_specs=pl.BlockSpec((1, tq, D), lambda b, qi, ki: (b, qi, 0)),
        compiler_params=pltpu.CompilerParams(
            dimension_semantics=("parallel", "parallel", "arbitrary")),
    )

    if nk == 1:
        kern = functools.partial(_attn_single_kv_kernel, num_heads=num_heads, d_head=d_head)
        return pl.pallas_call(kern, **common)(qkv, qkv, qkv)

    kern = functools.partial(_flash_attn_kernel, num_heads=num_heads, d_head=d_head)
    return pl.pallas_call(
        kern,
        scratch_shapes=[
            pltpu.VMEM((num_heads, tq, 1), jnp.float32),       # running max
            pltpu.VMEM((num_heads, tq, 1), jnp.float32),       # running denom
            pltpu.VMEM((num_heads, tq, d_head), jnp.float32),  # running acc
        ],
        **common,
    )(qkv, qkv, qkv)


# ---------------------------------------------------------------------------
# Neck 3x3 conv (pad=1, no bias) + LayerNorm2d:
#   halo handled by a zero-initialized VMEM scratch (no host-side jnp.pad),
#   im2col slab built in VMEM, one (Hp*Wp, 9C) x (9C, C) MXU matmul, LN2d fused.
# ---------------------------------------------------------------------------
def _neck_conv3_kernel(x_ref, w_ref, g_ref, b_ref, o_ref, xp_ref):
    _, Hp, Wp, C = x_ref.shape
    xp_ref[...] = jnp.zeros_like(xp_ref)
    xp_ref[1:Hp + 1, 1:Wp + 1, :] = x_ref[0]
    xp = xp_ref[...]                                      # (Hp+2, Wp+2, C) bf16 in VMEM

    taps = []
    for dy in range(3):
        for dx in range(3):
            taps.append(xp[dy:dy + Hp, dx:dx + Wp, :].reshape(Hp * Wp, C))
    slab = jnp.concatenate(taps, axis=-1)                 # (Hp*Wp, 9*C) bf16

    y = jnp.dot(slab, w_ref[...], preferred_element_type=jnp.float32)   # (Hp*Wp, C)

    # fused LayerNorm2d (over channels)
    mu = jnp.mean(y, axis=-1, keepdims=True)
    var = jnp.mean(jnp.square(y - mu), axis=-1, keepdims=True)
    y = (y - mu) * jax.lax.rsqrt(var + 1e-6) * g_ref[...] + b_ref[...]
    o_ref[0] = y.reshape(Hp, Wp, C).astype(o_ref.dtype)


def neck_conv3x3_ln(fmap, w_flat, gamma, beta):
    B, Hp, Wp, C = fmap.shape
    return pl.pallas_call(
        _neck_conv3_kernel,
        out_shape=jax.ShapeDtypeStruct((B, Hp, Wp, C), jnp.float32),
        grid=(B,),
        in_specs=[
            pl.BlockSpec((1, Hp, Wp, C), lambda b: (b, 0, 0, 0)),
            pl.BlockSpec((9 * C, C), lambda b: (0, 0)),
            pl.BlockSpec((1, C), lambda b: (0, 0)),
            pl.BlockSpec((1, C), lambda b: (0, 0)),
        ],
        out_specs=pl.BlockSpec((1, Hp, Wp, C), lambda b: (b, 0, 0, 0)),
        scratch_shapes=[pltpu.VMEM((Hp + 2, Wp + 2, C), jnp.bfloat16)],
        compiler_params=pltpu.CompilerParams(dimension_semantics=("parallel",)),
    )(fmap.astype(jnp.bfloat16), w_flat,
      gamma.reshape(1, C).astype(jnp.float32),
      beta.reshape(1, C).astype(jnp.float32))


# ---------------------------------------------------------------------------
# Parameters: weights stored bf16; pixel normalization folded into patch embed;
# attention scale folded into the Q columns of w_qkv (folds done in f32 first).
# ---------------------------------------------------------------------------
def init_params(key):
    def nrm(k, shape, s=0.02):
        return (s * jax.random.normal(k, shape)).astype(jnp.float32)

    keys = iter(jax.random.split(key, 64))
    Hp = Wp = IMG_SIZE // PATCH
    mlp_dim = EMBED_DIM * MLP_RATIO
    d_head = EMBED_DIM // NUM_HEADS
    scale = float(d_head) ** -0.5

    # patch embed: conv(k=p, s=p) expressed as matmul over flattened (py, px, c) patches
    w_patch = nrm(next(keys), (PATCH * PATCH * IN_CHANS, EMBED_DIM))
    b_patch = jnp.zeros((EMBED_DIM,), jnp.float32)
    # Fold (x - mean) / std preprocessing into the patch-embed weights/bias.
    ch = jnp.tile(jnp.arange(IN_CHANS), PATCH * PATCH)            # channel of each row
    row_scale = (1.0 / PIXEL_STD)[ch][:, None]
    row_shift = (PIXEL_MEAN / PIXEL_STD)[ch][:, None]
    w_patch_folded = (w_patch * row_scale).astype(jnp.bfloat16)
    b_patch_folded = b_patch - jnp.sum(row_shift * w_patch, axis=0)

    w_neck2 = nrm(next(keys), (3, 3, OUT_CHANS, OUT_CHANS))        # HWIO
    params = {
        "w_patch_folded": w_patch_folded,
        "b_patch_folded": b_patch_folded,
        "pos_embed": nrm(next(keys), (1, Hp, Wp, EMBED_DIM)),
        "blocks": [],
        # neck: conv1x1 (no bias) -> LN2d -> conv3x3 pad=1 (no bias) -> LN2d
        "w_neck1": nrm(next(keys), (EMBED_DIM, OUT_CHANS)).astype(jnp.bfloat16),
        "g_neck1": jnp.ones((OUT_CHANS,), jnp.float32),
        "b_neck1": jnp.zeros((OUT_CHANS,), jnp.float32),
        "w_neck2_flat": w_neck2.reshape(9 * OUT_CHANS, OUT_CHANS).astype(jnp.bfloat16),
        "g_neck2": jnp.ones((OUT_CHANS,), jnp.float32),
        "b_neck2": jnp.zeros((OUT_CHANS,), jnp.float32),
    }
    for _ in range(DEPTH):
        w_qkv = nrm(next(keys), (EMBED_DIM, 3 * EMBED_DIM))
        b_qkv = jnp.zeros((3 * EMBED_DIM,), jnp.float32)
        # Fold the 1/sqrt(d_head) attention scale into the Q columns.
        w_qkv = w_qkv.at[:, :EMBED_DIM].multiply(scale)
        b_qkv = b_qkv.at[:EMBED_DIM].multiply(scale)
        blk = {
            "g1": jnp.ones((EMBED_DIM,), jnp.float32),
            "b1": jnp.zeros((EMBED_DIM,), jnp.float32),
            "w_qkv": w_qkv.astype(jnp.bfloat16),
            "b_qkv": b_qkv,
            "w_proj": nrm(next(keys), (EMBED_DIM, EMBED_DIM)).astype(jnp.bfloat16),
            "b_proj": jnp.zeros((EMBED_DIM,), jnp.float32),
            "g2": jnp.ones((EMBED_DIM,), jnp.float32),
            "b2": jnp.zeros((EMBED_DIM,), jnp.float32),
            "w_fc1": nrm(next(keys), (EMBED_DIM, mlp_dim)).astype(jnp.bfloat16),
            "b_fc1": jnp.zeros((mlp_dim,), jnp.float32),
            "w_fc2": nrm(next(keys), (mlp_dim, EMBED_DIM)).astype(jnp.bfloat16),
            "b_fc2": jnp.zeros((EMBED_DIM,), jnp.float32),
        }
        params["blocks"].append(blk)
    return params


# ---------------------------------------------------------------------------
# Encoder forward (preprocess folded in; everything heavy is a fused Pallas call)
# ---------------------------------------------------------------------------
def transformer_block(tok, blk):
    B, N, D = tok.shape
    flat = tok.reshape(B * N, D)                      # f32 residual stream

    # --- attention branch: LN fused into QKV matmul; attention; residual fused into proj ---
    # TODO(synk): SAM ViT's decomposed relative positional bias and window partitioning
    #             are not reproduced.
    qkv = fused_matmul(flat, blk["w_qkv"], blk["b_qkv"],
                       ln_in=(blk["g1"], blk["b1"]), out_dtype=jnp.bfloat16)
    attn = flash_attention(qkv.reshape(B, N, 3 * D), num_heads=NUM_HEADS)
    flat = fused_matmul(attn.reshape(B * N, D), blk["w_proj"], blk["b_proj"],
                        residual=flat)

    # --- MLP branch: LN + GELU fused into FC1; bias + residual fused into FC2 ---
    h = fused_matmul(flat, blk["w_fc1"], blk["b_fc1"],
                     ln_in=(blk["g2"], blk["b2"]), act="gelu", out_dtype=jnp.bfloat16)
    flat = fused_matmul(h, blk["w_fc2"], blk["b_fc2"], residual=flat)
    return flat.reshape(B, N, D)


def sam_encode(params, image):
    """SAM preprocess + ViT image encoder.  image: (B, H, W, 3) float32 in [0, 255]."""
    B, H, W, C = image.shape
    Hp, Wp = H // PATCH, W // PATCH
    Np = Hp * Wp

    # Preprocess (normalize) is folded into the patch-embed weights, so the raw image
    # feeds the patch-embed matmul directly.
    # TODO(synk): pad-to-square / ResizeLongestSide for non-square inputs is not handled.
    patches = image.reshape(B, Hp, PATCH, Wp, PATCH, C)
    patches = jnp.transpose(patches, (0, 1, 3, 2, 4, 5)).reshape(B * Np, PATCH * PATCH * C)
    pos = jnp.broadcast_to(params["pos_embed"].reshape(1, Np, EMBED_DIM),
                           (B, Np, EMBED_DIM)).reshape(B * Np, EMBED_DIM)
    tok = fused_matmul(patches, params["w_patch_folded"], params["b_patch_folded"],
                       residual=pos)
    tok = tok.reshape(B, Np, EMBED_DIM)

    for blk in params["blocks"]:
        tok = transformer_block(tok, blk)

    # neck: conv1x1 (no bias) + LayerNorm2d fused; conv3x3 + LayerNorm2d fused kernel
    feat = fused_matmul(tok.reshape(B * Np, EMBED_DIM), params["w_neck1"],
                        ln_out=(params["g_neck1"], params["b_neck1"]),
                        out_dtype=jnp.bfloat16)
    fmap = feat.reshape(B, Hp, Wp, OUT_CHANS)
    return neck_conv3x3_ln(fmap, params["w_neck2_flat"],
                           params["g_neck2"], params["b_neck2"])


_sam_encode_jit = jax.jit(sam_encode)


def forward(params, input_dict):
    """Analog of SegmentAnythingHQ.forward: encodes every image in the scene.

    All images in the scene are batched into one (B, H, W, 3) tensor (they share a shape
    after SAM's resize), so the whole scene runs through a single set of Pallas calls.
    """
    imgs = jnp.concatenate(input_dict["img_list"], axis=0)        # (B, H, W, 3)
    feats = _sam_encode_jit(params, imgs)                         # (B, Hp, Wp, OUT_CHANS)
    input_dict["sam_features"] = [feats[i:i + 1] for i in range(feats.shape[0])]
    # TODO(synk): automatic mask generation + label-map assignment (get_sam) has no Pallas
    #             equivalent (CPU-side NMS / segmentation bookkeeping).
    input_dict["cls_agonistic_seg"] = None
    return input_dict


# ---------------------------------------------------------------------------
if __name__ == "__main__":
    key = jax.random.PRNGKey(0)
    k_param, k_img0, k_img1 = jax.random.split(key, 3)
    params = init_params(k_param)

    # two small synthetic RGB "images", values in [0, 255], NHWC layout
    img0 = jax.random.uniform(k_img0, (1, IMG_SIZE, IMG_SIZE, 3), jnp.float32) * 255.0
    img1 = jax.random.uniform(k_img1, (1, IMG_SIZE, IMG_SIZE, 3), jnp.float32) * 255.0
    input_dict = {"img_list": [img0, img1]}

    out = forward(params, input_dict)
    feats = [jax.block_until_ready(f) for f in out["sam_features"]]
    assert len(feats) == 2
    assert feats[0].shape == (1, IMG_SIZE // PATCH, IMG_SIZE // PATCH, OUT_CHANS)
    assert all(bool(jnp.all(jnp.isfinite(f))) for f in feats)
    print("KERNEL_OK")
</pallas_src>

<mosaic_0001>
module attributes {stable_mosaic.version = 11 : i64} {
  func.func @_fused_mm_kernel(%arg0: i32, %arg1: i32, %arg2: i32, %arg3: memref<64x192xf32, #tpu.memory_space<vmem>>, %arg4: memref<192x256xbf16, #tpu.memory_space<vmem>>, %arg5: memref<1x256xf32, #tpu.memory_space<vmem>>, %arg6: memref<64x256xf32, #tpu.memory_space<vmem>>, %arg7: memref<64x256xf32, #tpu.memory_space<vmem>>, %arg8: memref<64x256xf32, #tpu.memory_space<vmem>>) attributes {dimension_semantics = [#tpu.dimension_semantics<parallel>, #tpu.dimension_semantics<parallel>, #tpu.dimension_semantics<arbitrary>], iteration_bounds = array<i64: 2, 1, 1>, scalar_prefetch = 0 : i64, scratch_operands = 1 : i64, tpu.core_type = #tpu.core_type<tc>, window_params = [{transform_indices = @transform_0, window_bounds = array<i64: 64, 192>}, {transform_indices = @transform_1, window_bounds = array<i64: 192, 256>}, {transform_indices = @transform_2, window_bounds = array<i64: 1, 256>}, {transform_indices = @transform_3, window_bounds = array<i64: 64, 256>}, {transform_indices = @transform_4, window_bounds = array<i64: 64, 256>}]} {
    %c0_i32 = arith.constant 0 : i32
    %0 = arith.cmpi eq, %arg2, %c0_i32 : i32
    %1 = arith.extui %0 : i1 to i32
    %c0_i32_0 = arith.constant 0 : i32
    %2 = arith.cmpi ne, %1, %c0_i32_0 : i32
    scf.if %2 {
      %cst_10 = arith.constant 0.000000e+00 : f32
      %13 = vector.broadcast %cst_10 : f32 to vector<64x256xf32>
      %c0_11 = arith.constant 0 : index
      %c0_12 = arith.constant 0 : index
      %14 = vector.load %arg8[%c0_11, %c0_12] : memref<64x256xf32, #tpu.memory_space<vmem>>, vector<64x256xf32>
      tpu.vector_store %arg8[%c0_11, %c0_12], %13 {strides = array<i32>} : memref<64x256xf32, #tpu.memory_space<vmem>>, vector<64x256xf32>,
    } else {
    }
    %c0 = arith.constant 0 : index
    %c0_1 = arith.constant 0 : index
    %3 = vector.load %arg3[%c0, %c0_1] : memref<64x192xf32, #tpu.memory_space<vmem>>, vector<64x192xf32>
    %4 = arith.truncf %3 : vector<64x192xf32> to vector<64x192xbf16>
    %c0_2 = arith.constant 0 : index
    %c0_3 = arith.constant 0 : index
    %5 = vector.load %arg8[%c0_2, %c0_3] : memref<64x256xf32, #tpu.memory_space<vmem>>, vector<64x256xf32>
    %c0_4 = arith.constant 0 : index
    %c0_5 = arith.constant 0 : index
    %6 = vector.load %arg4[%c0_4, %c0_5] : memref<192x256xbf16, #tpu.memory_space<vmem>>, vector<192x256xbf16>
    %cst = arith.constant dense<0.000000e+00> : vector<64x256xf32>
    %7 = tpu.matmul %4, %6, %cst {dimension_numbers = #tpu.dot_dimension_numbers<[1], [0], [0], [1], [0, 0, 1, 1], [], []>} : vector<64x192xbf16>, vector<192x256xbf16>, vector<64x256xf32> -> vector<64x256xf32>
    %8 = arith.addf %5, %7 : vector<64x256xf32>
    %c0_6 = arith.constant 0 : index
    %c0_7 = arith.constant 0 : index
    %9 = vector.load %arg8[%c0_6, %c0_7] : memref<64x256xf32, #tpu.memory_space<vmem>>, vector<64x256xf32>
    tpu.vector_store %arg8[%c0_6, %c0_7], %8 {strides = array<i32>} : memref<64x256xf32, #tpu.memory_space<vmem>>, vector<64x256xf32>,
    %c0_i32_8 = arith.constant 0 : i32
    %10 = arith.cmpi eq, %arg2, %c0_i32_8 : i32
    %11 = arith.extui %10 : i1 to i32
    %c0_i32_9 = arith.constant 0 : i32
    %12 = arith.cmpi ne, %11, %c0_i32_9 : i32
    scf.if %12 {
      %c0_10 = arith.constant 0 : index
      %c0_11 = arith.constant 0 : index
      %13 = vector.load %arg8[%c0_10, %c0_11] : memref<64x256xf32, #tpu.memory_space<vmem>>, vector<64x256xf32>
      %c0_12 = arith.constant 0 : index
      %c0_13 = arith.constant 0 : index
      %14 = vector.load %arg5[%c0_12, %c0_13] : memref<1x256xf32, #tpu.memory_space<vmem>>, vector<1x256xf32>
      %15 = vector.broadcast %14 : vector<1x256xf32> to vector<64x256xf32>
      %16 = arith.addf %13, %15 : vector<64x256xf32>
      %c0_14 = arith.constant 0 : index
      %c0_15 = arith.constant 0 : index
      %17 = vector.load %arg6[%c0_14, %c0_15] : memref<64x256xf32, #tpu.memory_space<vmem>>, vector<64x256xf32>
      %18 = arith.addf %16, %17 : vector<64x256xf32>
      %c0_16 = arith.constant 0 : index
      %c0_17 = arith.constant 0 : index
      %19 = vector.load %arg7[%c0_16, %c0_17] : memref<64x256xf32, #tpu.memory_space<vmem>>, vector<64x256xf32>
      tpu.vector_store %arg7[%c0_16, %c0_17], %18 {strides = array<i32>} : memref<64x256xf32, #tpu.memory_space<vmem>>, vector<64x256xf32>,
    } else {
    }
    return
  }
  func.func @transform_0(%arg0: i32, %arg1: i32, %arg2: i32) -> (i32, i32) {
    %c0_i32 = arith.constant 0 : i32
    return %arg0, %arg2 : i32, i32
  }
  func.func @transform_1(%arg0: i32, %arg1: i32, %arg2: i32) -> (i32, i32) {
    %c0_i32 = arith.constant 0 : i32
    return %arg2, %arg1 : i32, i32
  }
  func.func @transform_2(%arg0: i32, %arg1: i32, %arg2: i32) -> (i32, i32) {
    %c0_i32 = arith.constant 0 : i32
    %c0_i32_0 = arith.constant 0 : i32
    return %c0_i32, %arg1 : i32, i32
  }
  func.func @transform_3(%arg0: i32, %arg1: i32, %arg2: i32) -> (i32, i32) {
    %c0_i32 = arith.constant 0 : i32
    return %arg0, %arg1 : i32, i32
  }
  func.func @transform_4(%arg0: i32, %arg1: i32, %arg2: i32) -> (i32, i32) {
    %c0_i32 = arith.constant 0 : i32
    return %arg0, %arg1 : i32, i32
  }
}

module attributes {stable_mosaic.version = 11 : i64} {
  func.func @_fused_mm_kernel(%arg0: i32, %arg1: i32, %arg2: i32, %arg3: memref<64x256xf32, #tpu.memory_space<vmem>>, %arg4: memref<256x384xbf16, #tpu.memory_space<vmem>>, %arg5: memref<1x256xf32, #tpu.memory_space<vmem>>, %arg6: memref<1x256xf32, #tpu.memory_space<vmem>>, %arg7: memref<1x384xf32, #tpu.memory_space<vmem>>, %arg8: memref<64x384xbf16, #tpu.memory_space<vmem>>, %arg9: memref<64x384xf32, #tpu.memory_space<vmem>>, %arg10: memref<64x256xbf16, #tpu.memory_space<vmem>>) attributes {dimension_semantics = [#tpu.dimension_semantics<parallel>, #tpu.dimension_semantics<arbitrary>, #tpu.dimension_semantics<arbitrary>], iteration_bounds = array<i64: 2, 2, 1>, scalar_prefetch = 0 : i64, scratch_operands = 2 : i64, tpu.core_type = #tpu.core_type<tc>, window_params = [{transform_indices = @transform_0, window_bounds = array<i64: 64, 256>}, {transform_indices = @transform_1, window_bounds = array<i64: 256, 384>}, {transform_indices = @transform_2, window_bounds = array<i64: 1, 256>}, {transform_indices = @transform_3, window_bounds = array<i64: 1, 256>}, {transform_indices = @transform_4, window_bounds = array<i64: 1, 384>}, {transform_indices = @transform_5, window_bounds = array<i64: 64, 384>}]} {
    %c0_i32 = arith.constant 0 : i32
    %0 = arith.cmpi eq, %arg2, %c0_i32 : i32
    %1 = arith.extui %0 : i1 to i32
    %c0_i32_0 = arith.constant 0 : i32
    %2 = arith.cmpi ne, %1, %c0_i32_0 : i32
    scf.if %2 {
      %cst_12 = arith.constant 0.000000e+00 : f32
      %15 = vector.broadcast %cst_12 : f32 to vector<64x384xf32>
      %c0_13 = arith.constant 0 : index
      %c0_14 = arith.constant 0 : index
      %16 = vector.load %arg9[%c0_13, %c0_14] : memref<64x384xf32, #tpu.memory_space<vmem>>, vector<64x384xf32>
      tpu.vector_store %arg9[%c0_13, %c0_14], %15 {strides = array<i32>} : memref<64x384xf32, #tpu.memory_space<vmem>>, vector<64x384xf32>,
    } else {
    }
    %c0_i32_1 = arith.constant 0 : i32
    %3 = arith.cmpi eq, %arg1, %c0_i32_1 : i32
    %4 = arith.extui %3 : i1 to i32
    %c0_i32_2 = arith.constant 0 : i32
    %5 = arith.cmpi ne, %4, %c0_i32_2 : i32
    scf.if %5 {
      %c0_12 = arith.constant 0 : index
      %c0_13 = arith.constant 0 : index
      %15 = vector.load %arg3[%c0_12, %c0_13] : memref<64x256xf32, #tpu.memory_space<vmem>>, vector<64x256xf32>
      %cst_14 = arith.constant dense<0.000000e+00> : vector<64xf32>
      %16 = vector.multi_reduction <add>, %15, %cst_14 [1] : vector<64x256xf32> to vector<64xf32>
      %17 = vector.shape_cast %16 : vector<64xf32> to vector<64x1xf32>
      %cst_15 = arith.constant 2.560000e+02 : f32
      %18 = vector.broadcast %cst_15 : f32 to vector<64x1xf32>
      %19 = arith.divf %17, %18 : vector<64x1xf32>
      %20 = vector.broadcast %19 : vector<64x1xf32> to vector<64x256xf32>
      %21 = arith.subf %15, %20 : vector<64x256xf32>
      %22 = arith.mulf %21, %21 : vector<64x256xf32>
      %cst_16 = arith.constant dense<0.000000e+00> : vector<64xf32>
      %23 = vector.multi_reduction <add>, %22, %cst_16 [1] : vector<64x256xf32> to vector<64xf32>
      %24 = vector.shape_cast %23 : vector<64xf32> to vector<64x1xf32>
      %cst_17 = arith.constant 2.560000e+02 : f32
      %25 = vector.broadcast %cst_17 : f32 to vector<64x1xf32>
      %26 = arith.divf %24, %25 : vector<64x1xf32>
      %27 = vector.broadcast %19 : vector<64x1xf32> to vector<64x256xf32>
      %28 = arith.subf %15, %27 : vector<64x256xf32>
      %cst_18 = arith.constant 9.99999997E-7 : f32
      %29 = vector.broadcast %cst_18 : f32 to vector<64x1xf32>
      %30 = arith.addf %26, %29 : vector<64x1xf32>
      %31 = math.rsqrt %30 : vector<64x1xf32>
      %32 = vector.broadcast %31 : vector<64x1xf32> to vector<64x256xf32>
      %33 = arith.mulf %28, %32 : vector<64x256xf32>
      %c0_19 = arith.constant 0 : index
      %c0_20 = arith.constant 0 : index
      %34 = vector.load %arg5[%c0_19, %c0_20] : memref<1x256xf32, #tpu.memory_space<vmem>>, vector<1x256xf32>
      %35 = vector.broadcast %34 : vector<1x256xf32> to vector<64x256xf32>
      %36 = arith.mulf %33, %35 : vector<64x256xf32>
      %c0_21 = arith.constant 0 : index
      %c0_22 = arith.constant 0 : index
      %37 = vector.load %arg6[%c0_21, %c0_22] : memref<1x256xf32, #tpu.memory_space<vmem>>, vector<1x256xf32>
      %38 = vector.broadcast %37 : vector<1x256xf32> to vector<64x256xf32>
      %39 = arith.addf %36, %38 : vector<64x256xf32>
      %40 = arith.truncf %39 : vector<64x256xf32> to vector<64x256xbf16>
      %c0_23 = arith.constant 0 : index
      %c0_24 = arith.constant 0 : index
      %41 = vector.load %arg10[%c0_23, %c0_24] : memref<64x256xbf16, #tpu.memory_space<vmem>>, vector<64x256xbf16>
      tpu.vector_store %arg10[%c0_23, %c0_24], %40 {strides = array<i32>} : memref<64x256xbf16, #tpu.memory_space<vmem>>, vector<64x256xbf16>,
    } else {
    }
    %c0 = arith.constant 0 : index
    %c0_3 = arith.constant 0 : index
    %6 = vector.load %arg10[%c0, %c0_3] : memref<64x256xbf16, #tpu.memory_space<vmem>>, vector<64x256xbf16>
    %c0_4 = arith.constant 0 : index
    %c0_5 = arith.constant 0 : index
    %7 = vector.load %arg9[%c0_4, %c0_5] : memref<64x384xf32, #tpu.memory_space<vmem>>, vector<64x384xf32>
    %c0_6 = arith.constant 0 : index
    %c0_7 = arith.constant 0 : index
    %8 = vector.load %arg4[%c0_6, %c0_7] : memref<256x384xbf16, #tpu.memory_space<vmem>>, vector<256x384xbf16>
    %cst = arith.constant dense<0.000000e+00> : vector<64x384xf32>
    %9 = tpu.matmul %6, %8, %cst {dimension_numbers = #tpu.dot_dimension_numbers<[1], [0], [0], [1], [0, 0, 1, 1], [], []>} : vector<64x256xbf16>, vector<256x384xbf16>, vector<64x384xf32> -> vector<64x384xf32>
    %10 = arith.addf %7, %9 : vector<64x384xf32>
    %c0_8 = arith.constant 0 : index
    %c0_9 = arith.constant 0 : index
    %11 = vector.load %arg9[%c0_8, %c0_9] : memref<64x384xf32, #tpu.memory_space<vmem>>, vector<64x384xf32>
    tpu.vector_store %arg9[%c0_8, %c0_9], %10 {strides = array<i32>} : memref<64x384xf32, #tpu.memory_space<vmem>>, vector<64x384xf32>,
    %c0_i32_10 = arith.constant 0 : i32
    %12 = arith.cmpi eq, %arg2, %c0_i32_10 : i32
    %13 = arith.extui %12 : i1 to i32
    %c0_i32_11 = arith.constant 0 : i32
    %14 = arith.cmpi ne, %13, %c0_i32_11 : i32
    scf.if %14 {
      %c0_12 = arith.constant 0 : index
      %c0_13 = arith.constant 0 : index
      %15 = vector.load %arg9[%c0_12, %c0_13] : memref<64x384xf32, #tpu.memory_space<vmem>>, vector<64x384xf32>
      %c0_14 = arith.constant 0 : index
      %c0_15 = arith.constant 0 : index
      %16 = vector.load %arg7[%c0_14, %c0_15] : memref<1x384xf32, #tpu.memory_space<vmem>>, vector<1x384xf32>
      %17 = vector.broadcast %16 : vector<1x384xf32> to vector<64x384xf32>
      %18 = arith.addf %15, %17 : vector<64x384xf32>
      %19 = arith.truncf %18 : vector<64x384xf32> to vector<64x384xbf16>
      %c0_16 = arith.constant 0 : index
      %c0_17 = arith.constant 0 : index
      %20 = vector.load %arg8[%c0_16, %c0_17] : memref<64x384xbf16, #tpu.memory_space<vmem>>, vector<64x384xbf16>
      tpu.vector_store %arg8[%c0_16, %c0_17], %19 {strides = array<i32>} : memref<64x384xbf16, #tpu.memory_space<vmem>>, vector<64x384xbf16>,
    } else {
    }
    return
  }
  func.func @transform_0(%arg0: i32, %arg1: i32, %arg2: i32) -> (i32, i32) {
    %c0_i32 = arith.constant 0 : i32
    return %arg0, %arg2 : i32, i32
  }
  func.func @transform_1(%arg0: i32, %arg1: i32, %arg2: i32) -> (i32, i32) {
    %c0_i32 = arith.constant 0 : i32
    return %arg2, %arg1 : i32, i32
  }
  func.func @transform_2(%arg0: i32, %arg1: i32, %arg2: i32) -> (i32, i32) {
    %c0_i32 = arith.constant 0 : i32
    %c0_i32_0 = arith.constant 0 : i32
    return %c0_i32, %arg2 : i32, i32
  }
  func.func @transform_3(%arg0: i32, %arg1: i32, %arg2: i32) -> (i32, i32) {
    %c0_i32 = arith.constant 0 : i32
    %c0_i32_0 = arith.constant 0 : i32
    return %c0_i32, %arg2 : i32, i32
  }
  func.func @transform_4(%arg0: i32, %arg1: i32, %arg2: i32) -> (i32, i32) {
    %c0_i32 = arith.constant 0 : i32
    %c0_i32_0 = arith.constant 0 : i32
    return %c0_i32, %arg1 : i32, i32
  }
  func.func @transform_5(%arg0: i32, %arg1: i32, %arg2: i32) -> (i32, i32) {
    %c0_i32 = arith.constant 0 : i32
    return %arg0, %arg1 : i32, i32
  }
}

module attributes {stable_mosaic.version = 11 : i64} {
  func.func @_attn_single_kv_kernel(%arg0: i32, %arg1: i32, %arg2: i32, %arg3: memref<1x64x256xbf16, #tpu.memory_space<vmem>>, %arg4: memref<1x64x256xbf16, #tpu.memory_space<vmem>>, %arg5: memref<1x64x256xbf16, #tpu.memory_space<vmem>>, %arg6: memref<1x64x256xbf16, #tpu.memory_space<vmem>>) attributes {dimension_semantics = [#tpu.dimension_semantics<parallel>, #tpu.dimension_semantics<parallel>, #tpu.dimension_semantics<arbitrary>], iteration_bounds = array<i64: 2, 1, 1>, scalar_prefetch = 0 : i64, scratch_operands = 0 : i64, tpu.core_type = #tpu.core_type<tc>, window_params = [{transform_indices = @transform_0, window_bounds = array<i64: 1, 64, 256>}, {transform_indices = @transform_1, window_bounds = array<i64: 1, 64, 256>}, {transform_indices = @transform_2, window_bounds = array<i64: 1, 64, 256>}, {transform_indices = @transform_3, window_bounds = array<i64: 1, 64, 256>}]} {
    %c0 = arith.constant 0 : index
    %c0_0 = arith.constant 0 : index
    %c0_1 = arith.constant 0 : index
    %0 = vector.load %arg3[%c0, %c0_0, %c0_1] : memref<1x64x256xbf16, #tpu.memory_space<vmem>>, vector<1x64x256xbf16>
    %1 = vector.shape_cast %0 : vector<1x64x256xbf16> to vector<64x256xbf16>
    %c0_2 = arith.constant 0 : index
    %c0_3 = arith.constant 0 : index
    %c0_4 = arith.constant 0 : index
    %2 = vector.load %arg4[%c0_2, %c0_3, %c0_4] : memref<1x64x256xbf16, #tpu.memory_space<vmem>>, vector<1x64x256xbf16>
    %3 = vector.shape_cast %2 : vector<1x64x256xbf16> to vector<64x256xbf16>
    %c0_5 = arith.constant 0 : index
    %c0_6 = arith.constant 0 : index
    %c0_7 = arith.constant 0 : index
    %4 = vector.load %arg5[%c0_5, %c0_6, %c0_7] : memref<1x64x256xbf16, #tpu.memory_space<vmem>>, vector<1x64x256xbf16>
    %5 = vector.shape_cast %4 : vector<1x64x256xbf16> to vector<64x256xbf16>
    %6 = vector.extract_strided_slice %1 {offsets = [0, 0], sizes = [64, 128], strides = [1, 1]} : vector<64x256xbf16> to vector<64x128xbf16>
    %7 = vector.extract_strided_slice %3 {offsets = [0, 0], sizes = [64, 128], strides = [1, 1]} : vector<64x256xbf16> to vector<64x128xbf16>
    %8 = vector.extract_strided_slice %5 {offsets = [0, 0], sizes = [64, 128], strides = [1, 1]} : vector<64x256xbf16> to vector<64x128xbf16>
    %cst = arith.constant dense<0.000000e+00> : vector<64x64xf32>
    %9 = tpu.matmul %6, %7, %cst {dimension_numbers = #tpu.dot_dimension_numbers<[1], [1], [0], [0], [0, 0, 1, 0], [], []>} : vector<64x128xbf16>, vector<64x128xbf16>, vector<64x64xf32> -> vector<64x64xf32>
    %cst_8 = arith.constant dense<0xFF800000> : vector<64xf32>
    %10 = vector.multi_reduction <maximumf>, %9, %cst_8 [1] : vector<64x64xf32> to vector<64xf32>
    %11 = vector.shape_cast %10 : vector<64xf32> to vector<64x1xf32>
    %12 = vector.broadcast %11 : vector<64x1xf32> to vector<64x64xf32>
    %13 = arith.subf %9, %12 : vector<64x64xf32>
    %14 = math.exp %13 : vector<64x64xf32>
    %cst_9 = arith.constant dense<0.000000e+00> : vector<64xf32>
    %15 = vector.multi_reduction <add>, %14, %cst_9 [1] : vector<64x64xf32> to vector<64xf32>
    %16 = vector.shape_cast %15 : vector<64xf32> to vector<64x1xf32>
    %17 = arith.truncf %14 : vector<64x64xf32> to vector<64x64xbf16>
    %cst_10 = arith.constant dense<0.000000e+00> : vector<64x128xf32>
    %18 = tpu.matmul %17, %8, %cst_10 {dimension_numbers = #tpu.dot_dimension_numbers<[1], [0], [0], [1], [0, 0, 1, 1], [], []>} : vector<64x64xbf16>, vector<64x128xbf16>, vector<64x128xf32> -> vector<64x128xf32>
    %19 = tpu.reciprocal %16 {approx = true} : vector<64x1xf32> -> vector<64x1xf32>
    %20 = vector.broadcast %19 : vector<64x1xf32> to vector<64x128xf32>
    %21 = arith.mulf %18, %20 : vector<64x128xf32>
    %22 = arith.truncf %21 : vector<64x128xf32> to vector<64x128xbf16>
    %c0_11 = arith.constant 0 : index
    %c0_12 = arith.constant 0 : index
    %c0_13 = arith.constant 0 : index
    %23 = vector.load %arg6[%c0_11, %c0_12, %c0_13] : memref<1x64x256xbf16, #tpu.memory_space<vmem>>, vector<1x64x128xbf16>
    %24 = vector.shape_cast %23 : vector<1x64x128xbf16> to vector<64x128xbf16>
    %25 = vector.shape_cast %22 : vector<64x128xbf16> to vector<1x64x128xbf16>
    tpu.vector_store %arg6[%c0_11, %c0_12, %c0_13], %25 {strides = array<i32>} : memref<1x64x256xbf16, #tpu.memory_space<vmem>>, vector<1x64x128xbf16>,
    %26 = vector.extract_strided_slice %1 {offsets = [0, 128], sizes = [64, 128], strides = [1, 1]} : vector<64x256xbf16> to vector<64x128xbf16>
    %27 = vector.extract_strided_slice %3 {offsets = [0, 128], sizes = [64, 128], strides = [1, 1]} : vector<64x256xbf16> to vector<64x128xbf16>
    %28 = vector.extract_strided_slice %5 {offsets = [0, 128], sizes = [64, 128], strides = [1, 1]} : vector<64x256xbf16> to vector<64x128xbf16>
    %cst_14 = arith.constant dense<0.000000e+00> : vector<64x64xf32>
    %29 = tpu.matmul %26, %27, %cst_14 {dimension_numbers = #tpu.dot_dimension_numbers<[1], [1], [0], [0], [0, 0, 1, 0], [], []>} : vector<64x128xbf16>, vector<64x128xbf16>, vector<64x64xf32> -> vector<64x64xf32>
    %cst_15 = arith.constant dense<0xFF800000> : vector<64xf32>
    %30 = vector.multi_reduction <maximumf>, %29, %cst_15 [1] : vector<64x64xf32> to vector<64xf32>
    %31 = vector.shape_cast %30 : vector<64xf32> to vector<64x1xf32>
    %32 = vector.broadcast %31 : vector<64x1xf32> to vector<64x64xf32>
    %33 = arith.subf %29, %32 : vector<64x64xf32>
    %34 = math.exp %33 : vector<64x64xf32>
    %cst_16 = arith.constant dense<0.000000e+00> : vector<64xf32>
    %35 = vector.multi_reduction <add>, %34, %cst_16 [1] : vector<64x64xf32> to vector<64xf32>
    %36 = vector.shape_cast %35 : vector<64xf32> to vector<64x1xf32>
    %37 = arith.truncf %34 : vector<64x64xf32> to vector<64x64xbf16>
    %cst_17 = arith.constant dense<0.000000e+00> : vector<64x128xf32>
    %38 = tpu.matmul %37, %28, %cst_17 {dimension_numbers = #tpu.dot_dimension_numbers<[1], [0], [0], [1], [0, 0, 1, 1], [], []>} : vector<64x64xbf16>, vector<64x128xbf16>, vector<64x128xf32> -> vector<64x128xf32>
    %39 = tpu.reciprocal %36 {approx = true} : vector<64x1xf32> -> vector<64x1xf32>
    %40 = vector.broadcast %39 : vector<64x1xf32> to vector<64x128xf32>
    %41 = arith.mulf %38, %40 : vector<64x128xf32>
    %42 = arith.truncf %41 : vector<64x128xf32> to vector<64x128xbf16>
    %c0_18 = arith.constant 0 : index
    %c0_19 = arith.constant 0 : index
    %c128 = arith.constant 128 : index
    %43 = vector.load %arg6[%c0_18, %c0_19, %c128] : memref<1x64x256xbf16, #tpu.memory_space<vmem>>, vector<1x64x128xbf16>
    %44 = vector.shape_cast %43 : vector<1x64x128xbf16> to vector<64x128xbf16>
    %45 = vector.shape_cast %42 : vector<64x128xbf16> to vector<1x64x128xbf16>
    tpu.vector_store %arg6[%c0_18, %c0_19, %c128], %45 {strides = array<i32>} : memref<1x64x256xbf16, #tpu.memory_space<vmem>>, vector<1x64x128xbf16>,
    return
  }
  func.func @transform_0(%arg0: i32, %arg1: i32, %arg2: i32) -> (i32, i32, i32) {
    %c0_i32 = arith.constant 0 : i32
    %c0_i32_0 = arith.constant 0 : i32
    return %arg0, %arg1, %c0_i32 : i32, i32, i32
  }
  func.func @transform_1(%arg0: i32, %arg1: i32, %arg2: i32) -> (i32, i32, i32) {
    %c1_i32 = arith.constant 1 : i32
    %c0_i32 = arith.constant 0 : i32
    return %arg0, %arg2, %c1_i32 : i32, i32, i32
  }
  func.func @transform_2(%arg0: i32, %arg1: i32, %arg2: i32) -> (i32, i32, i32) {
    %c2_i32 = arith.constant 2 : i32
    %c0_i32 = arith.constant 0 : i32
    return %arg0, %arg2, %c2_i32 : i32, i32, i32
  }
  func.func @transform_3(%arg0: i32, %arg1: i32, %arg2: i32) -> (i32, i32, i32) {
    %c0_i32 = arith.constant 0 : i32
    %c0_i32_0 = arith.constant 0 : i32
    return %arg0, %arg1, %c0_i32 : i32, i32, i32
  }
}

module attributes {stable_mosaic.version = 11 : i64} {
  func.func @_fused_mm_kernel(%arg0: i32, %arg1: i32, %arg2: i32, %arg3: memref<64x256xbf16, #tpu.memory_space<vmem>>, %arg4: memref<256x256xbf16, #tpu.memory_space<vmem>>, %arg5: memref<1x256xf32, #tpu.memory_space<vmem>>, %arg6: memref<64x256xf32, #tpu.memory_space<vmem>>, %arg7: memref<64x256xf32, #tpu.memory_space<vmem>>, %arg8: memref<64x256xf32, #tpu.memory_space<vmem>>) attributes {dimension_semantics = [#tpu.dimension_semantics<parallel>, #tpu.dimension_semantics<parallel>, #tpu.dimension_semantics<arbitrary>], iteration_bounds = array<i64: 2, 1, 1>, scalar_prefetch = 0 : i64, scratch_operands = 1 : i64, tpu.core_type = #tpu.core_type<tc>, window_params = [{transform_indices = @transform_0, window_bounds = array<i64: 64, 256>}, {transform_indices = @transform_1, window_bounds = array<i64: 256, 256>}, {transform_indices = @transform_2, window_bounds = array<i64: 1, 256>}, {transform_indices = @transform_3, window_bounds = array<i64: 64, 256>}, {transform_indices = @transform_4, window_bounds = array<i64: 64, 256>}]} {
    %c0_i32 = arith.constant 0 : i32
    %0 = arith.cmpi eq, %arg2, %c0_i32 : i32
    %1 = arith.extui %0 : i1 to i32
    %c0_i32_0 = arith.constant 0 : i32
    %2 = arith.cmpi ne, %1, %c0_i32_0 : i32
    scf.if %2 {
      %cst_10 = arith.constant 0.000000e+00 : f32
      %12 = vector.broadcast %cst_10 : f32 to vector<64x256xf32>
      %c0_11 = arith.constant 0 : index
      %c0_12 = arith.constant 0 : index
      %13 = vector.load %arg8[%c0_11, %c0_12] : memref<64x256xf32, #tpu.memory_space<vmem>>, vector<64x256xf32>
      tpu.vector_store %arg8[%c0_11, %c0_12], %12 {strides = array<i32>} : memref<64x256xf32, #tpu.memory_space<vmem>>, vector<64x256xf32>,
    } else {
    }
    %c0 = arith.constant 0 : index
    %c0_1 = arith.constant 0 : index
    %3 = vector.load %arg3[%c0, %c0_1] : memref<64x256xbf16, #tpu.memory_space<vmem>>, vector<64x256xbf16>
    %c0_2 = arith.constant 0 : index
    %c0_3 = arith.constant 0 : index
    %4 = vector.load %arg8[%c0_2, %c0_3] : memref<64x256xf32, #tpu.memory_space<vmem>>, vector<64x256xf32>
    %c0_4 = arith.constant 0 : index
    %c0_5 = arith.constant 0 : index
    %5 = vector.load %arg4[%c0_4, %c0_5] : memref<256x256xbf16, #tpu.memory_space<vmem>>, vector<256x256xbf16>
    %cst = arith.constant dense<0.000000e+00> : vector<64x256xf32>
    %6 = tpu.matmul %3, %5, %cst {dimension_numbers = #tpu.dot_dimension_numbers<[1], [0], [0], [1], [0, 0, 1, 1], [], []>} : vector<64x256xbf16>, vector<256x256xbf16>, vector<64x256xf32> -> vector<64x256xf32>
    %7 = arith.addf %4, %6 : vector<64x256xf32>
    %c0_6 = arith.constant 0 : index
    %c0_7 = arith.constant 0 : index
    %8 = vector.load %arg8[%c0_6, %c0_7] : memref<64x256xf32, #tpu.memory_space<vmem>>, vector<64x256xf32>
    tpu.vector_store %arg8[%c0_6, %c0_7], %7 {strides = array<i32>} : memref<64x256xf32, #tpu.memory_space<vmem>>, vector<64x256xf32>,
    %c0_i32_8 = arith.constant 0 : i32
    %9 = arith.cmpi eq, %arg2, %c0_i32_8 : i32
    %10 = arith.extui %9 : i1 to i32
    %c0_i32_9 = arith.constant 0 : i32
    %11 = arith.cmpi ne, %10, %c0_i32_9 : i32
    scf.if %11 {
      %c0_10 = arith.constant 0 : index
      %c0_11 = arith.constant 0 : index
      %12 = vector.load %arg8[%c0_10, %c0_11] : memref<64x256xf32, #tpu.memory_space<vmem>>, vector<64x256xf32>
      %c0_12 = arith.constant 0 : index
      %c0_13 = arith.constant 0 : index
      %13 = vector.load %arg5[%c0_12, %c0_13] : memref<1x256xf32, #tpu.memory_space<vmem>>, vector<1x256xf32>
      %14 = vector.broadcast %13 : vector<1x256xf32> to vector<64x256xf32>
      %15 = arith.addf %12, %14 : vector<64x256xf32>
      %c0_14 = arith.constant 0 : index
      %c0_15 = arith.constant 0 : index
      %16 = vector.load %arg6[%c0_14, %c0_15] : memref<64x256xf32, #tpu.memory_space<vmem>>, vector<64x256xf32>
      %17 = arith.addf %15, %16 : vector<64x256xf32>
      %c0_16 = arith.constant 0 : index
      %c0_17 = arith.constant 0 : index
      %18 = vector.load %arg7[%c0_16, %c0_17] : memref<64x256xf32, #tpu.memory_space<vmem>>, vector<64x256xf32>
      tpu.vector_store %arg7[%c0_16, %c0_17], %17 {strides = array<i32>} : memref<64x256xf32, #tpu.memory_space<vmem>>, vector<64x256xf32>,
    } else {
    }
    return
  }
  func.func @transform_0(%arg0: i32, %arg1: i32, %arg2: i32) -> (i32, i32) {
    %c0_i32 = arith.constant 0 : i32
    return %arg0, %arg2 : i32, i32
  }
  func.func @transform_1(%arg0: i32, %arg1: i32, %arg2: i32) -> (i32, i32) {
    %c0_i32 = arith.constant 0 : i32
    return %arg2, %arg1 : i32, i32
  }
  func.func @transform_2(%arg0: i32, %arg1: i32, %arg2: i32) -> (i32, i32) {
    %c0_i32 = arith.constant 0 : i32
    %c0_i32_0 = arith.constant 0 : i32
    return %c0_i32, %arg1 : i32, i32
  }
  func.func @transform_3(%arg0: i32, %arg1: i32, %arg2: i32) -> (i32, i32) {
    %c0_i32 = arith.constant 0 : i32
    return %arg0, %arg1 : i32, i32
  }
  func.func @transform_4(%arg0: i32, %arg1: i32, %arg2: i32) -> (i32, i32) {
    %c0_i32 = arith.constant 0 : i32
    return %arg0, %arg1 : i32, i32
  }
}

module attributes {stable_mosaic.version = 11 : i64} {
  func.func @_fused_mm_kernel(%arg0: i32, %arg1: i32, %arg2: i32, %arg3: memref<64x256xf32, #tpu.memory_space<vmem>>, %arg4: memref<256x512xbf16, #tpu.memory_space<vmem>>, %arg5: memref<1x256xf32, #tpu.memory_space<vmem>>, %arg6: memref<1x256xf32, #tpu.memory_space<vmem>>, %arg7: memref<1x512xf32, #tpu.memory_space<vmem>>, %arg8: memref<64x512xbf16, #tpu.memory_space<vmem>>, %arg9: memref<64x512xf32, #tpu.memory_space<vmem>>, %arg10: memref<64x256xbf16, #tpu.memory_space<vmem>>) attributes {dimension_semantics = [#tpu.dimension_semantics<parallel>, #tpu.dimension_semantics<arbitrary>, #tpu.dimension_semantics<arbitrary>], iteration_bounds = array<i64: 2, 2, 1>, scalar_prefetch = 0 : i64, scratch_operands = 2 : i64, tpu.core_type = #tpu.core_type<tc>, window_params = [{transform_indices = @transform_0, window_bounds = array<i64: 64, 256>}, {transform_indices = @transform_1, window_bounds = array<i64: 256, 512>}, {transform_indices = @transform_2, window_bounds = array<i64: 1, 256>}, {transform_indices = @transform_3, window_bounds = array<i64: 1, 256>}, {transform_indices = @transform_4, window_bounds = array<i64: 1, 512>}, {transform_indices = @transform_5, window_bounds = array<i64: 64, 512>}]} {
    %c0_i32 = arith.constant 0 : i32
    %0 = arith.cmpi eq, %arg2, %c0_i32 : i32
    %1 = arith.extui %0 : i1 to i32
    %c0_i32_0 = arith.constant 0 : i32
    %2 = arith.cmpi ne, %1, %c0_i32_0 : i32
    scf.if %2 {
      %cst_12 = arith.constant 0.000000e+00 : f32
      %15 = vector.broadcast %cst_12 : f32 to vector<64x512xf32>
      %c0_13 = arith.constant 0 : index
      %c0_14 = arith.constant 0 : index
      %16 = vector.load %arg9[%c0_13, %c0_14] : memref<64x512xf32, #tpu.memory_space<vmem>>, vector<64x512xf32>
      tpu.vector_store %arg9[%c0_13, %c0_14], %15 {strides = array<i32>} : memref<64x512xf32, #tpu.memory_space<vmem>>, vector<64x512xf32>,
    } else {
    }
    %c0_i32_1 = arith.constant 0 : i32
    %3 = arith.cmpi eq, %arg1, %c0_i32_1 : i32
    %4 = arith.extui %3 : i1 to i32
    %c0_i32_2 = arith.constant 0 : i32
    %5 = arith.cmpi ne, %4, %c0_i32_2 : i32
    scf.if %5 {
      %c0_12 = arith.constant 0 : index
      %c0_13 = arith.constant 0 : index
      %15 = vector.load %arg3[%c0_12, %c0_13] : memref<64x256xf32, #tpu.memory_space<vmem>>, vector<64x256xf32>
      %cst_14 = arith.constant dense<0.000000e+00> : vector<64xf32>
      %16 = vector.multi_reduction <add>, %15, %cst_14 [1] : vector<64x256xf32> to vector<64xf32>
      %17 = vector.shape_cast %16 : vector<64xf32> to vector<64x1xf32>
      %cst_15 = arith.constant 2.560000e+02 : f32
      %18 = vector.broadcast %cst_15 : f32 to vector<64x1xf32>
      %19 = arith.divf %17, %18 : vector<64x1xf32>
      %20 = vector.broadcast %19 : vector<64x1xf32> to vector<64x256xf32>
      %21 = arith.subf %15, %20 : vector<64x256xf32>
      %22 = arith.mulf %21, %21 : vector<64x256xf32>
      %cst_16 = arith.constant dense<0.000000e+00> : vector<64xf32>
      %23 = vector.multi_reduction <add>, %22, %cst_16 [1] : vector<64x256xf32> to vector<64xf32>
      %24 = vector.shape_cast %23 : vector<64xf32> to vector<64x1xf32>
      %cst_17 = arith.constant 2.560000e+02 : f32
      %25 = vector.broadcast %cst_17 : f32 to vector<64x1xf32>
      %26 = arith.divf %24, %25 : vector<64x1xf32>
      %27 = vector.broadcast %19 : vector<64x1xf32> to vector<64x256xf32>
      %28 = arith.subf %15, %27 : vector<64x256xf32>
      %cst_18 = arith.constant 9.99999997E-7 : f32
      %29 = vector.broadcast %cst_18 : f32 to vector<64x1xf32>
      %30 = arith.addf %26, %29 : vector<64x1xf32>
      %31 = math.rsqrt %30 : vector<64x1xf32>
      %32 = vector.broadcast %31 : vector<64x1xf32> to vector<64x256xf32>
      %33 = arith.mulf %28, %32 : vector<64x256xf32>
      %c0_19 = arith.constant 0 : index
      %c0_20 = arith.constant 0 : index
      %34 = vector.load %arg5[%c0_19, %c0_20] : memref<1x256xf32, #tpu.memory_space<vmem>>, vector<1x256xf32>
      %35 = vector.broadcast %34 : vector<1x256xf32> to vector<64x256xf32>
      %36 = arith.mulf %33, %35 : vector<64x256xf32>
      %c0_21 = arith.constant 0 : index
      %c0_22 = arith.constant 0 : index
      %37 = vector.load %arg6[%c0_21, %c0_22] : memref<1x256xf32, #tpu.memory_space<vmem>>, vector<1x256xf32>
      %38 = vector.broadcast %37 : vector<1x256xf32> to vector<64x256xf32>
      %39 = arith.addf %36, %38 : vector<64x256xf32>
      %40 = arith.truncf %39 : vector<64x256xf32> to vector<64x256xbf16>
      %c0_23 = arith.constant 0 : index
      %c0_24 = arith.constant 0 : index
      %41 = vector.load %arg10[%c0_23, %c0_24] : memref<64x256xbf16, #tpu.memory_space<vmem>>, vector<64x256xbf16>
      tpu.vector_store %arg10[%c0_23, %c0_24], %40 {strides = array<i32>} : memref<64x256xbf16, #tpu.memory_space<vmem>>, vector<64x256xbf16>,
    } else {
    }
    %c0 = arith.constant 0 : index
    %c0_3 = arith.constant 0 : index
    %6 = vector.load %arg10[%c0, %c0_3] : memref<64x256xbf16, #tpu.memory_space<vmem>>, vector<64x256xbf16>
    %c0_4 = arith.constant 0 : index
    %c0_5 = arith.constant 0 : index
    %7 = vector.load %arg9[%c0_4, %c0_5] : memref<64x512xf32, #tpu.memory_space<vmem>>, vector<64x512xf32>
    %c0_6 = arith.constant 0 : index
    %c0_7 = arith.constant 0 : index
    %8 = vector.load %arg4[%c0_6, %c0_7] : memref<256x512xbf16, #tpu.memory_space<vmem>>, vector<256x512xbf16>
    %cst = arith.constant dense<0.000000e+00> : vector<64x512xf32>
    %9 = tpu.matmul %6, %8, %cst {dimension_numbers = #tpu.dot_dimension_numbers<[1], [0], [0], [1], [0, 0, 1, 1], [], []>} : vector<64x256xbf16>, vector<256x512xbf16>, vector<64x512xf32> -> vector<64x512xf32>
    %10 = arith.addf %7, %9 : vector<64x512xf32>
    %c0_8 = arith.constant 0 : index
    %c0_9 = arith.constant 0 : index
    %11 = vector.load %arg9[%c0_8, %c0_9] : memref<64x512xf32, #tpu.memory_space<vmem>>, vector<64x512xf32>
    tpu.vector_store %arg9[%c0_8, %c0_9], %10 {strides = array<i32>} : memref<64x512xf32, #tpu.memory_space<vmem>>, vector<64x512xf32>,
    %c0_i32_10 = arith.constant 0 : i32
    %12 = arith.cmpi eq, %arg2, %c0_i32_10 : i32
    %13 = arith.extui %12 : i1 to i32
    %c0_i32_11 = arith.constant 0 : i32
    %14 = arith.cmpi ne, %13, %c0_i32_11 : i32
    scf.if %14 {
      %c0_12 = arith.constant 0 : index
      %c0_13 = arith.constant 0 : index
      %15 = vector.load %arg9[%c0_12, %c0_13] : memref<64x512xf32, #tpu.memory_space<vmem>>, vector<64x512xf32>
      %c0_14 = arith.constant 0 : index
      %c0_15 = arith.constant 0 : index
      %16 = vector.load %arg7[%c0_14, %c0_15] : memref<1x512xf32, #tpu.memory_space<vmem>>, vector<1x512xf32>
      %17 = vector.broadcast %16 : vector<1x512xf32> to vector<64x512xf32>
      %18 = arith.addf %15, %17 : vector<64x512xf32>
      %cst_16 = arith.constant 5.000000e-01 : f32
      %19 = vector.broadcast %cst_16 : f32 to vector<64x512xf32>
      %20 = arith.mulf %19, %18 : vector<64x512xf32>
      %cst_17 = arith.constant 4.471500e-02 : f32
      %21 = vector.broadcast %cst_17 : f32 to vector<64x512xf32>
      %22 = arith.mulf %21, %18 : vector<64x512xf32>
      %23 = arith.mulf %22, %18 : vector<64x512xf32>
      %24 = arith.mulf %23, %18 : vector<64x512xf32>
      %25 = arith.addf %18, %24 : vector<64x512xf32>
      %cst_18 = arith.constant 0.797884583 : f32
      %26 = vector.broadcast %cst_18 : f32 to vector<64x512xf32>
      %27 = arith.mulf %26, %25 : vector<64x512xf32>
      %28 = math.tanh %27 : vector<64x512xf32>
      %cst_19 = arith.constant 1.000000e+00 : f32
      %29 = vector.broadcast %cst_19 : f32 to vector<64x512xf32>
      %30 = arith.addf %29, %28 : vector<64x512xf32>
      %31 = arith.mulf %20, %30 : vector<64x512xf32>
      %32 = arith.truncf %31 : vector<64x512xf32> to vector<64x512xbf16>
      %c0_20 = arith.constant 0 : index
      %c0_21 = arith.constant 0 : index
      %33 = vector.load %arg8[%c0_20, %c0_21] : memref<64x512xbf16, #tpu.memory_space<vmem>>, vector<64x512xbf16>
      tpu.vector_store %arg8[%c0_20, %c0_21], %32 {strides = array<i32>} : memref<64x512xbf16, #tpu.memory_space<vmem>>, vector<64x512xbf16>,
    } else {
    }
    return
  }
  func.func @transform_0(%arg0: i32, %arg1: i32, %arg2: i32) -> (i32, i32) {
    %c0_i32 = arith.constant 0 : i32
    return %arg0, %arg2 : i32, i32
  }
  func.func @transform_1(%arg0: i32, %arg1: i32, %arg2: i32) -> (i32, i32) {
    %c0_i32 = arith.constant 0 : i32
    return %arg2, %arg1 : i32, i32
  }
  func.func @transform_2(%arg0: i32, %arg1: i32, %arg2: i32) -> (i32, i32) {
    %c0_i32 = arith.constant 0 : i32
    %c0_i32_0 = arith.constant 0 : i32
    return %c0_i32, %arg2 : i32, i32
  }
  func.func @transform_3(%arg0: i32, %arg1: i32, %arg2: i32) -> (i32, i32) {
    %c0_i32 = arith.constant 0 : i32
    %c0_i32_0 = arith.constant 0 : i32
    return %c0_i32, %arg2 : i32, i32
  }
  func.func @transform_4(%arg0: i32, %arg1: i32, %arg2: i32) -> (i32, i32) {
    %c0_i32 = arith.constant 0 : i32
    %c0_i32_0 = arith.constant 0 : i32
    return %c0_i32, %arg1 : i32, i32
  }
  func.func @transform_5(%arg0: i32, %arg1: i32, %arg2: i32) -> (i32, i32) {
    %c0_i32 = arith.constant 0 : i32
    return %arg0, %arg1 : i32, i32
  }
}

module attributes {stable_mosaic.version = 11 : i64} {
  func.func @_fused_mm_kernel(%arg0: i32, %arg1: i32, %arg2: i32, %arg3: memref<64x512xbf16, #tpu.memory_space<vmem>>, %arg4: memref<512x256xbf16, #tpu.memory_space<vmem>>, %arg5: memref<1x256xf32, #tpu.memory_space<vmem>>, %arg6: memref<64x256xf32, #tpu.memory_space<vmem>>, %arg7: memref<64x256xf32, #tpu.memory_space<vmem>>, %arg8: memref<64x256xf32, #tpu.memory_space<vmem>>) attributes {dimension_semantics = [#tpu.dimension_semantics<parallel>, #tpu.dimension_semantics<parallel>, #tpu.dimension_semantics<arbitrary>], iteration_bounds = array<i64: 2, 1, 2>, scalar_prefetch = 0 : i64, scratch_operands = 1 : i64, tpu.core_type = #tpu.core_type<tc>, window_params = [{transform_indices = @transform_0, window_bounds = array<i64: 64, 512>}, {transform_indices = @transform_1, window_bounds = array<i64: 512, 256>}, {transform_indices = @transform_2, window_bounds = array<i64: 1, 256>}, {transform_indices = @transform_3, window_bounds = array<i64: 64, 256>}, {transform_indices = @transform_4, window_bounds = array<i64: 64, 256>}]} {
    %c0_i32 = arith.constant 0 : i32
    %0 = arith.cmpi eq, %arg2, %c0_i32 : i32
    %1 = arith.extui %0 : i1 to i32
    %c0_i32_0 = arith.constant 0 : i32
    %2 = arith.cmpi ne, %1, %c0_i32_0 : i32
    scf.if %2 {
      %cst_9 = arith.constant 0.000000e+00 : f32
      %12 = vector.broadcast %cst_9 : f32 to vector<64x256xf32>
      %c0_10 = arith.constant 0 : index
      %c0_11 = arith.constant 0 : index
      %13 = vector.load %arg8[%c0_10, %c0_11] : memref<64x256xf32, #tpu.memory_space<vmem>>, vector<64x256xf32>
      tpu.vector_store %arg8[%c0_10, %c0_11], %12 {strides = array<i32>} : memref<64x256xf32, #tpu.memory_space<vmem>>, vector<64x256xf32>,
    } else {
    }
    %c0 = arith.constant 0 : index
    %c0_1 = arith.constant 0 : index
    %3 = vector.load %arg3[%c0, %c0_1] : memref<64x512xbf16, #tpu.memory_space<vmem>>, vector<64x512xbf16>
    %c0_2 = arith.constant 0 : index
    %c0_3 = arith.constant 0 : index
    %4 = vector.load %arg8[%c0_2, %c0_3] : memref<64x256xf32, #tpu.memory_space<vmem>>, vector<64x256xf32>
    %c0_4 = arith.constant 0 : index
    %c0_5 = arith.constant 0 : index
    %5 = vector.load %arg4[%c0_4, %c0_5] : memref<512x256xbf16, #tpu.memory_space<vmem>>, vector<512x256xbf16>
    %cst = arith.constant dense<0.000000e+00> : vector<64x256xf32>
    %6 = tpu.matmul %3, %5, %cst {dimension_numbers = #tpu.dot_dimension_numbers<[1], [0], [0], [1], [0, 0, 1, 1], [], []>} : vector<64x512xbf16>, vector<512x256xbf16>, vector<64x256xf32> -> vector<64x256xf32>
    %7 = arith.addf %4, %6 : vector<64x256xf32>
    %c0_6 = arith.constant 0 : index
    %c0_7 = arith.constant 0 : index
    %8 = vector.load %arg8[%c0_6, %c0_7] : memref<64x256xf32, #tpu.memory_space<vmem>>, vector<64x256xf32>
    tpu.vector_store %arg8[%c0_6, %c0_7], %7 {strides = array<i32>} : memref<64x256xf32, #tpu.memory_space<vmem>>, vector<64x256xf32>,
    %c1_i32 = arith.constant 1 : i32
    %9 = arith.cmpi eq, %arg2, %c1_i32 : i32
    %10 = arith.extui %9 : i1 to i32
    %c0_i32_8 = arith.constant 0 : i32
    %11 = arith.cmpi ne, %10, %c0_i32_8 : i32
    scf.if %11 {
      %c0_9 = arith.constant 0 : index
      %c0_10 = arith.constant 0 : index
      %12 = vector.load %arg8[%c0_9, %c0_10] : memref<64x256xf32, #tpu.memory_space<vmem>>, vector<64x256xf32>
      %c0_11 = arith.constant 0 : index
      %c0_12 = arith.constant 0 : index
      %13 = vector.load %arg5[%c0_11, %c0_12] : memref<1x256xf32, #tpu.memory_space<vmem>>, vector<1x256xf32>
      %14 = vector.broadcast %13 : vector<1x256xf32> to vector<64x256xf32>
      %15 = arith.addf %12, %14 : vector<64x256xf32>
      %c0_13 = arith.constant 0 : index
      %c0_14 = arith.constant 0 : index
      %16 = vector.load %arg6[%c0_13, %c0_14] : memref<64x256xf32, #tpu.memory_space<vmem>>, vector<64x256xf32>
      %17 = arith.addf %15, %16 : vector<64x256xf32>
      %c0_15 = arith.constant 0 : index
      %c0_16 = arith.constant 0 : index
      %18 = vector.load %arg7[%c0_15, %c0_16] : memref<64x256xf32, #tpu.memory_space<vmem>>, vector<64x256xf32>
      tpu.vector_store %arg7[%c0_15, %c0_16], %17 {strides = array<i32>} : memref<64x256xf32, #tpu.memory_space<vmem>>, vector<64x256xf32>,
    } else {
    }
    return
  }
  func.func @transform_0(%arg0: i32, %arg1: i32, %arg2: i32) -> (i32, i32) {
    %c0_i32 = arith.constant 0 : i32
    return %arg0, %arg2 : i32, i32
  }
  func.func @transform_1(%arg0: i32, %arg1: i32, %arg2: i32) -> (i32, i32) {
    %c0_i32 = arith.constant 0 : i32
    return %arg2, %arg1 : i32, i32
  }
  func.func @transform_2(%arg0: i32, %arg1: i32, %arg2: i32) -> (i32, i32) {
    %c0_i32 = arith.constant 0 : i32
    %c0_i32_0 = arith.constant 0 : i32
    return %c0_i32, %arg1 : i32, i32
  }
  func.func @transform_3(%arg0: i32, %arg1: i32, %arg2: i32) -> (i32, i32) {
    %c0_i32 = arith.constant 0 : i32
    return %arg0, %arg1 : i32, i32
  }
  func.func @transform_4(%arg0: i32, %arg1: i32, %arg2: i32) -> (i32, i32) {
    %c0_i32 = arith.constant 0 : i32
    return %arg0, %arg1 : i32, i32
  }
}

module attributes {stable_mosaic.version = 11 : i64} {
  func.func @_fused_mm_kernel(%arg0: i32, %arg1: i32, %arg2: i32, %arg3: memref<64x256xf32, #tpu.memory_space<vmem>>, %arg4: memref<256x128xbf16, #tpu.memory_space<vmem>>, %arg5: memref<1x128xf32, #tpu.memory_space<vmem>>, %arg6: memref<1x128xf32, #tpu.memory_space<vmem>>, %arg7: memref<64x128xbf16, #tpu.memory_space<vmem>>, %arg8: memref<64x128xf32, #tpu.memory_space<vmem>>) attributes {dimension_semantics = [#tpu.dimension_semantics<parallel>, #tpu.dimension_semantics<parallel>, #tpu.dimension_semantics<arbitrary>], iteration_bounds = array<i64: 2, 1, 1>, scalar_prefetch = 0 : i64, scratch_operands = 1 : i64, tpu.core_type = #tpu.core_type<tc>, window_params = [{transform_indices = @transform_0, window_bounds = array<i64: 64, 256>}, {transform_indices = @transform_1, window_bounds = array<i64: 256, 128>}, {transform_indices = @transform_2, window_bounds = array<i64: 1, 128>}, {transform_indices = @transform_3, window_bounds = array<i64: 1, 128>}, {transform_indices = @transform_4, window_bounds = array<i64: 64, 128>}]} {
    %c0_i32 = arith.constant 0 : i32
    %0 = arith.cmpi eq, %arg2, %c0_i32 : i32
    %1 = arith.extui %0 : i1 to i32
    %c0_i32_0 = arith.constant 0 : i32
    %2 = arith.cmpi ne, %1, %c0_i32_0 : i32
    scf.if %2 {
      %cst_10 = arith.constant 0.000000e+00 : f32
      %13 = vector.broadcast %cst_10 : f32 to vector<64x128xf32>
      %c0_11 = arith.constant 0 : index
      %c0_12 = arith.constant 0 : index
      %14 = vector.load %arg8[%c0_11, %c0_12] : memref<64x128xf32, #tpu.memory_space<vmem>>, vector<64x128xf32>
      tpu.vector_store %arg8[%c0_11, %c0_12], %13 {strides = array<i32>} : memref<64x128xf32, #tpu.memory_space<vmem>>, vector<64x128xf32>,
    } else {
    }
    %c0 = arith.constant 0 : index
    %c0_1 = arith.constant 0 : index
    %3 = vector.load %arg3[%c0, %c0_1] : memref<64x256xf32, #tpu.memory_space<vmem>>, vector<64x256xf32>
    %4 = arith.truncf %3 : vector<64x256xf32> to vector<64x256xbf16>
    %c0_2 = arith.constant 0 : index
    %c0_3 = arith.constant 0 : index
    %5 = vector.load %arg8[%c0_2, %c0_3] : memref<64x128xf32, #tpu.memory_space<vmem>>, vector<64x128xf32>
    %c0_4 = arith.constant 0 : index
    %c0_5 = arith.constant 0 : index
    %6 = vector.load %arg4[%c0_4, %c0_5] : memref<256x128xbf16, #tpu.memory_space<vmem>>, vector<256x128xbf16>
    %cst = arith.constant dense<0.000000e+00> : vector<64x128xf32>
    %7 = tpu.matmul %4, %6, %cst {dimension_numbers = #tpu.dot_dimension_numbers<[1], [0], [0], [1], [0, 0, 1, 1], [], []>} : vector<64x256xbf16>, vector<256x128xbf16>, vector<64x128xf32> -> vector<64x128xf32>
    %8 = arith.addf %5, %7 : vector<64x128xf32>
    %c0_6 = arith.constant 0 : index
    %c0_7 = arith.constant 0 : index
    %9 = vector.load %arg8[%c0_6, %c0_7] : memref<64x128xf32, #tpu.memory_space<vmem>>, vector<64x128xf32>
    tpu.vector_store %arg8[%c0_6, %c0_7], %8 {strides = array<i32>} : memref<64x128xf32, #tpu.memory_space<vmem>>, vector<64x128xf32>,
    %c0_i32_8 = arith.constant 0 : i32
    %10 = arith.cmpi eq, %arg2, %c0_i32_8 : i32
    %11 = arith.extui %10 : i1 to i32
    %c0_i32_9 = arith.constant 0 : i32
    %12 = arith.cmpi ne, %11, %c0_i32_9 : i32
    scf.if %12 {
      %c0_10 = arith.constant 0 : index
      %c0_11 = arith.constant 0 : index
      %13 = vector.load %arg8[%c0_10, %c0_11] : memref<64x128xf32, #tpu.memory_space<vmem>>, vector<64x128xf32>
      %cst_12 = arith.constant dense<0.000000e+00> : vector<64xf32>
      %14 = vector.multi_reduction <add>, %13, %cst_12 [1] : vector<64x128xf32> to vector<64xf32>
      %15 = vector.shape_cast %14 : vector<64xf32> to vector<64x1xf32>
      %cst_13 = arith.constant 1.280000e+02 : f32
      %16 = vector.broadcast %cst_13 : f32 to vector<64x1xf32>
      %17 = arith.divf %15, %16 : vector<64x1xf32>
      %18 = vector.broadcast %17 : vector<64x1xf32> to vector<64x128xf32>
      %19 = arith.subf %13, %18 : vector<64x128xf32>
      %20 = arith.mulf %19, %19 : vector<64x128xf32>
      %cst_14 = arith.constant dense<0.000000e+00> : vector<64xf32>
      %21 = vector.multi_reduction <add>, %20, %cst_14 [1] : vector<64x128xf32> to vector<64xf32>
      %22 = vector.shape_cast %21 : vector<64xf32> to vector<64x1xf32>
      %cst_15 = arith.constant 1.280000e+02 : f32
      %23 = vector.broadcast %cst_15 : f32 to vector<64x1xf32>
      %24 = arith.divf %22, %23 : vector<64x1xf32>
      %25 = vector.broadcast %17 : vector<64x1xf32> to vector<64x128xf32>
      %26 = arith.subf %13, %25 : vector<64x128xf32>
      %cst_16 = arith.constant 9.99999997E-7 : f32
      %27 = vector.broadcast %cst_16 : f32 to vector<64x1xf32>
      %28 = arith.addf %24, %27 : vector<64x1xf32>
      %29 = math.rsqrt %28 : vector<64x1xf32>
      %30 = vector.broadcast %29 : vector<64x1xf32> to vector<64x128xf32>
      %31 = arith.mulf %26, %30 : vector<64x128xf32>
      %c0_17 = arith.constant 0 : index
      %c0_18 = arith.constant 0 : index
      %32 = vector.load %arg5[%c0_17, %c0_18] : memref<1x128xf32, #tpu.memory_space<vmem>>, vector<1x128xf32>
      %33 = vector.broadcast %32 : vector<1x128xf32> to vector<64x128xf32>
      %34 = arith.mulf %31, %33 : vector<64x128xf32>
      %c0_19 = arith.constant 0 : index
      %c0_20 = arith.constant 0 : index
      %35 = vector.load %arg6[%c0_19, %c0_20] : memref<1x128xf32, #tpu.memory_space<vmem>>, vector<1x128xf32>
      %36 = vector.broadcast %35 : vector<1x128xf32> to vector<64x128xf32>
      %37 = arith.addf %34, %36 : vector<64x128xf32>
      %38 = arith.truncf %37 : vector<64x128xf32> to vector<64x128xbf16>
      %c0_21 = arith.constant 0 : index
      %c0_22 = arith.constant 0 : index
      %39 = vector.load %arg7[%c0_21, %c0_22] : memref<64x128xbf16, #tpu.memory_space<vmem>>, vector<64x128xbf16>
      tpu.vector_store %arg7[%c0_21, %c0_22], %38 {strides = array<i32>} : memref<64x128xbf16, #tpu.memory_space<vmem>>, vector<64x128xbf16>,
    } else {
    }
    return
  }
  func.func @transform_0(%arg0: i32, %arg1: i32, %arg2: i32) -> (i32, i32) {
    %c0_i32 = arith.constant 0 : i32
    return %arg0, %arg2 : i32, i32
  }
  func.func @transform_1(%arg0: i32, %arg1: i32, %arg2: i32) -> (i32, i32) {
    %c0_i32 = arith.constant 0 : i32
    return %arg2, %arg1 : i32, i32
  }
  func.func @transform_2(%arg0: i32, %arg1: i32, %arg2: i32) -> (i32, i32) {
    %c0_i32 = arith.constant 0 : i32
    %c0_i32_0 = arith.constant 0 : i32
    return %c0_i32, %arg1 : i32, i32
  }
  func.func @transform_3(%arg0: i32, %arg1: i32, %arg2: i32) -> (i32, i32) {
    %c0_i32 = arith.constant 0 : i32
    %c0_i32_0 = arith.constant 0 : i32
    return %c0_i32, %arg1 : i32, i32
  }
  func.func @transform_4(%arg0: i32, %arg1: i32, %arg2: i32) -> (i32, i32) {
    %c0_i32 = arith.constant 0 : i32
    return %arg0, %arg1 : i32, i32
  }
}

module attributes {stable_mosaic.version = 11 : i64} {
  func.func @_neck_conv3_kernel(%arg0: i32, %arg1: memref<1x8x8x128xbf16, #tpu.memory_space<vmem>>, %arg2: memref<1152x128xbf16, #tpu.memory_space<vmem>>, %arg3: memref<1x128xf32, #tpu.memory_space<vmem>>, %arg4: memref<1x128xf32, #tpu.memory_space<vmem>>, %arg5: memref<1x8x8x128xf32, #tpu.memory_space<vmem>>, %arg6: memref<10x10x128xbf16, #tpu.memory_space<vmem>>) attributes {dimension_semantics = [#tpu.dimension_semantics<parallel>], iteration_bounds = array<i64: 2>, scalar_prefetch = 0 : i64, scratch_operands = 1 : i64, tpu.core_type = #tpu.core_type<tc>, window_params = [{transform_indices = @transform_0, window_bounds = array<i64: 1, 8, 8, 128>}, {pipeline_mode = #tpu.pipeline_mode<synchronous>, transform_indices = @transform_1, window_bounds = array<i64: 1152, 128>}, {pipeline_mode = #tpu.pipeline_mode<synchronous>, transform_indices = @transform_2, window_bounds = array<i64: 1, 128>}, {pipeline_mode = #tpu.pipeline_mode<synchronous>, transform_indices = @transform_3, window_bounds = array<i64: 1, 128>}, {transform_indices = @transform_4, window_bounds = array<i64: 1, 8, 8, 128>}]} {
    %cst = arith.constant 0.000000e+00 : bf16
    %0 = vector.broadcast %cst : bf16 to vector<10x10x128xbf16>
    %c0 = arith.constant 0 : index
    %c0_0 = arith.constant 0 : index
    %c0_1 = arith.constant 0 : index
    %1 = vector.load %arg6[%c0, %c0_0, %c0_1] : memref<10x10x128xbf16, #tpu.memory_space<vmem>>, vector<10x10x128xbf16>
    tpu.vector_store %arg6[%c0, %c0_0, %c0_1], %0 {strides = array<i32>} : memref<10x10x128xbf16, #tpu.memory_space<vmem>>, vector<10x10x128xbf16>,
    %c0_2 = arith.constant 0 : index
    %c0_3 = arith.constant 0 : index
    %c0_4 = arith.constant 0 : index
    %c0_5 = arith.constant 0 : index
    %2 = vector.load %arg1[%c0_2, %c0_3, %c0_4, %c0_5] : memref<1x8x8x128xbf16, #tpu.memory_space<vmem>>, vector<1x8x8x128xbf16>
    %3 = vector.shape_cast %2 : vector<1x8x8x128xbf16> to vector<8x8x128xbf16>
    %c1 = arith.constant 1 : index
    %c1_6 = arith.constant 1 : index
    %c0_7 = arith.constant 0 : index
    %4 = vector.load %arg6[%c1, %c1_6, %c0_7] : memref<10x10x128xbf16, #tpu.memory_space<vmem>>, vector<8x8x128xbf16>
    tpu.vector_store %arg6[%c1, %c1_6, %c0_7], %3 {strides = array<i32>} : memref<10x10x128xbf16, #tpu.memory_space<vmem>>, vector<8x8x128xbf16>,
    %c0_8 = arith.constant 0 : index
    %c0_9 = arith.constant 0 : index
    %c0_10 = arith.constant 0 : index
    %5 = vector.load %arg6[%c0_8, %c0_9, %c0_10] : memref<10x10x128xbf16, #tpu.memory_space<vmem>>, vector<10x10x128xbf16>
    %6 = vector.extract_strided_slice %5 {offsets = [0, 0, 0], sizes = [8, 8, 128], strides = [1, 1, 1]} : vector<10x10x128xbf16> to vector<8x8x128xbf16>
    %7 = vector.shape_cast %6 : vector<8x8x128xbf16> to vector<64x128xbf16>
    %8 = vector.extract_strided_slice %5 {offsets = [0, 1, 0], sizes = [8, 8, 128], strides = [1, 1, 1]} : vector<10x10x128xbf16> to vector<8x8x128xbf16>
    %9 = vector.shape_cast %8 : vector<8x8x128xbf16> to vector<64x128xbf16>
    %10 = vector.extract_strided_slice %5 {offsets = [0, 2, 0], sizes = [8, 8, 128], strides = [1, 1, 1]} : vector<10x10x128xbf16> to vector<8x8x128xbf16>
    %11 = vector.shape_cast %10 : vector<8x8x128xbf16> to vector<64x128xbf16>
    %12 = vector.extract_strided_slice %5 {offsets = [1, 0, 0], sizes = [8, 8, 128], strides = [1, 1, 1]} : vector<10x10x128xbf16> to vector<8x8x128xbf16>
    %13 = vector.shape_cast %12 : vector<8x8x128xbf16> to vector<64x128xbf16>
    %14 = vector.extract_strided_slice %5 {offsets = [1, 1, 0], sizes = [8, 8, 128], strides = [1, 1, 1]} : vector<10x10x128xbf16> to vector<8x8x128xbf16>
    %15 = vector.shape_cast %14 : vector<8x8x128xbf16> to vector<64x128xbf16>
    %16 = vector.extract_strided_slice %5 {offsets = [1, 2, 0], sizes = [8, 8, 128], strides = [1, 1, 1]} : vector<10x10x128xbf16> to vector<8x8x128xbf16>
    %17 = vector.shape_cast %16 : vector<8x8x128xbf16> to vector<64x128xbf16>
    %18 = vector.extract_strided_slice %5 {offsets = [2, 0, 0], sizes = [8, 8, 128], strides = [1, 1, 1]} : vector<10x10x128xbf16> to vector<8x8x128xbf16>
    %19 = vector.shape_cast %18 : vector<8x8x128xbf16> to vector<64x128xbf16>
    %20 = vector.extract_strided_slice %5 {offsets = [2, 1, 0], sizes = [8, 8, 128], strides = [1, 1, 1]} : vector<10x10x128xbf16> to vector<8x8x128xbf16>
    %21 = vector.shape_cast %20 : vector<8x8x128xbf16> to vector<64x128xbf16>
    %22 = vector.extract_strided_slice %5 {offsets = [2, 2, 0], sizes = [8, 8, 128], strides = [1, 1, 1]} : vector<10x10x128xbf16> to vector<8x8x128xbf16>
    %23 = vector.shape_cast %22 : vector<8x8x128xbf16> to vector<64x128xbf16>
    %24 = tpu.concatenate %7, %9, %11, %13, %15, %17, %19, %21, %23 in 1 : vector<64x128xbf16>, vector<64x128xbf16>, vector<64x128xbf16>, vector<64x128xbf16>, vector<64x128xbf16>, vector<64x128xbf16>, vector<64x128xbf16>, vector<64x128xbf16>, vector<64x128xbf16> -> vector<64x1152xbf16>
    %c0_11 = arith.constant 0 : index
    %c0_12 = arith.constant 0 : index
    %25 = vector.load %arg2[%c0_11, %c0_12] : memref<1152x128xbf16, #tpu.memory_space<vmem>>, vector<1152x128xbf16>
    %cst_13 = arith.constant dense<0.000000e+00> : vector<64x128xf32>
    %26 = tpu.matmul %24, %25, %cst_13 {dimension_numbers = #tpu.dot_dimension_numbers<[1], [0], [0], [1], [0, 0, 1, 1], [], []>} : vector<64x1152xbf16>, vector<1152x128xbf16>, vector<64x128xf32> -> vector<64x128xf32>
    %cst_14 = arith.constant dense<0.000000e+00> : vector<64xf32>
    %27 = vector.multi_reduction <add>, %26, %cst_14 [1] : vector<64x128xf32> to vector<64xf32>
    %28 = vector.shape_cast %27 : vector<64xf32> to vector<64x1xf32>
    %cst_15 = arith.constant 1.280000e+02 : f32
    %29 = vector.broadcast %cst_15 : f32 to vector<64x1xf32>
    %30 = arith.divf %28, %29 : vector<64x1xf32>
    %31 = vector.broadcast %30 : vector<64x1xf32> to vector<64x128xf32>
    %32 = arith.subf %26, %31 : vector<64x128xf32>
    %33 = arith.mulf %32, %32 : vector<64x128xf32>
    %cst_16 = arith.constant dense<0.000000e+00> : vector<64xf32>
    %34 = vector.multi_reduction <add>, %33, %cst_16 [1] : vector<64x128xf32> to vector<64xf32>
    %35 = vector.shape_cast %34 : vector<64xf32> to vector<64x1xf32>
    %cst_17 = arith.constant 1.280000e+02 : f32
    %36 = vector.broadcast %cst_17 : f32 to vector<64x1xf32>
    %37 = arith.divf %35, %36 : vector<64x1xf32>
    %38 = vector.broadcast %30 : vector<64x1xf32> to vector<64x128xf32>
    %39 = arith.subf %26, %38 : vector<64x128xf32>
    %cst_18 = arith.constant 9.99999997E-7 : f32
    %40 = vector.broadcast %cst_18 : f32 to vector<64x1xf32>
    %41 = arith.addf %37, %40 : vector<64x1xf32>
    %42 = math.rsqrt %41 : vector<64x1xf32>
    %43 = vector.broadcast %42 : vector<64x1xf32> to vector<64x128xf32>
    %44 = arith.mulf %39, %43 : vector<64x128xf32>
    %c0_19 = arith.constant 0 : index
    %c0_20 = arith.constant 0 : index
    %45 = vector.load %arg3[%c0_19, %c0_20] : memref<1x128xf32, #tpu.memory_space<vmem>>, vector<1x128xf32>
    %46 = vector.broadcast %45 : vector<1x128xf32> to vector<64x128xf32>
    %47 = arith.mulf %44, %46 : vector<64x128xf32>
    %c0_21 = arith.constant 0 : index
    %c0_22 = arith.constant 0 : index
    %48 = vector.load %arg4[%c0_21, %c0_22] : memref<1x128xf32, #tpu.memory_space<vmem>>, vector<1x128xf32>
    %49 = vector.broadcast %48 : vector<1x128xf32> to vector<64x128xf32>
    %50 = arith.addf %47, %49 : vector<64x128xf32>
    %51 = vector.shape_cast %50 : vector<64x128xf32> to vector<8x8x128xf32>
    %c0_23 = arith.constant 0 : index
    %c0_24 = arith.constant 0 : index
    %c0_25 = arith.constant 0 : index
    %c0_26 = arith.constant 0 : index
    %52 = vector.load %arg5[%c0_23, %c0_24, %c0_25, %c0_26] : memref<1x8x8x128xf32, #tpu.memory_space<vmem>>, vector<1x8x8x128xf32>
    %53 = vector.shape_cast %52 : vector<1x8x8x128xf32> to vector<8x8x128xf32>
    %54 = vector.shape_cast %51 : vector<8x8x128xf32> to vector<1x8x8x128xf32>
    tpu.vector_store %arg5[%c0_23, %c0_24, %c0_25, %c0_26], %54 {strides = array<i32>} : memref<1x8x8x128xf32, #tpu.memory_space<vmem>>, vector<1x8x8x128xf32>,
    return
  }
  func.func @transform_0(%arg0: i32) -> (i32, i32, i32, i32) {
    %c0_i32 = arith.constant 0 : i32
    %c0_i32_0 = arith.constant 0 : i32
    %c0_i32_1 = arith.constant 0 : i32
    %c0_i32_2 = arith.constant 0 : i32
    return %arg0, %c0_i32, %c0_i32_0, %c0_i32_1 : i32, i32, i32, i32
  }
  func.func @transform_1(%arg0: i32) -> (i32, i32) {
    %c0_i32 = arith.constant 0 : i32
    %c0_i32_0 = arith.constant 0 : i32
    %c0_i32_1 = arith.constant 0 : i32
    return %c0_i32, %c0_i32_0 : i32, i32
  }
  func.func @transform_2(%arg0: i32) -> (i32, i32) {
    %c0_i32 = arith.constant 0 : i32
    %c0_i32_0 = arith.constant 0 : i32
    %c0_i32_1 = arith.constant 0 : i32
    return %c0_i32, %c0_i32_0 : i32, i32
  }
  func.func @transform_3(%arg0: i32) -> (i32, i32) {
    %c0_i32 = arith.constant 0 : i32
    %c0_i32_0 = arith.constant 0 : i32
    %c0_i32_1 = arith.constant 0 : i32
    return %c0_i32, %c0_i32_0 : i32, i32
  }
  func.func @transform_4(%arg0: i32) -> (i32, i32, i32, i32) {
    %c0_i32 = arith.constant 0 : i32
    %c0_i32_0 = arith.constant 0 : i32
    %c0_i32_1 = arith.constant 0 : i32
    %c0_i32_2 = arith.constant 0 : i32
    return %arg0, %c0_i32, %c0_i32_0, %c0_i32_1 : i32, i32, i32, i32
  }
}

</mosaic_0001>

<bundles_post_ra>
// kernel: sam_encode.13
= control target key start
LH: loop header
LB: loop body
LE: loop exit
PB: predicated region body
PF: predicated region fallthrough
CT: control target
= control target key end

     0   :  { %s1097_s15 = smov 0   ;;  %s1099_s16 = smov 0   ;;  %s1281_s0 = inlined_call_operand.vmem [shape: f32[128,192], index: 0, kind: input, shape index: {}]   ;;  %s1282_s1 = inlined_call_operand.vmem [shape: bf16[192,256], index: 1, kind: input, shape index: {}]   ;;  %s1283_s2 = inlined_call_operand.vmem [shape: f32[1,256], index: 2, kind: input, shape index: {}]   ;;  %s1284_s3 = inlined_call_operand.vmem [shape: f32[128,256], index: 3, kind: input, shape index: {}]   ;;  %s1285_s4 = inlined_call_operand.vmem [shape: f32[128,256], index: 4, kind: output, shape index: {}]  }
   0x1   :  { %s1101_s17 = smov 0  }
   0x2 LB: > { %s33_s18 = sadd.s32 1, %s1066_s16  ;;  %p921_p0 = scmp.ge.s32.totalorder %s1070_s17, 1  ;;  %s1070_s17 = sphi %s1101_s17, %s14_s17   ;;  %s1066_s16 = sphi %s1099_s16, %s1287_s16   ;;  %s1062_s15 = sphi %s1097_s15, %s1286_s15  }
   0x3   : > { %p35_p1 = scmp.ge.s32.totalorder %s33_s18, 2  ;;  %p240_p2 = scmp.lt.s32.totalorder %s1070_s17, 3 }
   0x5   : > { %s1289_s18 = smov (%p35_p1, %s33_s18), 0  ;;  %p241_p3 = pnand %p921_p0, %p240_p2 }
   0x6   : > { %v1012_v0 = vld [vmem:[%s1282_s1 + $0x4] ss:$8 sps:$4 sm:$0xff] (!%p241_p3)   ;;  %s922_s21 = sshll.u32 (!%p241_p3), %s1062_s15, 3  ;;  %v1014_v1 = vld [vmem:[%s1282_s1] ss:$8 sps:$4 sm:$0xff] (!%p241_p3)   ;;  %vm558_vm0 = vcmask (!%p241_p3), 523264   ;;  %v697_v48 = vlaneseq (!%p241_p3) }
   0x7   : > { %244 = sbr.rel (%p241_p3) target bundleno = 283 (0x11b), region = 36  ;;  %571 = vmatprep.subr.bf16.mxu0 (!%p241_p3), %v1012_v0  ;;  %964 = vmatprep.subr.bf16.mxu1 (!%p241_p3), %v1012_v0  ;;  %v1015_v2 = vld [vmem:[%s1282_s1 + $0x14] ss:$8 sps:$4 sm:$0xff] (!%p241_p3)   ;;  %p302_p4 = scmp.lt.s32.totalorder (!%p241_p3), %s922_s21, 15  ;;  %v1017_v3 = vld [vmem:[%s1282_s1 + $0x10] ss:$8 sps:$4 sm:$0xff] (!%p241_p3)  }
   0x8   : > { %572 = vmatpush1.bf16.msra.mxu0 (!%p241_p3), %v1014_v1  ;;  %976 = vmatpush1.bf16.msra.mxu1 (!%p241_p3), %v1014_v1  ;;  %v1018_v4 = vld [vmem:[%s1282_s1 + $0x24] ss:$8 sps:$4 sm:$0xff] (!%p241_p3)   ;;  %v1020_v5 = vld [vmem:[%s1282_s1 + $0x20] ss:$8 sps:$4 sm:$0xff] (!%p241_p3)   ;;  %v1021_v6 = vld [vmem:[%s1282_s1 + $0x34] ss:$8 sps:$4 sm:$0xff] (!%p241_p3)  }
   0x9   : > { %573 = vmatprep.subr.bf16.mxu0 (!%p241_p3), %v1015_v2  ;;  %965 = vmatprep.subr.bf16.mxu1 (!%p241_p3), %v1015_v2  ;;  %v1023_v7 = vld [vmem:[%s1282_s1 + $0x30] ss:$8 sps:$4 sm:$0xff] (!%p241_p3)   ;;  %v1024_v8 = vld [vmem:[%s1282_s1 + $0x44] ss:$8 sps:$4 sm:$0xff] (!%p241_p3)   ;;  %v1026_v9 = vld [vmem:[%s1282_s1 + $0x40] ss:$8 sps:$4 sm:$0xff] (!%p241_p3)  }
   0xa   : > { %v1027_v10 = vld [vmem:[%s1282_s1 + $0x54] ss:$8 sps:$4 sm:$0xff] (!%p241_p3)   ;;  %v1029_v17 = vld [vmem:[%s1282_s1 + $0x50] ss:$8 sps:$4 sm:$0xff] (!%p241_p3)   ;;  %v1030_v18 = vld [vmem:[%s1282_s1 + $0x64] ss:$8 sps:$4 sm:$0xff] (!%p241_p3)  }
   0xb   : > { %v1032_v19 = vld [vmem:[%s1282_s1 + $0x60] ss:$8 sps:$4 sm:$0xff] (!%p241_p3)   ;;  %v1033_v20 = vld [vmem:[%s1282_s1 + $0x74] ss:$8 sps:$4 sm:$0xff] (!%p241_p3)   ;;  %v1035_v21 = vld [vmem:[%s1282_s1 + $0x70] ss:$8 sps:$4 sm:$0xff] (!%p241_p3)  }
   0xc   : > { %574 = vmatpush1.bf16.msra.mxu0 (!%p241_p3), %v1017_v3  ;;  %977 = vmatpush1.bf16.msra.mxu1 (!%p241_p3), %v1017_v3  ;;  %v1036_v22 = vld [vmem:[%s1282_s1 + $0x84] ss:$8 sps:$4 sm:$0xff] (!%p241_p3)   ;;  %v1038_v23 = vld [vmem:[%s1282_s1 + $0x80] ss:$8 sps:$4 sm:$0xff] (!%p241_p3)   ;;  %v1039_v24 = vld [vmem:[%s1282_s1 + $0x94] ss:$8 sps:$4 sm:$0xff] (!%p241_p3)  }
   0xd   : > { %575 = vmatprep.subr.bf16.mxu0 (!%p241_p3), %v1018_v4  ;;  %966 = vmatprep.subr.bf16.mxu1 (!%p241_p3), %v1018_v4  ;;  %v1041_v25 = vld [vmem:[%s1282_s1 + $0x90] ss:$8 sps:$4 sm:$0xff] (!%p241_p3)   ;;  %v1042_v26 = vld [vmem:[%s1282_s1 + $0xa4] ss:$8 sps:$4 sm:$0xff] (!%p241_p3)   ;;  %v1044_v27 = vld [vmem:[%s1282_s1 + $0xa0] ss:$8 sps:$4 sm:$0xff] (!%p241_p3)  }
   0xe   : > { %s1291_s21 = smov (!%p302_p4, %s922_s21), 15  ;;  %v1045_v28 = vld [vmem:[%s1282_s1 + $0xb4] ss:$8 sps:$4 sm:$0xff]   ;;  %v1047_v29 = vld [vmem:[%s1282_s1 + $0xb0] ss:$8 sps:$4 sm:$0xff]   ;;  %v698_v49 = vshrl.u32 %v697_v48, 7 }
   0xf   : > { %s1136_s8 = sshll.u32 %s1291_s21, 4  ;;  %v695_v51 = vld [vmem:[%s1283_s2] sm:$0x3] }
  0x10   : > { %576 = vmatpush1.bf16.msra.mxu0 %v1020_v5  ;;  %978 = vmatpush1.bf16.msra.mxu1 %v1020_v5  ;;  %s1148_s15 = scalar_lea.vmem %s1281_s0, %s1136_s8  ;;  %v699_v50 = vsub.s32 0, %v698_v49  ;;  %v703_v52 = vsub.s32 1, %v698_v49  ;;  %s1222_s6 = scalar_lea.vmem %s1284_s3, %s1136_s8 }
  0x11   : > { %577 = vmatprep.subr.bf16.mxu0 %v1021_v6  ;;  %967 = vmatprep.subr.bf16.mxu1 %v1021_v6  ;;  %v375_v11 = vld [vmem:[%s1148_s15 + $0x8] sm:$0xff]  ;;  %v377_v12 = vld [vmem:[%s1148_s15 + $0x18] sm:$0xff]  ;;  %v374_v30 = vld [vmem:[%s1148_s15] sm:$0xff]  ;;  %s1234_s9 = scalar_lea.vmem %s1285_s4, %s1136_s8 }
  0x12   : > { %v383_v13 = vld [vmem:[%s1148_s15 + $0x48] sm:$0xff]  ;;  %v391_v14 = vpack.c.bf16 %v377_v12, %v375_v11  ;;  %v385_v15 = vld [vmem:[%s1148_s15 + $0x58] sm:$0xff]  ;;  %v376_v31 = vld [vmem:[%s1148_s15 + $0x10] sm:$0xff]  ;;  %v700_v53 = vrot.slane %v695_v51, %v699_v50  ;;  %v1224_v54 = vrot.slane %v695_v51, %v703_v52 }
  0x13   : > { %v395_v16 = vpack.c.bf16 %v385_v15, %v383_v13  ;;  %v382_v32 = vld [vmem:[%s1148_s15 + $0x40] sm:$0xff]  ;;  %v384_v33 = vld [vmem:[%s1148_s15 + $0x50] sm:$0xff]  ;;  %v379_v34 = vld [vmem:[%s1148_s15 + $0x28] sm:$0xff]  ;;  %v390_v38 = vpack.c.bf16 %v376_v31, %v374_v30 }
  0x14   : > { %578 = vmatpush1.bf16.msra.mxu0 %v1023_v7  ;;  %979 = vmatpush1.bf16.msra.mxu1 %v1023_v7  ;;  %v381_v35 = vld [vmem:[%s1148_s15 + $0x38] sm:$0xff]  ;;  %v387_v36 = vld [vmem:[%s1148_s15 + $0x68] sm:$0xff]  ;;  %v394_v39 = vpack.c.bf16 %v384_v33, %v382_v32  ;;  %v378_v42 = vld [vmem:[%s1148_s15 + $0x20] sm:$0xff] }
  0x15   : > { %579 = vmatprep.subr.bf16.mxu0 %v1024_v8  ;;  %968 = vmatprep.subr.bf16.mxu1 %v1024_v8  ;;  %v389_v37 = vld [vmem:[%s1148_s15 + $0x78] sm:$0xff]  ;;  %v393_v40 = vpack.c.bf16 %v381_v35, %v379_v34  ;;  %v380_v43 = vld [vmem:[%s1148_s15 + $0x30] sm:$0xff]  ;;  %v386_v44 = vld [vmem:[%s1148_s15 + $0x60] sm:$0xff] }
  0x16   : > { %955 = vmatprep.mubr.msk.bf16.mxu0 %vm558_vm0, %v391_v14  ;;  %957 = vmatprep.mubr.msk.bf16.mxu1 %vm558_vm0, %v395_v16  ;;  %v397_v41 = vpack.c.bf16 %v389_v37, %v387_v36  ;;  %v388_v45 = vld [vmem:[%s1148_s15 + $0x70] sm:$0xff]  ;;  %v392_v46 = vpack.c.bf16 %v380_v43, %v378_v42  ;;  %v723_v56 = vld [vmem:[%s1222_s6] sm:$0xff]  ;;  %v724_v62 = vld [vmem:[%s1222_s6 + $0x8] sm:$0xff] }
  0x17   : > { %v396_v47 = vpack.c.bf16 %v388_v45, %v386_v44  ;;  %v731_v58 = vld [vmem:[%s1222_s6 + $0x40] sm:$0xff]  ;;  %v732_v0 = vld [vmem:[%s1222_s6 + $0x48] sm:$0xff]  ;;  %v725_v4 = vld [vmem:[%s1222_s6 + $0x10] sm:$0xff] }
  0x18   : > { %580 = vmatpush1.bf16.msra.mxu0 %v1026_v9  ;;  %980 = vmatpush1.bf16.msra.mxu1 %v1026_v9  ;;  %v733_v6 = vld [vmem:[%s1222_s6 + $0x50] sm:$0xff]  ;;  %v726_v12 = vld [vmem:[%s1222_s6 + $0x18] sm:$0xff]  ;;  %v728_v30 = vld [vmem:[%s1222_s6 + $0x28] sm:$0xff] }
  0x19   : > { %581 = vmatprep.subr.bf16.mxu0 %v1027_v10  ;;  %969 = vmatprep.subr.bf16.mxu1 %v1027_v10  ;;  %v734_v14 = vld [vmem:[%s1222_s6 + $0x58] sm:$0xff]  ;;  %v736_v32 = vld [vmem:[%s1222_s6 + $0x68] sm:$0xff]  ;;  %v729_v36 = vld [vmem:[%s1222_s6 + $0x30] sm:$0xff] }
  0x1a   : > { %v730_v44 = vld [vmem:[%s1222_s6 + $0x38] sm:$0xff] }
  0x1c   : > { %582 = vmatpush1.bf16.msra.mxu0 %v1029_v17  ;;  %981 = vmatpush1.bf16.msra.mxu1 %v1029_v17 }
  0x1d   : > { %583 = vmatprep.subr.bf16.mxu0 %v1030_v18  ;;  %970 = vmatprep.subr.bf16.mxu1 %v1030_v18 }
  0x20   : > { %584 = vmatpush1.bf16.msra.mxu0 %v1032_v19  ;;  %982 = vmatpush1.bf16.msra.mxu1 %v1032_v19 }
  0x21   : > { %585 = vmatprep.subr.bf16.mxu0 %v1033_v20  ;;  %971 = vmatprep.subr.bf16.mxu1 %v1033_v20 }
  0x24   : > { %586 = vmatpush1.bf16.msra.mxu0 %v1035_v21  ;;  %983 = vmatpush1.bf16.msra.mxu1 %v1035_v21 }
  0x25   : > { %587 = vmatprep.subr.bf16.mxu0 %v1036_v22  ;;  %972 = vmatprep.subr.bf16.mxu1 %v1036_v22 }
  0x28   : > { %588 = vmatpush1.bf16.msra.mxu0 %v1038_v23  ;;  %984 = vmatpush1.bf16.msra.mxu1 %v1038_v23 }
  0x29   : > { %589 = vmatprep.subr.bf16.mxu0 %v1039_v24  ;;  %973 = vmatprep.subr.bf16.mxu1 %v1039_v24  ;;  %v727_v24 = vld [vmem:[%s1222_s6 + $0x20] sm:$0xff] }
  0x2c   : > { %590 = vmatpush1.bf16.msra.mxu0 %v1041_v25  ;;  %985 = vmatpush1.bf16.msra.mxu1 %v1041_v25 }
  0x2d   : > { %591 = vmatprep.subr.bf16.mxu0 %v1042_v26  ;;  %974 = vmatprep.subr.bf16.mxu1 %v1042_v26  ;;  %v735_v26 = vld [vmem:[%s1222_s6 + $0x60] sm:$0xff] }
  0x30   : > { %592 = vmatpush1.bf16.msra.mxu0 %v1044_v27  ;;  %986 = vmatpush1.bf16.msra.mxu1 %v1044_v27 }
  0x31   : > { %593 = vmatprep.subr.bf16.mxu0 %v1045_v28  ;;  %975 = vmatprep.subr.bf16.mxu1 %v1045_v28 }
  0x34   : > { %594 = vmatpush1.bf16.msra.mxu0 %v1047_v29  ;;  %987 = vmatpush1.bf16.msra.mxu1 %v1047_v29 }
  0x37   : > { %604 = vmatmul.mubr.bf16.vlgmr.msra.gmra.mrb[0].mxu0 %v390_v38  ;;  %624 = vmatmul.mubr.bf16.vlgmr.msra.gmra.mrb[0].mxu1 %v394_v39  ;;  %v737_v38 = vld [vmem:[%s1222_s6 + $0x70] sm:$0xff] }
  0x38   : > { %956 = vmatprep.mubr.msk.bf16.mxu0 %vm558_vm0, %v393_v40  ;;  %958 = vmatprep.mubr.msk.bf16.mxu1 %vm558_vm0, %v397_v41 }
  0x3f   : > { %614 = vmatmul.mubr.bf16.gmra.mrb[4].mxu0 %v392_v46  ;;  %634 = vmatmul.mubr.bf16.gmra.mrb[4].mxu1 %v396_v47  ;;  %v738_v46 = vld [vmem:[%s1222_s6 + $0x78] sm:$0xff] }
 0x10a   : > { %v605_v55 = vpop.f32.mrb[0].mxu0  ;;  %v625_v57 = vpop.f32.mrb[0].mxu1 }
 0x10b   : > { %v707_v59 = vadd.f32 %v700_v53, %v605_v55  ;;  %v715_v60 = vadd.f32 %v700_v53, %v625_v57  ;;  %v607_v61 = vpop.f32.mrb[1].mxu0  ;;  %v627_v63 = vpop.f32.mrb[1].mxu1 }
 0x10c   : > { %v708_v1 = vadd.f32 %v1224_v54, %v607_v61  ;;  %v716_v2 = vadd.f32 %v1224_v54, %v627_v63  ;;  %v609_v3 = vpop.f32.mrb[2].mxu0  ;;  %v629_v5 = vpop.f32.mrb[2].mxu1 }
 0x10d   : > { %v739_v7 = vadd.f32 %v723_v56, %v707_v59  ;;  %v747_v8 = vadd.f32 %v731_v58, %v715_v60  ;;  %v709_v9 = vadd.f32 %v700_v53, %v609_v3  ;;  %v717_v10 = vadd.f32 %v700_v53, %v629_v5  ;;  %v611_v11 = vpop.f32.mrb[3].mxu0  ;;  %v631_v13 = vpop.f32.mrb[3].mxu1 }
 0x10e   : > { %v740_v15 = vadd.f32 %v724_v62, %v708_v1  ;;  %v748_v16 = vadd.f32 %v732_v0, %v716_v2  ;;  %v710_v17 = vadd.f32 %v1224_v54, %v611_v11  ;;  %v718_v18 = vadd.f32 %v1224_v54, %v631_v13 }
 0x10f   : > { %755 = vst [vmem:[%s1234_s9] sm:$0xff] %v739_v7  ;;  %763 = vst [vmem:[%s1234_s9 + $0x40] sm:$0xff] %v747_v8  ;;  %v741_v19 = vadd.f32 %v725_v4, %v709_v9  ;;  %v749_v20 = vadd.f32 %v733_v6, %v717_v10 }
 0x110   : > { %756 = vst [vmem:[%s1234_s9 + $0x8] sm:$0xff] %v740_v15  ;;  %764 = vst [vmem:[%s1234_s9 + $0x48] sm:$0xff] %v748_v16  ;;  %v742_v21 = vadd.f32 %v726_v12, %v710_v17  ;;  %v750_v22 = vadd.f32 %v734_v14, %v718_v18 }
 0x111   : > { %757 = vst [vmem:[%s1234_s9 + $0x10] sm:$0xff] %v741_v19  ;;  %765 = vst [vmem:[%s1234_s9 + $0x50] sm:$0xff] %v749_v20 }
 0x112   : > { %758 = vst [vmem:[%s1234_s9 + $0x18] sm:$0xff] %v742_v21  ;;  %766 = vst [vmem:[%s1234_s9 + $0x58] sm:$0xff] %v750_v22  ;;  %v615_v23 = vpop.f32.mrb[4].mxu0  ;;  %v635_v25 = vpop.f32.mrb[4].mxu1 }
 0x113   : > { %v711_v27 = vadd.f32 %v700_v53, %v615_v23  ;;  %v719_v28 = vadd.f32 %v700_v53, %v635_v25  ;;  %v617_v29 = vpop.f32.mrb[5].mxu0  ;;  %v637_v31 = vpop.f32.mrb[5].mxu1 }
 0x114   : > { %v712_v33 = vadd.f32 %v1224_v54, %v617_v29  ;;  %v720_v34 = vadd.f32 %v1224_v54, %v637_v31  ;;  %v619_v35 = vpop.f32.mrb[6].mxu0  ;;  %v639_v37 = vpop.f32.mrb[6].mxu1 }
 0x115   : > { %v743_v39 = vadd.f32 %v727_v24, %v711_v27  ;;  %v751_v40 = vadd.f32 %v735_v26, %v719_v28  ;;  %v713_v41 = vadd.f32 %v700_v53, %v619_v35  ;;  %v721_v42 = vadd.f32 %v700_v53, %v639_v37  ;;  %v621_v43 = vpop.f32.mrb[7].mxu0  ;;  %v641_v45 = vpop.f32.mrb[7].mxu1 }
 0x116   : > { %v744_v47 = vadd.f32 %v728_v30, %v712_v33  ;;  %v752_v48 = vadd.f32 %v736_v32, %v720_v34  ;;  %v714_v49 = vadd.f32 %v1224_v54, %v621_v43  ;;  %v722_v50 = vadd.f32 %v1224_v54, %v641_v45 }
 0x117   : > { %759 = vst [vmem:[%s1234_s9 + $0x20] sm:$0xff] %v743_v39  ;;  %767 = vst [vmem:[%s1234_s9 + $0x60] sm:$0xff] %v751_v40  ;;  %v745_v51 = vadd.f32 %v729_v36, %v713_v41  ;;  %v753_v52 = vadd.f32 %v737_v38, %v721_v42 }
 0x118   : > { %760 = vst [vmem:[%s1234_s9 + $0x28] sm:$0xff] %v744_v47  ;;  %768 = vst [vmem:[%s1234_s9 + $0x68] sm:$0xff] %v752_v48  ;;  %v746_v53 = vadd.f32 %v730_v44, %v714_v49  ;;  %v754_v55 = vadd.f32 %v738_v46, %v722_v50 }
 0x119   : > { %761 = vst [vmem:[%s1234_s9 + $0x30] sm:$0xff] %v745_v51  ;;  %769 = vst [vmem:[%s1234_s9 + $0x70] sm:$0xff] %v753_v52 }
 0x11a   : > { %762 = vst [vmem:[%s1234_s9 + $0x38] sm:$0xff] %v746_v53  ;;  %770 = vst [vmem:[%s1234_s9 + $0x78] sm:$0xff] %v754_v55 }
 0x11b PF: > { %s14_s17 = sadd.s32 1, %s1070_s17   ;;  %s1286_s15 = smov %s1066_s16 }
 0x11c   : > { %p11_p5 = scmp.ge.s32.totalorder %s14_s17, 4   ;;  %s1287_s16 = smov %s1289_s18 }
 0x11e   :  { %13 = sbr.rel (!%p11_p5) target bundleno = 2 (0x2), region = 83 }

// kernel: sam_encode.15
= control target key start
LH: loop header
LB: loop body
LE: loop exit
PB: predicated region body
PF: predicated region fallthrough
CT: control target
= control target key end

     0   :  { %s1682_s12 = smov 0   ;;  %s1684_s13 = smov 0   ;;  %s1925_s0 = inlined_call_operand.vmem [shape: bf16[2,64,768], index: 0, kind: input, shape index: {}, may-alias: {0,1,2}]   ;;  %s1926_s1 = inlined_call_operand.vmem [shape: bf16[2,64,768], index: 1, kind: input, shape index: {}, may-alias: {0,1,2}]   ;;  %s1927_s2 = inlined_call_operand.vmem [shape: bf16[2,64,768], index: 2, kind: input, shape index: {}, may-alias: {0,1,2}]   ;;  %s1928_s3 = inlined_call_operand.vmem [shape: bf16[2,64,256], index: 3, kind: output, shape index: {}]  }
   0x1   :  { %s1686_s14 = smov 0   ;;  %s1688_s15 = smov 0  }
   0x2   :  { %s1690_s16 = smov 0  }
   0x3 LB: > { %s32_s17 = sadd.s32 1, %s1656_s15  ;;  %p48_p1 = scmp.ne.s32.totalorder %s1648_s13, %s1644_s12  ;;  %s1660_s16 = sphi %s1690_s16, %s13_s16   ;;  %s1656_s15 = sphi %s1688_s15, %s1933_s15   ;;  %s1652_s14 = sphi %s1686_s14, %s1932_s14   ;;  %s1648_s13 = sphi %s1684_s13, %s1931_s13   ;;  %s1644_s12 = sphi %s1682_s12, %s1930_s12  }
   0x4   : > { %p34_p0 = scmp.ge.s32.totalorder %s32_s17, 2  ;;  %p49_p2 = scmp.eq.s32.totalorder %s1660_s16, 0 }
   0x5   : > { %s41_s20 = sadd.s32 1, %s1648_s13  ;;  %p1289_p5 = scmp.ge.s32.totalorder %s1660_s16, 2 }
   0x6   : > { %s1935_s17 = smov (%p34_p0, %s32_s17), 0  ;;  %p1713_p3 = por %p49_p2, %p48_p1 }
   0x7   : > { %s36_s19 = ssub.s32 %s1656_s15, %s1935_s17  ;;  %158 = sbr.rel (%p1289_p5) target bundleno = 41 (0x29), region = 16 }
   0x8   : > { %p39_p4 = scmp.eq.s32.totalorder %s36_s19, 0 }
   0xa   : > { %s1721_s21 = scalar_select %p39_p4, %s1648_s13, %s41_s20  }
   0xe   : > { %161 = sbr.rel (!%p1713_p3) target bundleno = 23 (0x17), region = 20  ;;  %s163_s22 = sand.u32 (%p1713_p3), 1, %s1648_s13  }
   0xf   : > { %s1481_s23 = smul.u32 (%p1713_p3), 192, %s1656_s15  ;;  %s1290_s24 = sshll.u32 (%p1713_p3), %s163_s22, 6 }
  0x10   : > { %s165_s28 = scalar_lea.vmem (%p1713_p3), [#allocation2], %s1290_s24 }
  0x11   : > { %s171_s27 = scalar_lea.vmem (%p1713_p3), %s1925_s0, %s1481_s23 }
  0x12   : > { %v213_v0 = vld [vmem:[%s171_s27] sm:$0xff] (%p1713_p3)  ;;  %v215_v1 = vld [vmem:[%s171_s27 + $0x18] sm:$0xff] (%p1713_p3)  ;;  %v217_v2 = vld [vmem:[%s171_s27 + $0x30] sm:$0xff] (%p1713_p3) }
  0x13   : > { %214 = vst [vmem:[%s165_s28] sm:$0xff] (%p1713_p3), %v213_v0  ;;  %216 = vst [vmem:[%s165_s28 + $0x8] sm:$0xff] (%p1713_p3), %v215_v1  ;;  %v219_v3 = vld [vmem:[%s171_s27 + $0x48] sm:$0xff] (%p1713_p3)  ;;  %v221_v4 = vld [vmem:[%s171_s27 + $0x60] sm:$0xff] (%p1713_p3) }
  0x14   : > { %218 = vst [vmem:[%s165_s28 + $0x10] sm:$0xff] (%p1713_p3), %v217_v2  ;;  %v223_v5 = vld [vmem:[%s171_s27 + $0x78] sm:$0xff] (%p1713_p3)  ;;  %220 = vst [vmem:[%s165_s28 + $0x18] sm:$0xff] (%p1713_p3), %v219_v3  ;;  %v225_v6 = vld [vmem:[%s171_s27 + $0x90] sm:$0xff] (%p1713_p3) }
  0x15   : > { %222 = vst [vmem:[%s165_s28 + $0x20] sm:$0xff] %v221_v4  ;;  %224 = vst [vmem:[%s165_s28 + $0x28] sm:$0xff] %v223_v5  ;;  %v227_v7 = vld [vmem:[%s171_s27 + $0xa8] sm:$0xff] }
  0x16   : > { %226 = vst [vmem:[%s165_s28 + $0x30] sm:$0xff] %v225_v6  ;;  %228 = vst [vmem:[%s165_s28 + $0x38] sm:$0xff] %v227_v7 }
  0x17 PF: > { %234 = sbr.rel (!%p1713_p3) target bundleno = 32 (0x20), region = 58  ;;  %s236_s29 = sand.u32 (%p1713_p3), 1, %s1648_s13  }
  0x18   : > { %s1293_s30 = smul.u32 (%p1713_p3), 192, %s1656_s15  ;;  %s1292_s4 = sshll.u32 (%p1713_p3), %s236_s29, 6 }
  0x19   : > { %s238_s8 = scalar_lea.vmem (%p1713_p3), [#allocation3], %s1292_s4 }
  0x1a   : > { %s1191_s7 = scalar_lea.vmem (%p1713_p3), %s1926_s1, %s1293_s30 }
  0x1b   : > { %v1294_v8 = vld [vmem:[%s1191_s7 + $0x8] sm:$0xff] (%p1713_p3)  ;;  %v1295_v9 = vld [vmem:[%s1191_s7 + $0x20] sm:$0xff] (%p1713_p3)  ;;  %v1296_v10 = vld [vmem:[%s1191_s7 + $0x38] sm:$0xff] (%p1713_p3) }
  0x1c   : > { %288 = vst [vmem:[%s238_s8] sm:$0xff] (%p1713_p3), %v1294_v8  ;;  %290 = vst [vmem:[%s238_s8 + $0x8] sm:$0xff] (%p1713_p3), %v1295_v9  ;;  %v1297_v11 = vld [vmem:[%s1191_s7 + $0x50] sm:$0xff] (%p1713_p3)  ;;  %v1298_v12 = vld [vmem:[%s1191_s7 + $0x68] sm:$0xff] (%p1713_p3) }
  0x1d   : > { %292 = vst [vmem:[%s238_s8 + $0x10] sm:$0xff] (%p1713_p3), %v1296_v10  ;;  %v1299_v13 = vld [vmem:[%s1191_s7 + $0x80] sm:$0xff] (%p1713_p3)  ;;  %294 = vst [vmem:[%s238_s8 + $0x18] sm:$0xff] (%p1713_p3), %v1297_v11  ;;  %v1300_v14 = vld [vmem:[%s1191_s7 + $0x98] sm:$0xff] (%p1713_p3) }
  0x1e   : > { %296 = vst [vmem:[%s238_s8 + $0x20] sm:$0xff] %v1298_v12  ;;  %298 = vst [vmem:[%s238_s8 + $0x28] sm:$0xff] %v1299_v13  ;;  %v1301_v15 = vld [vmem:[%s1191_s7 + $0xb0] sm:$0xff] }
  0x1f   : > { %300 = vst [vmem:[%s238_s8 + $0x30] sm:$0xff] %v1300_v14  ;;  %302 = vst [vmem:[%s238_s8 + $0x38] sm:$0xff] %v1301_v15 }
  0x20 PF: > { %308 = sbr.rel (!%p1713_p3) target bundleno = 41 (0x29), region = 96  ;;  %s310_s9 = sand.u32 (%p1713_p3), 1, %s1648_s13  }
  0x21   : > { %s1303_s10 = smul.u32 (%p1713_p3), 192, %s1656_s15  ;;  %s1302_s11 = sshll.u32 (%p1713_p3), %s310_s9, 6 }
  0x22   : > { %s312_s23 = scalar_lea.vmem (%p1713_p3), [#allocation4], %s1302_s11 }
  0x23   : > { %s1199_s22 = scalar_lea.vmem (%p1713_p3), %s1927_s2, %s1303_s10 }
  0x24   : > { %v1304_v16 = vld [vmem:[%s1199_s22 + $0x10] sm:$0xff] (%p1713_p3)  ;;  %v1305_v17 = vld [vmem:[%s1199_s22 + $0x28] sm:$0xff] (%p1713_p3)  ;;  %v1306_v18 = vld [vmem:[%s1199_s22 + $0x40] sm:$0xff] (%p1713_p3) }
  0x25   : > { %362 = vst [vmem:[%s312_s23] sm:$0xff] (%p1713_p3), %v1304_v16  ;;  %364 = vst [vmem:[%s312_s23 + $0x8] sm:$0xff] (%p1713_p3), %v1305_v17  ;;  %v1307_v19 = vld [vmem:[%s1199_s22 + $0x58] sm:$0xff] (%p1713_p3)  ;;  %v1308_v20 = vld [vmem:[%s1199_s22 + $0x70] sm:$0xff] (%p1713_p3) }
  0x26   : > { %366 = vst [vmem:[%s312_s23 + $0x10] sm:$0xff] (%p1713_p3), %v1306_v18  ;;  %v1309_v21 = vld [vmem:[%s1199_s22 + $0x88] sm:$0xff] (%p1713_p3)  ;;  %368 = vst [vmem:[%s312_s23 + $0x18] sm:$0xff] (%p1713_p3), %v1307_v19  ;;  %v1310_v22 = vld [vmem:[%s1199_s22 + $0xa0] sm:$0xff] (%p1713_p3) }
  0x27   : > { %370 = vst [vmem:[%s312_s23 + $0x20] sm:$0xff] %v1308_v20  ;;  %372 = vst [vmem:[%s312_s23 + $0x28] sm:$0xff] %v1309_v21  ;;  %v1311_v23 = vld [vmem:[%s1199_s22 + $0xb8] sm:$0xff] }
  0x28   : > { %374 = vst [vmem:[%s312_s23 + $0x30] sm:$0xff] %v1310_v22  ;;  %376 = vst [vmem:[%s312_s23 + $0x38] sm:$0xff] %v1311_v23 }
  0x29 PF: > { %p1312_p6 = scmp.ge.s32.totalorder %s1660_s16, 1  ;;  %p381_p7 = scmp.lt.s32.totalorder %s1660_s16, 3 }
  0x2b   : > { %p382_p8 = pnand %p1312_p6, %p381_p7 }
  0x2c   : > { %s388_s18 = sand.u32 (!%p382_p8), 1, %s1644_s12   ;;  %vm590_vm0 = vcmask (!%p382_p8), 523264   ;;  %p442_p9 = scmp.lt.s32.totalorder (!%p382_p8), %s1652_s14, 1 }
  0x2d   : > { %385 = sbr.rel (%p382_p8) target bundleno = 1097 (0x449), region = 134  ;;  %s1748_s24 = sshll.u32 (!%p382_p8), %s388_s18, 6 }
  0x2e   : > { %s1751_s25 = scalar_lea.vmem (!%p382_p8), [#allocation3], %s1748_s24  ;;  %s1756_s26 = scalar_lea.vmem (!%p382_p8), [#allocation2], %s1748_s24 }
  0x2f   : > { %v1522_v24 = vld [vmem:[%s1751_s25] ss:$8 sps:$4 sm:$0xff] (!%p382_p8)   ;;  %v1525_v25 = vld [vmem:[%s1751_s25 + $0x10] ss:$8 sps:$4 sm:$0xff] (!%p382_p8)   ;;  %s1773_s12 = scalar_lea.vmem (!%p382_p8), [#allocation4], %s1748_s24 }
  0x30   : > { %1417 = vmatprep.subr.bf16.mxu0 (!%p382_p8), %v1522_v24  ;;  %v1531_v26 = vld [vmem:[%s1756_s26] ss:$8 sps:$4 sm:$0xff] (!%p382_p8)   ;;  %v1529_v28 = vld [vmem:[%s1751_s25 + $0x30] ss:$8 sps:$4 sm:$0xff] (!%p382_p8)   ;;  %v1543_v50 = vld [vmem:[%s1773_s12 + $0x4] ss:$8 sps:$4 sm:$0xff] (!%p382_p8)  }
  0x31   : > { %1418 = vmatpush3.bf16.xpose.msra.mxu0 (!%p382_p8), %v1522_v24  ;;  %1425 = vmatprep.mubr.bf16.mxu0 (!%p382_p8), %v1531_v26  ;;  %v1527_v27 = vld [vmem:[%s1751_s25 + $0x20] ss:$8 sps:$4 sm:$0xff] (!%p382_p8)   ;;  %v1534_v29 = vld [vmem:[%s1756_s26 + $0x10] ss:$8 sps:$4 sm:$0xff] (!%p382_p8)   ;;  %v1524_v52 = vld [vmem:[%s1751_s25 + $0x4] ss:$8 sps:$4 sm:$0xff] (!%p382_p8)  }
  0x32   : > { %1419 = vmatprep.subr.bf16.mxu0 (!%p382_p8), %v1525_v25  ;;  %v1537_v30 = vld [vmem:[%s1756_s26 + $0x20] ss:$8 sps:$4 sm:$0xff] (!%p382_p8)   ;;  %v1539_v31 = vld [vmem:[%s1756_s26 + $0x30] ss:$8 sps:$4 sm:$0xff] (!%p382_p8)   ;;  %v1550_v20 = vld [vmem:[%s1751_s25 + $0x14] ss:$8 sps:$4 sm:$0xff] (!%p382_p8)  }
  0x33   : > { %v1541_v48 = vld [vmem:[%s1773_s12] ss:$8 sps:$4 sm:$0xff] (!%p382_p8)   ;;  %v1544_v49 = vld [vmem:[%s1773_s12 + $0x10] ss:$8 sps:$4 sm:$0xff] (!%p382_p8)   ;;  %v1551_v26 = vld [vmem:[%s1751_s25 + $0x24] ss:$8 sps:$4 sm:$0xff] (!%p382_p8)  }
  0x34   : > { %1433 = vmatprep.subr.bf16.mxu1 %v1541_v48  ;;  %v1546_v51 = vld [vmem:[%s1773_s12 + $0x20] ss:$8 sps:$4 sm:$0xff]   ;;  %v1548_v53 = vld [vmem:[%s1773_s12 + $0x30] ss:$8 sps:$4 sm:$0xff]   ;;  %s1937_s14 = smov (!%p442_p9, %s1652_s14), 1 }
  0x35   : > { %1434 = vmatpush3.bf16.msra.mxu1 %v1541_v48  ;;  %s1368_s27 = sshll.u32 %s1937_s14, 6 }
  0x36   : > { %1435 = vmatprep.subr.bf16.mxu1 %v1544_v49  ;;  %s1881_s30 = scalar_lea.vmem %s1928_s3, %s1368_s27 }
  0x39   : > { %1420 = vmatpush3.bf16.xpose.msra.mxu0 %v1525_v25  ;;  %1436 = vmatpush3.bf16.msra.mxu1 %v1544_v49 }
  0x3a   : > { %1421 = vmatprep.subr.bf16.mxu0 %v1527_v27  ;;  %1437 = vmatprep.subr.bf16.mxu1 %v1546_v51 }
  0x3d   : > { %1438 = vmatpush3.bf16.msra.mxu1 %v1546_v51 }
  0x3e   : > { %1439 = vmatprep.subr.bf16.mxu1 %v1548_v53 }
  0x41   : > { %1422 = vmatpush3.bf16.xpose.msra.mxu0 %v1527_v27  ;;  %1440 = vmatpush3.bf16.msra.mxu1 %v1548_v53  ;;  %v1533_v27 = vld [vmem:[%s1756_s26 + $0x4] ss:$8 sps:$4 sm:$0xff]  }
  0x42   : > { %1423 = vmatprep.subr.bf16.mxu0 %v1529_v28  ;;  %1449 = vmatprep.subr.bf16.mxu1 %v1524_v52 }
  0x49   : > { %1424 = vmatpush3.bf16.xpose.msra.mxu0 %v1529_v28 }
  0x4a   : > { %1465 = vmatprep.subr.bf16.mxu0 %v1543_v50 }
  0x50   : > { %1426 = vmatmul.mubr.bf16.vlgmr.msra.gmra.mrb[0].mxu0 %v1534_v29  ;;  %v1552_v29 = vld [vmem:[%s1751_s25 + $0x34] ss:$8 sps:$4 sm:$0xff]  }
  0x51   : > { %1429 = vmatprep.mubr.bf16.mxu0 %v1537_v30  ;;  %1466 = vmatpush3.bf16.msra.mxu0 %v1543_v50  ;;  %v1536_v30 = vld [vmem:[%s1756_s26 + $0x14] ss:$8 sps:$4 sm:$0xff]  }
  0x58   : > { %1430 = vmatmul.mubr.bf16.gmra.mrb[4].mxu0 %v1539_v31  ;;  %v1553_v31 = vld [vmem:[%s1756_s26 + $0x24] ss:$8 sps:$4 sm:$0xff]  }
 0x123   : > { %v1427_v32 = vpop.f32.mrb[0].mxu0 }
 0x124   : > { %v559_v33 = vpop.f32.mrb[1].mxu0  ;;  %v597_v34 = vsel %vm590_vm0, %v1427_v32, -inf }
 0x125   : > { %598 = vmax.xlane.f32.xlu1 %v597_v34  ;;  %v1428_v35 = vpop.f32.mrb[2].mxu0  ;;  %v591_v36 = vsel %vm590_vm0, %v559_v33, -inf }
 0x126   : > { %592 = vmax.xlane.f32.xlu0 %v591_v36  ;;  %v562_v37 = vpop.f32.mrb[3].mxu0  ;;  %v600_v38 = vsel %vm590_vm0, %v1428_v35, -inf }
 0x127   : > { %v594_v39 = vsel %vm590_vm0, %v562_v37, -inf }
 0x129   : > { %601 = vmax.xlane.f32.xlu1 %v600_v38 }
 0x12a   : > { %595 = vmax.xlane.f32.xlu0 %v594_v39 }
 0x12b   : > { %v1431_v40 = vpop.f32.mrb[4].mxu0 }
 0x12c   : > { %v575_v41 = vpop.f32.mrb[5].mxu0  ;;  %v609_v46 = vsel %vm590_vm0, %v1431_v40, -inf }
 0x12d   : > { %v1432_v42 = vpop.f32.mrb[6].mxu0  ;;  %v603_v43 = vsel %vm590_vm0, %v575_v41, -inf }
 0x12e   : > { %604 = vmax.xlane.f32.xlu0 %v603_v43  ;;  %v578_v44 = vpop.f32.mrb[7].mxu0  ;;  %v612_v47 = vsel %vm590_vm0, %v1432_v42, -inf }
 0x12f   : > { %v606_v45 = vsel %vm590_vm0, %v578_v44, -inf }
 0x130   : > { %607 = vmax.xlane.f32.xlu1 %v606_v45 }
 0x132   : > { %610 = vmax.xlane.f32.xlu0 %v609_v46 }
 0x134   : > { %613 = vmax.xlane.f32.xlu1 %v612_v47 }
 0x1b2   : > { %v599_v54 = vpop.xlane.xlu1 %598 }
 0x1b3   : > { %v617_v55 = vsub.f32 %v1427_v32, %v599_v54  ;;  %v593_v56 = vpop.xlane.xlu0 %592  ;;  %v1554_v32 = vld [vmem:[%s1756_s26 + $0x34] ss:$8 sps:$4 sm:$0xff]  }
 0x1b4   : > { %v615_v57 = vsub.f32 %v559_v33, %v593_v56 }
 0x1b5   : > { %v627_v58 = vmul.f32 1.442695, %v617_v55 }
 0x1b6   : > { %v623_v59 = vmul.f32 1.442695, %v615_v57  ;;  %v602_v60 = vpop.xlane.xlu1 %601 }
 0x1b7   : > { %v618_v61 = vsub.f32 %v1428_v35, %v602_v60  ;;  %v596_v62 = vpop.xlane.xlu0 %595  ;;  %1558 = vpow2.f32 %v627_v58 }
 0x1b8   : > { %v616_v63 = vsub.f32 %v562_v37, %v596_v62  ;;  %1560 = vpow2.f32 %v623_v59  ;;  %v1555_v62 = vld [vmem:[%s1773_s12 + $0x14] ss:$8 sps:$4 sm:$0xff]  }
 0x1b9   : > { %v629_v0 = vmul.f32 1.442695, %v618_v61  ;;  %1467 = vmatprep.subr.bf16.mxu0 %v1555_v62 }
 0x1ba   : > { %v625_v1 = vmul.f32 1.442695, %v616_v63  ;;  %1468 = vmatpush3.bf16.msra.mxu0 %v1555_v62 }
 0x1bb   : > { %1562 = vpow2.f32 %v629_v0  ;;  %v605_v2 = vpop.xlane.xlu0 %604 }
 0x1bc   : > { %1564 = vpow2.f32 %v625_v1  ;;  %v619_v3 = vsub.f32 %v575_v41, %v605_v2  ;;  %v1556_v1 = vld [vmem:[%s1773_s12 + $0x24] ss:$8 sps:$4 sm:$0xff]  }
 0x1bd   : > { %v608_v4 = vpop.xlane.xlu1 %607  ;;  %1469 = vmatprep.subr.bf16.mxu0 %v1556_v1 }
 0x1be   : > { %v631_v5 = vmul.f32 1.442695, %v619_v3  ;;  %v620_v6 = vsub.f32 %v578_v44, %v608_v4  ;;  %1470 = vmatpush3.bf16.msra.mxu0 %v1556_v1  ;;  %v1557_v3 = vld [vmem:[%s1773_s12 + $0x34] ss:$8 sps:$4 sm:$0xff]  }
 0x1bf   : > { %v611_v7 = vpop.xlane.xlu0 %610  ;;  %1471 = vmatprep.subr.bf16.mxu0 %v1557_v3 }
 0x1c0   : > { %v633_v8 = vmul.f32 1.442695, %v620_v6  ;;  %v621_v9 = vsub.f32 %v1431_v40, %v611_v7  ;;  %1566 = vpow2.f32 %v631_v5 }
 0x1c1   : > { %v614_v10 = vpop.xlane.xlu1 %613  ;;  %v1781_v13 = vpop.eup %1558 }
 0x1c2   : > { %1568 = vpow2.f32 %v633_v8  ;;  %v635_v11 = vmul.f32 1.442695, %v621_v9  ;;  %v622_v12 = vsub.f32 %v1432_v42, %v614_v10  ;;  %v1783_v14 = vpop.eup %1560  ;;  %v645_v59 = vsel %vm590_vm0, %v1781_v13, 0.0  ;;  %1472 = vmatpush3.bf16.msra.mxu0 %v1557_v3 }
 0x1c3   : > { %v639_v57 = vsel %vm590_vm0, %v1783_v14, 0.0 }
 0x1c4   : > { %v637_v15 = vmul.f32 1.442695, %v622_v12  ;;  %1570 = vpow2.f32 %v635_v11 }
 0x1c5   : > { %v1785_v16 = vpop.eup %1562 }
 0x1c6   : > { %v1787_v17 = vpop.eup %1564  ;;  %1572 = vpow2.f32 %v637_v15  ;;  %v664_v18 = vpack.c.bf16 %v1785_v16, %v1781_v13  ;;  %v648_v60 = vsel %vm590_vm0, %v1785_v16, 0.0 }
 0x1c7   : > { %v663_v19 = vpack.c.bf16 %v1787_v17, %v1783_v14  ;;  %v642_v58 = vsel %vm590_vm0, %v1787_v17, 0.0 }
 0x1c9   : > { %1441 = vmatprep.mubr.msk.bf16.mxu1 %vm590_vm0, %v663_v19 }
 0x1ca   : > { %1442 = vmatmul.mubr.msk.bf16.vlgmr.msra.gmra.mrb[0].mxu1 %vm590_vm0, %v664_v18  ;;  %v1796_v21 = vpop.eup %1566 }
 0x1cb   : > { %1450 = vmatpush3.bf16.xpose.msra.mxu1 %v1524_v52  ;;  %v651_v61 = vsel %vm590_vm0, %v1796_v21, 0.0 }
 0x1cc   : > { %v1798_v22 = vpop.eup %1568  ;;  %1451 = vmatprep.subr.bf16.mxu1 %v1550_v20 }
 0x1cd   : > { %v665_v23 = vpack.c.bf16 %v1798_v22, %v1796_v21  ;;  %v654_v63 = vsel %vm590_vm0, %v1798_v22, 0.0 }
 0x1ce   : > { %v1802_v24 = vpop.eup %1570 }
 0x1cf   : > { %1445 = vmatprep.mubr.msk.bf16.mxu1 %vm590_vm0, %v665_v23  ;;  %v657_v0 = vsel %vm590_vm0, %v1802_v24, 0.0 }
 0x1d0   : > { %v1805_v25 = vpop.eup %1572 }
 0x1d1   : > { %v666_v28 = vpack.c.bf16 %v1805_v25, %v1802_v24  ;;  %v660_v2 = vsel %vm590_vm0, %v1805_v25, 0.0 }
 0x1d3   : > { %1452 = vmatpush3.bf16.xpose.msra.mxu1 %v1550_v20 }
 0x1d4   : > { %1446 = vmatmul.mubr.msk.bf16.gmra.mrb[4].mxu1 %vm590_vm0, %v666_v28  ;;  %1453 = vmatprep.subr.bf16.mxu1 %v1551_v26 }
 0x1d5   : > { %1457 = vmatprep.mubr.bf16.mxu1 %v1533_v27 }
 0x1db   : > { %1454 = vmatpush3.bf16.xpose.msra.mxu1 %v1551_v26 }
 0x1dc   : > { %1455 = vmatprep.subr.bf16.mxu1 %v1552_v29 }
 0x1e3   : > { %1456 = vmatpush3.bf16.xpose.msra.mxu1 %v1552_v29 }
 0x1ea   : > { %1458 = vmatmul.mubr.bf16.vlgmr.msra.gmra.mrb[8].mxu1 %v1536_v30 }
 0x1eb   : > { %1461 = vmatprep.mubr.bf16.mxu1 %v1553_v31 }
 0x1f2   : > { %1462 = vmatmul.mubr.bf16.gmra.mrb[12].mxu1 %v1554_v32 }
 0x29d   : > { %v1816_v33 = vpop.f32.mrb[0].mxu1 }
 0x29e   : > { %v1818_v34 = vpop.f32.mrb[1].mxu1 }
 0x29f   : > { %v1820_v35 = vpop.f32.mrb[2].mxu1 }
 0x2a0   : > { %v1822_v36 = vpop.f32.mrb[3].mxu1 }
 0x2a7   : > { %v1824_v37 = vpop.f32.mrb[4].mxu1 }
 0x2a8   : > { %v1826_v38 = vpop.f32.mrb[5].mxu1 }
 0x2a9   : > { %v1828_v39 = vpop.f32.mrb[6].mxu1 }
 0x2aa   : > { %v1830_v40 = vpop.f32.mrb[7].mxu1 }
 0x2bd   : > { %v1459_v41 = vpop.f32.mrb[8].mxu1 }
 0x2be   : > { %v890_v42 = vpop.f32.mrb[9].mxu1  ;;  %v927_v47 = vsel %vm590_vm0, %v1459_v41, -inf }
 0x2bf   : > { %v1460_v43 = vpop.f32.mrb[10].mxu1  ;;  %v921_v44 = vsel %vm590_vm0, %v890_v42, -inf }
 0x2c0   : > { %922 = vmax.xlane.f32.xlu0 %v921_v44  ;;  %v893_v45 = vpop.f32.mrb[11].mxu1  ;;  %v930_v49 = vsel %vm590_vm0, %v1460_v43, -inf }
 0x2c1   : > { %v924_v46 = vsel %vm590_vm0, %v893_v45, -inf }
 0x2c2   : > { %925 = vmax.xlane.f32.xlu1 %v924_v46 }
 0x2c4   : > { %928 = vmax.xlane.f32.xlu0 %v927_v47 }
 0x2c5   : > { %v1835_v48 = vpop.f32.mrb[12].mxu1 }
 0x2c6   : > { %931 = vmax.xlane.f32.xlu1 %v930_v49  ;;  %v906_v50 = vpop.f32.mrb[13].mxu1  ;;  %v939_v55 = vsel %vm590_vm0, %v1835_v48, -inf }
 0x2c7   : > { %v1838_v51 = vpop.f32.mrb[14].mxu1  ;;  %v933_v52 = vsel %vm590_vm0, %v906_v50, -inf }
 0x2c8   : > { %934 = vmax.xlane.f32.xlu0 %v933_v52  ;;  %v909_v53 = vpop.f32.mrb[15].mxu1  ;;  %v942_v56 = vsel %vm590_vm0, %v1838_v51, -inf }
 0x2c9   : > { %v936_v54 = vsel %vm590_vm0, %v909_v53, -inf }
 0x2ca   : > { %937 = vmax.xlane.f32.xlu1 %v936_v54 }
 0x2cc   : > { %940 = vmax.xlane.f32.xlu0 %v939_v55 }
 0x2ce   : > { %943 = vmax.xlane.f32.xlu1 %v942_v56 }
 0x2d0   : > { %640 = vadd.xlane.f32.xlu0 %v639_v57 }
 0x2d2   : > { %643 = vadd.xlane.f32.xlu1 %v642_v58 }
 0x2d4   : > { %646 = vadd.xlane.f32.xlu0 %v645_v59 }
 0x2d6   : > { %649 = vadd.xlane.f32.xlu1 %v648_v60 }
 0x2d8   : > { %652 = vadd.xlane.f32.xlu0 %v651_v61 }
 0x2da   : > { %655 = vadd.xlane.f32.xlu1 %v654_v63 }
 0x2dc   : > { %658 = vadd.xlane.f32.xlu0 %v657_v0 }
 0x2de   : > { %661 = vadd.xlane.f32.xlu1 %v660_v2 }
 0x34d   : > { %v923_v4 = vpop.xlane.xlu0 %922 }
 0x34e   : > { %v945_v5 = vsub.f32 %v890_v42, %v923_v4 }
 0x34f   : > { %v926_v6 = vpop.xlane.xlu1 %925 }
 0x350   : > { %v953_v7 = vmul.f32 1.442695, %v945_v5  ;;  %v946_v8 = vsub.f32 %v893_v45, %v926_v6 }
 0x351   : > { %v929_v9 = vpop.xlane.xlu0 %928 }
 0x352   : > { %v955_v10 = vmul.f32 1.442695, %v946_v8  ;;  %v947_v11 = vsub.f32 %v1459_v41, %v929_v9  ;;  %1574 = vpow2.f32 %v953_v7 }
 0x353   : > { %v932_v12 = vpop.xlane.xlu1 %931 }
 0x354   : > { %1576 = vpow2.f32 %v955_v10  ;;  %v957_v13 = vmul.f32 1.442695, %v947_v11  ;;  %v948_v14 = vsub.f32 %v1460_v43, %v932_v12 }
 0x355   : > { %v935_v15 = vpop.xlane.xlu0 %934 }
 0x356   : > { %1578 = vpow2.f32 %v957_v13  ;;  %v959_v16 = vmul.f32 1.442695, %v948_v14  ;;  %v949_v17 = vsub.f32 %v906_v50, %v935_v15 }
 0x357   : > { %v938_v18 = vpop.xlane.xlu1 %937 }
 0x358   : > { %1580 = vpow2.f32 %v959_v16  ;;  %v961_v19 = vmul.f32 1.442695, %v949_v17  ;;  %v950_v20 = vsub.f32 %v909_v53, %v938_v18 }
 0x359   : > { %v941_v21 = vpop.xlane.xlu0 %940 }
 0x35a   : > { %v963_v22 = vmul.f32 1.442695, %v950_v20  ;;  %v951_v23 = vsub.f32 %v1835_v48, %v941_v21  ;;  %1582 = vpow2.f32 %v961_v19 }
 0x35b   : > { %v944_v24 = vpop.xlane.xlu1 %943 }
 0x35c   : > { %1584 = vpow2.f32 %v963_v22  ;;  %v965_v25 = vmul.f32 1.442695, %v951_v23  ;;  %v952_v26 = vsub.f32 %v1838_v51, %v944_v24  ;;  %v1575_v27 = vpop.eup %1574 }
 0x35d   : > { %v641_v28 = vpop.xlane.xlu0 %640  ;;  %v969_v50 = vsel %vm590_vm0, %v1575_v27, 0.0 }
 0x35e   : > { %v1577_v29 = vpop.eup %1576  ;;  %1586 = vpow2.f32 %v965_v25  ;;  %v967_v30 = vmul.f32 1.442695, %v952_v26 }
 0x35f   : > { %1588 = vrcp.f32 %v641_v28  ;;  %v644_v31 = vpop.xlane.xlu1 %643  ;;  %v993_v32 = vpack.c.bf16 %v1577_v29, %v1575_v27  ;;  %v972_v53 = vsel %vm590_vm0, %v1577_v29, 0.0 }
 0x360   : > { %v1579_v41 = vpop.eup %1578  ;;  %1590 = vpow2.f32 %v967_v30 }
 0x361   : > { %1592 = vrcp.f32 %v644_v31  ;;  %1473 = vmatprep.mubr.msk.bf16.mxu0 %vm590_vm0, %v993_v32  ;;  %v647_v42 = vpop.xlane.xlu0 %646  ;;  %v975_v43 = vsel %vm590_vm0, %v1579_v41, 0.0 }
 0x362   : > { %v1581_v44 = vpop.eup %1580  ;;  %1594 = vrcp.f32 %v647_v42  ;;  %976 = vadd.xlane.f32.xlu0 %v975_v43 }
 0x363   : > { %v994_v45 = vpack.c.bf16 %v1581_v44, %v1579_v41  ;;  %v650_v46 = vpop.xlane.xlu1 %649  ;;  %v978_v47 = vsel %vm590_vm0, %v1581_v44, 0.0 }
 0x364   : > { %1596 = vrcp.f32 %v650_v46  ;;  %979 = vadd.xlane.f32.xlu1 %v978_v47  ;;  %v1583_v48 = vpop.eup %1582 }
 0x365   : > { %1474 = vmatmul.mubr.msk.bf16.vlgmr.msra.gmra.mrb[8].mxu0 %vm590_vm0, %v994_v45  ;;  %v653_v49 = vpop.xlane.xlu0 %652  ;;  %v981_v58 = vsel %vm590_vm0, %v1583_v48, 0.0 }
 0x366   : > { %v1585_v51 = vpop.eup %1584  ;;  %1598 = vrcp.f32 %v653_v49  ;;  %970 = vadd.xlane.f32.xlu0 %v969_v50 }
 0x367   : > { %v656_v52 = vpop.xlane.xlu1 %655  ;;  %v995_v54 = vpack.c.bf16 %v1585_v51, %v1583_v48  ;;  %v984_v63 = vsel %vm590_vm0, %v1585_v51, 0.0 }
 0x368   : > { %v1587_v55 = vpop.eup %1586  ;;  %1600 = vrcp.f32 %v656_v52  ;;  %973 = vadd.xlane.f32.xlu1 %v972_v53 }
 0x369   : > { %v1589_v56 = vpop.eup %1588  ;;  %v659_v57 = vpop.xlane.xlu0 %658  ;;  %1477 = vmatprep.mubr.msk.bf16.mxu0 %vm590_vm0, %v995_v54  ;;  %v987_v4 = vsel %vm590_vm0, %v1587_v55, 0.0 }
 0x36a   : > { %v1591_v59 = vpop.eup %1590  ;;  %v776_v60 = vmul.f32 %v1589_v56, %v1818_v34  ;;  %1602 = vrcp.f32 %v659_v57  ;;  %982 = vadd.xlane.f32.xlu0 %v981_v58 }
 0x36b   : > { %v1593_v61 = vpop.eup %1592  ;;  %v662_v62 = vpop.xlane.xlu1 %661  ;;  %v996_v0 = vpack.c.bf16 %v1591_v59, %v1587_v55 }
 0x36c   : > { %v1595_v1 = vpop.eup %1594  ;;  %v1369_v2 = vpack.c.bf16 %v776_v60, %v776_v60  ;;  %v777_v3 = vmul.f32 %v1593_v61, %v1822_v36  ;;  %1604 = vrcp.f32 %v662_v62  ;;  %985 = vadd.xlane.f32.xlu1 %v984_v63  ;;  %v990_v36 = vsel %vm590_vm0, %v1591_v59, 0.0 }
 0x36d   : > { %v778_v34 = vmul.f32 %v1595_v1, %v1816_v33  ;;  %1478 = vmatmul.mubr.msk.bf16.gmra.mrb[12].mxu0 %vm590_vm0, %v996_v0 }
 0x36e   : > { %v1597_v5 = vpop.eup %1596  ;;  %816 = vst [vmem:[%s1881_s30] sm:$0xf] %v1369_v2  ;;  %v1370_v6 = vpack.c.bf16 %v777_v3, %v777_v3  ;;  %988 = vadd.xlane.f32.xlu0 %v987_v4 }
 0x36f   : > { %v1371_v7 = vpack.c.bf16 %v778_v34, %v778_v34  ;;  %v779_v8 = vmul.f32 %v1597_v5, %v1820_v35 }
 0x370   : > { %v1599_v9 = vpop.eup %1598  ;;  %817 = vst [vmem:[%s1881_s30 + $0x8] sm:$0xf] %v1370_v6  ;;  %991 = vadd.xlane.f32.xlu1 %v990_v36 }
 0x371   : > { %818 = vst [vmem:[%s1881_s30 + $0x10] sm:$0xf] %v1371_v7  ;;  %v1372_v33 = vpack.c.bf16 %v779_v8, %v779_v8  ;;  %v780_v10 = vmul.f32 %v1599_v9, %v1826_v38 }
 0x372   : > { %v1601_v11 = vpop.eup %1600 }
 0x373   : > { %819 = vst [vmem:[%s1881_s30 + $0x18] sm:$0xf] %v1372_v33  ;;  %v1373_v12 = vpack.c.bf16 %v780_v10, %v780_v10  ;;  %v781_v13 = vmul.f32 %v1601_v11, %v1830_v40 }
 0x374   : > { %v1603_v14 = vpop.eup %1602 }
 0x375   : > { %820 = vst [vmem:[%s1881_s30 + $0x20] sm:$0xf] %v1373_v12  ;;  %v1374_v35 = vpack.c.bf16 %v781_v13, %v781_v13  ;;  %v782_v15 = vmul.f32 %v1603_v14, %v1824_v37 }
 0x376   : > { %v1605_v16 = vpop.eup %1604 }
 0x377   : > { %821 = vst [vmem:[%s1881_s30 + $0x28] sm:$0xf] %v1374_v35  ;;  %v1375_v17 = vpack.c.bf16 %v782_v15, %v782_v15  ;;  %v783_v18 = vmul.f32 %v1605_v16, %v1828_v39 }
 0x379   : > { %822 = vst [vmem:[%s1881_s30 + $0x30] sm:$0xf] %v1375_v17  ;;  %v1376_v19 = vpack.c.bf16 %v783_v18, %v783_v18 }
 0x37b   : > { %823 = vst [vmem:[%s1881_s30 + $0x38] sm:$0xf] %v1376_v19 }
 0x3ef   : > { %v977_v20 = vpop.xlane.xlu0 %976 }
 0x3f0   : > { %1606 = vrcp.f32 %v977_v20 }
 0x3f1   : > { %v980_v38 = vpop.xlane.xlu1 %979 }
 0x3f3   : > { %v971_v21 = vpop.xlane.xlu0 %970 }
 0x3f4   : > { %1608 = vrcp.f32 %v971_v21 }
 0x3f5   : > { %v974_v22 = vpop.xlane.xlu1 %973  ;;  %1610 = vrcp.f32 %v980_v38 }
 0x3f6   : > { %1612 = vrcp.f32 %v974_v22 }
 0x3f7   : > { %v983_v23 = vpop.xlane.xlu0 %982 }
 0x3f9   : > { %v986_v40 = vpop.xlane.xlu1 %985 }
 0x3fa   : > { %v1607_v25 = vpop.eup %1606 }
 0x3fb   : > { %v989_v24 = vpop.xlane.xlu0 %988 }
 0x3fc   : > { %1614 = vrcp.f32 %v989_v24 }
 0x3fd   : > { %v992_v37 = vpop.xlane.xlu1 %991  ;;  %1616 = vrcp.f32 %v983_v23 }
 0x3fe   : > { %1618 = vrcp.f32 %v992_v37  ;;  %v1609_v26 = vpop.eup %1608 }
 0x3ff   : > { %1620 = vrcp.f32 %v986_v40  ;;  %v1611_v29 = vpop.eup %1610 }
 0x400   : > { %v1613_v32 = vpop.eup %1612 }
 0x406   : > { %v1615_v48 = vpop.eup %1614 }
 0x407   : > { %v1617_v50 = vpop.eup %1616 }
 0x408   : > { %v1619_v53 = vpop.eup %1618 }
 0x409   : > { %v1621_v56 = vpop.eup %1620 }
 0x438   : > { %v1475_v39 = vpop.f32.mrb[8].mxu0 }
 0x439   : > { %v1100_v27 = vmul.f32 %v1607_v25, %v1475_v39  ;;  %v1059_v28 = vpop.f32.mrb[9].mxu0 }
 0x43a   : > { %v1098_v30 = vmul.f32 %v1609_v26, %v1059_v28  ;;  %v1476_v31 = vpop.f32.mrb[10].mxu0 }
 0x43b   : > { %v1379_v41 = vpack.c.bf16 %v1100_v27, %v1100_v27  ;;  %v1101_v42 = vmul.f32 %v1611_v29, %v1476_v31  ;;  %v1062_v43 = vpop.f32.mrb[11].mxu0 }
 0x43c   : > { %v1377_v44 = vpack.c.bf16 %v1098_v30, %v1098_v30  ;;  %v1099_v45 = vmul.f32 %v1613_v32, %v1062_v43 }
 0x43d   : > { %1140 = vst [vmem:[%s1881_s30 + $0x14] sm:$0xf] %v1379_v41  ;;  %v1380_v46 = vpack.c.bf16 %v1101_v42, %v1101_v42 }
 0x43e   : > { %1138 = vst [vmem:[%s1881_s30 + $0x4] sm:$0xf] %v1377_v44  ;;  %v1378_v47 = vpack.c.bf16 %v1099_v45, %v1099_v45 }
 0x43f   : > { %1141 = vst [vmem:[%s1881_s30 + $0x1c] sm:$0xf] %v1380_v46 }
 0x440   : > { %1139 = vst [vmem:[%s1881_s30 + $0xc] sm:$0xf] %v1378_v47  ;;  %v1479_v49 = vpop.f32.mrb[12].mxu0 }
 0x441   : > { %v1104_v51 = vmul.f32 %v1615_v48, %v1479_v49  ;;  %v1075_v52 = vpop.f32.mrb[13].mxu0 }
 0x442   : > { %v1102_v54 = vmul.f32 %v1617_v50, %v1075_v52  ;;  %v1480_v55 = vpop.f32.mrb[14].mxu0 }
 0x443   : > { %v1383_v57 = vpack.c.bf16 %v1104_v51, %v1104_v51  ;;  %v1105_v58 = vmul.f32 %v1619_v53, %v1480_v55  ;;  %v1078_v59 = vpop.f32.mrb[15].mxu0 }
 0x444   : > { %v1381_v60 = vpack.c.bf16 %v1102_v54, %v1102_v54  ;;  %v1103_v61 = vmul.f32 %v1621_v56, %v1078_v59 }
 0x445   : > { %1144 = vst [vmem:[%s1881_s30 + $0x34] sm:$0xf] %v1383_v57  ;;  %v1384_v62 = vpack.c.bf16 %v1105_v58, %v1105_v58 }
 0x446   : > { %1142 = vst [vmem:[%s1881_s30 + $0x24] sm:$0xf] %v1381_v60  ;;  %v1382_v63 = vpack.c.bf16 %v1103_v61, %v1103_v61 }
 0x447   : > { %1145 = vst [vmem:[%s1881_s30 + $0x3c] sm:$0xf] %v1384_v62 }
 0x448   : > { %1143 = vst [vmem:[%s1881_s30 + $0x2c] sm:$0xf] %v1382_v63 }
 0x449 PF: > { %s13_s16 = sadd.s32 1, %s1660_s16   ;;  %s1930_s12 = smov %s1648_s13 }
 0x44a   : > { %p10_p10 = scmp.ge.s32.totalorder %s13_s16, 4   ;;  %s1931_s13 = smov %s1721_s21 }
 0x44b   : > { %s1932_s14 = smov %s1656_s15  ;;  %s1933_s15 = smov %s1935_s17 }
 0x44c   :  { %12 = sbr.rel (!%p10_p10) target bundleno = 3 (0x3), region = 197 }

// kernel: sam_encode.14
= control target key start
LH: loop header
LB: loop body
LE: loop exit
PB: predicated region body
PF: predicated region fallthrough
CT: control target
= control target key end

     0   :  { %s2670_s0 = inlined_call_operand.vmem [shape: f32[128,256], index: 0, kind: input, shape index: {}]   ;;  %s2671_s1 = inlined_call_operand.vmem [shape: bf16[256,768], index: 1, kind: input, shape index: {}]   ;;  %s2672_s2 = inlined_call_operand.vmem [shape: f32[1,256], index: 2, kind: input, shape index: {}]   ;;  %s2673_s3 = inlined_call_operand.vmem [shape: f32[1,256], index: 3, kind: input, shape index: {}]   ;;  %s2674_s4 = inlined_call_operand.vmem [shape: f32[1,768], index: 4, kind: input, shape index: {}]   ;;  %s2675_s5 = inlined_call_operand.vmem [shape: bf16[128,768], index: 5, kind: output, shape index: {}]  }
   0x1   :  { %2676 = sst [smem:[#allocation6_spill]] %s2671_s1 }
   0x2   :  { %s2138_s18 = smov 0   ;;  %s2140_s19 = smov 0  }
   0x3   :  { %s2142_s20 = smov 0   ;;  %s2144_s21 = smov 0  }
   0x4   :  { %s2146_s22 = smov 0   ;;  %s2148_s23 = smov 0  }
   0x5   :  { %s2150_s24 = smov 0   ;;  %s2152_s25 = smov 0  }
   0x6   :  { %s2154_s26 = smov 0  }
   0x7 LB: > { %s1659_s27 = sadd.s32 4294967295, %s2105_s26   ;;  %s30_s28 = sadd.s32 1, %s2097_s24  ;;  %s2105_s26 = sphi %s2154_s26, %s15_s26   ;;  %s2101_s25 = sphi %s2152_s25, %s2686_s25   ;;  %s2097_s24 = sphi %s2150_s24, %s2685_s24   ;;  %s2093_s23 = sphi %s2148_s23, %s2684_s23   ;;  %s2089_s22 = sphi %s2146_s22, %s2683_s22   ;;  %s2085_s21 = sphi %s2144_s21, %s2682_s21   ;;  %s2081_s20 = sphi %s2142_s20, %s2681_s20   ;;  %s2077_s19 = sphi %s2140_s19, %s2680_s19   ;;  %s2073_s18 = sphi %s2138_s18, %s2679_s18  }
   0x8   : > { %p32_p0 = scmp.ge.s32.totalorder %s30_s28, 2  ;;  %s34_s29 = sadd.s32 1, %s2101_s25 }
   0x9   : > { %s71_s30 = sadd.s32 1, %s2085_s21  ;;  %p78_p1 = scmp.ne.s32.totalorder %s2085_s21, %s2081_s20 }
   0xa   : > { %s2688_s28 = smov (%p32_p0, %s30_s28), 0  ;;  %s2690_s29 = smov (!%p32_p0, %s34_s29), %s2101_s25 }
   0xb   : > { %s67_s6 = ssub.s32 %s2097_s24, %s2688_s28  ;;  %p79_p2 = scmp.eq.s32.totalorder %s2105_s26, 0 }
   0xc   : > { %p36_p3 = scmp.ge.s32.totalorder %s2690_s29, 2  ;;  %p69_p4 = scmp.eq.s32.totalorder %s67_s6, 0 }
   0xd   : > { %p80_p5 = por %p79_p2, %p78_p1  ;;  %s177_s7 = sadd.s32 1, %s2077_s19 }
   0xe   : > { %s2692_s29 = smov (%p36_p3, %s2690_s29), 0  ;;  %p187_p6 = scmp.ne.s32.totalorder %s2077_s19, %s2073_s18 }
   0xf   : > { %s2199_s8 = scalar_select %p69_p4, %s2085_s21, %s71_s30  }
  0x10   : > { %s172_s9 = ssub.s32 %s2101_s25, %s2692_s29  ;;  %p188_p7 = scmp.eq.s32.totalorder %s1659_s27, 3 }
  0x11   : > { %s174_s10 = sor.u32 %s172_s9, %s67_s6  ;;  %p1664_p10 = scmp.ge.s32.totalorder %s2105_s26, 4 }
  0x12   : > { %p175_p8 = scmp.eq.s32.totalorder %s174_s10, 0  ;;  %p2205_p9 = por %p188_p7, %p187_p6 }
  0x13   : > { %226 = sbr.rel (%p1664_p10) target bundleno = 72 (0x48), region = 24 }
  0x14   : > { %s2210_s12 = scalar_select %p175_p8, %s2077_s19, %s177_s7  }
  0x1a   : > { %244 = sbr.rel (!%p80_p5) target bundleno = 72 (0x48), region = 32  ;;  %s246_s13 = sand.u32 (%p80_p5), 1, %s2085_s21  }
  0x1b   : > { %s1820_s14 = smul.u32 (%p80_p5), 12, %s2097_s24  ;;  %s2678_s1 = sld [smem:[#allocation6_spill]] (%p80_p5) }
  0x1c   : > { %s1878_s15 = smul.u32 (%p80_p5), 384, %s246_s13 }
  0x1e   : > { %s2223_s30 = scalar_lea.vmem (%p80_p5), [#allocation4], %s1878_s15 }
  0x21   : > { %s2218_s27 = scalar_lea.vmem %s2678_s1, %s1820_s14 }
  0x22   : > { %v269_v0 = vld [vmem:[%s2218_s27] sm:$0xff]  ;;  %v271_v1 = vld [vmem:[%s2218_s27 + $0x18] sm:$0xff]  ;;  %v273_v2 = vld [vmem:[%s2218_s27 + $0x30] sm:$0xff] }
  0x23   : > { %270 = vst [vmem:[%s2223_s30] sm:$0xff] %v269_v0  ;;  %272 = vst [vmem:[%s2223_s30 + $0xc] sm:$0xff] %v271_v1  ;;  %v275_v3 = vld [vmem:[%s2218_s27 + $0x48] sm:$0xff]  ;;  %v277_v4 = vld [vmem:[%s2218_s27 + $0x60] sm:$0xff] }
  0x24   : > { %274 = vst [vmem:[%s2223_s30 + $0x18] sm:$0xff] %v273_v2  ;;  %v279_v5 = vld [vmem:[%s2218_s27 + $0x78] sm:$0xff]  ;;  %276 = vst [vmem:[%s2223_s30 + $0x24] sm:$0xff] %v275_v3  ;;  %v281_v6 = vld [vmem:[%s2218_s27 + $0x90] sm:$0xff] }
  0x25   : > { %278 = vst [vmem:[%s2223_s30 + $0x30] sm:$0xff] %v277_v4  ;;  %280 = vst [vmem:[%s2223_s30 + $0x3c] sm:$0xff] %v279_v5  ;;  %v283_v7 = vld [vmem:[%s2218_s27 + $0xa8] sm:$0xff]  ;;  %v285_v8 = vld [vmem:[%s2218_s27 + $0xc0] sm:$0xff] }
  0x26   : > { %282 = vst [vmem:[%s2223_s30 + $0x48] sm:$0xff] %v281_v6  ;;  %284 = vst [vmem:[%s2223_s30 + $0x54] sm:$0xff] %v283_v7  ;;  %v287_v9 = vld [vmem:[%s2218_s27 + $0xd8] sm:$0xff]  ;;  %v289_v10 = vld [vmem:[%s2218_s27 + $0xf0] sm:$0xff] }
  0x27   : > { %286 = vst [vmem:[%s2223_s30 + $0x60] sm:$0xff] %v285_v8  ;;  %v291_v11 = vld [vmem:[%s2218_s27 + $0x108] sm:$0xff]  ;;  %288 = vst [vmem:[%s2223_s30 + $0x6c] sm:$0xff] %v287_v9  ;;  %v293_v12 = vld [vmem:[%s2218_s27 + $0x120] sm:$0xff] }
  0x28   : > { %290 = vst [vmem:[%s2223_s30 + $0x78] sm:$0xff] %v289_v10  ;;  %292 = vst [vmem:[%s2223_s30 + $0x84] sm:$0xff] %v291_v11  ;;  %v295_v13 = vld [vmem:[%s2218_s27 + $0x138] sm:$0xff]  ;;  %v297_v14 = vld [vmem:[%s2218_s27 + $0x150] sm:$0xff] }
  0x29   : > { %294 = vst [vmem:[%s2223_s30 + $0x90] sm:$0xff] %v293_v12  ;;  %296 = vst [vmem:[%s2223_s30 + $0x9c] sm:$0xff] %v295_v13  ;;  %v299_v15 = vld [vmem:[%s2218_s27 + $0x168] sm:$0xff]  ;;  %v301_v16 = vld [vmem:[%s2218_s27 + $0x180] sm:$0xff] }
  0x2a   : > { %298 = vst [vmem:[%s2223_s30 + $0xa8] sm:$0xff] %v297_v14  ;;  %v303_v17 = vld [vmem:[%s2218_s27 + $0x198] sm:$0xff]  ;;  %300 = vst [vmem:[%s2223_s30 + $0xb4] sm:$0xff] %v299_v15  ;;  %v305_v18 = vld [vmem:[%s2218_s27 + $0x1b0] sm:$0xff] }
  0x2b   : > { %302 = vst [vmem:[%s2223_s30 + $0xc0] sm:$0xff] %v301_v16  ;;  %304 = vst [vmem:[%s2223_s30 + $0xcc] sm:$0xff] %v303_v17  ;;  %v307_v19 = vld [vmem:[%s2218_s27 + $0x1c8] sm:$0xff]  ;;  %v309_v20 = vld [vmem:[%s2218_s27 + $0x1e0] sm:$0xff] }
  0x2c   : > { %306 = vst [vmem:[%s2223_s30 + $0xd8] sm:$0xff] %v305_v18  ;;  %308 = vst [vmem:[%s2223_s30 + $0xe4] sm:$0xff] %v307_v19  ;;  %v311_v21 = vld [vmem:[%s2218_s27 + $0x1f8] sm:$0xff]  ;;  %v313_v22 = vld [vmem:[%s2218_s27 + $0x210] sm:$0xff] }
  0x2d   : > { %310 = vst [vmem:[%s2223_s30 + $0xf0] sm:$0xff] %v309_v20  ;;  %v315_v23 = vld [vmem:[%s2218_s27 + $0x228] sm:$0xff]  ;;  %312 = vst [vmem:[%s2223_s30 + $0xfc] sm:$0xff] %v311_v21  ;;  %v317_v24 = vld [vmem:[%s2218_s27 + $0x240] sm:$0xff] }
  0x2e   : > { %314 = vst [vmem:[%s2223_s30 + $0x108] sm:$0xff] %v313_v22  ;;  %316 = vst [vmem:[%s2223_s30 + $0x114] sm:$0xff] %v315_v23  ;;  %v319_v25 = vld [vmem:[%s2218_s27 + $0x258] sm:$0xff]  ;;  %v321_v26 = vld [vmem:[%s2218_s27 + $0x270] sm:$0xff] }
  0x2f   : > { %318 = vst [vmem:[%s2223_s30 + $0x120] sm:$0xff] %v317_v24  ;;  %320 = vst [vmem:[%s2223_s30 + $0x12c] sm:$0xff] %v319_v25  ;;  %v323_v27 = vld [vmem:[%s2218_s27 + $0x288] sm:$0xff]  ;;  %v325_v28 = vld [vmem:[%s2218_s27 + $0x2a0] sm:$0xff] }
  0x30   : > { %322 = vst [vmem:[%s2223_s30 + $0x138] sm:$0xff] %v321_v26  ;;  %v327_v29 = vld [vmem:[%s2218_s27 + $0x2b8] sm:$0xff]  ;;  %324 = vst [vmem:[%s2223_s30 + $0x144] sm:$0xff] %v323_v27  ;;  %v329_v30 = vld [vmem:[%s2218_s27 + $0x2d0] sm:$0xff] }
  0x31   : > { %326 = vst [vmem:[%s2223_s30 + $0x150] sm:$0xff] %v325_v28  ;;  %328 = vst [vmem:[%s2223_s30 + $0x15c] sm:$0xff] %v327_v29  ;;  %v331_v31 = vld [vmem:[%s2218_s27 + $0x2e8] sm:$0xff]  ;;  %v1668_v33 = vld [vmem:[%s2218_s27 + $0x20] sm:$0xf] }
  0x32   : > { %v1666_v32 = vld [vmem:[%s2218_s27 + $0x8] sm:$0xf]  ;;  %330 = vst [vmem:[%s2223_s30 + $0x168] sm:$0xff] %v329_v30  ;;  %332 = vst [vmem:[%s2223_s30 + $0x174] sm:$0xff] %v331_v31  ;;  %v1670_v34 = vld [vmem:[%s2218_s27 + $0x38] sm:$0xf] }
  0x33   : > { %1667 = vst [vmem:[%s2223_s30 + $0x8] sm:$0xf] %v1666_v32  ;;  %v1672_v35 = vld [vmem:[%s2218_s27 + $0x50] sm:$0xf]  ;;  %1669 = vst [vmem:[%s2223_s30 + $0x14] sm:$0xf] %v1668_v33 }
  0x34   : > { %1671 = vst [vmem:[%s2223_s30 + $0x20] sm:$0xf] %v1670_v34  ;;  %1673 = vst [vmem:[%s2223_s30 + $0x2c] sm:$0xf] %v1672_v35  ;;  %v1674_v36 = vld [vmem:[%s2218_s27 + $0x68] sm:$0xf] }
  0x35   : > { %v1676_v37 = vld [vmem:[%s2218_s27 + $0x80] sm:$0xf]  ;;  %v1678_v38 = vld [vmem:[%s2218_s27 + $0x98] sm:$0xf]  ;;  %1675 = vst [vmem:[%s2223_s30 + $0x38] sm:$0xf] %v1674_v36 }
  0x36   : > { %1677 = vst [vmem:[%s2223_s30 + $0x44] sm:$0xf] %v1676_v37  ;;  %1679 = vst [vmem:[%s2223_s30 + $0x50] sm:$0xf] %v1678_v38  ;;  %v1680_v39 = vld [vmem:[%s2218_s27 + $0xb0] sm:$0xf] }
  0x37   : > { %v1682_v40 = vld [vmem:[%s2218_s27 + $0xc8] sm:$0xf]  ;;  %v1684_v41 = vld [vmem:[%s2218_s27 + $0xe0] sm:$0xf]  ;;  %1681 = vst [vmem:[%s2223_s30 + $0x5c] sm:$0xf] %v1680_v39 }
  0x38   : > { %1683 = vst [vmem:[%s2223_s30 + $0x68] sm:$0xf] %v1682_v40  ;;  %1685 = vst [vmem:[%s2223_s30 + $0x74] sm:$0xf] %v1684_v41  ;;  %v1686_v42 = vld [vmem:[%s2218_s27 + $0xf8] sm:$0xf] }
  0x39   : > { %v1688_v43 = vld [vmem:[%s2218_s27 + $0x110] sm:$0xf]  ;;  %v1690_v44 = vld [vmem:[%s2218_s27 + $0x128] sm:$0xf]  ;;  %1687 = vst [vmem:[%s2223_s30 + $0x80] sm:$0xf] %v1686_v42 }
  0x3a   : > { %1689 = vst [vmem:[%s2223_s30 + $0x8c] sm:$0xf] %v1688_v43  ;;  %1691 = vst [vmem:[%s2223_s30 + $0x98] sm:$0xf] %v1690_v44  ;;  %v1692_v45 = vld [vmem:[%s2218_s27 + $0x140] sm:$0xf] }
  0x3b   : > { %v1694_v46 = vld [vmem:[%s2218_s27 + $0x158] sm:$0xf]  ;;  %v1696_v47 = vld [vmem:[%s2218_s27 + $0x170] sm:$0xf]  ;;  %1693 = vst [vmem:[%s2223_s30 + $0xa4] sm:$0xf] %v1692_v45 }
  0x3c   : > { %1695 = vst [vmem:[%s2223_s30 + $0xb0] sm:$0xf] %v1694_v46  ;;  %1697 = vst [vmem:[%s2223_s30 + $0xbc] sm:$0xf] %v1696_v47  ;;  %v1698_v48 = vld [vmem:[%s2218_s27 + $0x188] sm:$0xf] }
  0x3d   : > { %v1700_v49 = vld [vmem:[%s2218_s27 + $0x1a0] sm:$0xf]  ;;  %v1702_v50 = vld [vmem:[%s2218_s27 + $0x1b8] sm:$0xf]  ;;  %1699 = vst [vmem:[%s2223_s30 + $0xc8] sm:$0xf] %v1698_v48 }
  0x3e   : > { %1701 = vst [vmem:[%s2223_s30 + $0xd4] sm:$0xf] %v1700_v49  ;;  %1703 = vst [vmem:[%s2223_s30 + $0xe0] sm:$0xf] %v1702_v50  ;;  %v1704_v51 = vld [vmem:[%s2218_s27 + $0x1d0] sm:$0xf] }
  0x3f   : > { %v1706_v52 = vld [vmem:[%s2218_s27 + $0x1e8] sm:$0xf]  ;;  %v1708_v53 = vld [vmem:[%s2218_s27 + $0x200] sm:$0xf]  ;;  %1705 = vst [vmem:[%s2223_s30 + $0xec] sm:$0xf] %v1704_v51 }
  0x40   : > { %1707 = vst [vmem:[%s2223_s30 + $0xf8] sm:$0xf] %v1706_v52  ;;  %1709 = vst [vmem:[%s2223_s30 + $0x104] sm:$0xf] %v1708_v53  ;;  %v1710_v54 = vld [vmem:[%s2218_s27 + $0x218] sm:$0xf] }
  0x41   : > { %v1712_v55 = vld [vmem:[%s2218_s27 + $0x230] sm:$0xf]  ;;  %v1714_v56 = vld [vmem:[%s2218_s27 + $0x248] sm:$0xf]  ;;  %1711 = vst [vmem:[%s2223_s30 + $0x110] sm:$0xf] %v1710_v54 }
  0x42   : > { %1713 = vst [vmem:[%s2223_s30 + $0x11c] sm:$0xf] %v1712_v55  ;;  %1715 = vst [vmem:[%s2223_s30 + $0x128] sm:$0xf] %v1714_v56  ;;  %v1716_v57 = vld [vmem:[%s2218_s27 + $0x260] sm:$0xf] }
  0x43   : > { %v1718_v58 = vld [vmem:[%s2218_s27 + $0x278] sm:$0xf]  ;;  %v1720_v59 = vld [vmem:[%s2218_s27 + $0x290] sm:$0xf]  ;;  %1717 = vst [vmem:[%s2223_s30 + $0x134] sm:$0xf] %v1716_v57 }
  0x44   : > { %1719 = vst [vmem:[%s2223_s30 + $0x140] sm:$0xf] %v1718_v58  ;;  %1721 = vst [vmem:[%s2223_s30 + $0x14c] sm:$0xf] %v1720_v59  ;;  %v1722_v60 = vld [vmem:[%s2218_s27 + $0x2a8] sm:$0xf] }
  0x45   : > { %v1724_v61 = vld [vmem:[%s2218_s27 + $0x2c0] sm:$0xf]  ;;  %v1726_v62 = vld [vmem:[%s2218_s27 + $0x2d8] sm:$0xf]  ;;  %1723 = vst [vmem:[%s2223_s30 + $0x158] sm:$0xf] %v1722_v60 }
  0x46   : > { %1725 = vst [vmem:[%s2223_s30 + $0x164] sm:$0xf] %v1724_v61  ;;  %1727 = vst [vmem:[%s2223_s30 + $0x170] sm:$0xf] %v1726_v62  ;;  %v1728_v63 = vld [vmem:[%s2218_s27 + $0x2f0] sm:$0xf] }
  0x47   : > { %1729 = vst [vmem:[%s2223_s30 + $0x17c] sm:$0xf] %v1728_v63 }
  0x48 PF: > { %p1730_p11 = scmp.ge.s32.totalorder %s2105_s26, 1  ;;  %p416_p12 = scmp.lt.s32.totalorder %s2105_s26, 5 }
  0x4a   : > { %p417_p13 = pnand %p1730_p11, %p416_p12 }
  0x4b   : > { %s423_s6 = sand.u32 (!%p417_p13), 1, %s2081_s20   ;;  %s468_s7 = sand.u32 (!%p417_p13), 1, %s2073_s18   ;;  %v2107_v0 = vmov (!%p417_p13), 0.0  }
  0x4c   : > { %420 = sbr.rel (%p417_p13) target bundleno = 741 (0x2e5), region = 62  ;;  %s1731_s10 = sshll.u32 (!%p417_p13), %s2093_s23, 3  ;;  %507 = vst [vmem:[#allocation2] sm:$0xff] (!%p417_p13), %v2107_v0  ;;  %508 = vst [vmem:[#allocation2 + $0x8] sm:$0xff] (!%p417_p13), %v2107_v0 }
  0x4d   : > { %s2354_s9 = smul.u32 (!%p417_p13), 384, %s423_s6  ;;  %509 = vst [vmem:[#allocation2 + $0x10] sm:$0xff] (!%p417_p13), %v2107_v0  ;;  %510 = vst [vmem:[#allocation2 + $0x18] sm:$0xff] (!%p417_p13), %v2107_v0  ;;  %p473_p0 = scmp.lt.s32.totalorder (!%p417_p13), %s1731_s10, 15 }
  0x4e   : > { %511 = vst [vmem:[#allocation2 + $0x20] sm:$0xff] (!%p417_p13), %v2107_v0  ;;  %512 = vst [vmem:[#allocation2 + $0x28] sm:$0xff] (!%p417_p13), %v2107_v0  ;;  %s1880_s18 = smul.u32 (!%p417_p13), 96, %s468_s7  ;;  %p1734_p2 = scmp.ne.s32.totalorder (!%p417_p13), %s2089_s22, 0 }
  0x4f   : > { %513 = vst [vmem:[#allocation2 + $0x30] sm:$0xff] (!%p417_p13), %v2107_v0  ;;  %514 = vst [vmem:[#allocation2 + $0x38] sm:$0xff] (!%p417_p13), %v2107_v0  ;;  %s2358_s20 = smul.u32 (!%p417_p13), 3, %s2089_s22  ;;  %s2374_s7 = scalar_lea.vmem (!%p417_p13), [#allocation4], %s2354_s9 }
  0x50   : > { %515 = vst [vmem:[#allocation2 + $0x40] sm:$0xff] (!%p417_p13), %v2107_v0  ;;  %516 = vst [vmem:[#allocation2 + $0x48] sm:$0xff] (!%p417_p13), %v2107_v0  ;;  %s2376_s1 = scalar_lea.vmem (!%p417_p13), [#allocation5], %s1880_s18 }
  0x51   : > { %517 = vst [vmem:[#allocation2 + $0x50] sm:$0xff] (!%p417_p13), %v2107_v0  ;;  %518 = vst [vmem:[#allocation2 + $0x58] sm:$0xff] (!%p417_p13), %v2107_v0  ;;  %p496_p1 = scmp.lt.s32.totalorder (!%p417_p13), %s2358_s20, 5 }
  0x52   : > { %519 = vst [vmem:[#allocation2 + $0x60] sm:$0xff] (!%p417_p13), %v2107_v0  ;;  %520 = vst [vmem:[#allocation2 + $0x68] sm:$0xff] (!%p417_p13), %v2107_v0 }
  0x53   : > { %521 = vst [vmem:[#allocation2 + $0x70] sm:$0xff] %v2107_v0  ;;  %522 = vst [vmem:[#allocation2 + $0x78] sm:$0xff] %v2107_v0  ;;  %s2694_s10 = smov (!%p473_p0, %s1731_s10), 15  ;;  %534 = sbr.rel (%p1734_p2) target bundleno = 422 (0x1a6), region = 74 }
  0x54   : > { %523 = vst [vmem:[#allocation2 + $0x80] sm:$0xff] %v2107_v0  ;;  %524 = vst [vmem:[#allocation2 + $0x88] sm:$0xff] %v2107_v0  ;;  %s1821_s13 = sshll.u32 %s2694_s10, 4 }
  0x55   : > { %525 = vst [vmem:[#allocation2 + $0x90] sm:$0xff] %v2107_v0  ;;  %526 = vst [vmem:[#allocation2 + $0x98] sm:$0xff] %v2107_v0  ;;  %s2364_s16 = scalar_lea.vmem %s2670_s0, %s1821_s13 }
  0x56   : > { %527 = vst [vmem:[#allocation2 + $0xa0] sm:$0xff] %v2107_v0  ;;  %528 = vst [vmem:[#allocation2 + $0xa8] sm:$0xff] %v2107_v0  ;;  %s2367_s17 = scalar_select %p496_p1, %s2358_s20, 5 }
  0x57   : > { %529 = vst [vmem:[#allocation2 + $0xb0] sm:$0xff] %v2107_v0  ;;  %530 = vst [vmem:[#allocation2 + $0xb8] sm:$0xff] %v2107_v0  ;;  %v535_v1 = vld [vmem:[%s2364_s16] sm:$0xff] (!%p1734_p2)  ;;  %v536_v2 = vld [vmem:[%s2364_s16 + $0x8] sm:$0xff] (!%p1734_p2) }
  0x58   : > { %s498_s6 = scalar_lea.vmem %s2674_s4, %s2367_s17  ;;  %v539_v3 = vld [vmem:[%s2364_s16 + $0x20] sm:$0xff] (!%p1734_p2)  ;;  %v551_v4 = vadd.f32 (!%p1734_p2), %v536_v2, %v535_v1  ;;  %v540_v5 = vld [vmem:[%s2364_s16 + $0x28] sm:$0xff] (!%p1734_p2)  ;;  %v537_v6 = vld [vmem:[%s2364_s16 + $0x10] sm:$0xff] (!%p1734_p2) }
  0x59   : > { %v538_v7 = vld [vmem:[%s2364_s16 + $0x18] sm:$0xff] (!%p1734_p2)  ;;  %v557_v8 = vadd.f32 (!%p1734_p2), %v540_v5, %v539_v3  ;;  %v541_v9 = vld [vmem:[%s2364_s16 + $0x30] sm:$0xff] (!%p1734_p2)  ;;  %v543_v13 = vld [vmem:[%s2364_s16 + $0x40] sm:$0xff] (!%p1734_p2) }
  0x5a   : > { %v542_v10 = vld [vmem:[%s2364_s16 + $0x38] sm:$0xff]  ;;  %552 = vadd.xlane.f32.xlu0 %v551_v4  ;;  %v554_v11 = vadd.f32 %v538_v7, %v537_v6  ;;  %v544_v14 = vld [vmem:[%s2364_s16 + $0x48] sm:$0xff]  ;;  %v545_v15 = vld [vmem:[%s2364_s16 + $0x50] sm:$0xff] }
  0x5b   : > { %558 = vadd.xlane.f32.xlu1 %v557_v8  ;;  %v560_v12 = vadd.f32 %v542_v10, %v541_v9  ;;  %v546_v16 = vld [vmem:[%s2364_s16 + $0x58] sm:$0xff]  ;;  %v563_v17 = vadd.f32 %v544_v14, %v543_v13  ;;  %v547_v19 = vld [vmem:[%s2364_s16 + $0x60] sm:$0xff]  ;;  %v548_v20 = vld [vmem:[%s2364_s16 + $0x68] sm:$0xff] }
  0x5c   : > { %v566_v18 = vadd.f32 %v546_v16, %v545_v15  ;;  %v549_v21 = vld [vmem:[%s2364_s16 + $0x70] sm:$0xff]  ;;  %v550_v22 = vld [vmem:[%s2364_s16 + $0x78] sm:$0xff]  ;;  %v569_v23 = vadd.f32 %v548_v20, %v547_v19 }
  0x5d   : > { %v572_v24 = vadd.f32 %v550_v22, %v549_v21 }
  0x5e   : > { %555 = vadd.xlane.f32.xlu0 %v554_v11 }
  0x5f   : > { %561 = vadd.xlane.f32.xlu1 %v560_v12 }
  0x62   : > { %564 = vadd.xlane.f32.xlu0 %v563_v17 }
  0x63   : > { %567 = vadd.xlane.f32.xlu1 %v566_v18 }
  0x66   : > { %570 = vadd.xlane.f32.xlu0 %v569_v23 }
  0x67   : > { %573 = vadd.xlane.f32.xlu1 %v572_v24 }
  0xe7   : > { %v553_v25 = vpop.xlane.xlu0 %552 }
  0xe8   : > { %v576_v26 = vmul.f32 0.00390625, %v553_v25  ;;  %v559_v27 = vpop.xlane.xlu1 %558 }
  0xe9   : > { %v578_v28 = vmul.f32 0.00390625, %v559_v27 }
  0xea   : > { %v2395_v29 = vsub.f32 %v535_v1, %v576_v26  ;;  %v2397_v30 = vsub.f32 %v536_v2, %v576_v26 }
  0xeb   : > { %v2399_v31 = vsub.f32 %v539_v3, %v578_v28  ;;  %v2401_v32 = vsub.f32 %v540_v5, %v578_v28  ;;  %v556_v33 = vpop.xlane.xlu0 %555 }
  0xec   : > { %v577_v34 = vmul.f32 0.00390625, %v556_v33  ;;  %v562_v35 = vpop.xlane.xlu1 %561  ;;  %v600_v36 = vmul.f32 %v2395_v29, %v2395_v29  ;;  %v601_v37 = vmul.f32 %v2397_v30, %v2397_v30 }
  0xed   : > { %v579_v38 = vmul.f32 0.00390625, %v562_v35  ;;  %v604_v39 = vmul.f32 %v2399_v31, %v2399_v31  ;;  %v605_v40 = vmul.f32 %v2401_v32, %v2401_v32 }
  0xee   : > { %v2411_v41 = vsub.f32 %v537_v6, %v577_v34  ;;  %v2413_v42 = vsub.f32 %v538_v7, %v577_v34  ;;  %v616_v43 = vadd.f32 %v601_v37, %v600_v36 }
  0xef   : > { %v2415_v44 = vsub.f32 %v541_v9, %v579_v38  ;;  %v2417_v45 = vsub.f32 %v542_v10, %v579_v38  ;;  %v565_v46 = vpop.xlane.xlu0 %564  ;;  %v622_v49 = vadd.f32 %v605_v40, %v604_v39  ;;  %v680_v40 = vld [vmem:[%s2672_s2] sm:$0x3] }
  0xf0   : > { %v580_v47 = vmul.f32 0.00390625, %v565_v46  ;;  %617 = vadd.xlane.f32.xlu0 %v616_v43  ;;  %v568_v48 = vpop.xlane.xlu1 %567  ;;  %v602_v50 = vmul.f32 %v2411_v41, %v2411_v41  ;;  %v603_v51 = vmul.f32 %v2413_v42, %v2413_v42 }
  0xf1   : > { %v581_v52 = vmul.f32 0.00390625, %v568_v48  ;;  %v606_v53 = vmul.f32 %v2415_v44, %v2415_v44  ;;  %v607_v54 = vmul.f32 %v2417_v45, %v2417_v45 }
  0xf2   : > { %v2427_v55 = vsub.f32 %v543_v13, %v580_v47  ;;  %v2429_v56 = vsub.f32 %v544_v14, %v580_v47  ;;  %v619_v57 = vadd.f32 %v603_v51, %v602_v50 }
  0xf3   : > { %v2431_v58 = vsub.f32 %v545_v15, %v581_v52  ;;  %v2433_v59 = vsub.f32 %v546_v16, %v581_v52  ;;  %v571_v60 = vpop.xlane.xlu0 %570  ;;  %v625_v63 = vadd.f32 %v607_v54, %v606_v53  ;;  %v708_v52 = vld [vmem:[%s2673_s3] sm:$0x3] }
  0xf4   : > { %v582_v61 = vmul.f32 0.00390625, %v571_v60  ;;  %623 = vadd.xlane.f32.xlu0 %v622_v49  ;;  %620 = vadd.xlane.f32.xlu1 %v619_v57  ;;  %v574_v62 = vpop.xlane.xlu1 %573  ;;  %v608_v0 = vmul.f32 %v2427_v55, %v2427_v55  ;;  %v609_v1 = vmul.f32 %v2429_v56, %v2429_v56 }
  0xf5   : > { %v583_v2 = vmul.f32 0.00390625, %v574_v62  ;;  %v610_v3 = vmul.f32 %v2431_v58, %v2431_v58  ;;  %v611_v4 = vmul.f32 %v2433_v59, %v2433_v59 }
  0xf6   : > { %v2443_v5 = vsub.f32 %v547_v19, %v582_v61  ;;  %v2445_v6 = vsub.f32 %v548_v20, %v582_v61  ;;  %v628_v7 = vadd.f32 %v609_v1, %v608_v0  ;;  %v682_v19 = vlaneseq }
  0xf7   : > { %v2447_v8 = vsub.f32 %v549_v21, %v583_v2  ;;  %v2449_v9 = vsub.f32 %v550_v22, %v583_v2  ;;  %v631_v10 = vadd.f32 %v611_v4, %v610_v3 }
  0xf8   : > { %626 = vadd.xlane.f32.xlu1 %v625_v63  ;;  %629 = vadd.xlane.f32.xlu0 %v628_v7  ;;  %v612_v11 = vmul.f32 %v2443_v5, %v2443_v5  ;;  %v613_v12 = vmul.f32 %v2445_v6, %v2445_v6  ;;  %v683_v25 = vshrl.u32 %v682_v19, 7 }
  0xf9   : > { %v614_v13 = vmul.f32 %v2447_v8, %v2447_v8  ;;  %v615_v14 = vmul.f32 %v2449_v9, %v2449_v9 }
  0xfa   : > { %v634_v15 = vadd.f32 %v613_v12, %v612_v11  ;;  %v684_v36 = vsub.s32 0, %v683_v25  ;;  %v688_v37 = vsub.s32 1, %v683_v25 }
  0xfb   : > { %v637_v16 = vadd.f32 %v615_v14, %v614_v13 }
  0xfc   : > { %632 = vadd.xlane.f32.xlu1 %v631_v10  ;;  %635 = vadd.xlane.f32.xlu0 %v634_v15  ;;  %v2462_v50 = vrot.slane %v680_v40, %v684_v36  ;;  %v2464_v51 = vrot.slane %v680_v40, %v688_v37  ;;  %v2471_v63 = vrot.slane %v708_v52, %v684_v36 }
  0xfd   : > { %v2473_v1 = vrot.slane %v708_v52, %v688_v37 }
 0x100   : > { %638 = vadd.xlane.f32.xlu1 %v637_v16 }
 0x17d   : > { %v618_v17 = vpop.xlane.xlu0 %617 }
 0x17e   : > { %v640_v18 = vmul.f32 0.00390625, %v618_v17 }
 0x180   : > { %v648_v20 = vadd.f32 1e-06, %v640_v18 }
 0x181   : > { %v621_v21 = vpop.xlane.xlu1 %620  ;;  %v624_v22 = vpop.xlane.xlu0 %623 }
 0x182   : > { %1955 = vrsqrt.f32 %v648_v20  ;;  %v641_v23 = vmul.f32 0.00390625, %v621_v21  ;;  %v642_v24 = vmul.f32 0.00390625, %v624_v22 }
 0x184   : > { %v649_v26 = vadd.f32 1e-06, %v641_v23  ;;  %v650_v27 = vadd.f32 1e-06, %v642_v24 }
 0x185   : > { %v627_v28 = vpop.xlane.xlu1 %626  ;;  %v630_v33 = vpop.xlane.xlu0 %629 }
 0x186   : > { %1957 = vrsqrt.f32 %v649_v26  ;;  %v643_v34 = vmul.f32 0.00390625, %v627_v28  ;;  %v644_v35 = vmul.f32 0.00390625, %v630_v33 }
 0x187   : > { %1959 = vrsqrt.f32 %v650_v27 }
 0x188   : > { %v651_v38 = vadd.f32 1e-06, %v643_v34  ;;  %v652_v39 = vadd.f32 1e-06, %v644_v35 }
 0x189   : > { %v633_v43 = vpop.xlane.xlu1 %632  ;;  %v636_v46 = vpop.xlane.xlu0 %635 }
 0x18a   : > { %1961 = vrsqrt.f32 %v651_v38  ;;  %v645_v47 = vmul.f32 0.00390625, %v633_v43  ;;  %v646_v48 = vmul.f32 0.00390625, %v636_v46 }
 0x18b   : > { %1963 = vrsqrt.f32 %v652_v39 }
 0x18c   : > { %v1956_v49 = vpop.eup %1955  ;;  %v653_v53 = vadd.f32 1e-06, %v645_v47  ;;  %v654_v54 = vadd.f32 1e-06, %v646_v48 }
 0x18d   : > { %v664_v57 = vmul.f32 %v1956_v49, %v2395_v29  ;;  %v665_v60 = vmul.f32 %v1956_v49, %v2397_v30  ;;  %v639_v61 = vpop.xlane.xlu1 %638 }
 0x18e   : > { %1965 = vrsqrt.f32 %v653_v53  ;;  %v647_v62 = vmul.f32 0.00390625, %v639_v61 }
 0x18f   : > { %1967 = vrsqrt.f32 %v654_v54  ;;  %v692_v2 = vmul.f32 %v2462_v50, %v664_v57  ;;  %v693_v3 = vmul.f32 %v2464_v51, %v665_v60 }
 0x190   : > { %v1958_v0 = vpop.eup %1957  ;;  %v655_v4 = vadd.f32 1e-06, %v647_v62 }
 0x191   : > { %v1960_v7 = vpop.eup %1959  ;;  %v666_v10 = vmul.f32 %v1958_v0, %v2411_v41  ;;  %v667_v29 = vmul.f32 %v1958_v0, %v2413_v42  ;;  %v720_v15 = vadd.f32 %v2471_v63, %v692_v2  ;;  %v721_v16 = vadd.f32 %v2473_v1, %v693_v3 }
 0x192   : > { %v668_v30 = vmul.f32 %v1960_v7, %v2399_v31  ;;  %v669_v11 = vmul.f32 %v1960_v7, %v2401_v32  ;;  %1969 = vrsqrt.f32 %v655_v4 }
 0x193   : > { %v694_v12 = vmul.f32 %v2462_v50, %v666_v10  ;;  %v695_v13 = vmul.f32 %v2464_v51, %v667_v29 }
 0x194   : > { %v1962_v14 = vpop.eup %1961  ;;  %v696_v17 = vmul.f32 %v2462_v50, %v668_v30  ;;  %v697_v41 = vmul.f32 %v2464_v51, %v669_v11 }
 0x195   : > { %v1964_v18 = vpop.eup %1963  ;;  %v722_v42 = vadd.f32 %v2471_v63, %v694_v12  ;;  %v723_v31 = vadd.f32 %v2473_v1, %v695_v13  ;;  %v670_v32 = vmul.f32 %v1962_v14, %v2415_v44  ;;  %v671_v19 = vmul.f32 %v1962_v14, %v2417_v45 }
 0x196   : > { %v672_v20 = vmul.f32 %v1964_v18, %v2427_v55  ;;  %v673_v21 = vmul.f32 %v1964_v18, %v2429_v56  ;;  %v724_v27 = vadd.f32 %v2471_v63, %v696_v17  ;;  %v725_v28 = vadd.f32 %v2473_v1, %v697_v41 }
 0x197   : > { %v736_v22 = vpack.c.bf16 %v722_v42, %v720_v15  ;;  %v737_v23 = vpack.c.bf16 %v723_v31, %v721_v16  ;;  %v698_v24 = vmul.f32 %v2462_v50, %v670_v32  ;;  %v699_v25 = vmul.f32 %v2464_v51, %v671_v19 }
 0x198   : > { %v1966_v26 = vpop.eup %1965  ;;  %v700_v33 = vmul.f32 %v2462_v50, %v672_v20  ;;  %v701_v44 = vmul.f32 %v2464_v51, %v673_v21 }
 0x199   : > { %v1968_v45 = vpop.eup %1967  ;;  %744 = vst [vmem:[#allocation3] sm:$0xff] %v736_v22  ;;  %745 = vst [vmem:[#allocation3 + $0x8] sm:$0xff] %v737_v23  ;;  %v726_v55 = vadd.f32 %v2471_v63, %v698_v24  ;;  %v727_v56 = vadd.f32 %v2473_v1, %v699_v25  ;;  %v674_v34 = vmul.f32 %v1966_v26, %v2431_v58 }
 0x19a   : > { %v675_v35 = vmul.f32 %v1966_v26, %v2433_v59  ;;  %v676_v36 = vmul.f32 %v1968_v45, %v2443_v5  ;;  %v677_v37 = vmul.f32 %v1968_v45, %v2445_v6  ;;  %v728_v47 = vadd.f32 %v2471_v63, %v700_v33 }
 0x19b   : > { %v738_v38 = vpack.c.bf16 %v726_v55, %v724_v27  ;;  %v739_v39 = vpack.c.bf16 %v727_v56, %v725_v28  ;;  %v702_v40 = vmul.f32 %v2462_v50, %v674_v34  ;;  %v729_v48 = vadd.f32 %v2473_v1, %v701_v44 }
 0x19c   : > { %v703_v43 = vmul.f32 %v2464_v51, %v675_v35  ;;  %v1970_v46 = vpop.eup %1969  ;;  %v704_v49 = vmul.f32 %v2462_v50, %v676_v36  ;;  %v705_v58 = vmul.f32 %v2464_v51, %v677_v37 }
 0x19d   : > { %746 = vst [vmem:[#allocation3 + $0x10] sm:$0xff] %v738_v38  ;;  %747 = vst [vmem:[#allocation3 + $0x18] sm:$0xff] %v739_v39  ;;  %v730_v59 = vadd.f32 %v2471_v63, %v702_v40  ;;  %v678_v6 = vmul.f32 %v1970_v46, %v2447_v8  ;;  %v679_v52 = vmul.f32 %v1970_v46, %v2449_v9 }
 0x19e   : > { %v731_v5 = vadd.f32 %v2473_v1, %v703_v43  ;;  %v732_v61 = vadd.f32 %v2471_v63, %v704_v49  ;;  %v733_v62 = vadd.f32 %v2473_v1, %v705_v58 }
 0x19f   : > { %v740_v53 = vpack.c.bf16 %v730_v59, %v728_v47  ;;  %v706_v57 = vmul.f32 %v2462_v50, %v678_v6  ;;  %v707_v60 = vmul.f32 %v2464_v51, %v679_v52 }
 0x1a0   : > { %v741_v54 = vpack.c.bf16 %v731_v5, %v729_v48 }
 0x1a1   : > { %748 = vst [vmem:[#allocation3 + $0x20] sm:$0xff] %v740_v53  ;;  %v734_v0 = vadd.f32 %v2471_v63, %v706_v57  ;;  %v735_v2 = vadd.f32 %v2473_v1, %v707_v60 }
 0x1a2   : > { %749 = vst [vmem:[#allocation3 + $0x28] sm:$0xff] %v741_v54 }
 0x1a3   : > { %v742_v3 = vpack.c.bf16 %v734_v0, %v732_v61  ;;  %v743_v8 = vpack.c.bf16 %v735_v2, %v733_v62 }
 0x1a5   : > { %750 = vst [vmem:[#allocation3 + $0x30] sm:$0xff] %v742_v3  ;;  %751 = vst [vmem:[#allocation3 + $0x38] sm:$0xff] %v743_v8 }
 0x1a6 PF: > { %v1971_v9 = vld [vmem:[%s2374_s7 + $0x4] ss:$12 sps:$4 sm:$0xff]   ;;  %v1973_v50 = vld [vmem:[%s2374_s7] ss:$12 sps:$4 sm:$0xff]   ;;  %v1974_v51 = vld [vmem:[%s2374_s7 + $0x1c] ss:$12 sps:$4 sm:$0xff]   ;;  %v1319_v57 = vlaneseq }
 0x1a7   : > { %1104 = vmatprep.subr.bf16.mxu0 %v1971_v9  ;;  %v1976_v63 = vld [vmem:[%s2374_s7 + $0x18] ss:$12 sps:$4 sm:$0xff]   ;;  %v1977_v1 = vld [vmem:[%s2374_s7 + $0x34] ss:$12 sps:$4 sm:$0xff]   ;;  %v1979_v4 = vld [vmem:[%s2374_s7 + $0x30] ss:$12 sps:$4 sm:$0xff]  }
 0x1a8   : > { %1105 = vmatpush1.bf16.msra.mxu0 %v1973_v50  ;;  %v1980_v7 = vld [vmem:[%s2374_s7 + $0x4c] ss:$12 sps:$4 sm:$0xff]   ;;  %v1992_v10 = vld [vmem:[%s2374_s7 + $0xc8] ss:$12 sps:$4 sm:$0xff]   ;;  %v1983_v30 = vld [vmem:[%s2374_s7 + $0x64] ss:$12 sps:$4 sm:$0xff]  }
 0x1a9   : > { %1106 = vmatprep.subr.bf16.mxu0 %v1974_v51  ;;  %v1982_v29 = vld [vmem:[%s2374_s7 + $0x48] ss:$12 sps:$4 sm:$0xff]   ;;  %1838 = vmatprep.subr.bf16.mxu1 %v1992_v10  ;;  %v1997_v12 = vld [vmem:[%s2374_s7 + $0xe0] ss:$12 sps:$4 sm:$0xff]   ;;  %v2002_v16 = vld [vmem:[%s2374_s7 + $0xf8] ss:$12 sps:$4 sm:$0xff]  }
 0x1aa   : > { %v1995_v11 = vld [vmem:[%s2374_s7 + $0x8] ss:$12 sps:$4 sm:$0xff]   ;;  %v1985_v13 = vld [vmem:[%s2374_s7 + $0x60] ss:$12 sps:$4 sm:$0xff]   ;;  %v1988_v17 = vld [vmem:[%s2374_s7 + $0x78] ss:$12 sps:$4 sm:$0xff]  }
 0x1ab   : > { %1839 = vmatpush3.bf16.msra.mxu1 %v1995_v11  ;;  %v1986_v14 = vld [vmem:[%s2374_s7 + $0x7c] ss:$12 sps:$4 sm:$0xff]   ;;  %v2000_v15 = vld [vmem:[%s2374_s7 + $0x20] ss:$12 sps:$4 sm:$0xff]   ;;  %v2005_v41 = vld [vmem:[%s2374_s7 + $0x38] ss:$12 sps:$4 sm:$0xff]  }
 0x1ac   : > { %1107 = vmatpush1.bf16.msra.mxu0 %v1976_v63  ;;  %1840 = vmatprep.subr.bf16.mxu1 %v1997_v12  ;;  %v1989_v18 = vld [vmem:[%s2374_s7 + $0x94] ss:$12 sps:$4 sm:$0xff]   ;;  %v2007_v42 = vld [vmem:[%s2374_s7 + $0x110] ss:$12 sps:$4 sm:$0xff]   ;;  %v1993_v20 = vld [vmem:[%s2374_s7 + $0xac] ss:$12 sps:$4 sm:$0xff]  }
 0x1ad   : > { %1108 = vmatprep.subr.bf16.mxu0 %v1977_v1  ;;  %v1991_v31 = vld [vmem:[%s2374_s7 + $0x90] ss:$12 sps:$4 sm:$0xff]   ;;  %v2012_v19 = vld [vmem:[%s2374_s7 + $0x128] ss:$12 sps:$4 sm:$0xff]   ;;  %v2017_v23 = vld [vmem:[%s2374_s7 + $0x140] ss:$12 sps:$4 sm:$0xff]  }
 0x1ae   : > { %v2010_v32 = vld [vmem:[%s2374_s7 + $0x50] ss:$12 sps:$4 sm:$0xff]   ;;  %v1996_v21 = vld [vmem:[%s2374_s7 + $0xa8] ss:$12 sps:$4 sm:$0xff]   ;;  %v2001_v25 = vld [vmem:[%s2374_s7 + $0xc0] ss:$12 sps:$4 sm:$0xff]  }
 0x1af   : > { %1841 = vmatpush3.bf16.msra.mxu1 %v2000_v15  ;;  %v2015_v22 = vld [vmem:[%s2374_s7 + $0x68] ss:$12 sps:$4 sm:$0xff]   ;;  %v1998_v24 = vld [vmem:[%s2374_s7 + $0xc4] ss:$12 sps:$4 sm:$0xff]   ;;  %v2020_v26 = vld [vmem:[%s2374_s7 + $0x80] ss:$12 sps:$4 sm:$0xff]  }
 0x1b0   : > { %1109 = vmatpush1.bf16.msra.mxu0 %v1979_v4  ;;  %1842 = vmatprep.subr.bf16.mxu1 %v2002_v16  ;;  %v2022_v27 = vld [vmem:[%s2374_s7 + $0x158] ss:$12 sps:$4 sm:$0xff]   ;;  %v2003_v28 = vld [vmem:[%s2374_s7 + $0xdc] ss:$12 sps:$4 sm:$0xff]   ;;  %v2008_v55 = vld [vmem:[%s2374_s7 + $0xf4] ss:$12 sps:$4 sm:$0xff]  }
 0x1b1   : > { %1110 = vmatprep.subr.bf16.mxu0 %v1980_v7  ;;  %v2025_v33 = vld [vmem:[%s2374_s7 + $0x98] ss:$12 sps:$4 sm:$0xff]   ;;  %v2027_v45 = vld [vmem:[%s2374_s7 + $0x170] ss:$12 sps:$4 sm:$0xff]   ;;  %v753_v56 = vld [vmem:[#allocation3 + $0x8] sm:$0xff]  ;;  %v1320_v60 = vshrl.u32 %v1319_v57, 7 }
 0x1b2   : > { %v2006_v44 = vld [vmem:[%s2374_s7 + $0xd8] ss:$12 sps:$4 sm:$0xff]   ;;  %1209 = vmatprep.mubr.bf16.mxu1 %v753_v56  ;;  %1136 = vmatprep.mubr.bf16.mxu0 %v753_v56  ;;  %v2030_v34 = vld [vmem:[%s2374_s7 + $0xb0] ss:$12 sps:$4 sm:$0xff]   ;;  %v2016_v38 = vld [vmem:[%s2374_s7 + $0x108] ss:$12 sps:$4 sm:$0xff]  }
 0x1b3   : > { %1843 = vmatpush3.bf16.msra.mxu1 %v2005_v41  ;;  %v2011_v35 = vld [vmem:[%s2374_s7 + $0xf0] ss:$12 sps:$4 sm:$0xff]   ;;  %v2013_v36 = vld [vmem:[%s2374_s7 + $0x10c] ss:$12 sps:$4 sm:$0xff]   ;;  %v752_v37 = vld [vmem:[#allocation3] sm:$0xff]  ;;  %v1329_v61 = vsub.s32 2, %v1320_v60 }
 0x1b4   : > { %1111 = vmatpush1.bf16.msra.mxu0 %v1982_v29  ;;  %1844 = vmatprep.subr.bf16.mxu1 %v2007_v42  ;;  %v755_v39 = vld [vmem:[#allocation3 + $0x18] sm:$0xff]  ;;  %v2018_v40 = vld [vmem:[%s2374_s7 + $0x124] ss:$12 sps:$4 sm:$0xff]   ;;  %v2021_v43 = vld [vmem:[%s2374_s7 + $0x120] ss:$12 sps:$4 sm:$0xff]   ;;  %s1881_s15 = smul.u32 (%p2205_p9), 48, %s2093_s23 }
 0x1b5   : > { %1112 = vmatprep.subr.bf16.mxu0 %v1983_v30  ;;  %v2023_v46 = vld [vmem:[%s2374_s7 + $0x13c] ss:$12 sps:$4 sm:$0xff]   ;;  %v754_v47 = vld [vmem:[#allocation3 + $0x10] sm:$0xff]  ;;  %v2026_v48 = vld [vmem:[%s2374_s7 + $0x138] ss:$12 sps:$4 sm:$0xff]  }
 0x1b6   : > { %v757_v49 = vld [vmem:[#allocation3 + $0x28] sm:$0xff]  ;;  %v2028_v58 = vld [vmem:[%s2374_s7 + $0x154] ss:$12 sps:$4 sm:$0xff]   ;;  %v2031_v59 = vld [vmem:[%s2374_s7 + $0x150] ss:$12 sps:$4 sm:$0xff]   ;;  %s1464_s11 = sadd.s32 (%p2205_p9), %s1881_s15, %s2358_s20 }
 0x1b7   : > { %1845 = vmatpush3.bf16.msra.mxu1 %v2010_v32  ;;  %v2032_v5 = vld [vmem:[%s2374_s7 + $0x16c] ss:$12 sps:$4 sm:$0xff]   ;;  %v756_v6 = vld [vmem:[#allocation3 + $0x20] sm:$0xff]  ;;  %v2034_v52 = vld [vmem:[%s2374_s7 + $0x168] ss:$12 sps:$4 sm:$0xff]   ;;  %s1801_s16 = sshll.u32 (%p2205_p9), %s1464_s11, 2 }
 0x1b8   : > { %1113 = vmatpush1.bf16.msra.mxu0 %v1985_v13  ;;  %1846 = vmatprep.subr.bf16.mxu1 %v2012_v19  ;;  %v759_v53 = vld [vmem:[#allocation3 + $0x38] sm:$0xff]  ;;  %v758_v54 = vld [vmem:[#allocation3 + $0x30] sm:$0xff]  ;;  %v1317_v62 = vld [vmem:[%s498_s6] sm:$0x7]  ;;  %v1321_v19 = vsub.s32 0, %v1320_v60  ;;  %s1466_s30 = scalar_lea.vmem (%p2205_p9), %s2675_s5, %s1801_s16 }
 0x1b9   : > { %1114 = vmatprep.subr.bf16.mxu0 %v1986_v14  ;;  %v762_v2 = vld [vmem:[#allocation2 + $0x10] sm:$0xff]  ;;  %v2574_v9 = vrot.slane %v1317_v62, %v1329_v61  ;;  %v765_v51 = vld [vmem:[#allocation2 + $0x28] sm:$0xff]  ;;  %v768_v12 = vld [vmem:[#allocation2 + $0x40] sm:$0xff] }
 0x1ba   : > { %v761_v56 = vld [vmem:[#allocation2 + $0x8] sm:$0xff] }
 0x1bb   : > { %1847 = vmatpush3.bf16.msra.mxu1 %v2015_v22 }
 0x1bc   : > { %1115 = vmatpush1.bf16.msra.mxu0 %v1988_v17  ;;  %1848 = vmatprep.subr.bf16.mxu1 %v2017_v23  ;;  %v771_v17 = vld [vmem:[#allocation2 + $0x58] sm:$0xff]  ;;  %v1325_v23 = vsub.s32 1, %v1320_v60  ;;  %v780_v60 = vld [vmem:[#allocation2 + $0xa0] sm:$0xff] }
 0x1bd   : > { %1116 = vmatprep.subr.bf16.mxu0 %v1989_v18 }
 0x1bf   : > { %1849 = vmatpush3.bf16.msra.mxu1 %v2020_v26 }
 0x1c0   : > { %1117 = vmatpush1.bf16.msra.mxu0 %v1991_v31  ;;  %1850 = vmatprep.subr.bf16.mxu1 %v2022_v27 }
 0x1c1   : > { %1118 = vmatprep.subr.bf16.mxu0 %v1993_v20 }
 0x1c3   : > { %1851 = vmatpush3.bf16.msra.mxu1 %v2025_v33  ;;  %v760_v33 = vld [vmem:[#allocation2] sm:$0xff] }
 0x1c4   : > { %1119 = vmatpush1.bf16.msra.mxu0 %v1996_v21  ;;  %1852 = vmatprep.subr.bf16.mxu1 %v2027_v45 }
 0x1c5   : > { %1120 = vmatprep.subr.bf16.mxu0 %v1998_v24  ;;  %v774_v24 = vld [vmem:[#allocation2 + $0x70] sm:$0xff] }
 0x1c7   : > { %1853 = vmatpush3.bf16.msra.mxu1 %v2030_v34 }
 0x1c8   : > { %1121 = vmatpush1.bf16.msra.mxu0 %v2001_v25 }
 0x1c9   : > { %1122 = vmatprep.subr.bf16.mxu0 %v2003_v28 }
 0x1ca   : > { %1210 = vmatmul.mubr.bf16.vlgmr.msra.gmra.mrb[0].mxu1 %v752_v37 }
 0x1cb   : > { %1217 = vmatprep.mubr.bf16.mxu1 %v755_v39 }
 0x1cc   : > { %1123 = vmatpush1.bf16.msra.mxu0 %v2006_v44  ;;  %v777_v44 = vld [vmem:[#allocation2 + $0x88] sm:$0xff] }
 0x1cd   : > { %1124 = vmatprep.subr.bf16.mxu0 %v2008_v55  ;;  %v2583_v55 = vrot.slane %v1317_v62, %v1321_v19 }
 0x1d0   : > { %1125 = vmatpush1.bf16.msra.mxu0 %v2011_v35 }
 0x1d1   : > { %1126 = vmatprep.subr.bf16.mxu0 %v2013_v36 }
 0x1d2   : > { %1218 = vmatmul.mubr.bf16.gmra.mrb[4].mxu1 %v754_v47 }
 0x1d3   : > { %1225 = vmatprep.mubr.bf16.mxu1 %v757_v49 }
 0x1d4   : > { %1127 = vmatpush1.bf16.msra.mxu0 %v2016_v38  ;;  %v763_v38 = vld [vmem:[#allocation2 + $0x18] sm:$0xff] }
 0x1d5   : > { %1128 = vmatprep.subr.bf16.mxu0 %v2018_v40 }
 0x1d8   : > { %1129 = vmatpush1.bf16.msra.mxu0 %v2021_v43  ;;  %v764_v43 = vld [vmem:[#allocation2 + $0x20] sm:$0xff] }
 0x1d9   : > { %1130 = vmatprep.subr.bf16.mxu0 %v2023_v46 }
 0x1da   : > { %1226 = vmatmul.mubr.bf16.gmra.mrb[8].mxu1 %v756_v6 }
 0x1db   : > { %1233 = vmatprep.mubr.bf16.mxu1 %v759_v53 }
 0x1dc   : > { %1131 = vmatpush1.bf16.msra.mxu0 %v2026_v48 }
 0x1dd   : > { %1132 = vmatprep.subr.bf16.mxu0 %v2028_v58 }
 0x1e0   : > { %1133 = vmatpush1.bf16.msra.mxu0 %v2031_v59 }
 0x1e1   : > { %1134 = vmatprep.subr.bf16.mxu0 %v2032_v5 }
 0x1e2   : > { %1234 = vmatmul.mubr.bf16.gmra.mrb[12].mxu1 %v758_v54 }
 0x1e4   : > { %1135 = vmatpush1.bf16.msra.mxu0 %v2034_v52 }
 0x1e7   : > { %1137 = vmatmul.mubr.bf16.vlgmr.msra.gmra.mrb[0].mxu0 %v752_v37  ;;  %v2586_v37 = vrot.slane %v1317_v62, %v1325_v23 }
 0x1e8   : > { %1146 = vmatprep.mubr.bf16.mxu0 %v755_v39 }
 0x1ef   : > { %1147 = vmatmul.mubr.bf16.gmra.mrb[4].mxu0 %v754_v47 }
 0x1f0   : > { %1156 = vmatprep.mubr.bf16.mxu0 %v757_v49 }
 0x1f7   : > { %1157 = vmatmul.mubr.bf16.gmra.mrb[8].mxu0 %v756_v6 }
 0x1f8   : > { %1166 = vmatprep.mubr.bf16.mxu0 %v759_v53 }
 0x1ff   : > { %1167 = vmatmul.mubr.bf16.gmra.mrb[12].mxu0 %v758_v54 }
 0x29d   : > { %v1854_v0 = vpop.f32.mrb[0].mxu1 }
 0x29e   : > { %v1855_v3 = vpop.f32.mrb[1].mxu1 }
 0x29f   : > { %v1856_v8 = vadd.f32 %v1855_v3, %v1854_v0  ;;  %v1857_v50 = vpop.f32.mrb[2].mxu1 }
 0x2a0   : > { %v1858_v63 = vpop.f32.mrb[3].mxu1 }
 0x2a1   : > { %v1244_v1 = vadd.f32 %v1856_v8, %v762_v2  ;;  %v1859_v4 = vadd.f32 %v1858_v63, %v1857_v50  ;;  %v783_v63 = vld [vmem:[#allocation2 + $0xb8] sm:$0xff] }
 0x2a3   : > { %1268 = vst [vmem:[#allocation2 + $0x10] sm:$0xff] %v1244_v1  ;;  %v1336_v7 = vadd.f32 %v2574_v9, %v1244_v1  ;;  %v1247_v10 = vadd.f32 %v1859_v4, %v765_v51  ;;  %v766_v51 = vld [vmem:[#allocation2 + $0x30] sm:$0xff]  ;;  %v767_v4 = vld [vmem:[#allocation2 + $0x38] sm:$0xff] }
 0x2a5   : > { %v1823_v29 = vpack.c.bf16 %v1336_v7, %v1336_v7  ;;  %1271 = vst [vmem:[#allocation2 + $0x28] sm:$0xff] %v1247_v10  ;;  %v1339_v30 = vadd.f32 %v2574_v9, %v1247_v10  ;;  %v1860_v11 = vpop.f32.mrb[4].mxu1 }
 0x2a6   : > { %v1861_v13 = vpop.f32.mrb[5].mxu1 }
 0x2a7   : > { %1439 = vst [vmem:[%s2376_s1 + $0x8] sm:$0xf] %v1823_v29  ;;  %v1825_v14 = vpack.c.bf16 %v1339_v30, %v1339_v30  ;;  %v1862_v15 = vadd.f32 %v1861_v13, %v1860_v11  ;;  %v1863_v16 = vpop.f32.mrb[6].mxu1  ;;  %v769_v11 = vld [vmem:[#allocation2 + $0x48] sm:$0xff] }
 0x2a8   : > { %v1864_v41 = vpop.f32.mrb[7].mxu1 }
 0x2a9   : > { %1441 = vst [vmem:[%s2376_s1 + $0x14] sm:$0xf] %v1825_v14  ;;  %v1250_v18 = vadd.f32 %v1862_v15, %v768_v12  ;;  %v1865_v42 = vadd.f32 %v1864_v41, %v1863_v16  ;;  %v770_v14 = vld [vmem:[#allocation2 + $0x50] sm:$0xff] }
 0x2ab   : > { %1274 = vst [vmem:[#allocation2 + $0x40] sm:$0xff] %v1250_v18  ;;  %v1342_v31 = vadd.f32 %v2574_v9, %v1250_v18  ;;  %v1253_v32 = vadd.f32 %v1865_v42, %v771_v17 }
 0x2ad   : > { %v1827_v20 = vpack.c.bf16 %v1342_v31, %v1342_v31  ;;  %1277 = vst [vmem:[#allocation2 + $0x58] sm:$0xff] %v1253_v32  ;;  %v1345_v21 = vadd.f32 %v2574_v9, %v1253_v32  ;;  %v1866_v22 = vpop.f32.mrb[8].mxu1 }
 0x2ae   : > { %v1867_v25 = vpop.f32.mrb[9].mxu1 }
 0x2af   : > { %1443 = vst [vmem:[%s2376_s1 + $0x20] sm:$0xf] %v1827_v20  ;;  %v1829_v26 = vpack.c.bf16 %v1345_v21, %v1345_v21  ;;  %v1868_v27 = vadd.f32 %v1867_v25, %v1866_v22  ;;  %v1869_v28 = vpop.f32.mrb[10].mxu1 }
 0x2b0   : > { %v1870_v45 = vpop.f32.mrb[11].mxu1 }
 0x2b1   : > { %1445 = vst [vmem:[%s2376_s1 + $0x2c] sm:$0xf] %v1829_v26  ;;  %v1256_v34 = vadd.f32 %v1868_v27, %v774_v24  ;;  %v1871_v35 = vadd.f32 %v1870_v45, %v1869_v28  ;;  %v772_v26 = vld [vmem:[#allocation2 + $0x60] sm:$0xff]  ;;  %v773_v27 = vld [vmem:[#allocation2 + $0x68] sm:$0xff] }
 0x2b3   : > { %1280 = vst [vmem:[#allocation2 + $0x70] sm:$0xff] %v1256_v34  ;;  %v1348_v46 = vadd.f32 %v2574_v9, %v1256_v34  ;;  %v1259_v47 = vadd.f32 %v1871_v35, %v777_v44 }
 0x2b5   : > { %v1831_v6 = vpack.c.bf16 %v1348_v46, %v1348_v46  ;;  %1283 = vst [vmem:[#allocation2 + $0x88] sm:$0xff] %v1259_v47  ;;  %v1351_v52 = vadd.f32 %v2574_v9, %v1259_v47  ;;  %v1872_v53 = vpop.f32.mrb[12].mxu1 }
 0x2b6   : > { %v1873_v61 = vpop.f32.mrb[13].mxu1 }
 0x2b7   : > { %1447 = vst [vmem:[%s2376_s1 + $0x38] sm:$0xf] %v1831_v6  ;;  %v1833_v0 = vpack.c.bf16 %v1351_v52, %v1351_v52  ;;  %v1874_v2 = vadd.f32 %v1873_v61, %v1872_v53  ;;  %v1875_v3 = vpop.f32.mrb[14].mxu1  ;;  %v781_v6 = vld [vmem:[#allocation2 + $0xa8] sm:$0xff] }
 0x2b8   : > { %v1876_v1 = vpop.f32.mrb[15].mxu1 }
 0x2b9   : > { %1449 = vst [vmem:[%s2376_s1 + $0x44] sm:$0xf] %v1833_v0  ;;  %v1262_v7 = vadd.f32 %v1874_v2, %v780_v60  ;;  %v1877_v10 = vadd.f32 %v1876_v1, %v1875_v3 }
 0x2ba   : > { %v1138_v36 = vpop.f32.mrb[0].mxu0 }
 0x2bb   : > { %v1242_v39 = vadd.f32 %v1138_v36, %v760_v33  ;;  %v1140_v40 = vpop.f32.mrb[1].mxu0  ;;  %1286 = vst [vmem:[#allocation2 + $0xa0] sm:$0xff] %v1262_v7  ;;  %v1354_v15 = vadd.f32 %v2574_v9, %v1262_v7  ;;  %v1265_v16 = vadd.f32 %v1877_v10, %v783_v63  ;;  %v775_v33 = vld [vmem:[#allocation2 + $0x78] sm:$0xff] }
 0x2bc   : > { %v1243_v48 = vadd.f32 %v1140_v40, %v761_v56  ;;  %v1142_v49 = vpop.f32.mrb[2].mxu0  ;;  %v776_v56 = vld [vmem:[#allocation2 + $0x80] sm:$0xff] }
 0x2bd   : > { %1266 = vst [vmem:[#allocation2] sm:$0xff] %v1242_v39  ;;  %v1334_v58 = vadd.f32 %v2583_v55, %v1242_v39  ;;  %v1245_v59 = vadd.f32 %v1142_v49, %v763_v38  ;;  %v1144_v5 = vpop.f32.mrb[3].mxu0  ;;  %v1835_v32 = vpack.c.bf16 %v1354_v15, %v1354_v15  ;;  %1289 = vst [vmem:[#allocation2 + $0xb8] sm:$0xff] %v1265_v16  ;;  %v778_v49 = vld [vmem:[#allocation2 + $0x90] sm:$0xff] }
 0x2be   : > { %1267 = vst [vmem:[#allocation2 + $0x8] sm:$0xff] %v1243_v48  ;;  %v1335_v54 = vadd.f32 %v2586_v37, %v1243_v48  ;;  %v1246_v57 = vadd.f32 %v1144_v5, %v764_v43  ;;  %v1357_v19 = vadd.f32 %v2574_v9, %v1265_v16  ;;  %v1810_v15 = vld [vmem:[%s2376_s1 + $0x38] sm:$0xf] (%p2205_p9) }
 0x2bf   : > { %1269 = vst [vmem:[#allocation2 + $0x18] sm:$0xff] %v1245_v59  ;;  %v1337_v62 = vadd.f32 %v2583_v55, %v1245_v59  ;;  %1451 = vst [vmem:[%s2376_s1 + $0x50] sm:$0xf] %v1835_v32 }
 0x2c0   : > { %v1822_v8 = vpack.c.bf16 %v1335_v54, %v1334_v58  ;;  %1270 = vst [vmem:[#allocation2 + $0x20] sm:$0xff] %v1246_v57  ;;  %v1338_v50 = vadd.f32 %v2586_v37, %v1246_v57  ;;  %v1837_v23 = vpack.c.bf16 %v1357_v19, %v1357_v19  ;;  %v779_v58 = vld [vmem:[#allocation2 + $0x98] sm:$0xff]  ;;  %v782_v54 = vld [vmem:[#allocation2 + $0xb0] sm:$0xff]  ;;  %v1812_v16 = vld [vmem:[%s2376_s1 + $0x44] sm:$0xf] (%p2205_p9) }
 0x2c1   : > { %1811 = vst [vmem:[%s1466_s30 + $0x68] sm:$0xf] (%p2205_p9), %v1810_v15  ;;  %1813 = vst [vmem:[%s1466_s30 + $0x80] sm:$0xf] (%p2205_p9), %v1812_v16 }
 0x2c2   : > { %1438 = vst [vmem:[%s2376_s1] sm:$0xff] %v1822_v8  ;;  %v1824_v29 = vpack.c.bf16 %v1338_v50, %v1337_v62  ;;  %v1148_v30 = vpop.f32.mrb[4].mxu0  ;;  %1453 = vst [vmem:[%s2376_s1 + $0x5c] sm:$0xf] %v1837_v23 }
 0x2c3   : > { %v1248_v12 = vadd.f32 %v1148_v30, %v766_v51  ;;  %v1150_v13 = vpop.f32.mrb[5].mxu0 }
 0x2c4   : > { %1440 = vst [vmem:[%s2376_s1 + $0xc] sm:$0xff] %v1824_v29  ;;  %v1249_v17 = vadd.f32 %v1150_v13, %v767_v4  ;;  %v1152_v41 = vpop.f32.mrb[6].mxu0  ;;  %v1806_v13 = vld [vmem:[%s2376_s1 + $0x20] sm:$0xf] (%p2205_p9) }
 0x2c5   : > { %1272 = vst [vmem:[#allocation2 + $0x30] sm:$0xff] %v1248_v12  ;;  %v1340_v18 = vadd.f32 %v2583_v55, %v1248_v12  ;;  %v1251_v42 = vadd.f32 %v1152_v41, %v769_v11  ;;  %v1154_v31 = vpop.f32.mrb[7].mxu0  ;;  %v1802_v11 = vld [vmem:[%s2376_s1 + $0x8] sm:$0xf] (%p2205_p9)  ;;  %v1804_v12 = vld [vmem:[%s2376_s1 + $0x14] sm:$0xf] (%p2205_p9) }
 0x2c6   : > { %1273 = vst [vmem:[#allocation2 + $0x38] sm:$0xff] %v1249_v17  ;;  %v1341_v20 = vadd.f32 %v2586_v37, %v1249_v17  ;;  %v1252_v21 = vadd.f32 %v1154_v31, %v770_v14  ;;  %v1808_v14 = vld [vmem:[%s2376_s1 + $0x2c] sm:$0xf] (%p2205_p9)  ;;  %1803 = vst [vmem:[%s1466_s30 + $0x8] sm:$0xf] (%p2205_p9), %v1802_v11 }
 0x2c7   : > { %1275 = vst [vmem:[#allocation2 + $0x48] sm:$0xff] %v1251_v42  ;;  %v1343_v22 = vadd.f32 %v2583_v55, %v1251_v42  ;;  %1805 = vst [vmem:[%s1466_s30 + $0x20] sm:$0xf] (%p2205_p9), %v1804_v12  ;;  %v1814_v17 = vld [vmem:[%s2376_s1 + $0x50] sm:$0xf] (%p2205_p9) }
 0x2c8   : > { %v1826_v24 = vpack.c.bf16 %v1341_v20, %v1340_v18  ;;  %1276 = vst [vmem:[#allocation2 + $0x50] sm:$0xff] %v1252_v21  ;;  %v1344_v25 = vadd.f32 %v2586_v37, %v1252_v21  ;;  %1807 = vst [vmem:[%s1466_s30 + $0x38] sm:$0xf] (%p2205_p9), %v1806_v13 }
 0x2c9   : > { %1809 = vst [vmem:[%s1466_s30 + $0x50] sm:$0xf] (%p2205_p9), %v1808_v14  ;;  %v1816_v41 = vld [vmem:[%s2376_s1 + $0x5c] sm:$0xf] (%p2205_p9)  ;;  %1815 = vst [vmem:[%s1466_s30 + $0x98] sm:$0xf] (%p2205_p9), %v1814_v17 }
 0x2ca   : > { %1442 = vst [vmem:[%s2376_s1 + $0x18] sm:$0xff] %v1826_v24  ;;  %v1828_v28 = vpack.c.bf16 %v1344_v25, %v1343_v22  ;;  %v1158_v9 = vpop.f32.mrb[8].mxu0  ;;  %1817 = vst [vmem:[%s1466_s30 + $0xb0] sm:$0xf] (%p2205_p9), %v1816_v41 }
 0x2cb   : > { %v1254_v44 = vadd.f32 %v1158_v9, %v772_v26  ;;  %v1160_v45 = vpop.f32.mrb[9].mxu0 }
 0x2cc   : > { %1444 = vst [vmem:[%s2376_s1 + $0x24] sm:$0xff] %v1828_v28  ;;  %v1255_v34 = vadd.f32 %v1160_v45, %v773_v27  ;;  %v1162_v35 = vpop.f32.mrb[10].mxu0 }
 0x2cd   : > { %1278 = vst [vmem:[#allocation2 + $0x60] sm:$0xff] %v1254_v44  ;;  %v1346_v36 = vadd.f32 %v2583_v55, %v1254_v44  ;;  %v1257_v38 = vadd.f32 %v1162_v35, %v775_v33  ;;  %v1164_v39 = vpop.f32.mrb[11].mxu0 }
 0x2ce   : > { %1279 = vst [vmem:[#allocation2 + $0x68] sm:$0xff] %v1255_v34  ;;  %v1347_v40 = vadd.f32 %v2586_v37, %v1255_v34  ;;  %v1258_v43 = vadd.f32 %v1164_v39, %v776_v56 }
 0x2cf   : > { %1281 = vst [vmem:[#allocation2 + $0x78] sm:$0xff] %v1257_v38  ;;  %v1349_v46 = vadd.f32 %v2583_v55, %v1257_v38 }
 0x2d0   : > { %v1830_v47 = vpack.c.bf16 %v1347_v40, %v1346_v36  ;;  %1282 = vst [vmem:[#allocation2 + $0x80] sm:$0xff] %v1258_v43  ;;  %v1350_v48 = vadd.f32 %v2586_v37, %v1258_v43 }
 0x2d1   : > { %v1485_v1 = vld [vmem:[%s2376_s1 + $0x18] sm:$0xff] (%p2205_p9) }
 0x2d2   : > { %1446 = vst [vmem:[%s2376_s1 + $0x30] sm:$0xff] %v1830_v47  ;;  %v1832_v59 = vpack.c.bf16 %v1350_v48, %v1349_v46  ;;  %v1168_v5 = vpop.f32.mrb[12].mxu0  ;;  %1486 = vst [vmem:[%s1466_s30 + $0x30] sm:$0xff] (%p2205_p9), %v1485_v1 }
 0x2d3   : > { %v1260_v52 = vadd.f32 %v1168_v5, %v778_v49  ;;  %v1170_v53 = vpop.f32.mrb[13].mxu0  ;;  %v1487_v4 = vld [vmem:[%s2376_s1 + $0x24] sm:$0xff] (%p2205_p9) }
 0x2d4   : > { %1448 = vst [vmem:[%s2376_s1 + $0x3c] sm:$0xff] %v1832_v59  ;;  %v1261_v57 = vadd.f32 %v1170_v53, %v779_v58  ;;  %v1172_v60 = vpop.f32.mrb[14].mxu0  ;;  %1488 = vst [vmem:[%s1466_s30 + $0x48] sm:$0xff] (%p2205_p9), %v1487_v4 }
 0x2d5   : > { %1284 = vst [vmem:[#allocation2 + $0x90] sm:$0xff] %v1260_v52  ;;  %v1352_v61 = vadd.f32 %v2583_v55, %v1260_v52  ;;  %v1263_v62 = vadd.f32 %v1172_v60, %v781_v6  ;;  %v1174_v0 = vpop.f32.mrb[15].mxu0 }
 0x2d6   : > { %1285 = vst [vmem:[#allocation2 + $0x98] sm:$0xff] %v1261_v57  ;;  %v1353_v2 = vadd.f32 %v2586_v37, %v1261_v57  ;;  %v1264_v3 = vadd.f32 %v1174_v0, %v782_v54  ;;  %1460 = sbr.rel (!%p2205_p9) target bundleno = 741 (0x2e5), region = 82 }
 0x2d7   : > { %1287 = vst [vmem:[#allocation2 + $0xa8] sm:$0xff] %v1263_v62  ;;  %v1355_v8 = vadd.f32 %v2583_v55, %v1263_v62  ;;  %v1481_v55 = vld [vmem:[%s2376_s1] sm:$0xff] (%p2205_p9) }
 0x2d8   : > { %v1834_v50 = vpack.c.bf16 %v1353_v2, %v1352_v61  ;;  %1288 = vst [vmem:[#allocation2 + $0xb0] sm:$0xff] %v1264_v3  ;;  %v1356_v51 = vadd.f32 %v2586_v37, %v1264_v3  ;;  %v1483_v37 = vld [vmem:[%s2376_s1 + $0xc] sm:$0xff] (%p2205_p9)  ;;  %1482 = vst [vmem:[%s1466_s30] sm:$0xff] (%p2205_p9), %v1481_v55 }
 0x2d9   : > { %v1489_v7 = vld [vmem:[%s2376_s1 + $0x30] sm:$0xff] (%p2205_p9)  ;;  %1484 = vst [vmem:[%s1466_s30 + $0x18] sm:$0xff] (%p2205_p9), %v1483_v37 }
 0x2da   : > { %1450 = vst [vmem:[%s2376_s1 + $0x48] sm:$0xff] %v1834_v50  ;;  %v1836_v63 = vpack.c.bf16 %v1356_v51, %v1355_v8  ;;  %1490 = vst [vmem:[%s1466_s30 + $0x60] sm:$0xff] (%p2205_p9), %v1489_v7 }
 0x2db   : > { %v1491_v10 = vld [vmem:[%s2376_s1 + $0x3c] sm:$0xff] (%p2205_p9) }
 0x2dc   : > { %1452 = vst [vmem:[%s2376_s1 + $0x54] sm:$0xff] %v1836_v63  ;;  %1492 = vst [vmem:[%s1466_s30 + $0x78] sm:$0xff] (%p2205_p9), %v1491_v10 }
 0x2e1   : > { %v1493_v29 = vld [vmem:[%s2376_s1 + $0x48] sm:$0xff] }
 0x2e2   : > { %1494 = vst [vmem:[%s1466_s30 + $0x90] sm:$0xff] %v1493_v29 }
 0x2e3   : > { %v1495_v30 = vld [vmem:[%s2376_s1 + $0x54] sm:$0xff] }
 0x2e4   : > { %1496 = vst [vmem:[%s1466_s30 + $0xa8] sm:$0xff] %v1495_v30 }
 0x2e5 PF: > { %s15_s26 = sadd.s32 1, %s2105_s26   ;;  %s2679_s18 = smov %s2077_s19 }
 0x2e6   : > { %p12_p3 = scmp.ge.s32.totalorder %s15_s26, 6   ;;  %s2680_s19 = smov %s2210_s12 }
 0x2e7   : > { %s2681_s20 = smov %s2085_s21  ;;  %s2682_s21 = smov %s2199_s8 }
 0x2e8   : > { %s2683_s22 = smov %s2097_s24  ;;  %s2684_s23 = smov %s2101_s25 }
 0x2e9   : > { %s2685_s24 = smov %s2688_s28  ;;  %s2686_s25 = smov %s2692_s29 }
 0x2ea   :  { %14 = sbr.rel (!%p12_p3) target bundleno = 7 (0x7), region = 163 }

// kernel: sam_encode.16
= control target key start
LH: loop header
LB: loop body
LE: loop exit
PB: predicated region body
PF: predicated region fallthrough
CT: control target
= control target key end

     0   :  { %s1199_s15 = smov 0   ;;  %s1201_s16 = smov 0   ;;  %s1397_s0 = inlined_call_operand.vmem [shape: bf16[128,256], index: 0, kind: input, shape index: {}]   ;;  %s1398_s1 = inlined_call_operand.vmem [shape: bf16[256,256], index: 1, kind: input, shape index: {}]   ;;  %s1399_s2 = inlined_call_operand.vmem [shape: f32[1,256], index: 2, kind: input, shape index: {}]   ;;  %s1400_s3 = inlined_call_operand.vmem [shape: f32[128,256], index: 3, kind: input, shape index: {}]   ;;  %s1401_s4 = inlined_call_operand.vmem [shape: f32[128,256], index: 4, kind: output, shape index: {}]  }
   0x1   :  { %s1203_s17 = smov 0  }
   0x2 LB: > { %s33_s18 = sadd.s32 1, %s1168_s16  ;;  %p979_p0 = scmp.ge.s32.totalorder %s1172_s17, 1  ;;  %s1172_s17 = sphi %s1203_s17, %s14_s17   ;;  %s1168_s16 = sphi %s1201_s16, %s1403_s16   ;;  %s1164_s15 = sphi %s1199_s15, %s1402_s15  }
   0x3   : > { %p35_p1 = scmp.ge.s32.totalorder %s33_s18, 2  ;;  %p240_p2 = scmp.lt.s32.totalorder %s1172_s17, 3 }
   0x5   : > { %s1405_s18 = smov (%p35_p1, %s33_s18), 0  ;;  %p241_p3 = pnand %p979_p0, %p240_p2 }
   0x6   : > { %v1090_v0 = vld [vmem:[%s1398_s1 + $0x4] ss:$8 sps:$4 sm:$0xff] (!%p241_p3)   ;;  %v1092_v1 = vld [vmem:[%s1398_s1] ss:$8 sps:$4 sm:$0xff] (!%p241_p3)   ;;  %v1093_v2 = vld [vmem:[%s1398_s1 + $0x14] ss:$8 sps:$4 sm:$0xff] (!%p241_p3)   ;;  %v755_v40 = vlaneseq (!%p241_p3) }
   0x7   : > { %244 = sbr.rel (%p241_p3) target bundleno = 299 (0x12b), region = 36  ;;  %629 = vmatprep.subr.bf16.mxu0 (!%p241_p3), %v1090_v0  ;;  %1034 = vmatprep.subr.bf16.mxu1 (!%p241_p3), %v1090_v0  ;;  %v1095_v3 = vld [vmem:[%s1398_s1 + $0x10] ss:$8 sps:$4 sm:$0xff] (!%p241_p3)   ;;  %v1096_v4 = vld [vmem:[%s1398_s1 + $0x24] ss:$8 sps:$4 sm:$0xff] (!%p241_p3)   ;;  %s980_s29 = sshll.u32 (!%p241_p3), %s1164_s15, 3 }
   0x8   : > { %630 = vmatpush1.bf16.msra.mxu0 (!%p241_p3), %v1092_v1  ;;  %1050 = vmatpush1.bf16.msra.mxu1 (!%p241_p3), %v1092_v1  ;;  %v1098_v5 = vld [vmem:[%s1398_s1 + $0x20] ss:$8 sps:$4 sm:$0xff] (!%p241_p3)   ;;  %v1099_v6 = vld [vmem:[%s1398_s1 + $0x34] ss:$8 sps:$4 sm:$0xff] (!%p241_p3)   ;;  %p302_p4 = scmp.lt.s32.totalorder (!%p241_p3), %s980_s29, 15  ;;  %v756_v41 = vshrl.u32 (!%p241_p3), %v755_v40, 7 }
   0x9   : > { %631 = vmatprep.subr.bf16.mxu0 (!%p241_p3), %v1093_v2  ;;  %1035 = vmatprep.subr.bf16.mxu1 (!%p241_p3), %v1093_v2  ;;  %v1101_v7 = vld [vmem:[%s1398_s1 + $0x30] ss:$8 sps:$4 sm:$0xff] (!%p241_p3)   ;;  %v1102_v8 = vld [vmem:[%s1398_s1 + $0x44] ss:$8 sps:$4 sm:$0xff] (!%p241_p3)   ;;  %v1104_v9 = vld [vmem:[%s1398_s1 + $0x40] ss:$8 sps:$4 sm:$0xff] (!%p241_p3)  }
   0xa   : > { %v1105_v10 = vld [vmem:[%s1398_s1 + $0x54] ss:$8 sps:$4 sm:$0xff] (!%p241_p3)   ;;  %v1107_v11 = vld [vmem:[%s1398_s1 + $0x50] ss:$8 sps:$4 sm:$0xff] (!%p241_p3)   ;;  %v1108_v12 = vld [vmem:[%s1398_s1 + $0x64] ss:$8 sps:$4 sm:$0xff] (!%p241_p3)  }
   0xb   : > { %v1110_v14 = vld [vmem:[%s1398_s1 + $0x60] ss:$8 sps:$4 sm:$0xff] (!%p241_p3)   ;;  %v1111_v16 = vld [vmem:[%s1398_s1 + $0x74] ss:$8 sps:$4 sm:$0xff] (!%p241_p3)   ;;  %v1113_v17 = vld [vmem:[%s1398_s1 + $0x70] ss:$8 sps:$4 sm:$0xff] (!%p241_p3)  }
   0xc   : > { %632 = vmatpush1.bf16.msra.mxu0 (!%p241_p3), %v1095_v3  ;;  %1051 = vmatpush1.bf16.msra.mxu1 (!%p241_p3), %v1095_v3  ;;  %v1114_v18 = vld [vmem:[%s1398_s1 + $0x84] ss:$8 sps:$4 sm:$0xff] (!%p241_p3)   ;;  %v1116_v19 = vld [vmem:[%s1398_s1 + $0x80] ss:$8 sps:$4 sm:$0xff] (!%p241_p3)   ;;  %v1117_v20 = vld [vmem:[%s1398_s1 + $0x94] ss:$8 sps:$4 sm:$0xff] (!%p241_p3)  }
   0xd   : > { %633 = vmatprep.subr.bf16.mxu0 (!%p241_p3), %v1096_v4  ;;  %1036 = vmatprep.subr.bf16.mxu1 (!%p241_p3), %v1096_v4  ;;  %v1119_v21 = vld [vmem:[%s1398_s1 + $0x90] ss:$8 sps:$4 sm:$0xff] (!%p241_p3)   ;;  %v1120_v22 = vld [vmem:[%s1398_s1 + $0xa4] ss:$8 sps:$4 sm:$0xff] (!%p241_p3)   ;;  %v1122_v23 = vld [vmem:[%s1398_s1 + $0xa0] ss:$8 sps:$4 sm:$0xff] (!%p241_p3)  }
   0xe   : > { %s1407_s29 = smov (!%p302_p4, %s980_s29), 15  ;;  %v1123_v24 = vld [vmem:[%s1398_s1 + $0xb4] ss:$8 sps:$4 sm:$0xff]   ;;  %v1125_v25 = vld [vmem:[%s1398_s1 + $0xb0] ss:$8 sps:$4 sm:$0xff]   ;;  %v757_v42 = vsub.s32 0, %v756_v41 }
   0xf   : > { %s1031_s19 = sshll.u32 %s1407_s29, 3  ;;  %v1126_v26 = vld [vmem:[%s1398_s1 + $0xc4] ss:$8 sps:$4 sm:$0xff]   ;;  %v1128_v27 = vld [vmem:[%s1398_s1 + $0xc0] ss:$8 sps:$4 sm:$0xff]   ;;  %s1032_s22 = sshll.u32 %s1407_s29, 4 }
  0x10   : > { %634 = vmatpush1.bf16.msra.mxu0 %v1098_v5  ;;  %1052 = vmatpush1.bf16.msra.mxu1 %v1098_v5  ;;  %s1262_s24 = scalar_lea.vmem %s1397_s0, %s1031_s19  ;;  %v1129_v28 = vld [vmem:[%s1398_s1 + $0xd4] ss:$8 sps:$4 sm:$0xff]   ;;  %v1131_v29 = vld [vmem:[%s1398_s1 + $0xd0] ss:$8 sps:$4 sm:$0xff]   ;;  %v1132_v30 = vld [vmem:[%s1398_s1 + $0xe4] ss:$8 sps:$4 sm:$0xff]   ;;  %s1339_s28 = scalar_lea.vmem %s1400_s3, %s1032_s22 }
  0x11   : > { %635 = vmatprep.subr.bf16.mxu0 %v1099_v6  ;;  %1037 = vmatprep.subr.bf16.mxu1 %v1099_v6  ;;  %v1140_v13 = vld [vmem:[%s1262_s24 + $0x4] ss:$8 sps:$4 sm:$0xff]   ;;  %v1134_v31 = vld [vmem:[%s1398_s1 + $0xe0] ss:$8 sps:$4 sm:$0xff]   ;;  %v1135_v32 = vld [vmem:[%s1398_s1 + $0xf4] ss:$8 sps:$4 sm:$0xff]   ;;  %s1350_s30 = scalar_lea.vmem %s1401_s4, %s1032_s22 }
  0x12   : > { %v1143_v15 = vld [vmem:[%s1262_s24 + $0x24] ss:$8 sps:$4 sm:$0xff]   ;;  %661 = vmatprep.mubr.bf16.mxu0 %v1140_v13  ;;  %v1137_v33 = vld [vmem:[%s1398_s1 + $0xf0] ss:$8 sps:$4 sm:$0xff]   ;;  %v1138_v34 = vld [vmem:[%s1262_s24] ss:$8 sps:$4 sm:$0xff]  }
  0x13   : > { %681 = vmatprep.mubr.bf16.mxu1 %v1143_v15  ;;  %v1141_v35 = vld [vmem:[%s1262_s24 + $0x20] ss:$8 sps:$4 sm:$0xff]   ;;  %v1144_v36 = vld [vmem:[%s1262_s24 + $0x14] ss:$8 sps:$4 sm:$0xff]   ;;  %v1148_v38 = vld [vmem:[%s1262_s24 + $0x10] ss:$8 sps:$4 sm:$0xff]  }
  0x14   : > { %636 = vmatpush1.bf16.msra.mxu0 %v1101_v7  ;;  %1053 = vmatpush1.bf16.msra.mxu1 %v1101_v7  ;;  %v1146_v37 = vld [vmem:[%s1262_s24 + $0x34] ss:$8 sps:$4 sm:$0xff]   ;;  %v1149_v39 = vld [vmem:[%s1262_s24 + $0x30] ss:$8 sps:$4 sm:$0xff]   ;;  %v753_v43 = vld [vmem:[%s1399_s2] sm:$0x3] }
  0x15   : > { %637 = vmatprep.subr.bf16.mxu0 %v1102_v8  ;;  %1038 = vmatprep.subr.bf16.mxu1 %v1102_v8  ;;  %v761_v44 = vsub.s32 1, %v756_v41  ;;  %v758_v45 = vrot.slane %v753_v43, %v757_v42  ;;  %v781_v48 = vld [vmem:[%s1339_s28] sm:$0xff]  ;;  %v782_v54 = vld [vmem:[%s1339_s28 + $0x8] sm:$0xff]  ;;  %v783_v60 = vld [vmem:[%s1339_s28 + $0x10] sm:$0xff] }
  0x16   : > { %v789_v50 = vld [vmem:[%s1339_s28 + $0x40] sm:$0xff]  ;;  %v790_v56 = vld [vmem:[%s1339_s28 + $0x48] sm:$0xff]  ;;  %v791_v62 = vld [vmem:[%s1339_s28 + $0x50] sm:$0xff] }
  0x17   : > { %v1341_v46 = vrot.slane %v753_v43, %v761_v44  ;;  %v784_v4 = vld [vmem:[%s1339_s28 + $0x18] sm:$0xff] }
  0x18   : > { %638 = vmatpush1.bf16.msra.mxu0 %v1104_v9  ;;  %1054 = vmatpush1.bf16.msra.mxu1 %v1104_v9  ;;  %v792_v6 = vld [vmem:[%s1339_s28 + $0x58] sm:$0xff] }
  0x19   : > { %639 = vmatprep.subr.bf16.mxu0 %v1105_v10  ;;  %1039 = vmatprep.subr.bf16.mxu1 %v1105_v10 }
  0x1c   : > { %640 = vmatpush1.bf16.msra.mxu0 %v1107_v11  ;;  %1055 = vmatpush1.bf16.msra.mxu1 %v1107_v11 }
  0x1d   : > { %641 = vmatprep.subr.bf16.mxu0 %v1108_v12  ;;  %1040 = vmatprep.subr.bf16.mxu1 %v1108_v12 }
  0x20   : > { %642 = vmatpush1.bf16.msra.mxu0 %v1110_v14  ;;  %1056 = vmatpush1.bf16.msra.mxu1 %v1110_v14 }
  0x21   : > { %643 = vmatprep.subr.bf16.mxu0 %v1111_v16  ;;  %1041 = vmatprep.subr.bf16.mxu1 %v1111_v16  ;;  %v785_v16 = vld [vmem:[%s1339_s28 + $0x20] sm:$0xff] }
  0x24   : > { %644 = vmatpush1.bf16.msra.mxu0 %v1113_v17  ;;  %1057 = vmatpush1.bf16.msra.mxu1 %v1113_v17 }
  0x25   : > { %645 = vmatprep.subr.bf16.mxu0 %v1114_v18  ;;  %1042 = vmatprep.subr.bf16.mxu1 %v1114_v18  ;;  %v793_v18 = vld [vmem:[%s1339_s28 + $0x60] sm:$0xff] }
  0x28   : > { %646 = vmatpush1.bf16.msra.mxu0 %v1116_v19  ;;  %1058 = vmatpush1.bf16.msra.mxu1 %v1116_v19 }
  0x29   : > { %647 = vmatprep.subr.bf16.mxu0 %v1117_v20  ;;  %1043 = vmatprep.subr.bf16.mxu1 %v1117_v20 }
  0x2c   : > { %648 = vmatpush1.bf16.msra.mxu0 %v1119_v21  ;;  %1059 = vmatpush1.bf16.msra.mxu1 %v1119_v21 }
  0x2d   : > { %649 = vmatprep.subr.bf16.mxu0 %v1120_v22  ;;  %1044 = vmatprep.subr.bf16.mxu1 %v1120_v22  ;;  %v786_v22 = vld [vmem:[%s1339_s28 + $0x28] sm:$0xff] }
  0x30   : > { %650 = vmatpush1.bf16.msra.mxu0 %v1122_v23  ;;  %1060 = vmatpush1.bf16.msra.mxu1 %v1122_v23 }
  0x31   : > { %651 = vmatprep.subr.bf16.mxu0 %v1123_v24  ;;  %1045 = vmatprep.subr.bf16.mxu1 %v1123_v24  ;;  %v794_v24 = vld [vmem:[%s1339_s28 + $0x68] sm:$0xff] }
  0x34   : > { %652 = vmatpush1.bf16.msra.mxu0 %v1125_v25  ;;  %1061 = vmatpush1.bf16.msra.mxu1 %v1125_v25 }
  0x35   : > { %653 = vmatprep.subr.bf16.mxu0 %v1126_v26  ;;  %1046 = vmatprep.subr.bf16.mxu1 %v1126_v26 }
  0x38   : > { %654 = vmatpush1.bf16.msra.mxu0 %v1128_v27  ;;  %1062 = vmatpush1.bf16.msra.mxu1 %v1128_v27 }
  0x39   : > { %655 = vmatprep.subr.bf16.mxu0 %v1129_v28  ;;  %1047 = vmatprep.subr.bf16.mxu1 %v1129_v28  ;;  %v787_v28 = vld [vmem:[%s1339_s28 + $0x30] sm:$0xff] }
  0x3c   : > { %656 = vmatpush1.bf16.msra.mxu0 %v1131_v29  ;;  %1063 = vmatpush1.bf16.msra.mxu1 %v1131_v29 }
  0x3d   : > { %657 = vmatprep.subr.bf16.mxu0 %v1132_v30  ;;  %1048 = vmatprep.subr.bf16.mxu1 %v1132_v30  ;;  %v795_v30 = vld [vmem:[%s1339_s28 + $0x70] sm:$0xff] }
  0x40   : > { %658 = vmatpush1.bf16.msra.mxu0 %v1134_v31  ;;  %1064 = vmatpush1.bf16.msra.mxu1 %v1134_v31 }
  0x41   : > { %659 = vmatprep.subr.bf16.mxu0 %v1135_v32  ;;  %1049 = vmatprep.subr.bf16.mxu1 %v1135_v32 }
  0x44   : > { %660 = vmatpush1.bf16.msra.mxu0 %v1137_v33  ;;  %1065 = vmatpush1.bf16.msra.mxu1 %v1137_v33 }
  0x47   : > { %662 = vmatmul.mubr.bf16.vlgmr.msra.gmra.mrb[0].mxu0 %v1138_v34  ;;  %682 = vmatmul.mubr.bf16.vlgmr.msra.gmra.mrb[0].mxu1 %v1141_v35 }
  0x48   : > { %671 = vmatprep.mubr.bf16.mxu0 %v1144_v36  ;;  %691 = vmatprep.mubr.bf16.mxu1 %v1146_v37  ;;  %v788_v36 = vld [vmem:[%s1339_s28 + $0x38] sm:$0xff] }
  0x4f   : > { %672 = vmatmul.mubr.bf16.gmra.mrb[4].mxu0 %v1148_v38  ;;  %692 = vmatmul.mubr.bf16.gmra.mrb[4].mxu1 %v1149_v39  ;;  %v796_v38 = vld [vmem:[%s1339_s28 + $0x78] sm:$0xff] }
 0x11a   : > { %v663_v47 = vpop.f32.mrb[0].mxu0  ;;  %v683_v49 = vpop.f32.mrb[0].mxu1 }
 0x11b   : > { %v765_v51 = vadd.f32 %v758_v45, %v663_v47  ;;  %v773_v52 = vadd.f32 %v758_v45, %v683_v49  ;;  %v665_v53 = vpop.f32.mrb[1].mxu0  ;;  %v685_v55 = vpop.f32.mrb[1].mxu1 }
 0x11c   : > { %v766_v57 = vadd.f32 %v1341_v46, %v665_v53  ;;  %v774_v58 = vadd.f32 %v1341_v46, %v685_v55  ;;  %v667_v59 = vpop.f32.mrb[2].mxu0  ;;  %v687_v61 = vpop.f32.mrb[2].mxu1 }
 0x11d   : > { %v797_v63 = vadd.f32 %v781_v48, %v765_v51  ;;  %v805_v0 = vadd.f32 %v789_v50, %v773_v52  ;;  %v767_v1 = vadd.f32 %v758_v45, %v667_v59  ;;  %v775_v2 = vadd.f32 %v758_v45, %v687_v61  ;;  %v669_v3 = vpop.f32.mrb[3].mxu0  ;;  %v689_v5 = vpop.f32.mrb[3].mxu1 }
 0x11e   : > { %v798_v7 = vadd.f32 %v782_v54, %v766_v57  ;;  %v806_v8 = vadd.f32 %v790_v56, %v774_v58  ;;  %v768_v9 = vadd.f32 %v1341_v46, %v669_v3  ;;  %v776_v10 = vadd.f32 %v1341_v46, %v689_v5 }
 0x11f   : > { %813 = vst [vmem:[%s1350_s30] sm:$0xff] %v797_v63  ;;  %821 = vst [vmem:[%s1350_s30 + $0x40] sm:$0xff] %v805_v0  ;;  %v799_v11 = vadd.f32 %v783_v60, %v767_v1  ;;  %v807_v12 = vadd.f32 %v791_v62, %v775_v2 }
 0x120   : > { %814 = vst [vmem:[%s1350_s30 + $0x8] sm:$0xff] %v798_v7  ;;  %822 = vst [vmem:[%s1350_s30 + $0x48] sm:$0xff] %v806_v8  ;;  %v800_v13 = vadd.f32 %v784_v4, %v768_v9  ;;  %v808_v14 = vadd.f32 %v792_v6, %v776_v10 }
 0x121   : > { %815 = vst [vmem:[%s1350_s30 + $0x10] sm:$0xff] %v799_v11  ;;  %823 = vst [vmem:[%s1350_s30 + $0x50] sm:$0xff] %v807_v12 }
 0x122   : > { %816 = vst [vmem:[%s1350_s30 + $0x18] sm:$0xff] %v800_v13  ;;  %824 = vst [vmem:[%s1350_s30 + $0x58] sm:$0xff] %v808_v14  ;;  %v673_v15 = vpop.f32.mrb[4].mxu0  ;;  %v693_v17 = vpop.f32.mrb[4].mxu1 }
 0x123   : > { %v769_v19 = vadd.f32 %v758_v45, %v673_v15  ;;  %v777_v20 = vadd.f32 %v758_v45, %v693_v17  ;;  %v675_v21 = vpop.f32.mrb[5].mxu0  ;;  %v695_v23 = vpop.f32.mrb[5].mxu1 }
 0x124   : > { %v770_v25 = vadd.f32 %v1341_v46, %v675_v21  ;;  %v778_v26 = vadd.f32 %v1341_v46, %v695_v23  ;;  %v677_v27 = vpop.f32.mrb[6].mxu0  ;;  %v697_v29 = vpop.f32.mrb[6].mxu1 }
 0x125   : > { %v801_v31 = vadd.f32 %v785_v16, %v769_v19  ;;  %v809_v32 = vadd.f32 %v793_v18, %v777_v20  ;;  %v771_v33 = vadd.f32 %v758_v45, %v677_v27  ;;  %v779_v34 = vadd.f32 %v758_v45, %v697_v29  ;;  %v679_v35 = vpop.f32.mrb[7].mxu0  ;;  %v699_v37 = vpop.f32.mrb[7].mxu1 }
 0x126   : > { %v802_v39 = vadd.f32 %v786_v22, %v770_v25  ;;  %v810_v40 = vadd.f32 %v794_v24, %v778_v26  ;;  %v772_v41 = vadd.f32 %v1341_v46, %v679_v35  ;;  %v780_v42 = vadd.f32 %v1341_v46, %v699_v37 }
 0x127   : > { %817 = vst [vmem:[%s1350_s30 + $0x20] sm:$0xff] %v801_v31  ;;  %825 = vst [vmem:[%s1350_s30 + $0x60] sm:$0xff] %v809_v32  ;;  %v803_v43 = vadd.f32 %v787_v28, %v771_v33  ;;  %v811_v44 = vadd.f32 %v795_v30, %v779_v34 }
 0x128   : > { %818 = vst [vmem:[%s1350_s30 + $0x28] sm:$0xff] %v802_v39  ;;  %826 = vst [vmem:[%s1350_s30 + $0x68] sm:$0xff] %v810_v40  ;;  %v804_v45 = vadd.f32 %v788_v36, %v772_v41  ;;  %v812_v47 = vadd.f32 %v796_v38, %v780_v42 }
 0x129   : > { %819 = vst [vmem:[%s1350_s30 + $0x30] sm:$0xff] %v803_v43  ;;  %827 = vst [vmem:[%s1350_s30 + $0x70] sm:$0xff] %v811_v44 }
 0x12a   : > { %820 = vst [vmem:[%s1350_s30 + $0x38] sm:$0xff] %v804_v45  ;;  %828 = vst [vmem:[%s1350_s30 + $0x78] sm:$0xff] %v812_v47 }
 0x12b PF: > { %s14_s17 = sadd.s32 1, %s1172_s17   ;;  %s1402_s15 = smov %s1168_s16 }
 0x12c   : > { %p11_p5 = scmp.ge.s32.totalorder %s14_s17, 4   ;;  %s1403_s16 = smov %s1405_s18 }
 0x12e   :  { %13 = sbr.rel (!%p11_p5) target bundleno = 2 (0x2), region = 83 }

// kernel: sam_encode.17
= control target key start
LH: loop header
LB: loop body
LE: loop exit
PB: predicated region body
PF: predicated region fallthrough
CT: control target
= control target key end

     0   :  { %s3371_s0 = inlined_call_operand.vmem [shape: f32[128,256], index: 0, kind: input, shape index: {}]   ;;  %s3372_s1 = inlined_call_operand.vmem [shape: bf16[256,1024], index: 1, kind: input, shape index: {}]   ;;  %s3373_s2 = inlined_call_operand.vmem [shape: f32[1,256], index: 2, kind: input, shape index: {}]   ;;  %s3374_s3 = inlined_call_operand.vmem [shape: f32[1,256], index: 3, kind: input, shape index: {}]   ;;  %s3375_s4 = inlined_call_operand.vmem [shape: f32[1,1024], index: 4, kind: input, shape index: {}]   ;;  %s3376_s5 = inlined_call_operand.vmem [shape: bf16[128,1024], index: 5, kind: output, shape index: {}]  }
   0x1   :  { %3377 = sst [smem:[#allocation6_spill]] %s3372_s1 }
   0x2   :  { %s2536_s18 = smov 0   ;;  %s2538_s19 = smov 0  }
   0x3   :  { %s2540_s20 = smov 0   ;;  %s2542_s21 = smov 0  }
   0x4   :  { %s2544_s22 = smov 0   ;;  %s2546_s23 = smov 0  }
   0x5   :  { %s2548_s24 = smov 0   ;;  %s2550_s25 = smov 0  }
   0x6   :  { %s2552_s26 = smov 0  }
   0x7 LB: > { %s2061_s27 = sadd.s32 4294967295, %s2503_s26   ;;  %s30_s28 = sadd.s32 1, %s2495_s24  ;;  %s2503_s26 = sphi %s2552_s26, %s15_s26   ;;  %s2499_s25 = sphi %s2550_s25, %s3387_s25   ;;  %s2495_s24 = sphi %s2548_s24, %s3386_s24   ;;  %s2491_s23 = sphi %s2546_s23, %s3385_s23   ;;  %s2487_s22 = sphi %s2544_s22, %s3384_s22   ;;  %s2483_s21 = sphi %s2542_s21, %s3383_s21   ;;  %s2479_s20 = sphi %s2540_s20, %s3382_s20   ;;  %s2475_s19 = sphi %s2538_s19, %s3381_s19   ;;  %s2471_s18 = sphi %s2536_s18, %s3380_s18  }
   0x8   : > { %p32_p0 = scmp.ge.s32.totalorder %s30_s28, 2  ;;  %s34_s29 = sadd.s32 1, %s2499_s25 }
   0x9   : > { %s71_s30 = sadd.s32 1, %s2483_s21  ;;  %p78_p1 = scmp.ne.s32.totalorder %s2483_s21, %s2479_s20 }
   0xa   : > { %s3389_s28 = smov (%p32_p0, %s30_s28), 0  ;;  %s3391_s29 = smov (!%p32_p0, %s34_s29), %s2499_s25 }
   0xb   : > { %s67_s6 = ssub.s32 %s2495_s24, %s3389_s28  ;;  %p79_p2 = scmp.eq.s32.totalorder %s2503_s26, 0 }
   0xc   : > { %p36_p3 = scmp.ge.s32.totalorder %s3391_s29, 2  ;;  %p69_p4 = scmp.eq.s32.totalorder %s67_s6, 0 }
   0xd   : > { %p80_p5 = por %p79_p2, %p78_p1  ;;  %s177_s7 = sadd.s32 1, %s2475_s19 }
   0xe   : > { %s3393_s29 = smov (%p36_p3, %s3391_s29), 0  ;;  %p187_p6 = scmp.ne.s32.totalorder %s2475_s19, %s2471_s18 }
   0xf   : > { %s2597_s8 = scalar_select %p69_p4, %s2483_s21, %s71_s30  }
  0x10   : > { %s172_s9 = ssub.s32 %s2499_s25, %s3393_s29  ;;  %p188_p7 = scmp.eq.s32.totalorder %s2061_s27, 3 }
  0x11   : > { %s174_s10 = sor.u32 %s172_s9, %s67_s6  ;;  %p2066_p10 = scmp.ge.s32.totalorder %s2503_s26, 4 }
  0x12   : > { %p175_p8 = scmp.eq.s32.totalorder %s174_s10, 0  ;;  %p2603_p9 = por %p188_p7, %p187_p6 }
  0x13   : > { %226 = sbr.rel (%p2066_p10) target bundleno = 68 (0x44), region = 24 }
  0x14   : > { %s2608_s12 = scalar_select %p175_p8, %s2475_s19, %s177_s7  }
  0x1a   : > { %244 = sbr.rel (!%p80_p5) target bundleno = 68 (0x44), region = 32  ;;  %s246_s13 = sand.u32 (%p80_p5), 1, %s2483_s21  }
  0x1b   : > { %s2165_s14 = sshll.u32 (%p80_p5), %s2495_s24, 4  ;;  %s2067_s15 = sshll.u32 (%p80_p5), %s246_s13, 9 }
  0x1c   : > { %s3379_s1 = sld [smem:[#allocation6_spill]] (%p80_p5)  ;;  %s2621_s30 = scalar_lea.vmem (%p80_p5), [#allocation4], %s2067_s15 }
  0x22   : > { %s2616_s27 = scalar_lea.vmem %s3379_s1, %s2165_s14 }
  0x23   : > { %v267_v0 = vld [vmem:[%s2616_s27] sm:$0xff]  ;;  %v269_v1 = vld [vmem:[%s2616_s27 + $0x8] sm:$0xff] }
  0x24   : > { %v271_v2 = vld [vmem:[%s2616_s27 + $0x20] sm:$0xff]  ;;  %268 = vst [vmem:[%s2621_s30] sm:$0xff] %v267_v0  ;;  %270 = vst [vmem:[%s2621_s30 + $0x8] sm:$0xff] %v269_v1  ;;  %v273_v3 = vld [vmem:[%s2616_s27 + $0x28] sm:$0xff] }
  0x25   : > { %272 = vst [vmem:[%s2621_s30 + $0x10] sm:$0xff] %v271_v2  ;;  %v275_v4 = vld [vmem:[%s2616_s27 + $0x40] sm:$0xff]  ;;  %v277_v5 = vld [vmem:[%s2616_s27 + $0x48] sm:$0xff]  ;;  %274 = vst [vmem:[%s2621_s30 + $0x18] sm:$0xff] %v273_v3 }
  0x26   : > { %276 = vst [vmem:[%s2621_s30 + $0x20] sm:$0xff] %v275_v4  ;;  %278 = vst [vmem:[%s2621_s30 + $0x28] sm:$0xff] %v277_v5  ;;  %v279_v6 = vld [vmem:[%s2616_s27 + $0x60] sm:$0xff]  ;;  %v281_v7 = vld [vmem:[%s2616_s27 + $0x68] sm:$0xff] }
  0x27   : > { %v283_v8 = vld [vmem:[%s2616_s27 + $0x80] sm:$0xff]  ;;  %280 = vst [vmem:[%s2621_s30 + $0x30] sm:$0xff] %v279_v6  ;;  %282 = vst [vmem:[%s2621_s30 + $0x38] sm:$0xff] %v281_v7  ;;  %v285_v9 = vld [vmem:[%s2616_s27 + $0x88] sm:$0xff] }
  0x28   : > { %284 = vst [vmem:[%s2621_s30 + $0x40] sm:$0xff] %v283_v8  ;;  %v287_v10 = vld [vmem:[%s2616_s27 + $0xa0] sm:$0xff]  ;;  %v289_v11 = vld [vmem:[%s2616_s27 + $0xa8] sm:$0xff]  ;;  %286 = vst [vmem:[%s2621_s30 + $0x48] sm:$0xff] %v285_v9 }
  0x29   : > { %288 = vst [vmem:[%s2621_s30 + $0x50] sm:$0xff] %v287_v10  ;;  %290 = vst [vmem:[%s2621_s30 + $0x58] sm:$0xff] %v289_v11  ;;  %v291_v12 = vld [vmem:[%s2616_s27 + $0xc0] sm:$0xff]  ;;  %v293_v13 = vld [vmem:[%s2616_s27 + $0xc8] sm:$0xff] }
  0x2a   : > { %v295_v14 = vld [vmem:[%s2616_s27 + $0xe0] sm:$0xff]  ;;  %292 = vst [vmem:[%s2621_s30 + $0x60] sm:$0xff] %v291_v12  ;;  %294 = vst [vmem:[%s2621_s30 + $0x68] sm:$0xff] %v293_v13  ;;  %v297_v15 = vld [vmem:[%s2616_s27 + $0xe8] sm:$0xff] }
  0x2b   : > { %296 = vst [vmem:[%s2621_s30 + $0x70] sm:$0xff] %v295_v14  ;;  %v299_v16 = vld [vmem:[%s2616_s27 + $0x100] sm:$0xff]  ;;  %v301_v17 = vld [vmem:[%s2616_s27 + $0x108] sm:$0xff]  ;;  %298 = vst [vmem:[%s2621_s30 + $0x78] sm:$0xff] %v297_v15 }
  0x2c   : > { %300 = vst [vmem:[%s2621_s30 + $0x80] sm:$0xff] %v299_v16  ;;  %302 = vst [vmem:[%s2621_s30 + $0x88] sm:$0xff] %v301_v17  ;;  %v303_v18 = vld [vmem:[%s2616_s27 + $0x120] sm:$0xff]  ;;  %v305_v19 = vld [vmem:[%s2616_s27 + $0x128] sm:$0xff] }
  0x2d   : > { %v307_v20 = vld [vmem:[%s2616_s27 + $0x140] sm:$0xff]  ;;  %304 = vst [vmem:[%s2621_s30 + $0x90] sm:$0xff] %v303_v18  ;;  %306 = vst [vmem:[%s2621_s30 + $0x98] sm:$0xff] %v305_v19  ;;  %v309_v21 = vld [vmem:[%s2616_s27 + $0x148] sm:$0xff] }
  0x2e   : > { %308 = vst [vmem:[%s2621_s30 + $0xa0] sm:$0xff] %v307_v20  ;;  %v311_v22 = vld [vmem:[%s2616_s27 + $0x160] sm:$0xff]  ;;  %v313_v23 = vld [vmem:[%s2616_s27 + $0x168] sm:$0xff]  ;;  %310 = vst [vmem:[%s2621_s30 + $0xa8] sm:$0xff] %v309_v21 }
  0x2f   : > { %312 = vst [vmem:[%s2621_s30 + $0xb0] sm:$0xff] %v311_v22  ;;  %314 = vst [vmem:[%s2621_s30 + $0xb8] sm:$0xff] %v313_v23  ;;  %v315_v24 = vld [vmem:[%s2616_s27 + $0x180] sm:$0xff]  ;;  %v317_v25 = vld [vmem:[%s2616_s27 + $0x188] sm:$0xff] }
  0x30   : > { %v319_v26 = vld [vmem:[%s2616_s27 + $0x1a0] sm:$0xff]  ;;  %316 = vst [vmem:[%s2621_s30 + $0xc0] sm:$0xff] %v315_v24  ;;  %318 = vst [vmem:[%s2621_s30 + $0xc8] sm:$0xff] %v317_v25  ;;  %v321_v27 = vld [vmem:[%s2616_s27 + $0x1a8] sm:$0xff] }
  0x31   : > { %320 = vst [vmem:[%s2621_s30 + $0xd0] sm:$0xff] %v319_v26  ;;  %v323_v28 = vld [vmem:[%s2616_s27 + $0x1c0] sm:$0xff]  ;;  %v325_v29 = vld [vmem:[%s2616_s27 + $0x1c8] sm:$0xff]  ;;  %322 = vst [vmem:[%s2621_s30 + $0xd8] sm:$0xff] %v321_v27 }
  0x32   : > { %324 = vst [vmem:[%s2621_s30 + $0xe0] sm:$0xff] %v323_v28  ;;  %326 = vst [vmem:[%s2621_s30 + $0xe8] sm:$0xff] %v325_v29  ;;  %v327_v30 = vld [vmem:[%s2616_s27 + $0x1e0] sm:$0xff]  ;;  %v329_v31 = vld [vmem:[%s2616_s27 + $0x1e8] sm:$0xff] }
  0x33   : > { %v331_v32 = vld [vmem:[%s2616_s27 + $0x200] sm:$0xff]  ;;  %328 = vst [vmem:[%s2621_s30 + $0xf0] sm:$0xff] %v327_v30  ;;  %330 = vst [vmem:[%s2621_s30 + $0xf8] sm:$0xff] %v329_v31  ;;  %v333_v33 = vld [vmem:[%s2616_s27 + $0x208] sm:$0xff] }
  0x34   : > { %332 = vst [vmem:[%s2621_s30 + $0x100] sm:$0xff] %v331_v32  ;;  %v335_v34 = vld [vmem:[%s2616_s27 + $0x220] sm:$0xff]  ;;  %v337_v35 = vld [vmem:[%s2616_s27 + $0x228] sm:$0xff]  ;;  %334 = vst [vmem:[%s2621_s30 + $0x108] sm:$0xff] %v333_v33 }
  0x35   : > { %336 = vst [vmem:[%s2621_s30 + $0x110] sm:$0xff] %v335_v34  ;;  %338 = vst [vmem:[%s2621_s30 + $0x118] sm:$0xff] %v337_v35  ;;  %v339_v36 = vld [vmem:[%s2616_s27 + $0x240] sm:$0xff]  ;;  %v341_v37 = vld [vmem:[%s2616_s27 + $0x248] sm:$0xff] }
  0x36   : > { %v343_v38 = vld [vmem:[%s2616_s27 + $0x260] sm:$0xff]  ;;  %340 = vst [vmem:[%s2621_s30 + $0x120] sm:$0xff] %v339_v36  ;;  %342 = vst [vmem:[%s2621_s30 + $0x128] sm:$0xff] %v341_v37  ;;  %v345_v39 = vld [vmem:[%s2616_s27 + $0x268] sm:$0xff] }
  0x37   : > { %344 = vst [vmem:[%s2621_s30 + $0x130] sm:$0xff] %v343_v38  ;;  %v347_v40 = vld [vmem:[%s2616_s27 + $0x280] sm:$0xff]  ;;  %v349_v41 = vld [vmem:[%s2616_s27 + $0x288] sm:$0xff]  ;;  %346 = vst [vmem:[%s2621_s30 + $0x138] sm:$0xff] %v345_v39 }
  0x38   : > { %348 = vst [vmem:[%s2621_s30 + $0x140] sm:$0xff] %v347_v40  ;;  %350 = vst [vmem:[%s2621_s30 + $0x148] sm:$0xff] %v349_v41  ;;  %v351_v42 = vld [vmem:[%s2616_s27 + $0x2a0] sm:$0xff]  ;;  %v353_v43 = vld [vmem:[%s2616_s27 + $0x2a8] sm:$0xff] }
  0x39   : > { %v355_v44 = vld [vmem:[%s2616_s27 + $0x2c0] sm:$0xff]  ;;  %352 = vst [vmem:[%s2621_s30 + $0x150] sm:$0xff] %v351_v42  ;;  %354 = vst [vmem:[%s2621_s30 + $0x158] sm:$0xff] %v353_v43  ;;  %v357_v45 = vld [vmem:[%s2616_s27 + $0x2c8] sm:$0xff] }
  0x3a   : > { %356 = vst [vmem:[%s2621_s30 + $0x160] sm:$0xff] %v355_v44  ;;  %v359_v46 = vld [vmem:[%s2616_s27 + $0x2e0] sm:$0xff]  ;;  %v361_v47 = vld [vmem:[%s2616_s27 + $0x2e8] sm:$0xff]  ;;  %358 = vst [vmem:[%s2621_s30 + $0x168] sm:$0xff] %v357_v45 }
  0x3b   : > { %360 = vst [vmem:[%s2621_s30 + $0x170] sm:$0xff] %v359_v46  ;;  %362 = vst [vmem:[%s2621_s30 + $0x178] sm:$0xff] %v361_v47  ;;  %v363_v48 = vld [vmem:[%s2616_s27 + $0x300] sm:$0xff]  ;;  %v365_v49 = vld [vmem:[%s2616_s27 + $0x308] sm:$0xff] }
  0x3c   : > { %v367_v50 = vld [vmem:[%s2616_s27 + $0x320] sm:$0xff]  ;;  %364 = vst [vmem:[%s2621_s30 + $0x180] sm:$0xff] %v363_v48  ;;  %366 = vst [vmem:[%s2621_s30 + $0x188] sm:$0xff] %v365_v49  ;;  %v369_v51 = vld [vmem:[%s2616_s27 + $0x328] sm:$0xff] }
  0x3d   : > { %368 = vst [vmem:[%s2621_s30 + $0x190] sm:$0xff] %v367_v50  ;;  %v371_v52 = vld [vmem:[%s2616_s27 + $0x340] sm:$0xff]  ;;  %v373_v53 = vld [vmem:[%s2616_s27 + $0x348] sm:$0xff]  ;;  %370 = vst [vmem:[%s2621_s30 + $0x198] sm:$0xff] %v369_v51 }
  0x3e   : > { %372 = vst [vmem:[%s2621_s30 + $0x1a0] sm:$0xff] %v371_v52  ;;  %374 = vst [vmem:[%s2621_s30 + $0x1a8] sm:$0xff] %v373_v53  ;;  %v375_v54 = vld [vmem:[%s2616_s27 + $0x360] sm:$0xff]  ;;  %v377_v55 = vld [vmem:[%s2616_s27 + $0x368] sm:$0xff] }
  0x3f   : > { %v379_v56 = vld [vmem:[%s2616_s27 + $0x380] sm:$0xff]  ;;  %376 = vst [vmem:[%s2621_s30 + $0x1b0] sm:$0xff] %v375_v54  ;;  %378 = vst [vmem:[%s2621_s30 + $0x1b8] sm:$0xff] %v377_v55  ;;  %v381_v57 = vld [vmem:[%s2616_s27 + $0x388] sm:$0xff] }
  0x40   : > { %380 = vst [vmem:[%s2621_s30 + $0x1c0] sm:$0xff] %v379_v56  ;;  %v383_v58 = vld [vmem:[%s2616_s27 + $0x3a0] sm:$0xff]  ;;  %v385_v59 = vld [vmem:[%s2616_s27 + $0x3a8] sm:$0xff]  ;;  %382 = vst [vmem:[%s2621_s30 + $0x1c8] sm:$0xff] %v381_v57 }
  0x41   : > { %384 = vst [vmem:[%s2621_s30 + $0x1d0] sm:$0xff] %v383_v58  ;;  %386 = vst [vmem:[%s2621_s30 + $0x1d8] sm:$0xff] %v385_v59  ;;  %v387_v60 = vld [vmem:[%s2616_s27 + $0x3c0] sm:$0xff]  ;;  %v389_v61 = vld [vmem:[%s2616_s27 + $0x3c8] sm:$0xff] }
  0x42   : > { %v391_v62 = vld [vmem:[%s2616_s27 + $0x3e0] sm:$0xff]  ;;  %388 = vst [vmem:[%s2621_s30 + $0x1e0] sm:$0xff] %v387_v60  ;;  %390 = vst [vmem:[%s2621_s30 + $0x1e8] sm:$0xff] %v389_v61  ;;  %v393_v63 = vld [vmem:[%s2616_s27 + $0x3e8] sm:$0xff] }
  0x43   : > { %392 = vst [vmem:[%s2621_s30 + $0x1f0] sm:$0xff] %v391_v62  ;;  %394 = vst [vmem:[%s2621_s30 + $0x1f8] sm:$0xff] %v393_v63 }
  0x44 PF: > { %p2070_p11 = scmp.ge.s32.totalorder %s2503_s26, 1  ;;  %p407_p12 = scmp.lt.s32.totalorder %s2503_s26, 5 }
  0x46   : > { %p408_p13 = pnand %p2070_p11, %p407_p12 }
  0x47   : > { %s414_s6 = sand.u32 (!%p408_p13), 1, %s2479_s20   ;;  %s459_s7 = sand.u32 (!%p408_p13), 1, %s2471_s18   ;;  %v2505_v0 = vmov (!%p408_p13), 0.0  }
  0x48   : > { %411 = sbr.rel (%p408_p13) target bundleno = 814 (0x32e), region = 59  ;;  %s2752_s9 = sshll.u32 (!%p408_p13), %s414_s6, 9  ;;  %497 = vst [vmem:[#allocation2] sm:$0xff] (!%p408_p13), %v2505_v0  ;;  %498 = vst [vmem:[#allocation2 + $0x8] sm:$0xff] (!%p408_p13), %v2505_v0 }
  0x49   : > { %s2754_s10 = sshll.u32 (!%p408_p13), %s459_s7, 7  ;;  %499 = vst [vmem:[#allocation2 + $0x10] sm:$0xff] (!%p408_p13), %v2505_v0  ;;  %500 = vst [vmem:[#allocation2 + $0x18] sm:$0xff] (!%p408_p13), %v2505_v0  ;;  %s2073_s18 = sshll.u32 (!%p408_p13), %s2491_s23, 3 }
  0x4a   : > { %501 = vst [vmem:[#allocation2 + $0x20] sm:$0xff] (!%p408_p13), %v2505_v0  ;;  %502 = vst [vmem:[#allocation2 + $0x28] sm:$0xff] (!%p408_p13), %v2505_v0  ;;  %s2758_s20 = sshll.u32 (!%p408_p13), %s2487_s22, 2  ;;  %p464_p0 = scmp.lt.s32.totalorder (!%p408_p13), %s2073_s18, 15 }
  0x4b   : > { %503 = vst [vmem:[#allocation2 + $0x30] sm:$0xff] (!%p408_p13), %v2505_v0  ;;  %504 = vst [vmem:[#allocation2 + $0x38] sm:$0xff] (!%p408_p13), %v2505_v0  ;;  %p487_p1 = scmp.lt.s32.totalorder (!%p408_p13), %s2758_s20, 7  ;;  %s2774_s7 = scalar_lea.vmem (!%p408_p13), [#allocation4], %s2752_s9 }
  0x4c   : > { %505 = vst [vmem:[#allocation2 + $0x40] sm:$0xff] (!%p408_p13), %v2505_v0  ;;  %506 = vst [vmem:[#allocation2 + $0x48] sm:$0xff] (!%p408_p13), %v2505_v0  ;;  %s2777_s1 = scalar_lea.vmem (!%p408_p13), [#allocation5], %s2754_s10  ;;  %p2077_p2 = scmp.ne.s32.totalorder (!%p408_p13), %s2487_s22, 0 }
  0x4d   : > { %507 = vst [vmem:[#allocation2 + $0x50] sm:$0xff] (!%p408_p13), %v2505_v0  ;;  %508 = vst [vmem:[#allocation2 + $0x58] sm:$0xff] (!%p408_p13), %v2505_v0 }
  0x4e   : > { %509 = vst [vmem:[#allocation2 + $0x60] sm:$0xff] (!%p408_p13), %v2505_v0  ;;  %510 = vst [vmem:[#allocation2 + $0x68] sm:$0xff] (!%p408_p13), %v2505_v0 }
  0x4f   : > { %511 = vst [vmem:[#allocation2 + $0x70] sm:$0xff] %v2505_v0  ;;  %512 = vst [vmem:[#allocation2 + $0x78] sm:$0xff] %v2505_v0  ;;  %s3395_s18 = smov (!%p464_p0, %s2073_s18), 15 }
  0x50   : > { %513 = vst [vmem:[#allocation2 + $0x80] sm:$0xff] %v2505_v0  ;;  %514 = vst [vmem:[#allocation2 + $0x88] sm:$0xff] %v2505_v0  ;;  %s2762_s13 = scalar_select %p487_p1, %s2758_s20, 7 }
  0x51   : > { %515 = vst [vmem:[#allocation2 + $0x90] sm:$0xff] %v2505_v0  ;;  %516 = vst [vmem:[#allocation2 + $0x98] sm:$0xff] %v2505_v0  ;;  %s2166_s14 = sshll.u32 %s3395_s18, 4  ;;  %532 = sbr.rel (%p2077_p2) target bundleno = 418 (0x1a2), region = 71 }
  0x52   : > { %517 = vst [vmem:[#allocation2 + $0xa0] sm:$0xff] %v2505_v0  ;;  %518 = vst [vmem:[#allocation2 + $0xa8] sm:$0xff] %v2505_v0  ;;  %s2767_s17 = scalar_lea.vmem %s3371_s0, %s2166_s14  ;;  %s489_s6 = scalar_lea.vmem %s3375_s4, %s2762_s13 }
  0x53   : > { %519 = vst [vmem:[#allocation2 + $0xb0] sm:$0xff] %v2505_v0  ;;  %520 = vst [vmem:[#allocation2 + $0xb8] sm:$0xff] %v2505_v0  ;;  %v533_v1 = vld [vmem:[%s2767_s17] sm:$0xff] (!%p2077_p2)  ;;  %v534_v2 = vld [vmem:[%s2767_s17 + $0x8] sm:$0xff] (!%p2077_p2) }
  0x54   : > { %521 = vst [vmem:[#allocation2 + $0xc0] sm:$0xff] %v2505_v0  ;;  %522 = vst [vmem:[#allocation2 + $0xc8] sm:$0xff] %v2505_v0  ;;  %v537_v3 = vld [vmem:[%s2767_s17 + $0x20] sm:$0xff] (!%p2077_p2)  ;;  %v549_v4 = vadd.f32 (!%p2077_p2), %v534_v2, %v533_v1  ;;  %v538_v5 = vld [vmem:[%s2767_s17 + $0x28] sm:$0xff] (!%p2077_p2) }
  0x55   : > { %523 = vst [vmem:[#allocation2 + $0xd0] sm:$0xff] %v2505_v0  ;;  %524 = vst [vmem:[#allocation2 + $0xd8] sm:$0xff] %v2505_v0  ;;  %v535_v6 = vld [vmem:[%s2767_s17 + $0x10] sm:$0xff] (!%p2077_p2)  ;;  %v536_v7 = vld [vmem:[%s2767_s17 + $0x18] sm:$0xff] (!%p2077_p2)  ;;  %v555_v8 = vadd.f32 (!%p2077_p2), %v538_v5, %v537_v3 }
  0x56   : > { %525 = vst [vmem:[#allocation2 + $0xe0] sm:$0xff] %v2505_v0  ;;  %526 = vst [vmem:[#allocation2 + $0xe8] sm:$0xff] %v2505_v0  ;;  %v539_v9 = vld [vmem:[%s2767_s17 + $0x30] sm:$0xff] (!%p2077_p2)  ;;  %v540_v10 = vld [vmem:[%s2767_s17 + $0x38] sm:$0xff] (!%p2077_p2)  ;;  %550 = vadd.xlane.f32.xlu0 (!%p2077_p2), %v549_v4  ;;  %v552_v11 = vadd.f32 (!%p2077_p2), %v536_v7, %v535_v6 }
  0x57   : > { %527 = vst [vmem:[#allocation2 + $0xf0] sm:$0xff] %v2505_v0  ;;  %528 = vst [vmem:[#allocation2 + $0xf8] sm:$0xff] %v2505_v0  ;;  %556 = vadd.xlane.f32.xlu1 (!%p2077_p2), %v555_v8  ;;  %v558_v12 = vadd.f32 (!%p2077_p2), %v540_v10, %v539_v9  ;;  %v541_v13 = vld [vmem:[%s2767_s17 + $0x40] sm:$0xff] (!%p2077_p2)  ;;  %v542_v14 = vld [vmem:[%s2767_s17 + $0x48] sm:$0xff] (!%p2077_p2) }
  0x58   : > { %v543_v15 = vld [vmem:[%s2767_s17 + $0x50] sm:$0xff]  ;;  %v544_v16 = vld [vmem:[%s2767_s17 + $0x58] sm:$0xff]  ;;  %v561_v17 = vadd.f32 %v542_v14, %v541_v13  ;;  %v545_v19 = vld [vmem:[%s2767_s17 + $0x60] sm:$0xff] }
  0x59   : > { %v564_v18 = vadd.f32 %v544_v16, %v543_v15  ;;  %v546_v20 = vld [vmem:[%s2767_s17 + $0x68] sm:$0xff]  ;;  %v547_v21 = vld [vmem:[%s2767_s17 + $0x70] sm:$0xff]  ;;  %v548_v22 = vld [vmem:[%s2767_s17 + $0x78] sm:$0xff] }
  0x5a   : > { %553 = vadd.xlane.f32.xlu0 %v552_v11  ;;  %v567_v23 = vadd.f32 %v546_v20, %v545_v19  ;;  %v570_v24 = vadd.f32 %v548_v22, %v547_v21 }
  0x5b   : > { %559 = vadd.xlane.f32.xlu1 %v558_v12 }
  0x5e   : > { %562 = vadd.xlane.f32.xlu0 %v561_v17 }
  0x5f   : > { %565 = vadd.xlane.f32.xlu1 %v564_v18 }
  0x62   : > { %568 = vadd.xlane.f32.xlu0 %v567_v23 }
  0x63   : > { %571 = vadd.xlane.f32.xlu1 %v570_v24 }
  0xe3   : > { %v551_v25 = vpop.xlane.xlu0 %550 }
  0xe4   : > { %v574_v26 = vmul.f32 0.00390625, %v551_v25  ;;  %v557_v27 = vpop.xlane.xlu1 %556 }
  0xe5   : > { %v576_v28 = vmul.f32 0.00390625, %v557_v27 }
  0xe6   : > { %v2796_v29 = vsub.f32 %v533_v1, %v574_v26  ;;  %v2798_v30 = vsub.f32 %v534_v2, %v574_v26 }
  0xe7   : > { %v2800_v31 = vsub.f32 %v537_v3, %v576_v28  ;;  %v2802_v32 = vsub.f32 %v538_v5, %v576_v28  ;;  %v554_v33 = vpop.xlane.xlu0 %553 }
  0xe8   : > { %v575_v34 = vmul.f32 0.00390625, %v554_v33  ;;  %v560_v35 = vpop.xlane.xlu1 %559  ;;  %v598_v36 = vmul.f32 %v2796_v29, %v2796_v29  ;;  %v599_v37 = vmul.f32 %v2798_v30, %v2798_v30 }
  0xe9   : > { %v577_v38 = vmul.f32 0.00390625, %v560_v35  ;;  %v602_v39 = vmul.f32 %v2800_v31, %v2800_v31  ;;  %v603_v40 = vmul.f32 %v2802_v32, %v2802_v32 }
  0xea   : > { %v2812_v41 = vsub.f32 %v535_v6, %v575_v34  ;;  %v2814_v42 = vsub.f32 %v536_v7, %v575_v34  ;;  %v614_v43 = vadd.f32 %v599_v37, %v598_v36 }
  0xeb   : > { %v2816_v44 = vsub.f32 %v539_v9, %v577_v38  ;;  %v2818_v45 = vsub.f32 %v540_v10, %v577_v38  ;;  %v563_v46 = vpop.xlane.xlu0 %562  ;;  %v620_v49 = vadd.f32 %v603_v40, %v602_v39  ;;  %v678_v40 = vld [vmem:[%s3373_s2] sm:$0x3] }
  0xec   : > { %v578_v47 = vmul.f32 0.00390625, %v563_v46  ;;  %615 = vadd.xlane.f32.xlu0 %v614_v43  ;;  %v566_v48 = vpop.xlane.xlu1 %565  ;;  %v600_v50 = vmul.f32 %v2812_v41, %v2812_v41  ;;  %v601_v51 = vmul.f32 %v2814_v42, %v2814_v42 }
  0xed   : > { %v579_v52 = vmul.f32 0.00390625, %v566_v48  ;;  %v604_v53 = vmul.f32 %v2816_v44, %v2816_v44  ;;  %v605_v54 = vmul.f32 %v2818_v45, %v2818_v45 }
  0xee   : > { %v2828_v55 = vsub.f32 %v541_v13, %v578_v47  ;;  %v2830_v56 = vsub.f32 %v542_v14, %v578_v47  ;;  %v617_v57 = vadd.f32 %v601_v51, %v600_v50 }
  0xef   : > { %v2832_v58 = vsub.f32 %v543_v15, %v579_v52  ;;  %v2834_v59 = vsub.f32 %v544_v16, %v579_v52  ;;  %v569_v60 = vpop.xlane.xlu0 %568  ;;  %v623_v63 = vadd.f32 %v605_v54, %v604_v53  ;;  %v706_v52 = vld [vmem:[%s3374_s3] sm:$0x3] }
  0xf0   : > { %v580_v61 = vmul.f32 0.00390625, %v569_v60  ;;  %621 = vadd.xlane.f32.xlu0 %v620_v49  ;;  %618 = vadd.xlane.f32.xlu1 %v617_v57  ;;  %v572_v62 = vpop.xlane.xlu1 %571  ;;  %v606_v0 = vmul.f32 %v2828_v55, %v2828_v55  ;;  %v607_v1 = vmul.f32 %v2830_v56, %v2830_v56 }
  0xf1   : > { %v581_v2 = vmul.f32 0.00390625, %v572_v62  ;;  %v608_v3 = vmul.f32 %v2832_v58, %v2832_v58  ;;  %v609_v4 = vmul.f32 %v2834_v59, %v2834_v59 }
  0xf2   : > { %v2844_v5 = vsub.f32 %v545_v19, %v580_v61  ;;  %v2846_v6 = vsub.f32 %v546_v20, %v580_v61  ;;  %v626_v7 = vadd.f32 %v607_v1, %v606_v0  ;;  %v680_v19 = vlaneseq }
  0xf3   : > { %v2848_v8 = vsub.f32 %v547_v21, %v581_v2  ;;  %v2850_v9 = vsub.f32 %v548_v22, %v581_v2  ;;  %v629_v10 = vadd.f32 %v609_v4, %v608_v3 }
  0xf4   : > { %624 = vadd.xlane.f32.xlu1 %v623_v63  ;;  %627 = vadd.xlane.f32.xlu0 %v626_v7  ;;  %v610_v11 = vmul.f32 %v2844_v5, %v2844_v5  ;;  %v611_v12 = vmul.f32 %v2846_v6, %v2846_v6  ;;  %v681_v25 = vshrl.u32 %v680_v19, 7 }
  0xf5   : > { %v612_v13 = vmul.f32 %v2848_v8, %v2848_v8  ;;  %v613_v14 = vmul.f32 %v2850_v9, %v2850_v9 }
  0xf6   : > { %v632_v15 = vadd.f32 %v611_v12, %v610_v11  ;;  %v682_v36 = vsub.s32 0, %v681_v25  ;;  %v686_v37 = vsub.s32 1, %v681_v25 }
  0xf7   : > { %v635_v16 = vadd.f32 %v613_v14, %v612_v13 }
  0xf8   : > { %630 = vadd.xlane.f32.xlu1 %v629_v10  ;;  %633 = vadd.xlane.f32.xlu0 %v632_v15  ;;  %v2863_v50 = vrot.slane %v678_v40, %v682_v36  ;;  %v2865_v51 = vrot.slane %v678_v40, %v686_v37  ;;  %v2872_v63 = vrot.slane %v706_v52, %v682_v36 }
  0xf9   : > { %v2874_v1 = vrot.slane %v706_v52, %v686_v37 }
  0xfc   : > { %636 = vadd.xlane.f32.xlu1 %v635_v16 }
 0x179   : > { %v616_v17 = vpop.xlane.xlu0 %615 }
 0x17a   : > { %v638_v18 = vmul.f32 0.00390625, %v616_v17 }
 0x17c   : > { %v646_v20 = vadd.f32 1e-06, %v638_v18 }
 0x17d   : > { %v619_v21 = vpop.xlane.xlu1 %618  ;;  %v622_v22 = vpop.xlane.xlu0 %621 }
 0x17e   : > { %2257 = vrsqrt.f32 %v646_v20  ;;  %v639_v23 = vmul.f32 0.00390625, %v619_v21  ;;  %v640_v24 = vmul.f32 0.00390625, %v622_v22 }
 0x180   : > { %v647_v26 = vadd.f32 1e-06, %v639_v23  ;;  %v648_v27 = vadd.f32 1e-06, %v640_v24 }
 0x181   : > { %v625_v28 = vpop.xlane.xlu1 %624  ;;  %v628_v33 = vpop.xlane.xlu0 %627 }
 0x182   : > { %2259 = vrsqrt.f32 %v647_v26  ;;  %v641_v34 = vmul.f32 0.00390625, %v625_v28  ;;  %v642_v35 = vmul.f32 0.00390625, %v628_v33 }
 0x183   : > { %2261 = vrsqrt.f32 %v648_v27 }
 0x184   : > { %v649_v38 = vadd.f32 1e-06, %v641_v34  ;;  %v650_v39 = vadd.f32 1e-06, %v642_v35 }
 0x185   : > { %v631_v43 = vpop.xlane.xlu1 %630  ;;  %v634_v46 = vpop.xlane.xlu0 %633 }
 0x186   : > { %2263 = vrsqrt.f32 %v649_v38  ;;  %v643_v47 = vmul.f32 0.00390625, %v631_v43  ;;  %v644_v48 = vmul.f32 0.00390625, %v634_v46 }
 0x187   : > { %2265 = vrsqrt.f32 %v650_v39 }
 0x188   : > { %v2258_v49 = vpop.eup %2257  ;;  %v651_v53 = vadd.f32 1e-06, %v643_v47  ;;  %v652_v54 = vadd.f32 1e-06, %v644_v48 }
 0x189   : > { %v662_v57 = vmul.f32 %v2258_v49, %v2796_v29  ;;  %v663_v60 = vmul.f32 %v2258_v49, %v2798_v30  ;;  %v637_v61 = vpop.xlane.xlu1 %636 }
 0x18a   : > { %2267 = vrsqrt.f32 %v651_v53  ;;  %v645_v62 = vmul.f32 0.00390625, %v637_v61 }
 0x18b   : > { %2269 = vrsqrt.f32 %v652_v54  ;;  %v690_v2 = vmul.f32 %v2863_v50, %v662_v57  ;;  %v691_v3 = vmul.f32 %v2865_v51, %v663_v60 }
 0x18c   : > { %v2260_v0 = vpop.eup %2259  ;;  %v653_v4 = vadd.f32 1e-06, %v645_v62 }
 0x18d   : > { %v2262_v7 = vpop.eup %2261  ;;  %v664_v10 = vmul.f32 %v2260_v0, %v2812_v41  ;;  %v665_v29 = vmul.f32 %v2260_v0, %v2814_v42  ;;  %v718_v15 = vadd.f32 %v2872_v63, %v690_v2  ;;  %v719_v16 = vadd.f32 %v2874_v1, %v691_v3 }
 0x18e   : > { %v666_v30 = vmul.f32 %v2262_v7, %v2800_v31  ;;  %v667_v11 = vmul.f32 %v2262_v7, %v2802_v32  ;;  %2271 = vrsqrt.f32 %v653_v4 }
 0x18f   : > { %v692_v12 = vmul.f32 %v2863_v50, %v664_v10  ;;  %v693_v13 = vmul.f32 %v2865_v51, %v665_v29 }
 0x190   : > { %v2264_v14 = vpop.eup %2263  ;;  %v694_v17 = vmul.f32 %v2863_v50, %v666_v30  ;;  %v695_v41 = vmul.f32 %v2865_v51, %v667_v11 }
 0x191   : > { %v2266_v18 = vpop.eup %2265  ;;  %v720_v42 = vadd.f32 %v2872_v63, %v692_v12  ;;  %v721_v31 = vadd.f32 %v2874_v1, %v693_v13  ;;  %v668_v32 = vmul.f32 %v2264_v14, %v2816_v44  ;;  %v669_v19 = vmul.f32 %v2264_v14, %v2818_v45 }
 0x192   : > { %v670_v20 = vmul.f32 %v2266_v18, %v2828_v55  ;;  %v671_v21 = vmul.f32 %v2266_v18, %v2830_v56  ;;  %v722_v27 = vadd.f32 %v2872_v63, %v694_v17  ;;  %v723_v28 = vadd.f32 %v2874_v1, %v695_v41 }
 0x193   : > { %v734_v22 = vpack.c.bf16 %v720_v42, %v718_v15  ;;  %v735_v23 = vpack.c.bf16 %v721_v31, %v719_v16  ;;  %v696_v24 = vmul.f32 %v2863_v50, %v668_v32  ;;  %v697_v25 = vmul.f32 %v2865_v51, %v669_v19 }
 0x194   : > { %v2268_v26 = vpop.eup %2267  ;;  %v698_v33 = vmul.f32 %v2863_v50, %v670_v20  ;;  %v699_v44 = vmul.f32 %v2865_v51, %v671_v21 }
 0x195   : > { %v2270_v45 = vpop.eup %2269  ;;  %742 = vst [vmem:[#allocation3] sm:$0xff] %v734_v22  ;;  %743 = vst [vmem:[#allocation3 + $0x8] sm:$0xff] %v735_v23  ;;  %v724_v55 = vadd.f32 %v2872_v63, %v696_v24  ;;  %v725_v56 = vadd.f32 %v2874_v1, %v697_v25  ;;  %v672_v34 = vmul.f32 %v2268_v26, %v2832_v58 }
 0x196   : > { %v673_v35 = vmul.f32 %v2268_v26, %v2834_v59  ;;  %v674_v36 = vmul.f32 %v2270_v45, %v2844_v5  ;;  %v675_v37 = vmul.f32 %v2270_v45, %v2846_v6  ;;  %v726_v47 = vadd.f32 %v2872_v63, %v698_v33 }
 0x197   : > { %v736_v38 = vpack.c.bf16 %v724_v55, %v722_v27  ;;  %v737_v39 = vpack.c.bf16 %v725_v56, %v723_v28  ;;  %v700_v40 = vmul.f32 %v2863_v50, %v672_v34  ;;  %v727_v48 = vadd.f32 %v2874_v1, %v699_v44 }
 0x198   : > { %v701_v43 = vmul.f32 %v2865_v51, %v673_v35  ;;  %v2272_v46 = vpop.eup %2271  ;;  %v702_v49 = vmul.f32 %v2863_v50, %v674_v36  ;;  %v703_v58 = vmul.f32 %v2865_v51, %v675_v37 }
 0x199   : > { %744 = vst [vmem:[#allocation3 + $0x10] sm:$0xff] %v736_v38  ;;  %745 = vst [vmem:[#allocation3 + $0x18] sm:$0xff] %v737_v39  ;;  %v728_v59 = vadd.f32 %v2872_v63, %v700_v40  ;;  %v676_v6 = vmul.f32 %v2272_v46, %v2848_v8  ;;  %v677_v52 = vmul.f32 %v2272_v46, %v2850_v9 }
 0x19a   : > { %v729_v5 = vadd.f32 %v2874_v1, %v701_v43  ;;  %v730_v61 = vadd.f32 %v2872_v63, %v702_v49  ;;  %v731_v62 = vadd.f32 %v2874_v1, %v703_v58 }
 0x19b   : > { %v738_v53 = vpack.c.bf16 %v728_v59, %v726_v47  ;;  %v704_v57 = vmul.f32 %v2863_v50, %v676_v6  ;;  %v705_v60 = vmul.f32 %v2865_v51, %v677_v52 }
 0x19c   : > { %v739_v54 = vpack.c.bf16 %v729_v5, %v727_v48 }
 0x19d   : > { %746 = vst [vmem:[#allocation3 + $0x20] sm:$0xff] %v738_v53  ;;  %v732_v0 = vadd.f32 %v2872_v63, %v704_v57  ;;  %v733_v2 = vadd.f32 %v2874_v1, %v705_v60 }
 0x19e   : > { %747 = vst [vmem:[#allocation3 + $0x28] sm:$0xff] %v739_v54 }
 0x19f   : > { %v740_v3 = vpack.c.bf16 %v732_v0, %v730_v61  ;;  %v741_v8 = vpack.c.bf16 %v733_v2, %v731_v62 }
 0x1a1   : > { %748 = vst [vmem:[#allocation3 + $0x30] sm:$0xff] %v740_v3  ;;  %749 = vst [vmem:[#allocation3 + $0x38] sm:$0xff] %v741_v8 }
 0x1a2 PF: > { %v2273_v9 = vld [vmem:[%s2774_s7 + $0x4] ss:$16 sps:$4 sm:$0xff]   ;;  %v2275_v50 = vld [vmem:[%s2774_s7 + $0xc] ss:$16 sps:$4 sm:$0xff]   ;;  %v2277_v51 = vld [vmem:[%s2774_s7] ss:$16 sps:$4 sm:$0xff]  }
 0x1a3   : > { %1174 = vmatprep.subr.bf16.mxu0 %v2273_v9  ;;  %v2278_v63 = vld [vmem:[%s2774_s7 + $0x8] ss:$16 sps:$4 sm:$0xff]   ;;  %1247 = vmatprep.subr.bf16.mxu1 %v2275_v50  ;;  %v2279_v1 = vld [vmem:[%s2774_s7 + $0x24] ss:$16 sps:$4 sm:$0xff]   ;;  %v2281_v4 = vld [vmem:[%s2774_s7 + $0x2c] ss:$16 sps:$4 sm:$0xff]  }
 0x1a4   : > { %1175 = vmatpush1.bf16.msra.mxu0 %v2277_v51  ;;  %1248 = vmatpush1.bf16.msra.mxu1 %v2278_v63  ;;  %v2283_v7 = vld [vmem:[%s2774_s7 + $0x20] ss:$16 sps:$4 sm:$0xff]   ;;  %v2284_v10 = vld [vmem:[%s2774_s7 + $0x28] ss:$16 sps:$4 sm:$0xff]   ;;  %v2285_v29 = vld [vmem:[%s2774_s7 + $0x44] ss:$16 sps:$4 sm:$0xff]  }
 0x1a5   : > { %1176 = vmatprep.subr.bf16.mxu0 %v2279_v1  ;;  %1249 = vmatprep.subr.bf16.mxu1 %v2281_v4  ;;  %v2287_v30 = vld [vmem:[%s2774_s7 + $0x4c] ss:$16 sps:$4 sm:$0xff]   ;;  %v2289_v11 = vld [vmem:[%s2774_s7 + $0x40] ss:$16 sps:$4 sm:$0xff]   ;;  %v2290_v12 = vld [vmem:[%s2774_s7 + $0x48] ss:$16 sps:$4 sm:$0xff]  }
 0x1a6   : > { %v2291_v13 = vld [vmem:[%s2774_s7 + $0x64] ss:$16 sps:$4 sm:$0xff]   ;;  %v2293_v14 = vld [vmem:[%s2774_s7 + $0x6c] ss:$16 sps:$4 sm:$0xff]   ;;  %v2295_v15 = vld [vmem:[%s2774_s7 + $0x60] ss:$16 sps:$4 sm:$0xff]  }
 0x1a7   : > { %v2296_v16 = vld [vmem:[%s2774_s7 + $0x68] ss:$16 sps:$4 sm:$0xff]   ;;  %v2297_v17 = vld [vmem:[%s2774_s7 + $0x84] ss:$16 sps:$4 sm:$0xff]   ;;  %v2299_v41 = vld [vmem:[%s2774_s7 + $0x8c] ss:$16 sps:$4 sm:$0xff]  }
 0x1a8   : > { %1177 = vmatpush1.bf16.msra.mxu0 %v2283_v7  ;;  %1250 = vmatpush1.bf16.msra.mxu1 %v2284_v10  ;;  %v2301_v18 = vld [vmem:[%s2774_s7 + $0x80] ss:$16 sps:$4 sm:$0xff]   ;;  %v2302_v42 = vld [vmem:[%s2774_s7 + $0x88] ss:$16 sps:$4 sm:$0xff]   ;;  %v2303_v31 = vld [vmem:[%s2774_s7 + $0xa4] ss:$16 sps:$4 sm:$0xff]  }
 0x1a9   : > { %1178 = vmatprep.subr.bf16.mxu0 %v2285_v29  ;;  %1251 = vmatprep.subr.bf16.mxu1 %v2287_v30  ;;  %v2305_v32 = vld [vmem:[%s2774_s7 + $0xac] ss:$16 sps:$4 sm:$0xff]   ;;  %v2307_v19 = vld [vmem:[%s2774_s7 + $0xa0] ss:$16 sps:$4 sm:$0xff]   ;;  %v2308_v20 = vld [vmem:[%s2774_s7 + $0xa8] ss:$16 sps:$4 sm:$0xff]   ;;  %v1421_v29 = vlaneseq }
 0x1aa   : > { %v2309_v21 = vld [vmem:[%s2774_s7 + $0xc4] ss:$16 sps:$4 sm:$0xff]   ;;  %v2311_v22 = vld [vmem:[%s2774_s7 + $0xcc] ss:$16 sps:$4 sm:$0xff]   ;;  %v2313_v23 = vld [vmem:[%s2774_s7 + $0xc0] ss:$16 sps:$4 sm:$0xff]  }
 0x1ab   : > { %v2314_v24 = vld [vmem:[%s2774_s7 + $0xc8] ss:$16 sps:$4 sm:$0xff]   ;;  %v2315_v25 = vld [vmem:[%s2774_s7 + $0xe4] ss:$16 sps:$4 sm:$0xff]   ;;  %v2317_v26 = vld [vmem:[%s2774_s7 + $0xec] ss:$16 sps:$4 sm:$0xff]  }
 0x1ac   : > { %1179 = vmatpush1.bf16.msra.mxu0 %v2289_v11  ;;  %1252 = vmatpush1.bf16.msra.mxu1 %v2290_v12  ;;  %v2319_v27 = vld [vmem:[%s2774_s7 + $0xe0] ss:$16 sps:$4 sm:$0xff]   ;;  %v2320_v28 = vld [vmem:[%s2774_s7 + $0xe8] ss:$16 sps:$4 sm:$0xff]   ;;  %v2321_v33 = vld [vmem:[%s2774_s7 + $0x104] ss:$16 sps:$4 sm:$0xff]  }
 0x1ad   : > { %1180 = vmatprep.subr.bf16.mxu0 %v2291_v13  ;;  %1253 = vmatprep.subr.bf16.mxu1 %v2293_v14  ;;  %v2323_v44 = vld [vmem:[%s2774_s7 + $0x10c] ss:$16 sps:$4 sm:$0xff]   ;;  %v2325_v45 = vld [vmem:[%s2774_s7 + $0x100] ss:$16 sps:$4 sm:$0xff]   ;;  %v2326_v55 = vld [vmem:[%s2774_s7 + $0x108] ss:$16 sps:$4 sm:$0xff]  }
 0x1ae   : > { %v2327_v56 = vld [vmem:[%s2774_s7 + $0x124] ss:$16 sps:$4 sm:$0xff]   ;;  %v2329_v34 = vld [vmem:[%s2774_s7 + $0x12c] ss:$16 sps:$4 sm:$0xff]   ;;  %v2331_v35 = vld [vmem:[%s2774_s7 + $0x120] ss:$16 sps:$4 sm:$0xff]  }
 0x1af   : > { %v2332_v36 = vld [vmem:[%s2774_s7 + $0x128] ss:$16 sps:$4 sm:$0xff]   ;;  %v2333_v37 = vld [vmem:[%s2774_s7 + $0x144] ss:$16 sps:$4 sm:$0xff]   ;;  %v2335_v38 = vld [vmem:[%s2774_s7 + $0x14c] ss:$16 sps:$4 sm:$0xff]  }
 0x1b0   : > { %1181 = vmatpush1.bf16.msra.mxu0 %v2295_v15  ;;  %1254 = vmatpush1.bf16.msra.mxu1 %v2296_v16  ;;  %v2337_v39 = vld [vmem:[%s2774_s7 + $0x140] ss:$16 sps:$4 sm:$0xff]   ;;  %v2338_v40 = vld [vmem:[%s2774_s7 + $0x148] ss:$16 sps:$4 sm:$0xff]   ;;  %v2339_v43 = vld [vmem:[%s2774_s7 + $0x164] ss:$16 sps:$4 sm:$0xff]  }
 0x1b1   : > { %1182 = vmatprep.subr.bf16.mxu0 %v2297_v17  ;;  %1255 = vmatprep.subr.bf16.mxu1 %v2299_v41  ;;  %v2341_v46 = vld [vmem:[%s2774_s7 + $0x16c] ss:$16 sps:$4 sm:$0xff]   ;;  %v2343_v48 = vld [vmem:[%s2774_s7 + $0x160] ss:$16 sps:$4 sm:$0xff]   ;;  %v2344_v49 = vld [vmem:[%s2774_s7 + $0x168] ss:$16 sps:$4 sm:$0xff]  }
 0x1b2   : > { %v751_v47 = vld [vmem:[#allocation3 + $0x8] sm:$0xff]  ;;  %v2345_v58 = vld [vmem:[%s2774_s7 + $0x184] ss:$16 sps:$4 sm:$0xff]   ;;  %v2349_v5 = vld [vmem:[%s2774_s7 + $0x180] ss:$16 sps:$4 sm:$0xff]   ;;  %v1422_v30 = vshrl.u32 %v1421_v29, 7 }
 0x1b3   : > { %1206 = vmatprep.mubr.bf16.mxu0 %v751_v47  ;;  %1279 = vmatprep.mubr.bf16.mxu1 %v751_v47  ;;  %v2347_v59 = vld [vmem:[%s2774_s7 + $0x18c] ss:$16 sps:$4 sm:$0xff]   ;;  %v2350_v6 = vld [vmem:[%s2774_s7 + $0x188] ss:$16 sps:$4 sm:$0xff]   ;;  %v2351_v52 = vld [vmem:[%s2774_s7 + $0x1a4] ss:$16 sps:$4 sm:$0xff]  }
 0x1b4   : > { %1183 = vmatpush1.bf16.msra.mxu0 %v2301_v18  ;;  %1256 = vmatpush1.bf16.msra.mxu1 %v2302_v42  ;;  %v2353_v53 = vld [vmem:[%s2774_s7 + $0x1ac] ss:$16 sps:$4 sm:$0xff]   ;;  %v2355_v54 = vld [vmem:[%s2774_s7 + $0x1a0] ss:$16 sps:$4 sm:$0xff]   ;;  %v2356_v57 = vld [vmem:[%s2774_s7 + $0x1a8] ss:$16 sps:$4 sm:$0xff]  }
 0x1b5   : > { %1184 = vmatprep.subr.bf16.mxu0 %v2303_v31  ;;  %1257 = vmatprep.subr.bf16.mxu1 %v2305_v32  ;;  %v2357_v60 = vld [vmem:[%s2774_s7 + $0x1c4] ss:$16 sps:$4 sm:$0xff]   ;;  %v2359_v61 = vld [vmem:[%s2774_s7 + $0x1cc] ss:$16 sps:$4 sm:$0xff]   ;;  %v2361_v62 = vld [vmem:[%s2774_s7 + $0x1c0] ss:$16 sps:$4 sm:$0xff]  }
 0x1b6   : > { %v2362_v0 = vld [vmem:[%s2774_s7 + $0x1c8] ss:$16 sps:$4 sm:$0xff]   ;;  %v2363_v2 = vld [vmem:[%s2774_s7 + $0x1e4] ss:$16 sps:$4 sm:$0xff]   ;;  %v2365_v3 = vld [vmem:[%s2774_s7 + $0x1ec] ss:$16 sps:$4 sm:$0xff]  }
 0x1b7   : > { %v2367_v8 = vld [vmem:[%s2774_s7 + $0x1e0] ss:$16 sps:$4 sm:$0xff]   ;;  %v2368_v9 = vld [vmem:[%s2774_s7 + $0x1e8] ss:$16 sps:$4 sm:$0xff]   ;;  %v1423_v11 = vsub.s32 0, %v1422_v30  ;;  %v1431_v12 = vsub.s32 2, %v1422_v30 }
 0x1b8   : > { %1185 = vmatpush1.bf16.msra.mxu0 %v2307_v19  ;;  %1258 = vmatpush1.bf16.msra.mxu1 %v2308_v20  ;;  %v750_v50 = vld [vmem:[#allocation3] sm:$0xff]  ;;  %v753_v51 = vld [vmem:[#allocation3 + $0x18] sm:$0xff]  ;;  %v752_v63 = vld [vmem:[#allocation3 + $0x10] sm:$0xff]  ;;  %v1427_v14 = vsub.s32 1, %v1422_v30  ;;  %v1435_v15 = vsub.s32 3, %v1422_v30  ;;  %s2183_s13 = sshll.u32 (%p2603_p9), %s2491_s23, 6 }
 0x1b9   : > { %1186 = vmatprep.subr.bf16.mxu0 %v2309_v21  ;;  %1259 = vmatprep.subr.bf16.mxu1 %v2311_v22  ;;  %v755_v1 = vld [vmem:[#allocation3 + $0x28] sm:$0xff]  ;;  %v754_v4 = vld [vmem:[#allocation3 + $0x20] sm:$0xff]  ;;  %v757_v7 = vld [vmem:[#allocation3 + $0x38] sm:$0xff]  ;;  %s1883_s11 = sadd.s32 (%p2603_p9), %s2183_s13, %s2758_s20 }
 0x1ba   : > { %v756_v10 = vld [vmem:[#allocation3 + $0x30] sm:$0xff]  ;;  %v1419_v13 = vld [vmem:[%s489_s6] sm:$0xf]  ;;  %v759_v42 = vld [vmem:[#allocation2 + $0x8] sm:$0xff]  ;;  %s2162_s16 = sshll.u32 (%p2603_p9), %s1883_s11, 2 }
 0x1bb   : > { %v758_v16 = vld [vmem:[#allocation2] sm:$0xff]  ;;  %v760_v17 = vld [vmem:[#allocation2 + $0x10] sm:$0xff]  ;;  %v2991_v41 = vrot.slane %v1419_v13, %v1423_v11  ;;  %v2993_v18 = vrot.slane %v1419_v13, %v1431_v12  ;;  %v761_v31 = vld [vmem:[#allocation2 + $0x18] sm:$0xff]  ;;  %v2995_v20 = vrot.slane %v1419_v13, %v1427_v14  ;;  %v2997_v21 = vrot.slane %v1419_v13, %v1435_v15  ;;  %s1885_s30 = scalar_lea.vmem (%p2603_p9), %s3376_s5, %s2162_s16 }
 0x1bc   : > { %1187 = vmatpush1.bf16.msra.mxu0 %v2313_v23  ;;  %1260 = vmatpush1.bf16.msra.mxu1 %v2314_v24  ;;  %v762_v22 = vld [vmem:[#allocation2 + $0x20] sm:$0xff]  ;;  %v764_v23 = vld [vmem:[#allocation2 + $0x30] sm:$0xff] }
 0x1bd   : > { %1188 = vmatprep.subr.bf16.mxu0 %v2315_v25  ;;  %1261 = vmatprep.subr.bf16.mxu1 %v2317_v26 }
 0x1c0   : > { %1189 = vmatpush1.bf16.msra.mxu0 %v2319_v27  ;;  %1262 = vmatpush1.bf16.msra.mxu1 %v2320_v28  ;;  %v763_v28 = vld [vmem:[#allocation2 + $0x28] sm:$0xff] }
 0x1c1   : > { %1190 = vmatprep.subr.bf16.mxu0 %v2321_v33  ;;  %1263 = vmatprep.subr.bf16.mxu1 %v2323_v44  ;;  %v765_v33 = vld [vmem:[#allocation2 + $0x38] sm:$0xff] }
 0x1c4   : > { %1191 = vmatpush1.bf16.msra.mxu0 %v2325_v45  ;;  %1264 = vmatpush1.bf16.msra.mxu1 %v2326_v55 }
 0x1c5   : > { %1192 = vmatprep.subr.bf16.mxu0 %v2327_v56  ;;  %1265 = vmatprep.subr.bf16.mxu1 %v2329_v34 }
 0x1c8   : > { %1193 = vmatpush1.bf16.msra.mxu0 %v2331_v35  ;;  %1266 = vmatpush1.bf16.msra.mxu1 %v2332_v36 }
 0x1c9   : > { %1194 = vmatprep.subr.bf16.mxu0 %v2333_v37  ;;  %1267 = vmatprep.subr.bf16.mxu1 %v2335_v38 }
 0x1cc   : > { %1195 = vmatpush1.bf16.msra.mxu0 %v2337_v39  ;;  %1268 = vmatpush1.bf16.msra.mxu1 %v2338_v40 }
 0x1cd   : > { %1196 = vmatprep.subr.bf16.mxu0 %v2339_v43  ;;  %1269 = vmatprep.subr.bf16.mxu1 %v2341_v46 }
 0x1d0   : > { %1197 = vmatpush1.bf16.msra.mxu0 %v2343_v48  ;;  %1270 = vmatpush1.bf16.msra.mxu1 %v2344_v49 }
 0x1d1   : > { %1198 = vmatprep.subr.bf16.mxu0 %v2345_v58  ;;  %1271 = vmatprep.subr.bf16.mxu1 %v2347_v59 }
 0x1d4   : > { %1199 = vmatpush1.bf16.msra.mxu0 %v2349_v5  ;;  %1272 = vmatpush1.bf16.msra.mxu1 %v2350_v6 }
 0x1d5   : > { %1200 = vmatprep.subr.bf16.mxu0 %v2351_v52  ;;  %1273 = vmatprep.subr.bf16.mxu1 %v2353_v53 }
 0x1d8   : > { %1201 = vmatpush1.bf16.msra.mxu0 %v2355_v54  ;;  %1274 = vmatpush1.bf16.msra.mxu1 %v2356_v57 }
 0x1d9   : > { %1202 = vmatprep.subr.bf16.mxu0 %v2357_v60  ;;  %1275 = vmatprep.subr.bf16.mxu1 %v2359_v61 }
 0x1dc   : > { %1203 = vmatpush1.bf16.msra.mxu0 %v2361_v62  ;;  %1276 = vmatpush1.bf16.msra.mxu1 %v2362_v0 }
 0x1dd   : > { %1204 = vmatprep.subr.bf16.mxu0 %v2363_v2  ;;  %1277 = vmatprep.subr.bf16.mxu1 %v2365_v3 }
 0x1e0   : > { %1205 = vmatpush1.bf16.msra.mxu0 %v2367_v8  ;;  %1278 = vmatpush1.bf16.msra.mxu1 %v2368_v9 }
 0x1e3   : > { %1207 = vmatmul.mubr.bf16.vlgmr.msra.gmra.mrb[0].mxu0 %v750_v50  ;;  %1280 = vmatmul.mubr.bf16.vlgmr.msra.gmra.mrb[0].mxu1 %v750_v50 }
 0x1e4   : > { %1216 = vmatprep.mubr.bf16.mxu0 %v753_v51  ;;  %1289 = vmatprep.mubr.bf16.mxu1 %v753_v51 }
 0x1eb   : > { %1217 = vmatmul.mubr.bf16.gmra.mrb[4].mxu0 %v752_v63  ;;  %1290 = vmatmul.mubr.bf16.gmra.mrb[4].mxu1 %v752_v63 }
 0x1ec   : > { %1226 = vmatprep.mubr.bf16.mxu0 %v755_v1  ;;  %1299 = vmatprep.mubr.bf16.mxu1 %v755_v1 }
 0x1f3   : > { %1227 = vmatmul.mubr.bf16.gmra.mrb[8].mxu0 %v754_v4  ;;  %1300 = vmatmul.mubr.bf16.gmra.mrb[8].mxu1 %v754_v4 }
 0x1f4   : > { %1236 = vmatprep.mubr.bf16.mxu0 %v757_v7  ;;  %1309 = vmatprep.mubr.bf16.mxu1 %v757_v7 }
 0x1fb   : > { %1237 = vmatmul.mubr.bf16.gmra.mrb[12].mxu0 %v756_v10  ;;  %1310 = vmatmul.mubr.bf16.gmra.mrb[12].mxu1 %v756_v10 }
 0x2b6   : > { %v1208_v32 = vpop.f32.mrb[0].mxu0  ;;  %v1281_v19 = vpop.f32.mrb[0].mxu1 }
 0x2b7   : > { %v1320_v24 = vadd.f32 %v1208_v32, %v758_v16  ;;  %v1322_v25 = vadd.f32 %v1281_v19, %v760_v17  ;;  %v1210_v26 = vpop.f32.mrb[1].mxu0  ;;  %v1283_v27 = vpop.f32.mrb[1].mxu1 }
 0x2b8   : > { %v1321_v44 = vadd.f32 %v1210_v26, %v759_v42  ;;  %v1323_v45 = vadd.f32 %v1283_v27, %v761_v31  ;;  %v1212_v55 = vpop.f32.mrb[2].mxu0  ;;  %v1285_v56 = vpop.f32.mrb[2].mxu1  ;;  %v766_v42 = vld [vmem:[#allocation2 + $0x40] sm:$0xff] }
 0x2b9   : > { %1352 = vst [vmem:[#allocation2] sm:$0xff] %v1320_v24  ;;  %v1441_v34 = vadd.f32 %v2991_v41, %v1320_v24  ;;  %1354 = vst [vmem:[#allocation2 + $0x10] sm:$0xff] %v1322_v25  ;;  %v1443_v35 = vadd.f32 %v2993_v18, %v1322_v25  ;;  %v1324_v36 = vadd.f32 %v1212_v55, %v762_v22  ;;  %v1214_v38 = vpop.f32.mrb[3].mxu0  ;;  %v1287_v39 = vpop.f32.mrb[3].mxu1 }
 0x2ba   : > { %v1326_v37 = vadd.f32 %v1285_v56, %v764_v23  ;;  %1353 = vst [vmem:[#allocation2 + $0x8] sm:$0xff] %v1321_v44  ;;  %v3002_v40 = vadd.f32 %v2995_v20, %v1321_v44  ;;  %1355 = vst [vmem:[#allocation2 + $0x18] sm:$0xff] %v1323_v45  ;;  %v3005_v43 = vadd.f32 %v2997_v21, %v1323_v45  ;;  %v768_v23 = vld [vmem:[#allocation2 + $0x50] sm:$0xff] }
 0x2bb   : > { %v1325_v46 = vadd.f32 %v1214_v38, %v763_v28  ;;  %v1327_v47 = vadd.f32 %v1287_v39, %v765_v33  ;;  %v1505_v48 = vmul.f32 0.044715, %v1441_v34  ;;  %v1507_v49 = vmul.f32 0.044715, %v1443_v35  ;;  %1356 = vst [vmem:[#allocation2 + $0x20] sm:$0xff] %v1324_v36  ;;  %v767_v39 = vld [vmem:[#allocation2 + $0x48] sm:$0xff] }
 0x2bc   : > { %1358 = vst [vmem:[#allocation2 + $0x30] sm:$0xff] %v1326_v37  ;;  %v1506_v58 = vmul.f32 0.044715, %v3002_v40  ;;  %v1508_v59 = vmul.f32 0.044715, %v3005_v43  ;;  %v3010_v52 = vadd.f32 %v2991_v41, %v1324_v36  ;;  %v3013_v53 = vadd.f32 %v2993_v18, %v1326_v37 }
 0x2bd   : > { %1357 = vst [vmem:[#allocation2 + $0x28] sm:$0xff] %v1325_v46  ;;  %1359 = vst [vmem:[#allocation2 + $0x38] sm:$0xff] %v1327_v47  ;;  %v1537_v5 = vmul.f32 %v1505_v48, %v1441_v34  ;;  %v1539_v6 = vmul.f32 %v1507_v49, %v1443_v35  ;;  %v3018_v60 = vadd.f32 %v2995_v20, %v1325_v46  ;;  %v3025_v50 = vmul.f32 0.5, %v1441_v34 }
 0x2be   : > { %v1538_v54 = vmul.f32 %v1506_v58, %v3002_v40  ;;  %v1540_v57 = vmul.f32 %v1508_v59, %v3005_v43  ;;  %v1218_v61 = vpop.f32.mrb[4].mxu0  ;;  %v1291_v62 = vpop.f32.mrb[4].mxu1  ;;  %v1509_v3 = vmul.f32 0.044715, %v3010_v52  ;;  %v1511_v1 = vmul.f32 0.044715, %v3013_v53 }
 0x2bf   : > { %v1569_v0 = vmul.f32 %v1537_v5, %v1441_v34  ;;  %v1571_v2 = vmul.f32 %v1539_v6, %v1443_v35  ;;  %v3021_v8 = vpop.f32.mrb[5].mxu0  ;;  %v3023_v9 = vpop.f32.mrb[5].mxu1  ;;  %v3036_v11 = vadd.f32 %v2997_v21, %v1327_v47  ;;  %v1510_v17 = vmul.f32 0.044715, %v3018_v60  ;;  %v769_v59 = vld [vmem:[#allocation2 + $0x58] sm:$0xff]  ;;  %v770_v5 = vld [vmem:[#allocation2 + $0x60] sm:$0xff] }
 0x2c0   : > { %v1570_v51 = vmul.f32 %v1538_v54, %v3002_v40  ;;  %v1572_v63 = vmul.f32 %v1540_v57, %v3005_v43  ;;  %v3030_v4 = vpop.f32.mrb[6].mxu0  ;;  %v3032_v7 = vpop.f32.mrb[6].mxu1  ;;  %v1541_v30 = vmul.f32 %v1509_v3, %v3010_v52  ;;  %v1543_v16 = vmul.f32 %v1511_v1, %v3013_v53 }
 0x2c1   : > { %v1601_v10 = vadd.f32 %v1569_v0, %v1441_v34  ;;  %v1603_v29 = vadd.f32 %v1571_v2, %v1443_v35  ;;  %v3038_v12 = vpop.f32.mrb[7].mxu0  ;;  %v3040_v13 = vpop.f32.mrb[7].mxu1  ;;  %v3046_v32 = vmul.f32 0.5, %v1443_v35  ;;  %v1542_v27 = vmul.f32 %v1510_v17, %v3018_v60  ;;  %v772_v0 = vld [vmem:[#allocation2 + $0x70] sm:$0xff] }
 0x2c2   : > { %v1602_v14 = vadd.f32 %v1570_v51, %v3002_v40  ;;  %v1604_v15 = vadd.f32 %v1572_v63, %v3005_v43  ;;  %v1573_v22 = vmul.f32 %v1541_v30, %v3010_v52  ;;  %v1575_v26 = vmul.f32 %v1543_v16, %v3013_v53 }
 0x2c3   : > { %v1633_v31 = vmul.f32 0.7978846, %v1601_v10  ;;  %v1635_v19 = vmul.f32 0.7978846, %v1603_v29  ;;  %v1512_v33 = vmul.f32 0.044715, %v3036_v11  ;;  %v1328_v44 = vadd.f32 %v1218_v61, %v766_v42 }
 0x2c4   : > { %v1634_v24 = vmul.f32 0.7978846, %v1602_v14  ;;  %v1636_v25 = vmul.f32 0.7978846, %v1604_v15  ;;  %v1605_v28 = vadd.f32 %v1573_v22, %v3010_v52  ;;  %v1607_v45 = vadd.f32 %v1575_v26, %v3013_v53  ;;  %v771_v14 = vld [vmem:[#allocation2 + $0x68] sm:$0xff] }
 0x2c5   : > { %2369 = vtanh.f32 %v1633_v31  ;;  %v1574_v55 = vmul.f32 %v1542_v27, %v3018_v60  ;;  %v1330_v56 = vadd.f32 %v1291_v62, %v768_v23  ;;  %v1544_v37 = vmul.f32 %v1512_v33, %v3036_v11  ;;  %1360 = vst [vmem:[#allocation2 + $0x40] sm:$0xff] %v1328_v44 }
 0x2c6   : > { %2371 = vtanh.f32 %v1635_v19  ;;  %v3055_v34 = vpop.f32.mrb[8].mxu0  ;;  %v3057_v35 = vpop.f32.mrb[8].mxu1  ;;  %v1637_v36 = vmul.f32 0.7978846, %v1605_v28  ;;  %v3061_v38 = vadd.f32 %v2991_v41, %v1328_v44  ;;  %v1639_v48 = vmul.f32 0.7978846, %v1607_v45 }
 0x2c7   : > { %2373 = vtanh.f32 %v1634_v24  ;;  %v3063_v46 = vpop.f32.mrb[9].mxu0  ;;  %v3065_v47 = vpop.f32.mrb[9].mxu1  ;;  %v1606_v49 = vadd.f32 %v1574_v55, %v3018_v60  ;;  %1362 = vst [vmem:[#allocation2 + $0x50] sm:$0xff] %v1330_v56  ;;  %v3069_v58 = vadd.f32 %v2993_v18, %v1330_v56  ;;  %v3076_v57 = vmul.f32 0.5, %v3002_v40 }
 0x2c8   : > { %2375 = vtanh.f32 %v1636_v25  ;;  %v3071_v6 = vpop.f32.mrb[10].mxu0  ;;  %v3073_v54 = vpop.f32.mrb[10].mxu1  ;;  %v1576_v61 = vmul.f32 %v1544_v37, %v3036_v11  ;;  %v1513_v62 = vmul.f32 0.044715, %v3061_v38  ;;  %v3085_v51 = vmul.f32 0.5, %v3005_v43 }
 0x2c9   : > { %2377 = vtanh.f32 %v1637_v36  ;;  %v3080_v2 = vpop.f32.mrb[11].mxu0  ;;  %v3082_v3 = vpop.f32.mrb[11].mxu1  ;;  %v1638_v63 = vmul.f32 0.7978846, %v1606_v49  ;;  %v1515_v1 = vmul.f32 0.044715, %v3069_v58  ;;  %v1329_v29 = vadd.f32 %v3021_v8, %v767_v39 }
 0x2ca   : > { %2379 = vtanh.f32 %v1639_v48  ;;  %v1608_v40 = vadd.f32 %v1576_v61, %v3036_v11  ;;  %v1545_v10 = vmul.f32 %v1513_v62, %v3061_v38  ;;  %v1331_v30 = vadd.f32 %v3023_v9, %v769_v59 }
 0x2cb   : > { %2381 = vtanh.f32 %v1638_v63  ;;  %v1547_v15 = vmul.f32 %v1515_v1, %v3069_v58  ;;  %v1332_v16 = vadd.f32 %v3030_v4, %v770_v5  ;;  %v1334_v43 = vadd.f32 %v3032_v7, %v772_v0  ;;  %1361 = vst [vmem:[#allocation2 + $0x48] sm:$0xff] %v1329_v29 }
 0x2cc   : > { %v1640_v17 = vmul.f32 0.7978846, %v1608_v40  ;;  %v1577_v42 = vmul.f32 %v1545_v10, %v3061_v38  ;;  %v3097_v31 = vadd.f32 %v2995_v20, %v1329_v29  ;;  %1363 = vst [vmem:[#allocation2 + $0x58] sm:$0xff] %v1331_v30  ;;  %v3100_v8 = vadd.f32 %v2997_v21, %v1331_v30 }
 0x2cd   : > { %v1477_v9 = vmul.f32 0.5, %v3010_v52  ;;  %v1479_v19 = vmul.f32 0.5, %v3013_v53  ;;  %v1579_v22 = vmul.f32 %v1547_v15, %v3069_v58  ;;  %1364 = vst [vmem:[#allocation2 + $0x60] sm:$0xff] %v1332_v16  ;;  %1366 = vst [vmem:[#allocation2 + $0x70] sm:$0xff] %v1334_v43  ;;  %v1333_v4 = vadd.f32 %v3038_v12, %v771_v14 }
 0x2ce   : > { %v3106_v7 = vpop.f32.mrb[12].mxu0  ;;  %v3108_v23 = vpop.f32.mrb[12].mxu1  ;;  %v1478_v25 = vmul.f32 0.5, %v3018_v60  ;;  %2383 = vtanh.f32 %v1640_v17  ;;  %v1609_v26 = vadd.f32 %v1577_v42, %v3061_v38  ;;  %v1514_v52 = vmul.f32 0.044715, %v3097_v31 }
 0x2cf   : > { %v2370_v24 = vpop.eup %2369  ;;  %v3113_v27 = vpop.f32.mrb[13].mxu0  ;;  %v1611_v12 = vadd.f32 %v1579_v22, %v3069_v58  ;;  %v1516_v44 = vmul.f32 0.044715, %v3100_v8  ;;  %v3120_v45 = vadd.f32 %v2991_v41, %v1332_v16  ;;  %1365 = vst [vmem:[#allocation2 + $0x68] sm:$0xff] %v1333_v4  ;;  %v3128_v48 = vadd.f32 %v2993_v18, %v1334_v43 }
 0x2d0   : > { %v3115_v53 = vpop.f32.mrb[13].mxu1  ;;  %v2372_v28 = vpop.eup %2371  ;;  %v1697_v33 = vadd.f32 1.0, %v2370_v24  ;;  %v1641_v37 = vmul.f32 0.7978846, %v1609_v26  ;;  %v1546_v39 = vmul.f32 %v1514_v52, %v3097_v31  ;;  %v1480_v26 = vmul.f32 0.5, %v3036_v11  ;;  %v773_v52 = vld [vmem:[#allocation2 + $0x78] sm:$0xff] }
 0x2d1   : > { %v3122_v60 = vpop.f32.mrb[14].mxu0  ;;  %v3124_v55 = vpop.f32.mrb[14].mxu1  ;;  %v1699_v36 = vadd.f32 1.0, %v2372_v28  ;;  %v1643_v0 = vmul.f32 0.7978846, %v1611_v12  ;;  %v1548_v63 = vmul.f32 %v1516_v44, %v3100_v8  ;;  %v774_v28 = vld [vmem:[#allocation2 + $0x80] sm:$0xff] }
 0x2d2   : > { %v2374_v56 = vpop.eup %2373  ;;  %v3130_v49 = vpop.f32.mrb[15].mxu0  ;;  %v1729_v61 = vmul.f32 %v1697_v33, %v3025_v50  ;;  %2385 = vtanh.f32 %v1641_v37  ;;  %v1578_v29 = vmul.f32 %v1546_v39, %v3097_v31  ;;  %v1517_v42 = vmul.f32 0.044715, %v3120_v45 }
 0x2d3   : > { %v3132_v59 = vpop.f32.mrb[15].mxu1  ;;  %v2376_v5 = vpop.eup %2375  ;;  %v1698_v62 = vadd.f32 1.0, %v2374_v56  ;;  %v1731_v40 = vmul.f32 %v1699_v36, %v3046_v32  ;;  %2387 = vtanh.f32 %v1643_v0  ;;  %v1580_v16 = vmul.f32 %v1548_v63, %v3100_v8  ;;  %v776_v63 = vld [vmem:[#allocation2 + $0x90] sm:$0xff] }
 0x2d4   : > { %v2378_v1 = vpop.eup %2377  ;;  %v1700_v10 = vadd.f32 1.0, %v2376_v5  ;;  %v1610_v17 = vadd.f32 %v1578_v29, %v3097_v31  ;;  %v1549_v36 = vmul.f32 %v1517_v42, %v3120_v45  ;;  %v1519_v37 = vmul.f32 0.044715, %v3128_v48 }
 0x2d5   : > { %v2380_v30 = vpop.eup %2379  ;;  %v1730_v14 = vmul.f32 %v1698_v62, %v3076_v57  ;;  %v1701_v15 = vadd.f32 1.0, %v2378_v1  ;;  %v1612_v57 = vadd.f32 %v1580_v16, %v3100_v8  ;;  %v3149_v39 = vadd.f32 %v2995_v20, %v1333_v4 }
 0x2d6   : > { %v1732_v50 = vmul.f32 %v1700_v10, %v3085_v51  ;;  %v1703_v43 = vadd.f32 1.0, %v2380_v30  ;;  %v2382_v32 = vpop.eup %2381  ;;  %v1642_v56 = vmul.f32 0.7978846, %v1610_v17  ;;  %v1335_v5 = vadd.f32 %v3040_v13, %v773_v52  ;;  %v777_v52 = vld [vmem:[#allocation2 + $0x98] sm:$0xff] }
 0x2d7   : > { %v2167_v22 = vpack.c.bf16 %v1730_v14, %v1729_v61  ;;  %v1733_v24 = vmul.f32 %v1701_v15, %v1477_v9  ;;  %v1702_v44 = vadd.f32 1.0, %v2382_v32  ;;  %v1644_v51 = vmul.f32 0.7978846, %v1612_v57  ;;  %v775_v57 = vld [vmem:[#allocation2 + $0x88] sm:$0xff] }
 0x2d8   : > { %v2168_v33 = vpack.c.bf16 %v1732_v50, %v1731_v40  ;;  %v1735_v12 = vmul.f32 %v1703_v43, %v1479_v19  ;;  %v2384_v9 = vpop.eup %2383  ;;  %2389 = vtanh.f32 %v1642_v56  ;;  %v1336_v61 = vadd.f32 %v3055_v34, %v774_v28  ;;  %1367 = vst [vmem:[#allocation2 + $0x78] sm:$0xff] %v1335_v5 }
 0x2d9   : > { %1857 = vst [vmem:[%s2777_s1] sm:$0xff] %v2167_v22  ;;  %v1734_v11 = vmul.f32 %v1702_v44, %v1478_v25  ;;  %v1704_v19 = vadd.f32 1.0, %v2384_v9  ;;  %2391 = vtanh.f32 %v1644_v51  ;;  %v1581_v62 = vmul.f32 %v1549_v36, %v3120_v45 }
 0x2da   : > { %1858 = vst [vmem:[%s2777_s1 + $0x8] sm:$0xff] %v2168_v33  ;;  %v1551_v0 = vmul.f32 %v1519_v37, %v3128_v48  ;;  %v1481_v4 = vmul.f32 0.5, %v3061_v38  ;;  %v1518_v40 = vmul.f32 0.044715, %v3149_v39  ;;  %v3159_v25 = vadd.f32 %v2997_v21, %v1335_v5  ;;  %1368 = vst [vmem:[#allocation2 + $0x80] sm:$0xff] %v1336_v61 }
 0x2db   : > { %v2169_v1 = vpack.c.bf16 %v1734_v11, %v1733_v24  ;;  %v1736_v13 = vmul.f32 %v1704_v19, %v1480_v26  ;;  %v1613_v34 = vadd.f32 %v1581_v62, %v3120_v45  ;;  %v3164_v29 = vadd.f32 %v2991_v41, %v1336_v61 }
 0x2dc   : > { %v1583_v10 = vmul.f32 %v1551_v0, %v3128_v48  ;;  %v2386_v30 = vpop.eup %2385  ;;  %v1483_v14 = vmul.f32 0.5, %v3069_v58  ;;  %v1550_v38 = vmul.f32 %v1518_v40, %v3149_v39  ;;  %v1520_v15 = vmul.f32 0.044715, %v3159_v25 }
 0x2dd   : > { %1859 = vst [vmem:[%s2777_s1 + $0x10] sm:$0xff] %v2169_v1  ;;  %v1338_v16 = vadd.f32 %v3057_v35, %v776_v63  ;;  %v2388_v50 = vpop.eup %2387  ;;  %v2170_v43 = vpack.c.bf16 %v1736_v13, %v1735_v12  ;;  %v1705_v17 = vadd.f32 1.0, %v2386_v30  ;;  %v1645_v42 = vmul.f32 0.7978846, %v1613_v34  ;;  %v778_v30 = vld [vmem:[#allocation2 + $0xa0] sm:$0xff] }
 0x2de   : > { %v1615_v32 = vadd.f32 %v1583_v10, %v3128_v48  ;;  %v1707_v22 = vadd.f32 1.0, %v2388_v50  ;;  %v1482_v24 = vmul.f32 0.5, %v3097_v31  ;;  %v1582_v26 = vmul.f32 %v1550_v38, %v3149_v39  ;;  %v779_v50 = vld [vmem:[#allocation2 + $0xa8] sm:$0xff] }
 0x2df   : > { %v1552_v58 = vmul.f32 %v1520_v15, %v3159_v25  ;;  %1370 = vst [vmem:[#allocation2 + $0x90] sm:$0xff] %v1338_v16  ;;  %1860 = vst [vmem:[%s2777_s1 + $0x18] sm:$0xff] %v2170_v43  ;;  %v1484_v28 = vmul.f32 0.5, %v3100_v8  ;;  %2393 = vtanh.f32 %v1645_v42  ;;  %v1521_v33 = vmul.f32 0.044715, %v3164_v29 }
 0x2e0   : > { %v1647_v35 = vmul.f32 0.7978846, %v1615_v32  ;;  %v1737_v12 = vmul.f32 %v1705_v17, %v1481_v4  ;;  %v1614_v44 = vadd.f32 %v1582_v26, %v3149_v39  ;;  %v3181_v31 = vadd.f32 %v2993_v18, %v1338_v16 }
 0x2e1   : > { %v1584_v56 = vmul.f32 %v1552_v58, %v3159_v25  ;;  %v1553_v51 = vmul.f32 %v1521_v33, %v3164_v29  ;;  %v1337_v36 = vadd.f32 %v3063_v46, %v775_v57  ;;  %v1339_v37 = vadd.f32 %v3065_v47, %v777_v52  ;;  %v781_v58 = vld [vmem:[#allocation2 + $0xb8] sm:$0xff] }
 0x2e2   : > { %2395 = vtanh.f32 %v1647_v35  ;;  %v2390_v8 = vpop.eup %2389  ;;  %v1739_v9 = vmul.f32 %v1707_v22, %v1483_v14  ;;  %v1646_v11 = vmul.f32 0.7978846, %v1614_v44  ;;  %v1523_v61 = vmul.f32 0.044715, %v3181_v31  ;;  %v780_v14 = vld [vmem:[#allocation2 + $0xb0] sm:$0xff] }
 0x2e3   : > { %v1616_v5 = vadd.f32 %v1584_v56, %v3159_v25  ;;  %v2392_v19 = vpop.eup %2391  ;;  %v1706_v62 = vadd.f32 1.0, %v2390_v8  ;;  %v1585_v0 = vmul.f32 %v1553_v51, %v3164_v29  ;;  %1369 = vst [vmem:[#allocation2 + $0x88] sm:$0xff] %v1337_v36  ;;  %v3190_v63 = vadd.f32 %v2995_v20, %v1337_v36  ;;  %1371 = vst [vmem:[#allocation2 + $0x98] sm:$0xff] %v1339_v37 }
 0x2e4   : > { %v3193_v46 = vadd.f32 %v2997_v21, %v1339_v37  ;;  %v1708_v47 = vadd.f32 1.0, %v2392_v19  ;;  %2397 = vtanh.f32 %v1646_v11  ;;  %v1555_v4 = vmul.f32 %v1523_v61, %v3181_v31  ;;  %v782_v19 = vld [vmem:[#allocation2 + $0xc0] sm:$0xff] }
 0x2e5   : > { %v1648_v1 = vmul.f32 0.7978846, %v1616_v5  ;;  %v1738_v40 = vmul.f32 %v1706_v62, %v1482_v24  ;;  %v1485_v13 = vmul.f32 0.5, %v3120_v45  ;;  %v1617_v34 = vadd.f32 %v1585_v0, %v3164_v29 }
 0x2e6   : > { %v1522_v10 = vmul.f32 0.044715, %v3190_v63  ;;  %v1740_v38 = vmul.f32 %v1708_v47, %v1484_v28  ;;  %v1487_v15 = vmul.f32 0.5, %v3128_v48  ;;  %v1587_v16 = vmul.f32 %v1555_v4, %v3181_v31 }
 0x2e7   : > { %2399 = vtanh.f32 %v1648_v1  ;;  %v2171_v43 = vpack.c.bf16 %v1738_v40, %v1737_v12  ;;  %v1649_v17 = vmul.f32 0.7978846, %v1617_v34  ;;  %v1524_v45 = vmul.f32 0.044715, %v3193_v46 }
 0x2e8   : > { %v1554_v42 = vmul.f32 %v1522_v10, %v3190_v63  ;;  %v2172_v32 = vpack.c.bf16 %v1740_v38, %v1739_v9  ;;  %v1619_v22 = vadd.f32 %v1587_v16, %v3181_v31  ;;  %v1340_v24 = vadd.f32 %v3071_v6, %v778_v30 }
 0x2e9   : > { %v1342_v26 = vadd.f32 %v3073_v54, %v780_v14  ;;  %v2394_v48 = vpop.eup %2393  ;;  %1861 = vst [vmem:[%s2777_s1 + $0x20] sm:$0xff] %v2171_v43  ;;  %2401 = vtanh.f32 %v1649_v17  ;;  %v1556_v52 = vmul.f32 %v1524_v45, %v3193_v46  ;;  %v1341_v28 = vadd.f32 %v3080_v2, %v779_v50 }
 0x2ea   : > { %v1586_v57 = vmul.f32 %v1554_v42, %v3190_v63  ;;  %1862 = vst [vmem:[%s2777_s1 + $0x28] sm:$0xff] %v2172_v32  ;;  %v1709_v35 = vadd.f32 1.0, %v2394_v48  ;;  %v1651_v33 = vmul.f32 0.7978846, %v1619_v22  ;;  %1372 = vst [vmem:[#allocation2 + $0xa0] sm:$0xff] %v1340_v24  ;;  %v3212_v12 = vadd.f32 %v2991_v41, %v1340_v24  ;;  %v783_v48 = vld [vmem:[#allocation2 + $0xc8] sm:$0xff] }
 0x2eb   : > { %1374 = vst [vmem:[#allocation2 + $0xb0] sm:$0xff] %v1342_v26  ;;  %v3215_v6 = vadd.f32 %v2993_v18, %v1342_v26  ;;  %v1588_v56 = vmul.f32 %v1556_v52, %v3193_v46  ;;  %1373 = vst [vmem:[#allocation2 + $0xa8] sm:$0xff] %v1341_v28  ;;  %v3220_v51 = vadd.f32 %v2995_v20, %v1341_v28  ;;  %v1486_v37 = vmul.f32 0.5, %v3149_v39 }
 0x2ec   : > { %v2396_v54 = vpop.eup %2395  ;;  %v1618_v44 = vadd.f32 %v1586_v57, %v3190_v63  ;;  %v1343_v2 = vadd.f32 %v3082_v3, %v781_v58  ;;  %v1488_v8 = vmul.f32 0.5, %v3159_v25  ;;  %2403 = vtanh.f32 %v1651_v33  ;;  %v784_v58 = vld [vmem:[#allocation2 + $0xd0] sm:$0xff]  ;;  %v785_v33 = vld [vmem:[#allocation2 + $0xd8] sm:$0xff] }
 0x2ed   : > { %v1711_v36 = vadd.f32 1.0, %v2396_v54  ;;  %v1489_v9 = vmul.f32 0.5, %v3164_v29  ;;  %v1620_v5 = vadd.f32 %v1588_v56, %v3193_v46  ;;  %v1525_v61 = vmul.f32 0.044715, %v3212_v12 }
 0x2ee   : > { %v1650_v11 = vmul.f32 0.7978846, %v1618_v44  ;;  %1375 = vst [vmem:[#allocation2 + $0xb8] sm:$0xff] %v1343_v2  ;;  %v2398_v62 = vpop.eup %2397  ;;  %v1741_v0 = vmul.f32 %v1709_v35, %v1485_v13  ;;  %v1527_v3 = vmul.f32 0.044715, %v3215_v6  ;;  %v3234_v10 = vadd.f32 %v2997_v21, %v1343_v2 }
 0x2ef   : > { %v1743_v47 = vmul.f32 %v1711_v36, %v1487_v15  ;;  %v1526_v1 = vmul.f32 0.044715, %v3220_v51  ;;  %v1710_v39 = vadd.f32 1.0, %v2398_v62  ;;  %v1652_v25 = vmul.f32 0.7978846, %v1620_v5 }
 0x2f0   : > { %2405 = vtanh.f32 %v1650_v11  ;;  %v1557_v4 = vmul.f32 %v1525_v61, %v3212_v12  ;;  %v1559_v40 = vmul.f32 %v1527_v3, %v3215_v6  ;;  %v1344_v13 = vadd.f32 %v3106_v7, %v782_v19  ;;  %v786_v19 = vld [vmem:[#allocation2 + $0xe0] sm:$0xff] }
 0x2f1   : > { %v2400_v29 = vpop.eup %2399  ;;  %v1558_v34 = vmul.f32 %v1526_v1, %v3220_v51  ;;  %v1742_v30 = vmul.f32 %v1710_v39, %v1486_v37  ;;  %2407 = vtanh.f32 %v1652_v25  ;;  %v1491_v15 = vmul.f32 0.5, %v3181_v31 }
 0x2f2   : > { %v1712_v14 = vadd.f32 1.0, %v2400_v29  ;;  %v1589_v38 = vmul.f32 %v1557_v4, %v3212_v12  ;;  %v1591_v16 = vmul.f32 %v1559_v40, %v3215_v6  ;;  %v1528_v43 = vmul.f32 0.044715, %v3234_v10  ;;  %1376 = vst [vmem:[#allocation2 + $0xc0] sm:$0xff] %v1344_v13 }
 0x2f3   : > { %v1590_v50 = vmul.f32 %v1558_v34, %v3220_v51  ;;  %v2402_v17 = vpop.eup %2401  ;;  %v2173_v42 = vpack.c.bf16 %v1742_v30, %v1741_v0  ;;  %v3244_v32 = vadd.f32 %v2991_v41, %v1344_v13  ;;  %v1490_v22 = vmul.f32 0.5, %v3190_v63  ;;  %v788_v13 = vld [vmem:[#allocation2 + $0xf0] sm:$0xff] }
 0x2f4   : > { %v1744_v45 = vmul.f32 %v1712_v14, %v1488_v8  ;;  %v1621_v7 = vadd.f32 %v1589_v38, %v3212_v12  ;;  %v1623_v31 = vadd.f32 %v1591_v16, %v3215_v6  ;;  %v1560_v26 = vmul.f32 %v1528_v43, %v3234_v10 }
 0x2f5   : > { %v1622_v24 = vadd.f32 %v1590_v50, %v3220_v51  ;;  %1863 = vst [vmem:[%s2777_s1 + $0x30] sm:$0xff] %v2173_v42  ;;  %v1713_v52 = vadd.f32 1.0, %v2402_v17  ;;  %v1529_v35 = vmul.f32 0.044715, %v3244_v32  ;;  %v1492_v44 = vmul.f32 0.5, %v3193_v46 }
 0x2f6   : > { %v2174_v57 = vpack.c.bf16 %v1744_v45, %v1743_v47  ;;  %v1653_v28 = vmul.f32 0.7978846, %v1621_v7  ;;  %v2404_v54 = vpop.eup %2403  ;;  %v1655_v63 = vmul.f32 0.7978846, %v1623_v31  ;;  %v1592_v2 = vmul.f32 %v1560_v26, %v3234_v10  ;;  %v789_v7 = vld [vmem:[#allocation2 + $0xf8] sm:$0xff] }
 0x2f7   : > { %v1654_v56 = vmul.f32 0.7978846, %v1622_v24  ;;  %v1715_v36 = vadd.f32 1.0, %v2404_v54  ;;  %v1561_v37 = vmul.f32 %v1529_v35, %v3244_v32  ;;  %v1346_v8 = vadd.f32 %v3108_v23, %v784_v58 }
 0x2f8   : > { %1864 = vst [vmem:[%s2777_s1 + $0x38] sm:$0xff] %v2174_v57  ;;  %2409 = vtanh.f32 %v1653_v28  ;;  %v1624_v11 = vadd.f32 %v1592_v2, %v3234_v10  ;;  %v1345_v5 = vadd.f32 %v3113_v27, %v783_v48  ;;  %v1347_v61 = vadd.f32 %v3115_v53, %v785_v33 }
 0x2f9   : > { %2411 = vtanh.f32 %v1655_v63  ;;  %v1745_v62 = vmul.f32 %v1713_v52, %v1489_v9  ;;  %v1593_v0 = vmul.f32 %v1561_v37, %v3244_v32  ;;  %1378 = vst [vmem:[#allocation2 + $0xd0] sm:$0xff] %v1346_v8  ;;  %v3262_v47 = vadd.f32 %v2993_v18, %v1346_v8 }
 0x2fa   : > { %v2406_v46 = vpop.eup %2405  ;;  %2413 = vtanh.f32 %v1654_v56  ;;  %v1656_v1 = vmul.f32 0.7978846, %v1624_v11  ;;  %1377 = vst [vmem:[#allocation2 + $0xc8] sm:$0xff] %v1345_v5  ;;  %v3265_v23 = vadd.f32 %v2995_v20, %v1345_v5  ;;  %1379 = vst [vmem:[#allocation2 + $0xd8] sm:$0xff] %v1347_v61  ;;  %v3268_v27 = vadd.f32 %v2997_v21, %v1347_v61 }
 0x2fb   : > { %v1714_v3 = vadd.f32 1.0, %v2406_v46  ;;  %v2408_v53 = vpop.eup %2407  ;;  %v1493_v9 = vmul.f32 0.5, %v3212_v12  ;;  %v1625_v39 = vadd.f32 %v1593_v0, %v3244_v32  ;;  %v1531_v25 = vmul.f32 0.044715, %v3262_v47 }
 0x2fc   : > { %v1348_v4 = vadd.f32 %v3122_v60, %v786_v19  ;;  %v1747_v29 = vmul.f32 %v1715_v36, %v1491_v15  ;;  %v1716_v34 = vadd.f32 1.0, %v2408_v53  ;;  %2415 = vtanh.f32 %v1656_v1  ;;  %v787_v15 = vld [vmem:[#allocation2 + $0xe8] sm:$0xff] }
 0x2fd   : > { %v1746_v40 = vmul.f32 %v1714_v3, %v1490_v22  ;;  %v1495_v30 = vmul.f32 0.5, %v3215_v6  ;;  %v1657_v14 = vmul.f32 0.7978846, %v1625_v39  ;;  %v1563_v38 = vmul.f32 %v1531_v25, %v3262_v47 }
 0x2fe   : > { %v1530_v16 = vmul.f32 0.044715, %v3265_v23  ;;  %1380 = vst [vmem:[#allocation2 + $0xe0] sm:$0xff] %v1348_v4  ;;  %v1748_v50 = vmul.f32 %v1716_v34, %v1492_v44  ;;  %v1532_v43 = vmul.f32 0.044715, %v3268_v27  ;;  %v3279_v60 = vadd.f32 %v2991_v41, %v1348_v4 }
 0x2ff   : > { %v2175_v12 = vpack.c.bf16 %v1746_v40, %v1745_v62  ;;  %v1494_v17 = vmul.f32 0.5, %v3220_v51  ;;  %v1595_v42 = vmul.f32 %v1563_v38, %v3262_v47  ;;  %v1350_v45 = vadd.f32 %v3124_v55, %v788_v13 }
 0x300   : > { %v1562_v6 = vmul.f32 %v1530_v16, %v3265_v23  ;;  %v2176_v22 = vpack.c.bf16 %v1748_v50, %v1747_v29  ;;  %2417 = vtanh.f32 %v1657_v14  ;;  %v1564_v31 = vmul.f32 %v1532_v43, %v3268_v27 }
 0x301   : > { %1865 = vst [vmem:[%s2777_s1 + $0x40] sm:$0xff] %v2175_v12  ;;  %v1533_v24 = vmul.f32 0.044715, %v3279_v60  ;;  %v1627_v26 = vadd.f32 %v1595_v42, %v3262_v47  ;;  %1382 = vst [vmem:[#allocation2 + $0xf0] sm:$0xff] %v1350_v45  ;;  %v3291_v58 = vadd.f32 %v2993_v18, %v1350_v45  ;;  %v1349_v48 = vadd.f32 %v3130_v49, %v787_v15 }
 0x302   : > { %v2410_v41 = vpop.eup %2409  ;;  %v1594_v51 = vmul.f32 %v1562_v6, %v3265_v23  ;;  %1866 = vst [vmem:[%s2777_s1 + $0x48] sm:$0xff] %v2176_v22  ;;  %v1596_v52 = vmul.f32 %v1564_v31, %v3268_v27  ;;  %v1351_v35 = vadd.f32 %v3132_v59, %v789_v7  ;;  %v1496_v44 = vmul.f32 0.5, %v3234_v10 }
 0x303   : > { %v2412_v55 = vpop.eup %2411  ;;  %v1717_v57 = vadd.f32 1.0, %v2410_v41  ;;  %v1565_v28 = vmul.f32 %v1533_v24, %v3279_v60  ;;  %v1659_v63 = vmul.f32 0.7978846, %v1627_v26  ;;  %1381 = vst [vmem:[#allocation2 + $0xe8] sm:$0xff] %v1349_v48  ;;  %v1535_v59 = vmul.f32 0.044715, %v3291_v58 }
 0x304   : > { %v2414_v33 = vpop.eup %2413  ;;  %v1719_v54 = vadd.f32 1.0, %v2412_v55  ;;  %v1626_v56 = vadd.f32 %v1594_v51, %v3265_v23  ;;  %v1628_v49 = vadd.f32 %v1596_v52, %v3268_v27  ;;  %1383 = vst [vmem:[#allocation2 + $0xf8] sm:$0xff] %v1351_v35  ;;  %v1470_v19 = vadd.f32 %v2995_v20, %v1349_v48 }
 0x305   : > { %v1749_v18 = vmul.f32 %v1717_v57, %v1493_v9  ;;  %v1718_v2 = vadd.f32 1.0, %v2414_v33  ;;  %v1597_v36 = vmul.f32 %v1565_v28, %v3279_v60  ;;  %2419 = vtanh.f32 %v1659_v63 }
 0x306   : > { %v1751_v37 = vmul.f32 %v1719_v54, %v1495_v30  ;;  %v1658_v8 = vmul.f32 0.7978846, %v1626_v56  ;;  %v2416_v11 = vpop.eup %2415  ;;  %v1660_v10 = vmul.f32 0.7978846, %v1628_v49  ;;  %v1567_v62 = vmul.f32 %v1535_v59, %v3291_v58  ;;  %v1902_v59 = vld [vmem:[%s2777_s1 + $0x10] sm:$0xff] (%p2603_p9) }
 0x307   : > { %v1750_v5 = vmul.f32 %v1718_v2, %v1494_v17  ;;  %v1629_v61 = vadd.f32 %v1597_v36, %v3279_v60  ;;  %v1720_v46 = vadd.f32 1.0, %v2416_v11  ;;  %v1472_v0 = vadd.f32 %v2997_v21, %v1351_v35  ;;  %v1904_v11 = vld [vmem:[%s2777_s1 + $0x18] sm:$0xff] (%p2603_p9)  ;;  %1903 = vst [vmem:[%s1885_s30 + $0x20] sm:$0xff] (%p2603_p9), %v1902_v59 }
 0x308   : > { %2421 = vtanh.f32 %v1658_v8  ;;  %v1599_v9 = vmul.f32 %v1567_v62, %v3291_v58  ;;  %v1534_v39 = vmul.f32 0.044715, %v1470_v19  ;;  %v1497_v12 = vmul.f32 0.5, %v3244_v32  ;;  %1905 = vst [vmem:[%s1885_s30 + $0x28] sm:$0xff] (%p2603_p9), %v1904_v11 }
 0x309   : > { %v2177_v3 = vpack.c.bf16 %v1750_v5, %v1749_v18  ;;  %2423 = vtanh.f32 %v1660_v10  ;;  %v1752_v1 = vmul.f32 %v1720_v46, %v1496_v44  ;;  %v1661_v53 = vmul.f32 0.7978846, %v1629_v61  ;;  %v1906_v5 = vld [vmem:[%s2777_s1 + $0x20] sm:$0xff] (%p2603_p9)  ;;  %v1908_v10 = vld [vmem:[%s2777_s1 + $0x28] sm:$0xff] (%p2603_p9)  ;;  %v1910_v61 = vld [vmem:[%s2777_s1 + $0x30] sm:$0xff] (%p2603_p9) }
 0x30a   : > { %v2418_v25 = vpop.eup %2417  ;;  %v1536_v4 = vmul.f32 0.044715, %v1472_v0  ;;  %v1631_v20 = vadd.f32 %v1599_v9, %v3291_v58  ;;  %v1566_v40 = vmul.f32 %v1534_v39, %v1470_v19  ;;  %v1499_v17 = vmul.f32 0.5, %v3262_v47  ;;  %v1914_v46 = vld [vmem:[%s2777_s1 + $0x40] sm:$0xff] (%p2603_p9)  ;;  %v1916_v62 = vld [vmem:[%s2777_s1 + $0x48] sm:$0xff] (%p2603_p9)  ;;  %1907 = vst [vmem:[%s1885_s30 + $0x40] sm:$0xff] (%p2603_p9), %v1906_v5 }
 0x30b   : > { %1867 = vst [vmem:[%s2777_s1 + $0x50] sm:$0xff] %v2177_v3  ;;  %v2178_v29 = vpack.c.bf16 %v1752_v1, %v1751_v37  ;;  %2425 = vtanh.f32 %v1661_v53  ;;  %v1721_v21 = vadd.f32 1.0, %v2418_v25  ;;  %v1498_v7 = vmul.f32 0.5, %v3265_v23  ;;  %1909 = vst [vmem:[%s1885_s30 + $0x48] sm:$0xff] (%p2603_p9), %v1908_v10 }
 0x30c   : > { %v1568_v34 = vmul.f32 %v1536_v4, %v1472_v0  ;;  %v1663_v13 = vmul.f32 0.7978846, %v1631_v20  ;;  %v1598_v30 = vmul.f32 %v1566_v40, %v1470_v19  ;;  %v1500_v41 = vmul.f32 0.5, %v3268_v27  ;;  %1911 = vst [vmem:[%s1885_s30 + $0x60] sm:$0xff] (%p2603_p9), %v1910_v61  ;;  %1915 = vst [vmem:[%s1885_s30 + $0x80] sm:$0xff] (%p2603_p9), %v1914_v46 }
 0x30d   : > { %1868 = vst [vmem:[%s2777_s1 + $0x58] sm:$0xff] %v2178_v29  ;;  %v1753_v45 = vmul.f32 %v1721_v21, %v1497_v12  ;;  %v1501_v23 = vmul.f32 0.5, %v3279_v60  ;;  %v1503_v27 = vmul.f32 0.5, %v3291_v58  ;;  %v1502_v44 = vmul.f32 0.5, %v1470_v19  ;;  %v1898_v60 = vld [vmem:[%s2777_s1] sm:$0xff] (%p2603_p9)  ;;  %v1900_v58 = vld [vmem:[%s2777_s1 + $0x8] sm:$0xff] (%p2603_p9) }
 0x30e   : > { %v1600_v14 = vmul.f32 %v1568_v34, %v1472_v0  ;;  %2427 = vtanh.f32 %v1663_v13  ;;  %v1630_v16 = vadd.f32 %v1598_v30, %v1470_v19  ;;  %v1504_v18 = vmul.f32 0.5, %v1472_v0  ;;  %v1912_v19 = vld [vmem:[%s2777_s1 + $0x38] sm:$0xff] (%p2603_p9)  ;;  %1899 = vst [vmem:[%s1885_s30] sm:$0xff] (%p2603_p9), %v1898_v60  ;;  %1901 = vst [vmem:[%s1885_s30 + $0x8] sm:$0xff] (%p2603_p9), %v1900_v58 }
 0x30f   : > { %v2420_v38 = vpop.eup %2419  ;;  %1913 = vst [vmem:[%s1885_s30 + $0x68] sm:$0xff] (%p2603_p9), %v1912_v19  ;;  %1917 = vst [vmem:[%s1885_s30 + $0x88] sm:$0xff] (%p2603_p9), %v1916_v62 }
 0x310   : > { %v1723_v50 = vadd.f32 1.0, %v2420_v38  ;;  %v1632_v43 = vadd.f32 %v1600_v14, %v1472_v0  ;;  %v1662_v42 = vmul.f32 0.7978846, %v1630_v16 }
 0x312   : > { %v2422_v15 = vpop.eup %2421  ;;  %v1664_v31 = vmul.f32 0.7978846, %v1632_v43  ;;  %v1755_v24 = vmul.f32 %v1723_v50, %v1499_v17  ;;  %2429 = vtanh.f32 %v1662_v42  ;;  %v1918_v0 = vld [vmem:[%s2777_s1 + $0x50] sm:$0xff] (%p2603_p9) }
 0x313   : > { %v2424_v6 = vpop.eup %2423  ;;  %v1722_v22 = vadd.f32 1.0, %v2422_v15  ;;  %1919 = vst [vmem:[%s1885_s30 + $0xa0] sm:$0xff] (%p2603_p9), %v1918_v0 }
 0x314   : > { %v1724_v26 = vadd.f32 1.0, %v2424_v6  ;;  %2431 = vtanh.f32 %v1664_v31  ;;  %v1920_v3 = vld [vmem:[%s2777_s1 + $0x58] sm:$0xff] (%p2603_p9) }
 0x315   : > { %v1754_v32 = vmul.f32 %v1722_v22, %v1498_v7  ;;  %v2426_v55 = vpop.eup %2425  ;;  %1921 = vst [vmem:[%s1885_s30 + $0xa8] sm:$0xff] (%p2603_p9), %v1920_v3 }
 0x316   : > { %v1756_v51 = vmul.f32 %v1724_v26, %v1500_v41  ;;  %v1725_v52 = vadd.f32 1.0, %v2426_v55 }
 0x317   : > { %v2179_v48 = vpack.c.bf16 %v1754_v32, %v1753_v45 }
 0x318   : > { %v2180_v47 = vpack.c.bf16 %v1756_v51, %v1755_v24  ;;  %v2428_v57 = vpop.eup %2427  ;;  %v1757_v54 = vmul.f32 %v1725_v52, %v1501_v23 }
 0x319   : > { %1869 = vst [vmem:[%s2777_s1 + $0x60] sm:$0xff] %v2179_v48  ;;  %v1727_v28 = vadd.f32 1.0, %v2428_v57 }
 0x31a   : > { %1870 = vst [vmem:[%s2777_s1 + $0x68] sm:$0xff] %v2180_v47 }
 0x31b   : > { %v1759_v56 = vmul.f32 %v1727_v28, %v1503_v27 }
 0x31c   : > { %v2430_v35 = vpop.eup %2429 }
 0x31d   : > { %v1726_v63 = vadd.f32 1.0, %v2430_v35 }
 0x31e   : > { %v2432_v33 = vpop.eup %2431 }
 0x31f   : > { %v1728_v2 = vadd.f32 1.0, %v2432_v33  ;;  %v1758_v49 = vmul.f32 %v1726_v63, %v1502_v44  ;;  %1879 = sbr.rel (!%p2603_p9) target bundleno = 814 (0x32e), region = 79 }
 0x320   : > { %v1922_v1 = vld [vmem:[%s2777_s1 + $0x60] sm:$0xff] (%p2603_p9) }
 0x321   : > { %v1760_v36 = vmul.f32 %v1728_v2, %v1504_v18  ;;  %v2181_v37 = vpack.c.bf16 %v1758_v49, %v1757_v54  ;;  %v1924_v53 = vld [vmem:[%s2777_s1 + $0x68] sm:$0xff] (%p2603_p9)  ;;  %1923 = vst [vmem:[%s1885_s30 + $0xc0] sm:$0xff] (%p2603_p9), %v1922_v1 }
 0x322   : > { %1925 = vst [vmem:[%s1885_s30 + $0xc8] sm:$0xff] (%p2603_p9), %v1924_v53 }
 0x323   : > { %v2182_v8 = vpack.c.bf16 %v1760_v36, %v1759_v56  ;;  %1871 = vst [vmem:[%s2777_s1 + $0x70] sm:$0xff] %v2181_v37 }
 0x325   : > { %1872 = vst [vmem:[%s2777_s1 + $0x78] sm:$0xff] %v2182_v8 }
 0x32a   : > { %v1926_v9 = vld [vmem:[%s2777_s1 + $0x70] sm:$0xff] }
 0x32b   : > { %1927 = vst [vmem:[%s1885_s30 + $0xe0] sm:$0xff] %v1926_v9 }
 0x32c   : > { %v1928_v39 = vld [vmem:[%s2777_s1 + $0x78] sm:$0xff] }
 0x32d   : > { %1929 = vst [vmem:[%s1885_s30 + $0xe8] sm:$0xff] %v1928_v39 }
 0x32e PF: > { %s15_s26 = sadd.s32 1, %s2503_s26   ;;  %s3380_s18 = smov %s2475_s19 }
 0x32f   : > { %p12_p3 = scmp.ge.s32.totalorder %s15_s26, 6   ;;  %s3381_s19 = smov %s2608_s12 }
 0x330   : > { %s3382_s20 = smov %s2483_s21  ;;  %s3383_s21 = smov %s2597_s8 }
 0x331   : > { %s3384_s22 = smov %s2495_s24  ;;  %s3385_s23 = smov %s2499_s25 }
 0x332   : > { %s3386_s24 = smov %s3389_s28  ;;  %s3387_s25 = smov %s3393_s29 }
 0x333   :  { %14 = sbr.rel (!%p12_p3) target bundleno = 7 (0x7), region = 145 }

// kernel: sam_encode.24
= control target key start
LH: loop header
LB: loop body
LE: loop exit
PB: predicated region body
PF: predicated region fallthrough
CT: control target
= control target key end

     0   :  { %s1092_s15 = smov 0   ;;  %s1094_s16 = smov 0   ;;  %s1236_s0 = inlined_call_operand.vmem [shape: f32[128,256], index: 0, kind: input, shape index: {}]   ;;  %s1237_s1 = inlined_call_operand.vmem [shape: bf16[256,128], index: 1, kind: input, shape index: {}]   ;;  %s1238_s2 = inlined_call_operand.vmem [shape: f32[1,128], index: 2, kind: input, shape index: {}]   ;;  %s1239_s3 = inlined_call_operand.vmem [shape: f32[1,128], index: 3, kind: input, shape index: {}]   ;;  %s1240_s4 = inlined_call_operand.vmem [shape: bf16[128,128], index: 4, kind: output, shape index: {}]  }
   0x1   :  { %s1096_s17 = smov 0  }
   0x2 LB: > { %s33_s18 = sadd.s32 1, %s1061_s16  ;;  %p865_p0 = scmp.ge.s32.totalorder %s1065_s17, 1  ;;  %s1065_s17 = sphi %s1096_s17, %s14_s17   ;;  %s1061_s16 = sphi %s1094_s16, %s1242_s16   ;;  %s1057_s15 = sphi %s1092_s15, %s1241_s15  }
   0x3   : > { %p35_p1 = scmp.ge.s32.totalorder %s33_s18, 2  ;;  %p224_p2 = scmp.lt.s32.totalorder %s1065_s17, 3 }
   0x5   : > { %s1244_s18 = smov (%p35_p1, %s33_s18), 0  ;;  %p225_p3 = pnand %p865_p0, %p224_p2 }
   0x6   : > { %v1011_v0 = vld [vmem:[%s1237_s1 + $0x40] sm:$0xff] (!%p225_p3)   ;;  %s866_s21 = sshll.u32 (!%p225_p3), %s1057_s15, 3  ;;  %v1013_v2 = vld [vmem:[%s1237_s1 + $0x48] sm:$0xff] (!%p225_p3)   ;;  %v1015_v4 = vld [vmem:[%s1237_s1 + $0x50] sm:$0xff] (!%p225_p3)  }
   0x7   : > { %228 = sbr.rel (%p225_p3) target bundleno = 588 (0x24c), region = 36  ;;  %v1012_v1 = vld [vmem:[%s1237_s1] sm:$0xff] (!%p225_p3)   ;;  %931 = vmatprep.subr.bf16.mxu0 (!%p225_p3), %v1011_v0  ;;  %971 = vmatprep.subr.bf16.mxu1 (!%p225_p3), %v1011_v0  ;;  %p274_p4 = scmp.lt.s32.totalorder (!%p225_p3), %s866_s21, 15  ;;  %v1014_v3 = vld [vmem:[%s1237_s1 + $0x8] sm:$0xff] (!%p225_p3)   ;;  %v1016_v5 = vld [vmem:[%s1237_s1 + $0x10] sm:$0xff] (!%p225_p3)  }
   0x8   : > { %932 = vmatpush3.bf16.msra.mxu0 (!%p225_p3), %v1012_v1  ;;  %979 = vmatpush3.bf16.msra.mxu1 (!%p225_p3), %v1012_v1  ;;  %v1017_v6 = vld [vmem:[%s1237_s1 + $0x58] sm:$0xff] (!%p225_p3)   ;;  %v1019_v8 = vld [vmem:[%s1237_s1 + $0x60] sm:$0xff] (!%p225_p3)   ;;  %v1021_v10 = vld [vmem:[%s1237_s1 + $0x68] sm:$0xff] (!%p225_p3)  }
   0x9   : > { %933 = vmatprep.subr.bf16.mxu0 (!%p225_p3), %v1013_v2  ;;  %972 = vmatprep.subr.bf16.mxu1 (!%p225_p3), %v1013_v2  ;;  %v1018_v7 = vld [vmem:[%s1237_s1 + $0x18] sm:$0xff] (!%p225_p3)   ;;  %v1020_v9 = vld [vmem:[%s1237_s1 + $0x20] sm:$0xff] (!%p225_p3)   ;;  %v1022_v17 = vld [vmem:[%s1237_s1 + $0x28] sm:$0xff] (!%p225_p3)  }
   0xa   : > { %v1023_v18 = vld [vmem:[%s1237_s1 + $0x70] sm:$0xff] (!%p225_p3)   ;;  %v1025_v20 = vld [vmem:[%s1237_s1 + $0x78] sm:$0xff] (!%p225_p3)  }
   0xb   : > { %v1024_v19 = vld [vmem:[%s1237_s1 + $0x30] sm:$0xff] (!%p225_p3)   ;;  %v1026_v21 = vld [vmem:[%s1237_s1 + $0x38] sm:$0xff] (!%p225_p3)  }
   0xc   : > { %934 = vmatpush3.bf16.msra.mxu0 (!%p225_p3), %v1014_v3  ;;  %980 = vmatpush3.bf16.msra.mxu1 (!%p225_p3), %v1014_v3 }
   0xd   : > { %935 = vmatprep.subr.bf16.mxu0 (!%p225_p3), %v1015_v4  ;;  %973 = vmatprep.subr.bf16.mxu1 (!%p225_p3), %v1015_v4 }
   0xe   : > { %s1246_s21 = smov (!%p274_p4, %s866_s21), 15 }
   0xf   : > { %s899_s8 = sshll.u32 %s1246_s21, 4  ;;  %s870_s12 = sshll.u32 %s1246_s21, 2 }
  0x10   : > { %936 = vmatpush3.bf16.msra.mxu0 %v1016_v5  ;;  %981 = vmatpush3.bf16.msra.mxu1 %v1016_v5  ;;  %s1143_s15 = scalar_lea.vmem %s1236_s0, %s899_s8 }
  0x11   : > { %937 = vmatprep.subr.bf16.mxu0 %v1017_v6  ;;  %974 = vmatprep.subr.bf16.mxu1 %v1017_v6  ;;  %v322_v11 = vld [vmem:[%s1143_s15 + $0x8] sm:$0xff]  ;;  %v324_v12 = vld [vmem:[%s1143_s15 + $0x18] sm:$0xff]  ;;  %v321_v22 = vld [vmem:[%s1143_s15] sm:$0xff] }
  0x12   : > { %v330_v13 = vld [vmem:[%s1143_s15 + $0x48] sm:$0xff]  ;;  %v338_v14 = vpack.c.bf16 %v324_v12, %v322_v11  ;;  %v332_v15 = vld [vmem:[%s1143_s15 + $0x58] sm:$0xff]  ;;  %v323_v23 = vld [vmem:[%s1143_s15 + $0x10] sm:$0xff] }
  0x13   : > { %v342_v16 = vpack.c.bf16 %v332_v15, %v330_v13  ;;  %v329_v24 = vld [vmem:[%s1143_s15 + $0x40] sm:$0xff]  ;;  %v331_v25 = vld [vmem:[%s1143_s15 + $0x50] sm:$0xff]  ;;  %v326_v26 = vld [vmem:[%s1143_s15 + $0x28] sm:$0xff]  ;;  %v337_v30 = vpack.c.bf16 %v323_v23, %v321_v22 }
  0x14   : > { %938 = vmatpush3.bf16.msra.mxu0 %v1018_v7  ;;  %982 = vmatpush3.bf16.msra.mxu1 %v1018_v7  ;;  %v328_v27 = vld [vmem:[%s1143_s15 + $0x38] sm:$0xff]  ;;  %v334_v28 = vld [vmem:[%s1143_s15 + $0x68] sm:$0xff]  ;;  %v341_v31 = vpack.c.bf16 %v331_v25, %v329_v24  ;;  %v325_v34 = vld [vmem:[%s1143_s15 + $0x20] sm:$0xff] }
  0x15   : > { %939 = vmatprep.subr.bf16.mxu0 %v1019_v8  ;;  %975 = vmatprep.subr.bf16.mxu1 %v1019_v8  ;;  %v336_v29 = vld [vmem:[%s1143_s15 + $0x78] sm:$0xff]  ;;  %v340_v32 = vpack.c.bf16 %v328_v27, %v326_v26  ;;  %v327_v35 = vld [vmem:[%s1143_s15 + $0x30] sm:$0xff]  ;;  %v333_v36 = vld [vmem:[%s1143_s15 + $0x60] sm:$0xff] }
  0x16   : > { %513 = vmatprep.mubr.bf16.mxu0 %v338_v14  ;;  %529 = vmatprep.mubr.bf16.mxu1 %v342_v16  ;;  %v344_v33 = vpack.c.bf16 %v336_v29, %v334_v28  ;;  %v335_v37 = vld [vmem:[%s1143_s15 + $0x70] sm:$0xff]  ;;  %v339_v38 = vpack.c.bf16 %v327_v35, %v325_v34  ;;  %s306_s15 = scalar_lea.vmem %s1240_s4, %s870_s12 }
  0x17   : > { %v343_v39 = vpack.c.bf16 %v335_v37, %v333_v36 }
  0x18   : > { %940 = vmatpush3.bf16.msra.mxu0 %v1020_v9  ;;  %983 = vmatpush3.bf16.msra.mxu1 %v1020_v9 }
  0x19   : > { %941 = vmatprep.subr.bf16.mxu0 %v1021_v10  ;;  %976 = vmatprep.subr.bf16.mxu1 %v1021_v10 }
  0x1c   : > { %942 = vmatpush3.bf16.msra.mxu0 %v1022_v17  ;;  %984 = vmatpush3.bf16.msra.mxu1 %v1022_v17 }
  0x1d   : > { %943 = vmatprep.subr.bf16.mxu0 %v1023_v18  ;;  %977 = vmatprep.subr.bf16.mxu1 %v1023_v18 }
  0x20   : > { %944 = vmatpush3.bf16.msra.mxu0 %v1024_v19  ;;  %985 = vmatpush3.bf16.msra.mxu1 %v1024_v19 }
  0x21   : > { %945 = vmatprep.subr.bf16.mxu0 %v1025_v20  ;;  %978 = vmatprep.subr.bf16.mxu1 %v1025_v20 }
  0x24   : > { %946 = vmatpush3.bf16.msra.mxu0 %v1026_v21  ;;  %986 = vmatpush3.bf16.msra.mxu1 %v1026_v21 }
  0x27   : > { %514 = vmatmul.mubr.bf16.vlgmr.msra.gmra.mrb[0].mxu0 %v337_v30  ;;  %530 = vmatmul.mubr.bf16.vlgmr.msra.gmra.mrb[0].mxu1 %v341_v31 }
  0x28   : > { %521 = vmatprep.mubr.bf16.mxu0 %v340_v32  ;;  %537 = vmatprep.mubr.bf16.mxu1 %v344_v33 }
  0x2f   : > { %522 = vmatmul.mubr.bf16.gmra.mrb[4].mxu0 %v339_v38  ;;  %538 = vmatmul.mubr.bf16.gmra.mrb[4].mxu1 %v343_v39 }
  0xfa   : > { %v947_v40 = vpop.f32.mrb[0].mxu0  ;;  %v959_v41 = vpop.f32.mrb[0].mxu1 }
  0xfb   : > { %v948_v42 = vpop.f32.mrb[1].mxu0  ;;  %v960_v43 = vpop.f32.mrb[1].mxu1 }
  0xfc   : > { %v949_v44 = vadd.f32 %v948_v42, %v947_v40  ;;  %v961_v45 = vadd.f32 %v960_v43, %v959_v41  ;;  %v950_v46 = vpop.f32.mrb[2].mxu0  ;;  %v962_v47 = vpop.f32.mrb[2].mxu1 }
  0xfd   : > { %v951_v48 = vpop.f32.mrb[3].mxu0  ;;  %v963_v49 = vpop.f32.mrb[3].mxu1 }
  0xfe   : > { %v952_v50 = vadd.f32 %v951_v48, %v950_v46  ;;  %v964_v51 = vadd.f32 %v963_v49, %v962_v47  ;;  %573 = vadd.xlane.f32.xlu0 %v949_v44 }
 0x100   : > { %583 = vadd.xlane.f32.xlu1 %v964_v51 }
 0x102   : > { %v953_v52 = vpop.f32.mrb[4].mxu0  ;;  %581 = vadd.xlane.f32.xlu0 %v961_v45  ;;  %v965_v53 = vpop.f32.mrb[4].mxu1 }
 0x103   : > { %v954_v54 = vpop.f32.mrb[5].mxu0  ;;  %v966_v55 = vpop.f32.mrb[5].mxu1 }
 0x104   : > { %v955_v56 = vadd.f32 %v954_v54, %v953_v52  ;;  %v956_v57 = vpop.f32.mrb[6].mxu0  ;;  %v967_v58 = vadd.f32 %v966_v55, %v965_v53  ;;  %v968_v59 = vpop.f32.mrb[6].mxu1 }
 0x105   : > { %v957_v60 = vpop.f32.mrb[7].mxu0  ;;  %v969_v61 = vpop.f32.mrb[7].mxu1 }
 0x106   : > { %v958_v62 = vadd.f32 %v957_v60, %v956_v57  ;;  %577 = vadd.xlane.f32.xlu1 %v955_v56  ;;  %575 = vadd.xlane.f32.xlu0 %v952_v50  ;;  %v970_v63 = vadd.f32 %v969_v61, %v968_v59  ;;  %v887_v57 = vld [vmem:[%s1238_s2] ss:$0 sm:$0xff] }
 0x10a   : > { %579 = vadd.xlane.f32.xlu1 %v958_v62  ;;  %585 = vadd.xlane.f32.xlu0 %v967_v58 }
 0x10e   : > { %587 = vadd.xlane.f32.xlu1 %v970_v63 }
 0x18b   : > { %v574_v0 = vpop.xlane.xlu0 %573 }
 0x18c   : > { %v590_v1 = vmul.f32 0.0078125, %v574_v0 }
 0x18d   : > { %v584_v3 = vpop.xlane.xlu1 %583 }
 0x18e   : > { %v1182_v2 = vsub.f32 %v949_v44, %v590_v1  ;;  %v595_v8 = vmul.f32 0.0078125, %v584_v3  ;;  %v888_v1 = vld [vmem:[%s1239_s3] ss:$0 sm:$0xff] }
 0x18f   : > { %v582_v4 = vpop.xlane.xlu0 %581 }
 0x190   : > { %v594_v5 = vmul.f32 0.0078125, %v582_v4  ;;  %v606_v6 = vmul.f32 %v1182_v2, %v1182_v2  ;;  %v1192_v16 = vsub.f32 %v964_v51, %v595_v8 }
 0x192   : > { %v1186_v7 = vsub.f32 %v961_v45, %v594_v5  ;;  %614 = vadd.xlane.f32.xlu0 %v606_v6  ;;  %v611_v27 = vmul.f32 %v1192_v16, %v1192_v16 }
 0x193   : > { %v578_v9 = vpop.xlane.xlu1 %577  ;;  %v576_v10 = vpop.xlane.xlu0 %575 }
 0x194   : > { %v592_v11 = vmul.f32 0.0078125, %v578_v9  ;;  %v591_v12 = vmul.f32 0.0078125, %v576_v10  ;;  %v610_v13 = vmul.f32 %v1186_v7, %v1186_v7 }
 0x196   : > { %v1190_v14 = vsub.f32 %v955_v56, %v592_v11  ;;  %v599_v15 = vsub.f32 %v952_v50, %v591_v12  ;;  %622 = vadd.xlane.f32.xlu0 %v610_v13 }
 0x197   : > { %v580_v17 = vpop.xlane.xlu1 %579  ;;  %v586_v18 = vpop.xlane.xlu0 %585 }
 0x198   : > { %v593_v19 = vmul.f32 0.0078125, %v580_v17  ;;  %v596_v20 = vmul.f32 0.0078125, %v586_v18  ;;  %v608_v21 = vmul.f32 %v1190_v14, %v1190_v14  ;;  %v607_v22 = vmul.f32 %v599_v15, %v599_v15 }
 0x19a   : > { %v1196_v23 = vsub.f32 %v967_v58, %v596_v20  ;;  %618 = vadd.xlane.f32.xlu0 %v608_v21  ;;  %616 = vadd.xlane.f32.xlu1 %v607_v22  ;;  %v1198_v25 = vsub.f32 %v958_v62, %v593_v19 }
 0x19b   : > { %v588_v24 = vpop.xlane.xlu1 %587 }
 0x19c   : > { %v597_v26 = vmul.f32 0.0078125, %v588_v24  ;;  %v612_v28 = vmul.f32 %v1196_v23, %v1196_v23  ;;  %v609_v30 = vmul.f32 %v1198_v25, %v1198_v25 }
 0x19e   : > { %624 = vadd.xlane.f32.xlu1 %v611_v27  ;;  %626 = vadd.xlane.f32.xlu0 %v612_v28  ;;  %v1204_v29 = vsub.f32 %v970_v63, %v597_v26 }
 0x1a0   : > { %v613_v31 = vmul.f32 %v1204_v29, %v1204_v29 }
 0x1a2   : > { %620 = vadd.xlane.f32.xlu1 %v609_v30 }
 0x1a6   : > { %628 = vadd.xlane.f32.xlu1 %v613_v31 }
 0x21f   : > { %v615_v32 = vpop.xlane.xlu0 %614 }
 0x220   : > { %v630_v33 = vmul.f32 0.0078125, %v615_v32 }
 0x222   : > { %v638_v34 = vadd.f32 1e-06, %v630_v33 }
 0x223   : > { %v623_v35 = vpop.xlane.xlu0 %622 }
 0x224   : > { %v634_v36 = vmul.f32 0.0078125, %v623_v35  ;;  %1027 = vrsqrt.f32 %v638_v34 }
 0x226   : > { %v642_v37 = vadd.f32 1e-06, %v634_v36 }
 0x227   : > { %v617_v38 = vpop.xlane.xlu1 %616  ;;  %v619_v39 = vpop.xlane.xlu0 %618 }
 0x228   : > { %v631_v40 = vmul.f32 0.0078125, %v617_v38  ;;  %v632_v41 = vmul.f32 0.0078125, %v619_v39  ;;  %1029 = vrsqrt.f32 %v642_v37 }
 0x22a   : > { %v639_v42 = vadd.f32 1e-06, %v631_v40  ;;  %v640_v43 = vadd.f32 1e-06, %v632_v41 }
 0x22b   : > { %v625_v44 = vpop.xlane.xlu1 %624  ;;  %v627_v45 = vpop.xlane.xlu0 %626 }
 0x22c   : > { %1031 = vrsqrt.f32 %v639_v42  ;;  %v635_v46 = vmul.f32 0.0078125, %v625_v44  ;;  %v636_v47 = vmul.f32 0.0078125, %v627_v45 }
 0x22d   : > { %1033 = vrsqrt.f32 %v640_v43 }
 0x22e   : > { %v643_v48 = vadd.f32 1e-06, %v635_v46  ;;  %v644_v49 = vadd.f32 1e-06, %v636_v47  ;;  %v1028_v51 = vpop.eup %1027 }
 0x22f   : > { %v621_v50 = vpop.xlane.xlu1 %620  ;;  %v654_v55 = vmul.f32 %v1028_v51, %v1182_v2 }
 0x230   : > { %1035 = vrsqrt.f32 %v643_v48  ;;  %v633_v52 = vmul.f32 0.0078125, %v621_v50 }
 0x231   : > { %1037 = vrsqrt.f32 %v644_v49  ;;  %v669_v62 = vmul.f32 %v887_v57, %v654_v55 }
 0x232   : > { %v641_v53 = vadd.f32 1e-06, %v633_v52  ;;  %v1030_v54 = vpop.eup %1029 }
 0x233   : > { %v629_v56 = vpop.xlane.xlu1 %628  ;;  %v658_v60 = vmul.f32 %v1030_v54, %v1186_v7  ;;  %v684_v5 = vadd.f32 %v888_v1, %v669_v62 }
 0x234   : > { %1039 = vrsqrt.f32 %v641_v53  ;;  %v637_v58 = vmul.f32 0.0078125, %v629_v56 }
 0x235   : > { %v673_v4 = vmul.f32 %v887_v57, %v658_v60 }
 0x236   : > { %v1032_v59 = vpop.eup %1031  ;;  %v645_v61 = vadd.f32 1e-06, %v637_v58 }
 0x237   : > { %v655_v63 = vmul.f32 %v1032_v59, %v599_v15  ;;  %v1034_v0 = vpop.eup %1033  ;;  %v688_v13 = vadd.f32 %v888_v1, %v673_v4 }
 0x238   : > { %1041 = vrsqrt.f32 %v645_v61  ;;  %v656_v8 = vmul.f32 %v1034_v0, %v1190_v14 }
 0x239   : > { %v670_v2 = vmul.f32 %v887_v57, %v655_v63 }
 0x23a   : > { %v1036_v3 = vpop.eup %1035  ;;  %v671_v15 = vmul.f32 %v887_v57, %v656_v8 }
 0x23b   : > { %v685_v6 = vadd.f32 %v888_v1, %v670_v2  ;;  %v659_v9 = vmul.f32 %v1036_v3, %v1192_v16  ;;  %v1038_v7 = vpop.eup %1037 }
 0x23c   : > { %v660_v18 = vmul.f32 %v1038_v7, %v1196_v23  ;;  %v686_v16 = vadd.f32 %v888_v1, %v671_v15 }
 0x23d   : > { %v911_v10 = vpack.c.bf16 %v685_v6, %v684_v5  ;;  %v674_v11 = vmul.f32 %v887_v57, %v659_v9 }
 0x23e   : > { %v1040_v12 = vpop.eup %1039  ;;  %v675_v22 = vmul.f32 %v887_v57, %v660_v18 }
 0x23f   : > { %912 = vst [vmem:[%s306_s15] sm:$0xff] %v911_v10   ;;  %v689_v17 = vadd.f32 %v888_v1, %v674_v11  ;;  %v657_v19 = vmul.f32 %v1040_v12, %v1198_v25 }
 0x240   : > { %v690_v30 = vadd.f32 %v888_v1, %v675_v22 }
 0x241   : > { %v921_v20 = vpack.c.bf16 %v689_v17, %v688_v13  ;;  %v672_v14 = vmul.f32 %v887_v57, %v657_v19 }
 0x242   : > { %v1042_v21 = vpop.eup %1041 }
 0x243   : > { %929 = vst [vmem:[%s306_s15 + $0x10] sm:$0xff] %v921_v20   ;;  %v687_v24 = vadd.f32 %v888_v1, %v672_v14  ;;  %v661_v26 = vmul.f32 %v1042_v21, %v1204_v29 }
 0x245   : > { %v916_v27 = vpack.c.bf16 %v687_v24, %v686_v16  ;;  %v676_v28 = vmul.f32 %v887_v57, %v661_v26 }
 0x247   : > { %928 = vst [vmem:[%s306_s15 + $0x8] sm:$0xff] %v916_v27   ;;  %v691_v31 = vadd.f32 %v888_v1, %v676_v28 }
 0x249   : > { %v926_v32 = vpack.c.bf16 %v691_v31, %v690_v30 }
 0x24b   : > { %930 = vst [vmem:[%s306_s15 + $0x18] sm:$0xff] %v926_v32  }
 0x24c PF: > { %s14_s17 = sadd.s32 1, %s1065_s17   ;;  %s1241_s15 = smov %s1061_s16 }
 0x24d   : > { %p11_p5 = scmp.ge.s32.totalorder %s14_s17, 4   ;;  %s1242_s16 = smov %s1244_s18 }
 0x24f   :  { %13 = sbr.rel (!%p11_p5) target bundleno = 2 (0x2), region = 83 }

// kernel: sam_encode.18
= control target key start
LH: loop header
LB: loop body
LE: loop exit
PB: predicated region body
PF: predicated region fallthrough
CT: control target
= control target key end

     0   :  { %s1710_s15 = smov 0   ;;  %s1712_s16 = smov 0   ;;  %s1948_s0 = inlined_call_operand.vmem [shape: bf16[128,1024], index: 0, kind: input, shape index: {}]   ;;  %s1949_s1 = inlined_call_operand.vmem [shape: bf16[1024,256], index: 1, kind: input, shape index: {}]   ;;  %s1950_s2 = inlined_call_operand.vmem [shape: f32[1,256], index: 2, kind: input, shape index: {}]   ;;  %s1951_s3 = inlined_call_operand.vmem [shape: f32[128,256], index: 3, kind: input, shape index: {}]   ;;  %s1952_s4 = inlined_call_operand.vmem [shape: f32[128,256], index: 4, kind: output, shape index: {}]  }
   0x1   :  { %s1714_s17 = smov 0   ;;  %s1716_s18 = smov 0  }
   0x2   :  { %s1718_s19 = smov 0   ;;  %s1720_s20 = smov 0  }
   0x3   :  { %s1722_s21 = smov 0  }
   0x4 LB: > { %s26_s22 = sadd.s32 1, %s1674_s19  ;;  %s33_s23 = sadd.s32 1, %s1678_s20  ;;  %s1682_s21 = sphi %s1722_s21, %s14_s21   ;;  %s1678_s20 = sphi %s1720_s20, %s1958_s20   ;;  %s1674_s19 = sphi %s1718_s19, %s1957_s19   ;;  %s1670_s18 = sphi %s1716_s18, %s1956_s18   ;;  %s1666_s17 = sphi %s1714_s17, %s1955_s17   ;;  %s1662_s16 = sphi %s1712_s16, %s1954_s16   ;;  %s1658_s15 = sphi %s1710_s15, %s1953_s15  }
   0x5   : > { %p27_p0 = scmp.ge.s32.totalorder %s26_s22, 2  ;;  %p49_p1 = scmp.ne.s32.totalorder %s1662_s16, %s1658_s15 }
   0x6   : > { %p50_p2 = scmp.eq.s32.totalorder %s1682_s21, 0  ;;  %s42_s27 = sadd.s32 1, %s1662_s16 }
   0x7   : > { %s1960_s22 = smov (%p27_p0, %s26_s22), 0  ;;  %s1962_s23 = smov (!%p27_p0, %s33_s23), %s1678_s20 }
   0x8   : > { %p51_p3 = por %p50_p2, %p49_p1  ;;  %p35_p4 = scmp.ge.s32.totalorder %s1962_s23, 2 }
   0x9   : > { %s38_s24 = ssub.s32 %s1674_s19, %s1960_s22  ;;  %p1330_p6 = scmp.ge.s32.totalorder %s1682_s21, 4 }
   0xa   : > { %s1964_s23 = smov (%p35_p4, %s1962_s23), 0 }
   0xb   : > { %s37_s25 = ssub.s32 %s1678_s20, %s1964_s23  ;;  %193 = sbr.rel (%p1330_p6) target bundleno = 33 (0x21), region = 20 }
   0xc   : > { %s39_s26 = sor.u32 %s38_s24, %s37_s25 }
   0xd   : > { %p40_p5 = scmp.eq.s32.totalorder %s39_s26, 0 }
   0xf   : > { %s1761_s28 = scalar_select %p40_p5, %s1662_s16, %s42_s27  }
  0x12   : > { %196 = sbr.rel (!%p51_p3) target bundleno = 33 (0x21), region = 24  ;;  %s198_s29 = sand.u32 (%p51_p3), 1, %s1662_s16  }
  0x13   : > { %s1333_s30 = sshll.u32 (%p51_p3), %s1674_s19, 2  ;;  %s1331_s5 = sshll.u32 (%p51_p3), %s198_s29, 7 }
  0x14   : > { %s1431_s6 = sshll.u32 (%p51_p3), %s1678_s20, 6  ;;  %s200_s12 = scalar_lea.vmem (%p51_p3), [#allocation3], %s1331_s5 }
  0x15   : > { %s204_s7 = sadd.s32 (%p51_p3), %s1431_s6, %s1333_s30 }
  0x16   : > { %s1335_s8 = sshll.u32 (%p51_p3), %s204_s7, 2 }
  0x17   : > { %s1770_s11 = scalar_lea.vmem (%p51_p3), %s1948_s0, %s1335_s8 }
  0x18   : > { %v219_v0 = vld [vmem:[%s1770_s11] sm:$0xff] (%p51_p3)  ;;  %v221_v1 = vld [vmem:[%s1770_s11 + $0x8] sm:$0xff] (%p51_p3) }
  0x19   : > { %v223_v2 = vld [vmem:[%s1770_s11 + $0x20] sm:$0xff]  ;;  %220 = vst [vmem:[%s200_s12] sm:$0xff] %v219_v0  ;;  %222 = vst [vmem:[%s200_s12 + $0x8] sm:$0xff] %v221_v1  ;;  %v225_v3 = vld [vmem:[%s1770_s11 + $0x28] sm:$0xff] }
  0x1a   : > { %224 = vst [vmem:[%s200_s12 + $0x10] sm:$0xff] %v223_v2  ;;  %v227_v4 = vld [vmem:[%s1770_s11 + $0x40] sm:$0xff]  ;;  %v229_v5 = vld [vmem:[%s1770_s11 + $0x48] sm:$0xff]  ;;  %226 = vst [vmem:[%s200_s12 + $0x18] sm:$0xff] %v225_v3 }
  0x1b   : > { %228 = vst [vmem:[%s200_s12 + $0x20] sm:$0xff] %v227_v4  ;;  %230 = vst [vmem:[%s200_s12 + $0x28] sm:$0xff] %v229_v5  ;;  %v231_v6 = vld [vmem:[%s1770_s11 + $0x60] sm:$0xff]  ;;  %v233_v7 = vld [vmem:[%s1770_s11 + $0x68] sm:$0xff] }
  0x1c   : > { %v235_v8 = vld [vmem:[%s1770_s11 + $0x80] sm:$0xff]  ;;  %232 = vst [vmem:[%s200_s12 + $0x30] sm:$0xff] %v231_v6  ;;  %234 = vst [vmem:[%s200_s12 + $0x38] sm:$0xff] %v233_v7  ;;  %v237_v9 = vld [vmem:[%s1770_s11 + $0x88] sm:$0xff] }
  0x1d   : > { %236 = vst [vmem:[%s200_s12 + $0x40] sm:$0xff] %v235_v8  ;;  %v239_v10 = vld [vmem:[%s1770_s11 + $0xa0] sm:$0xff]  ;;  %v241_v11 = vld [vmem:[%s1770_s11 + $0xa8] sm:$0xff]  ;;  %238 = vst [vmem:[%s200_s12 + $0x48] sm:$0xff] %v237_v9 }
  0x1e   : > { %240 = vst [vmem:[%s200_s12 + $0x50] sm:$0xff] %v239_v10  ;;  %242 = vst [vmem:[%s200_s12 + $0x58] sm:$0xff] %v241_v11  ;;  %v243_v12 = vld [vmem:[%s1770_s11 + $0xc0] sm:$0xff]  ;;  %v245_v13 = vld [vmem:[%s1770_s11 + $0xc8] sm:$0xff] }
  0x1f   : > { %v247_v14 = vld [vmem:[%s1770_s11 + $0xe0] sm:$0xff]  ;;  %244 = vst [vmem:[%s200_s12 + $0x60] sm:$0xff] %v243_v12  ;;  %246 = vst [vmem:[%s200_s12 + $0x68] sm:$0xff] %v245_v13  ;;  %v249_v15 = vld [vmem:[%s1770_s11 + $0xe8] sm:$0xff] }
  0x20   : > { %248 = vst [vmem:[%s200_s12 + $0x70] sm:$0xff] %v247_v14  ;;  %250 = vst [vmem:[%s200_s12 + $0x78] sm:$0xff] %v249_v15 }
  0x21 PF: > { %p1336_p7 = scmp.ge.s32.totalorder %s1682_s21, 1  ;;  %p285_p8 = scmp.lt.s32.totalorder %s1682_s21, 5 }
  0x23   : > { %p286_p9 = pnand %p1336_p7, %p285_p8 }
  0x24   : > { %s292_s13 = sand.u32 (!%p286_p9), 1, %s1658_s15   ;;  %s1338_s14 = sshll.u32 (!%p286_p9), %s1666_s17, 6 }
  0x25   : > { %289 = sbr.rel (%p286_p9) target bundleno = 376 (0x178), region = 55  ;;  %s1337_s24 = sshll.u32 (!%p286_p9), %s292_s13, 7 }
  0x26   : > { %p350_p10 = scmp.lt.s32.totalorder (!%p286_p9), %s1338_s14, 127  ;;  %s1341_s25 = sshll.u32 (!%p286_p9), %s1670_s18, 3 }
  0x27   : > { %p367_p11 = scmp.lt.s32.totalorder (!%p286_p9), %s1341_s25, 15  ;;  %s1808_s18 = scalar_lea.vmem (!%p286_p9), [#allocation3], %s1337_s24 }
  0x28   : > { %p1347_p12 = scmp.ne.s32.totalorder (!%p286_p9), %s1666_s17, 0 }
  0x2c   : > { %s1966_s14 = smov (!%p350_p10, %s1338_s14), 127  ;;  %s1968_s25 = smov (!%p367_p11, %s1341_s25), 15 }
  0x2d   : > { %s1432_s26 = sshll.u32 %s1966_s14, 3  ;;  %s1433_s5 = sshll.u32 %s1968_s25, 4  ;;  %v1684_v16 = vmov (!%p1347_p12), 0.0  }
  0x2e   : > { %s1796_s30 = scalar_lea.vmem %s1949_s1, %s1432_s26  ;;  %s1801_s8 = scalar_lea.vmem %s1951_s3, %s1433_s5  ;;  %393 = vst [vmem:[#allocation2] sm:$0xff] (!%p1347_p12), %v1684_v16  ;;  %394 = vst [vmem:[#allocation2 + $0x8] sm:$0xff] (!%p1347_p12), %v1684_v16 }
  0x2f   : > { %s1806_s10 = scalar_lea.vmem %s1952_s4, %s1433_s5  ;;  %392 = sbr.rel (%p1347_p12) target bundleno = 54 (0x36), region = 63  ;;  %395 = vst [vmem:[#allocation2 + $0x10] sm:$0xff] (!%p1347_p12), %v1684_v16  ;;  %396 = vst [vmem:[#allocation2 + $0x18] sm:$0xff] (!%p1347_p12), %v1684_v16 }
  0x30   : > { %397 = vst [vmem:[#allocation2 + $0x20] sm:$0xff] (!%p1347_p12), %v1684_v16  ;;  %398 = vst [vmem:[#allocation2 + $0x28] sm:$0xff] (!%p1347_p12), %v1684_v16 }
  0x31   : > { %399 = vst [vmem:[#allocation2 + $0x30] sm:$0xff] (!%p1347_p12), %v1684_v16  ;;  %400 = vst [vmem:[#allocation2 + $0x38] sm:$0xff] (!%p1347_p12), %v1684_v16 }
  0x32   : > { %401 = vst [vmem:[#allocation2 + $0x40] sm:$0xff] (!%p1347_p12), %v1684_v16  ;;  %402 = vst [vmem:[#allocation2 + $0x48] sm:$0xff] (!%p1347_p12), %v1684_v16 }
  0x33   : > { %403 = vst [vmem:[#allocation2 + $0x50] sm:$0xff] (!%p1347_p12), %v1684_v16  ;;  %404 = vst [vmem:[#allocation2 + $0x58] sm:$0xff] (!%p1347_p12), %v1684_v16 }
  0x34   : > { %405 = vst [vmem:[#allocation2 + $0x60] sm:$0xff] (!%p1347_p12), %v1684_v16  ;;  %406 = vst [vmem:[#allocation2 + $0x68] sm:$0xff] (!%p1347_p12), %v1684_v16 }
  0x35   : > { %407 = vst [vmem:[#allocation2 + $0x70] sm:$0xff] (!%p1347_p12), %v1684_v16  ;;  %408 = vst [vmem:[#allocation2 + $0x78] sm:$0xff] (!%p1347_p12), %v1684_v16 }
  0x36 PF: > { %v1508_v17 = vld [vmem:[%s1796_s30 + $0x4] ss:$8 sps:$4 sm:$0xff]   ;;  %v1512_v19 = vld [vmem:[%s1796_s30] ss:$8 sps:$4 sm:$0xff]   ;;  %v1514_v21 = vld [vmem:[%s1796_s30 + $0x14] ss:$8 sps:$4 sm:$0xff]  }
  0x37   : > { %v1510_v18 = vld [vmem:[%s1796_s30 + $0x104] ss:$8 sps:$4 sm:$0xff]   ;;  %905 = vmatprep.subr.bf16.mxu1 %v1508_v17  ;;  %v1513_v20 = vld [vmem:[%s1796_s30 + $0x100] ss:$8 sps:$4 sm:$0xff]   ;;  %v1516_v22 = vld [vmem:[%s1796_s30 + $0x114] ss:$8 sps:$4 sm:$0xff]  }
  0x38   : > { %978 = vmatprep.subr.bf16.mxu0 %v1510_v18  ;;  %906 = vmatpush1.bf16.msra.mxu1 %v1512_v19  ;;  %v1518_v23 = vld [vmem:[%s1796_s30 + $0x10] ss:$8 sps:$4 sm:$0xff]   ;;  %v1520_v25 = vld [vmem:[%s1796_s30 + $0x24] ss:$8 sps:$4 sm:$0xff]   ;;  %v1524_v27 = vld [vmem:[%s1796_s30 + $0x20] ss:$8 sps:$4 sm:$0xff]  }
  0x39   : > { %979 = vmatpush1.bf16.msra.mxu0 %v1513_v20  ;;  %907 = vmatprep.subr.bf16.mxu1 %v1514_v21  ;;  %v1519_v24 = vld [vmem:[%s1796_s30 + $0x110] ss:$8 sps:$4 sm:$0xff]   ;;  %v1522_v26 = vld [vmem:[%s1796_s30 + $0x124] ss:$8 sps:$4 sm:$0xff]   ;;  %v1525_v28 = vld [vmem:[%s1796_s30 + $0x120] ss:$8 sps:$4 sm:$0xff]  }
  0x3a   : > { %980 = vmatprep.subr.bf16.mxu0 %v1516_v22  ;;  %v1526_v29 = vld [vmem:[%s1796_s30 + $0x34] ss:$8 sps:$4 sm:$0xff]   ;;  %v1530_v31 = vld [vmem:[%s1796_s30 + $0x30] ss:$8 sps:$4 sm:$0xff]   ;;  %v1532_v33 = vld [vmem:[%s1796_s30 + $0x44] ss:$8 sps:$4 sm:$0xff]  }
  0x3b   : > { %v1528_v30 = vld [vmem:[%s1796_s30 + $0x134] ss:$8 sps:$4 sm:$0xff]   ;;  %v1531_v32 = vld [vmem:[%s1796_s30 + $0x130] ss:$8 sps:$4 sm:$0xff]   ;;  %v1534_v34 = vld [vmem:[%s1796_s30 + $0x144] ss:$8 sps:$4 sm:$0xff]  }
  0x3c   : > { %908 = vmatpush1.bf16.msra.mxu1 %v1518_v23  ;;  %v1536_v35 = vld [vmem:[%s1796_s30 + $0x40] ss:$8 sps:$4 sm:$0xff]   ;;  %v1538_v37 = vld [vmem:[%s1796_s30 + $0x54] ss:$8 sps:$4 sm:$0xff]   ;;  %v1542_v39 = vld [vmem:[%s1796_s30 + $0x50] ss:$8 sps:$4 sm:$0xff]  }
  0x3d   : > { %981 = vmatpush1.bf16.msra.mxu0 %v1519_v24  ;;  %909 = vmatprep.subr.bf16.mxu1 %v1520_v25  ;;  %v1537_v36 = vld [vmem:[%s1796_s30 + $0x140] ss:$8 sps:$4 sm:$0xff]   ;;  %v1540_v38 = vld [vmem:[%s1796_s30 + $0x154] ss:$8 sps:$4 sm:$0xff]   ;;  %v1543_v40 = vld [vmem:[%s1796_s30 + $0x150] ss:$8 sps:$4 sm:$0xff]  }
  0x3e   : > { %982 = vmatprep.subr.bf16.mxu0 %v1522_v26  ;;  %v1544_v41 = vld [vmem:[%s1796_s30 + $0x64] ss:$8 sps:$4 sm:$0xff]   ;;  %v1548_v43 = vld [vmem:[%s1796_s30 + $0x60] ss:$8 sps:$4 sm:$0xff]   ;;  %v1550_v45 = vld [vmem:[%s1796_s30 + $0x74] ss:$8 sps:$4 sm:$0xff]  }
  0x3f   : > { %v1546_v42 = vld [vmem:[%s1796_s30 + $0x164] ss:$8 sps:$4 sm:$0xff]   ;;  %v1549_v44 = vld [vmem:[%s1796_s30 + $0x160] ss:$8 sps:$4 sm:$0xff]   ;;  %v1552_v46 = vld [vmem:[%s1796_s30 + $0x174] ss:$8 sps:$4 sm:$0xff]  }
  0x40   : > { %910 = vmatpush1.bf16.msra.mxu1 %v1524_v27  ;;  %v1554_v47 = vld [vmem:[%s1796_s30 + $0x70] ss:$8 sps:$4 sm:$0xff]   ;;  %v1556_v49 = vld [vmem:[%s1796_s30 + $0x84] ss:$8 sps:$4 sm:$0xff]   ;;  %v1560_v51 = vld [vmem:[%s1796_s30 + $0x80] ss:$8 sps:$4 sm:$0xff]  }
  0x41   : > { %983 = vmatpush1.bf16.msra.mxu0 %v1525_v28  ;;  %911 = vmatprep.subr.bf16.mxu1 %v1526_v29  ;;  %v1555_v48 = vld [vmem:[%s1796_s30 + $0x170] ss:$8 sps:$4 sm:$0xff]   ;;  %v1558_v50 = vld [vmem:[%s1796_s30 + $0x184] ss:$8 sps:$4 sm:$0xff]   ;;  %v1561_v52 = vld [vmem:[%s1796_s30 + $0x180] ss:$8 sps:$4 sm:$0xff]  }
  0x42   : > { %984 = vmatprep.subr.bf16.mxu0 %v1528_v30  ;;  %v1562_v53 = vld [vmem:[%s1796_s30 + $0x94] ss:$8 sps:$4 sm:$0xff]   ;;  %v1566_v55 = vld [vmem:[%s1796_s30 + $0x90] ss:$8 sps:$4 sm:$0xff]   ;;  %v1568_v57 = vld [vmem:[%s1796_s30 + $0xa4] ss:$8 sps:$4 sm:$0xff]  }
  0x43   : > { %v1564_v54 = vld [vmem:[%s1796_s30 + $0x194] ss:$8 sps:$4 sm:$0xff]   ;;  %v1567_v56 = vld [vmem:[%s1796_s30 + $0x190] ss:$8 sps:$4 sm:$0xff]   ;;  %v1570_v58 = vld [vmem:[%s1796_s30 + $0x1a4] ss:$8 sps:$4 sm:$0xff]  }
  0x44   : > { %912 = vmatpush1.bf16.msra.mxu1 %v1530_v31  ;;  %v1572_v59 = vld [vmem:[%s1796_s30 + $0xa0] ss:$8 sps:$4 sm:$0xff]   ;;  %v1574_v61 = vld [vmem:[%s1796_s30 + $0xb4] ss:$8 sps:$4 sm:$0xff]   ;;  %v1578_v63 = vld [vmem:[%s1796_s30 + $0xb0] ss:$8 sps:$4 sm:$0xff]  }
  0x45   : > { %985 = vmatpush1.bf16.msra.mxu0 %v1531_v32  ;;  %913 = vmatprep.subr.bf16.mxu1 %v1532_v33  ;;  %v1573_v60 = vld [vmem:[%s1796_s30 + $0x1a0] ss:$8 sps:$4 sm:$0xff]   ;;  %v1576_v62 = vld [vmem:[%s1796_s30 + $0x1b4] ss:$8 sps:$4 sm:$0xff]   ;;  %v1579_v0 = vld [vmem:[%s1796_s30 + $0x1b0] ss:$8 sps:$4 sm:$0xff]  }
  0x46   : > { %986 = vmatprep.subr.bf16.mxu0 %v1534_v34  ;;  %v1580_v1 = vld [vmem:[%s1796_s30 + $0xc4] ss:$8 sps:$4 sm:$0xff]   ;;  %v1584_v5 = vld [vmem:[%s1796_s30 + $0xc0] ss:$8 sps:$4 sm:$0xff]   ;;  %v1586_v7 = vld [vmem:[%s1796_s30 + $0xd4] ss:$8 sps:$4 sm:$0xff]  }
  0x47   : > { %v1606_v2 = vld [vmem:[%s1808_s18 + $0x4] ss:$16 sps:$4 sm:$0xff]   ;;  %v1609_v4 = vld [vmem:[%s1808_s18 + $0xc] ss:$16 sps:$4 sm:$0xff]   ;;  %v1585_v6 = vld [vmem:[%s1796_s30 + $0x1c0] ss:$8 sps:$4 sm:$0xff]  }
  0x48   : > { %914 = vmatpush1.bf16.msra.mxu1 %v1536_v35  ;;  %v1582_v3 = vld [vmem:[%s1796_s30 + $0x1c4] ss:$8 sps:$4 sm:$0xff]   ;;  %937 = vmatprep.mubr.bf16.mxu1 %v1606_v2  ;;  %v1588_v8 = vld [vmem:[%s1796_s30 + $0x1d4] ss:$8 sps:$4 sm:$0xff]   ;;  %v1590_v9 = vld [vmem:[%s1796_s30 + $0xd0] ss:$8 sps:$4 sm:$0xff]  }
  0x49   : > { %987 = vmatpush1.bf16.msra.mxu0 %v1537_v36  ;;  %915 = vmatprep.subr.bf16.mxu1 %v1538_v37  ;;  %v1591_v10 = vld [vmem:[%s1796_s30 + $0x1d0] ss:$8 sps:$4 sm:$0xff]   ;;  %v1592_v11 = vld [vmem:[%s1796_s30 + $0xe4] ss:$8 sps:$4 sm:$0xff]   ;;  %v1596_v13 = vld [vmem:[%s1796_s30 + $0xe0] ss:$8 sps:$4 sm:$0xff]  }
  0x4a   : > { %988 = vmatprep.subr.bf16.mxu0 %v1540_v38  ;;  %1010 = vmatprep.mubr.bf16.mxu0 %v1609_v4  ;;  %v1594_v12 = vld [vmem:[%s1796_s30 + $0x1e4] ss:$8 sps:$4 sm:$0xff]   ;;  %v1597_v14 = vld [vmem:[%s1796_s30 + $0x1e0] ss:$8 sps:$4 sm:$0xff]   ;;  %v1598_v15 = vld [vmem:[%s1796_s30 + $0xf4] ss:$8 sps:$4 sm:$0xff]  }
  0x4b   : > { %v1600_v16 = vld [vmem:[%s1796_s30 + $0x1f4] ss:$8 sps:$4 sm:$0xff]   ;;  %v1602_v17 = vld [vmem:[%s1796_s30 + $0xf0] ss:$8 sps:$4 sm:$0xff]   ;;  %v425_v34 = vld [vmem:[#allocation2] sm:$0xff]  ;;  %p1428_p13 = scmp.ne.s32.totalorder %s1666_s17, 1 }
  0x4c   : > { %916 = vmatpush1.bf16.msra.mxu1 %v1542_v39  ;;  %v1603_v18 = vld [vmem:[%s1796_s30 + $0x1f0] ss:$8 sps:$4 sm:$0xff]   ;;  %v1610_v21 = vld [vmem:[%s1808_s18 + $0x24] ss:$16 sps:$4 sm:$0xff]   ;;  %v1612_v22 = vld [vmem:[%s1808_s18 + $0x2c] ss:$16 sps:$4 sm:$0xff]  }
  0x4d   : > { %989 = vmatpush1.bf16.msra.mxu0 %v1543_v40  ;;  %917 = vmatprep.subr.bf16.mxu1 %v1544_v41  ;;  %v1604_v19 = vld [vmem:[%s1808_s18] ss:$16 sps:$4 sm:$0xff]   ;;  %v1607_v20 = vld [vmem:[%s1808_s18 + $0x8] ss:$16 sps:$4 sm:$0xff]   ;;  %v1616_v25 = vld [vmem:[%s1808_s18 + $0x44] ss:$16 sps:$4 sm:$0xff]  }
  0x4e   : > { %990 = vmatprep.subr.bf16.mxu0 %v1546_v42  ;;  %v1614_v23 = vld [vmem:[%s1808_s18 + $0x20] ss:$16 sps:$4 sm:$0xff]   ;;  %v1615_v24 = vld [vmem:[%s1808_s18 + $0x28] ss:$16 sps:$4 sm:$0xff]   ;;  %v1618_v26 = vld [vmem:[%s1808_s18 + $0x4c] ss:$16 sps:$4 sm:$0xff]  }
  0x4f   : > { %v1620_v27 = vld [vmem:[%s1808_s18 + $0x40] ss:$16 sps:$4 sm:$0xff]   ;;  %v1621_v28 = vld [vmem:[%s1808_s18 + $0x48] ss:$16 sps:$4 sm:$0xff]   ;;  %v1622_v29 = vld [vmem:[%s1808_s18 + $0x64] ss:$16 sps:$4 sm:$0xff]  }
  0x50   : > { %918 = vmatpush1.bf16.msra.mxu1 %v1548_v43  ;;  %v1624_v30 = vld [vmem:[%s1808_s18 + $0x6c] ss:$16 sps:$4 sm:$0xff]   ;;  %v1626_v31 = vld [vmem:[%s1808_s18 + $0x60] ss:$16 sps:$4 sm:$0xff]   ;;  %v1627_v32 = vld [vmem:[%s1808_s18 + $0x68] ss:$16 sps:$4 sm:$0xff]  }
  0x51   : > { %991 = vmatpush1.bf16.msra.mxu0 %v1549_v44  ;;  %919 = vmatprep.subr.bf16.mxu1 %v1550_v45  ;;  %v426_v38 = vld [vmem:[#allocation2 + $0x8] sm:$0xff]  ;;  %v427_v42 = vld [vmem:[#allocation2 + $0x10] sm:$0xff] }
  0x52   : > { %992 = vmatprep.subr.bf16.mxu0 %v1552_v46 }
  0x54   : > { %920 = vmatpush1.bf16.msra.mxu1 %v1554_v47  ;;  %v428_v47 = vld [vmem:[#allocation2 + $0x18] sm:$0xff] }
  0x55   : > { %993 = vmatpush1.bf16.msra.mxu0 %v1555_v48  ;;  %921 = vmatprep.subr.bf16.mxu1 %v1556_v49 }
  0x56   : > { %994 = vmatprep.subr.bf16.mxu0 %v1558_v50 }
  0x58   : > { %922 = vmatpush1.bf16.msra.mxu1 %v1560_v51 }
  0x59   : > { %995 = vmatpush1.bf16.msra.mxu0 %v1561_v52  ;;  %923 = vmatprep.subr.bf16.mxu1 %v1562_v53 }
  0x5a   : > { %996 = vmatprep.subr.bf16.mxu0 %v1564_v54  ;;  %v429_v54 = vld [vmem:[#allocation2 + $0x20] sm:$0xff] }
  0x5c   : > { %924 = vmatpush1.bf16.msra.mxu1 %v1566_v55 }
  0x5d   : > { %997 = vmatpush1.bf16.msra.mxu0 %v1567_v56  ;;  %925 = vmatprep.subr.bf16.mxu1 %v1568_v57 }
  0x5e   : > { %998 = vmatprep.subr.bf16.mxu0 %v1570_v58  ;;  %v430_v58 = vld [vmem:[#allocation2 + $0x28] sm:$0xff] }
  0x60   : > { %926 = vmatpush1.bf16.msra.mxu1 %v1572_v59 }
  0x61   : > { %999 = vmatpush1.bf16.msra.mxu0 %v1573_v60  ;;  %927 = vmatprep.subr.bf16.mxu1 %v1574_v61 }
  0x62   : > { %1000 = vmatprep.subr.bf16.mxu0 %v1576_v62  ;;  %v431_v62 = vld [vmem:[#allocation2 + $0x30] sm:$0xff] }
  0x64   : > { %928 = vmatpush1.bf16.msra.mxu1 %v1578_v63 }
  0x65   : > { %1001 = vmatpush1.bf16.msra.mxu0 %v1579_v0  ;;  %929 = vmatprep.subr.bf16.mxu1 %v1580_v1 }
  0x66   : > { %1002 = vmatprep.subr.bf16.mxu0 %v1582_v3  ;;  %v432_v3 = vld [vmem:[#allocation2 + $0x38] sm:$0xff] }
  0x68   : > { %930 = vmatpush1.bf16.msra.mxu1 %v1584_v5 }
  0x69   : > { %1003 = vmatpush1.bf16.msra.mxu0 %v1585_v6  ;;  %931 = vmatprep.subr.bf16.mxu1 %v1586_v7 }
  0x6a   : > { %1004 = vmatprep.subr.bf16.mxu0 %v1588_v8 }
  0x6c   : > { %932 = vmatpush1.bf16.msra.mxu1 %v1590_v9 }
  0x6d   : > { %1005 = vmatpush1.bf16.msra.mxu0 %v1591_v10  ;;  %933 = vmatprep.subr.bf16.mxu1 %v1592_v11  ;;  %v433_v10 = vld [vmem:[#allocation2 + $0x40] sm:$0xff] }
  0x6e   : > { %1006 = vmatprep.subr.bf16.mxu0 %v1594_v12 }
  0x70   : > { %934 = vmatpush1.bf16.msra.mxu1 %v1596_v13 }
  0x71   : > { %1007 = vmatpush1.bf16.msra.mxu0 %v1597_v14  ;;  %935 = vmatprep.subr.bf16.mxu1 %v1598_v15  ;;  %v434_v14 = vld [vmem:[#allocation2 + $0x48] sm:$0xff] }
  0x72   : > { %1008 = vmatprep.subr.bf16.mxu0 %v1600_v16 }
  0x74   : > { %936 = vmatpush1.bf16.msra.mxu1 %v1602_v17 }
  0x75   : > { %1009 = vmatpush1.bf16.msra.mxu0 %v1603_v18  ;;  %v435_v18 = vld [vmem:[#allocation2 + $0x50] sm:$0xff] }
  0x77   : > { %938 = vmatmul.mubr.bf16.vlgmr.msra.gmra.mrb[0].mxu1 %v1604_v19 }
  0x78   : > { %1011 = vmatmul.mubr.bf16.vlgmr.msra.gmra.mrb[0].mxu0 %v1607_v20  ;;  %947 = vmatprep.mubr.bf16.mxu1 %v1610_v21 }
  0x79   : > { %1020 = vmatprep.mubr.bf16.mxu0 %v1612_v22 }
  0x7f   : > { %948 = vmatmul.mubr.bf16.gmra.mrb[4].mxu1 %v1614_v23  ;;  %v436_v23 = vld [vmem:[#allocation2 + $0x58] sm:$0xff] }
  0x80   : > { %1021 = vmatmul.mubr.bf16.gmra.mrb[4].mxu0 %v1615_v24  ;;  %957 = vmatprep.mubr.bf16.mxu1 %v1616_v25 }
  0x81   : > { %1030 = vmatprep.mubr.bf16.mxu0 %v1618_v26 }
  0x87   : > { %958 = vmatmul.mubr.bf16.gmra.mrb[8].mxu1 %v1620_v27 }
  0x88   : > { %1031 = vmatmul.mubr.bf16.gmra.mrb[8].mxu0 %v1621_v28  ;;  %967 = vmatprep.mubr.bf16.mxu1 %v1622_v29 }
  0x89   : > { %1040 = vmatprep.mubr.bf16.mxu0 %v1624_v30  ;;  %v437_v30 = vld [vmem:[#allocation2 + $0x60] sm:$0xff] }
  0x8f   : > { %968 = vmatmul.mubr.bf16.gmra.mrb[12].mxu1 %v1626_v31 }
  0x90   : > { %1041 = vmatmul.mubr.bf16.gmra.mrb[12].mxu0 %v1627_v32 }
 0x14a   : > { %v939_v33 = vpop.f32.mrb[0].mxu1 }
 0x14b   : > { %v1012_v35 = vpop.f32.mrb[0].mxu0  ;;  %v941_v37 = vpop.f32.mrb[1].mxu1 }
 0x14c   : > { %v1013_v36 = vadd.f32 %v1012_v35, %v939_v33  ;;  %v1014_v39 = vpop.f32.mrb[1].mxu0  ;;  %v943_v41 = vpop.f32.mrb[2].mxu1 }
 0x14d   : > { %v1015_v40 = vadd.f32 %v1014_v39, %v941_v37  ;;  %v1016_v43 = vpop.f32.mrb[2].mxu0  ;;  %v945_v46 = vpop.f32.mrb[3].mxu1 }
 0x14e   : > { %v1051_v44 = vadd.f32 %v1013_v36, %v425_v34  ;;  %v1017_v45 = vadd.f32 %v1016_v43, %v943_v41  ;;  %v1018_v48 = vpop.f32.mrb[3].mxu0  ;;  %v438_v34 = vld [vmem:[#allocation2 + $0x68] sm:$0xff]  ;;  %v440_v43 = vld [vmem:[#allocation2 + $0x78] sm:$0xff] }
 0x14f   : > { %v1052_v49 = vadd.f32 %v1015_v40, %v426_v38  ;;  %v1019_v50 = vadd.f32 %v1018_v48, %v945_v46  ;;  %v439_v38 = vld [vmem:[#allocation2 + $0x70] sm:$0xff] }
 0x150   : > { %1067 = vst [vmem:[#allocation2] sm:$0xff] %v1051_v44  ;;  %v1053_v51 = vadd.f32 %v1017_v45, %v427_v42 }
 0x151   : > { %1068 = vst [vmem:[#allocation2 + $0x8] sm:$0xff] %v1052_v49  ;;  %v1054_v52 = vadd.f32 %v1019_v50, %v428_v47  ;;  %v1105_v49 = vlaneseq (!%p1428_p13) }
 0x152   : > { %1069 = vst [vmem:[#allocation2 + $0x10] sm:$0xff] %v1053_v51  ;;  %v949_v53 = vpop.f32.mrb[4].mxu1  ;;  %v1103_v51 = vld [vmem:[%s1950_s2] sm:$0x3] (!%p1428_p13) }
 0x153   : > { %1070 = vst [vmem:[#allocation2 + $0x18] sm:$0xff] %v1054_v52  ;;  %v1022_v55 = vpop.f32.mrb[4].mxu0  ;;  %v951_v57 = vpop.f32.mrb[5].mxu1  ;;  %v1106_v50 = vshrl.u32 (!%p1428_p13), %v1105_v49, 7 }
 0x154   : > { %v1023_v56 = vadd.f32 %v1022_v55, %v949_v53  ;;  %v1024_v59 = vpop.f32.mrb[5].mxu0  ;;  %v953_v61 = vpop.f32.mrb[6].mxu1 }
 0x155   : > { %v1025_v60 = vadd.f32 %v1024_v59, %v951_v57  ;;  %v1026_v63 = vpop.f32.mrb[6].mxu0  ;;  %v955_v2 = vpop.f32.mrb[7].mxu1  ;;  %v1107_v53 = vsub.s32 (!%p1428_p13), 0, %v1106_v50  ;;  %v1111_v55 = vsub.s32 (!%p1428_p13), 1, %v1106_v50  ;;  %v1131_v57 = vld [vmem:[%s1801_s8] sm:$0xff] (!%p1428_p13)  ;;  %v1133_v59 = vld [vmem:[%s1801_s8 + $0x10] sm:$0xff] (!%p1428_p13) }
 0x156   : > { %v1055_v0 = vadd.f32 %v1023_v56, %v429_v54  ;;  %v1027_v1 = vadd.f32 %v1026_v63, %v953_v61  ;;  %v1028_v4 = vpop.f32.mrb[7].mxu0  ;;  %v1134_v61 = vld [vmem:[%s1801_s8 + $0x18] sm:$0xff] (!%p1428_p13) }
 0x157   : > { %v1056_v5 = vadd.f32 %v1025_v60, %v430_v58  ;;  %v1029_v6 = vadd.f32 %v1028_v4, %v955_v2  ;;  %v1087_v52 = vld [vmem:[#allocation2] sm:$0xff] (!%p1428_p13)  ;;  %v1132_v58 = vld [vmem:[%s1801_s8 + $0x8] sm:$0xff] (!%p1428_p13)  ;;  %v1108_v63 = vrot.slane (!%p1428_p13), %v1103_v51, %v1107_v53 }
 0x158   : > { %1071 = vst [vmem:[#allocation2 + $0x20] sm:$0xff] %v1055_v0  ;;  %v1057_v7 = vadd.f32 %v1027_v1, %v431_v62  ;;  %v1088_v54 = vld [vmem:[#allocation2 + $0x8] sm:$0xff] (!%p1428_p13)  ;;  %v1112_v0 = vrot.slane (!%p1428_p13), %v1103_v51, %v1111_v55  ;;  %v1135_v4 = vld [vmem:[%s1801_s8 + $0x20] sm:$0xff] (!%p1428_p13) }
 0x159   : > { %1072 = vst [vmem:[#allocation2 + $0x28] sm:$0xff] %v1056_v5  ;;  %v1058_v8 = vadd.f32 %v1029_v6, %v432_v3  ;;  %v1089_v56 = vld [vmem:[#allocation2 + $0x10] sm:$0xff] (!%p1428_p13)  ;;  %v1136_v5 = vld [vmem:[%s1801_s8 + $0x28] sm:$0xff] (!%p1428_p13) }
 0x15a   : > { %1073 = vst [vmem:[#allocation2 + $0x30] sm:$0xff] %v1057_v7  ;;  %v959_v9 = vpop.f32.mrb[8].mxu1  ;;  %v1090_v60 = vld [vmem:[#allocation2 + $0x18] sm:$0xff] (!%p1428_p13)  ;;  %v1137_v6 = vld [vmem:[%s1801_s8 + $0x30] sm:$0xff] (!%p1428_p13)  ;;  %v1115_v7 = vadd.f32 (!%p1428_p13), %v1108_v63, %v1087_v52 }
 0x15b   : > { %1074 = vst [vmem:[#allocation2 + $0x38] sm:$0xff] %v1058_v8  ;;  %v1032_v11 = vpop.f32.mrb[8].mxu0  ;;  %v961_v13 = vpop.f32.mrb[9].mxu1  ;;  %v1116_v8 = vadd.f32 (!%p1428_p13), %v1112_v0, %v1088_v54 }
 0x15c   : > { %v1033_v12 = vadd.f32 %v1032_v11, %v959_v9  ;;  %v1034_v15 = vpop.f32.mrb[9].mxu0  ;;  %v963_v17 = vpop.f32.mrb[10].mxu1  ;;  %v1117_v9 = vadd.f32 (!%p1428_p13), %v1108_v63, %v1089_v56  ;;  %v1138_v11 = vld [vmem:[%s1801_s8 + $0x38] sm:$0xff] (!%p1428_p13) }
 0x15d   : > { %v1035_v16 = vadd.f32 %v1034_v15, %v961_v13  ;;  %v1036_v19 = vpop.f32.mrb[10].mxu0  ;;  %v965_v22 = vpop.f32.mrb[11].mxu1 }
 0x15e   : > { %v1059_v20 = vadd.f32 %v1033_v12, %v433_v10  ;;  %v1037_v21 = vadd.f32 %v1036_v19, %v963_v17  ;;  %v1038_v24 = vpop.f32.mrb[11].mxu0  ;;  %v1118_v10 = vadd.f32 (!%p1428_p13), %v1112_v0, %v1090_v60  ;;  %v1140_v19 = vld [vmem:[%s1801_s8 + $0x48] sm:$0xff] (!%p1428_p13) }
 0x15f   : > { %v1060_v25 = vadd.f32 %v1035_v16, %v434_v14  ;;  %v1039_v26 = vadd.f32 %v1038_v24, %v965_v22  ;;  %v1091_v62 = vld [vmem:[#allocation2 + $0x20] sm:$0xff] (!%p1428_p13)  ;;  %v1148_v24 = vadd.f32 (!%p1428_p13), %v1132_v58, %v1116_v8 }
 0x160   : > { %1075 = vst [vmem:[#allocation2 + $0x40] sm:$0xff] %v1059_v20  ;;  %v1061_v27 = vadd.f32 %v1037_v21, %v435_v18  ;;  %v1092_v1 = vld [vmem:[#allocation2 + $0x28] sm:$0xff] (!%p1428_p13)  ;;  %v1119_v14 = vadd.f32 (!%p1428_p13), %v1108_v63, %v1091_v62  ;;  %v1139_v18 = vld [vmem:[%s1801_s8 + $0x40] sm:$0xff] (!%p1428_p13) }
 0x161   : > { %1076 = vst [vmem:[#allocation2 + $0x48] sm:$0xff] %v1060_v25  ;;  %v1062_v28 = vadd.f32 %v1039_v26, %v436_v23  ;;  %v1093_v2 = vld [vmem:[#allocation2 + $0x30] sm:$0xff] (!%p1428_p13)  ;;  %v1120_v15 = vadd.f32 (!%p1428_p13), %v1112_v0, %v1092_v1  ;;  %v1147_v23 = vadd.f32 (!%p1428_p13), %v1131_v57, %v1115_v7  ;;  %v1149_v25 = vadd.f32 (!%p1428_p13), %v1133_v59, %v1117_v9 }
 0x162   : > { %1077 = vst [vmem:[#allocation2 + $0x50] sm:$0xff] %v1061_v27  ;;  %v969_v29 = vpop.f32.mrb[12].mxu1  ;;  %v1094_v3 = vld [vmem:[#allocation2 + $0x38] sm:$0xff] (!%p1428_p13)  ;;  %v1121_v16 = vadd.f32 (!%p1428_p13), %v1108_v63, %v1093_v2  ;;  %v1150_v26 = vadd.f32 (!%p1428_p13), %v1134_v61, %v1118_v10  ;;  %1164 = vst [vmem:[%s1806_s10 + $0x8] sm:$0xff] (!%p1428_p13), %v1148_v24 }
 0x163   : > { %1078 = vst [vmem:[#allocation2 + $0x58] sm:$0xff] %v1062_v28  ;;  %v1042_v31 = vpop.f32.mrb[12].mxu0  ;;  %v971_v33 = vpop.f32.mrb[13].mxu1  ;;  %v1122_v17 = vadd.f32 (!%p1428_p13), %v1112_v0, %v1094_v3  ;;  %1163 = vst [vmem:[%s1806_s10] sm:$0xff] (!%p1428_p13), %v1147_v23 }
 0x164   : > { %v1043_v32 = vadd.f32 %v1042_v31, %v969_v29  ;;  %v1044_v35 = vpop.f32.mrb[13].mxu0  ;;  %v973_v37 = vpop.f32.mrb[14].mxu1  ;;  %v1152_v31 = vadd.f32 (!%p1428_p13), %v1136_v5, %v1120_v15  ;;  %1165 = vst [vmem:[%s1806_s10 + $0x10] sm:$0xff] (!%p1428_p13), %v1149_v25  ;;  %1166 = vst [vmem:[%s1806_s10 + $0x18] sm:$0xff] (!%p1428_p13), %v1150_v26 }
 0x165   : > { %v1045_v36 = vadd.f32 %v1044_v35, %v971_v33  ;;  %v1046_v39 = vpop.f32.mrb[14].mxu0  ;;  %v975_v42 = vpop.f32.mrb[15].mxu1  ;;  %1086 = sbr.rel (%p1428_p13) target bundleno = 376 (0x178), region = 67  ;;  %v1154_v33 = vadd.f32 (!%p1428_p13), %v1138_v11, %v1122_v17  ;;  %v1142_v35 = vld [vmem:[%s1801_s8 + $0x58] sm:$0xff] (!%p1428_p13) }
 0x166   : > { %v1063_v40 = vadd.f32 %v1043_v32, %v437_v30  ;;  %v1047_v41 = vadd.f32 %v1046_v39, %v973_v37  ;;  %v1048_v44 = vpop.f32.mrb[15].mxu0  ;;  %v1151_v30 = vadd.f32 (!%p1428_p13), %v1135_v4, %v1119_v14  ;;  %v1153_v32 = vadd.f32 (!%p1428_p13), %v1137_v6, %v1121_v16  ;;  %1168 = vst [vmem:[%s1806_s10 + $0x28] sm:$0xff] (!%p1428_p13), %v1152_v31 }
 0x167   : > { %v1064_v45 = vadd.f32 %v1045_v36, %v438_v34  ;;  %v1049_v46 = vadd.f32 %v1048_v44, %v975_v42  ;;  %v1095_v12 = vld [vmem:[#allocation2 + $0x40] sm:$0xff] (!%p1428_p13)  ;;  %v1141_v34 = vld [vmem:[%s1801_s8 + $0x50] sm:$0xff] (!%p1428_p13)  ;;  %1170 = vst [vmem:[%s1806_s10 + $0x38] sm:$0xff] (!%p1428_p13), %v1154_v33 }
 0x168   : > { %1079 = vst [vmem:[#allocation2 + $0x60] sm:$0xff] %v1063_v40  ;;  %v1065_v47 = vadd.f32 %v1047_v41, %v439_v38  ;;  %v1096_v13 = vld [vmem:[#allocation2 + $0x48] sm:$0xff] (!%p1428_p13)  ;;  %v1143_v36 = vld [vmem:[%s1801_s8 + $0x60] sm:$0xff] (!%p1428_p13)  ;;  %v1123_v37 = vadd.f32 (!%p1428_p13), %v1108_v63, %v1095_v12  ;;  %v1145_v42 = vld [vmem:[%s1801_s8 + $0x70] sm:$0xff] (!%p1428_p13) }
 0x169   : > { %1080 = vst [vmem:[#allocation2 + $0x68] sm:$0xff] %v1064_v45  ;;  %v1066_v48 = vadd.f32 %v1049_v46, %v440_v43  ;;  %v1097_v20 = vld [vmem:[#allocation2 + $0x50] sm:$0xff] (!%p1428_p13)  ;;  %v1124_v38 = vadd.f32 (!%p1428_p13), %v1112_v0, %v1096_v13  ;;  %v1144_v41 = vld [vmem:[%s1801_s8 + $0x68] sm:$0xff] (!%p1428_p13)  ;;  %v1146_v43 = vld [vmem:[%s1801_s8 + $0x78] sm:$0xff] (!%p1428_p13) }
 0x16a   : > { %1081 = vst [vmem:[#allocation2 + $0x70] sm:$0xff] %v1065_v47  ;;  %v1098_v21 = vld [vmem:[#allocation2 + $0x58] sm:$0xff] (!%p1428_p13)  ;;  %v1125_v39 = vadd.f32 (!%p1428_p13), %v1108_v63, %v1097_v20  ;;  %1167 = vst [vmem:[%s1806_s10 + $0x20] sm:$0xff] (!%p1428_p13), %v1151_v30 }
 0x16b   : > { %1082 = vst [vmem:[#allocation2 + $0x78] sm:$0xff] %v1066_v48  ;;  %v1126_v40 = vadd.f32 (!%p1428_p13), %v1112_v0, %v1098_v21  ;;  %1169 = vst [vmem:[%s1806_s10 + $0x30] sm:$0xff] (!%p1428_p13), %v1153_v32  ;;  %v1155_v48 = vadd.f32 (!%p1428_p13), %v1139_v18, %v1123_v37  ;;  %v1156_v49 = vadd.f32 (!%p1428_p13), %v1140_v19, %v1124_v38 }
 0x16c   : > { %v1157_v50 = vadd.f32 %v1141_v34, %v1125_v39 }
 0x16d   : > { %v1158_v51 = vadd.f32 %v1142_v35, %v1126_v40  ;;  %1171 = vst [vmem:[%s1806_s10 + $0x40] sm:$0xff] %v1155_v48  ;;  %1172 = vst [vmem:[%s1806_s10 + $0x48] sm:$0xff] %v1156_v49 }
 0x16e   : > { %1173 = vst [vmem:[%s1806_s10 + $0x50] sm:$0xff] %v1157_v50 }
 0x16f   : > { %v1099_v22 = vld [vmem:[#allocation2 + $0x60] sm:$0xff]  ;;  %1174 = vst [vmem:[%s1806_s10 + $0x58] sm:$0xff] %v1158_v51 }
 0x170   : > { %v1100_v27 = vld [vmem:[#allocation2 + $0x68] sm:$0xff]  ;;  %v1127_v44 = vadd.f32 %v1108_v63, %v1099_v22 }
 0x171   : > { %v1101_v28 = vld [vmem:[#allocation2 + $0x70] sm:$0xff]  ;;  %v1128_v45 = vadd.f32 %v1112_v0, %v1100_v27 }
 0x172   : > { %v1102_v29 = vld [vmem:[#allocation2 + $0x78] sm:$0xff]  ;;  %v1129_v46 = vadd.f32 %v1108_v63, %v1101_v28  ;;  %v1159_v52 = vadd.f32 %v1143_v36, %v1127_v44 }
 0x173   : > { %v1130_v47 = vadd.f32 %v1112_v0, %v1102_v29  ;;  %v1160_v53 = vadd.f32 %v1144_v41, %v1128_v45 }
 0x174   : > { %v1161_v54 = vadd.f32 %v1145_v42, %v1129_v46  ;;  %1175 = vst [vmem:[%s1806_s10 + $0x60] sm:$0xff] %v1159_v52 }
 0x175   : > { %v1162_v55 = vadd.f32 %v1146_v43, %v1130_v47  ;;  %1176 = vst [vmem:[%s1806_s10 + $0x68] sm:$0xff] %v1160_v53 }
 0x176   : > { %1177 = vst [vmem:[%s1806_s10 + $0x70] sm:$0xff] %v1161_v54 }
 0x177   : > { %1178 = vst [vmem:[%s1806_s10 + $0x78] sm:$0xff] %v1162_v55 }
 0x178 PF: > { %s14_s21 = sadd.s32 1, %s1682_s21   ;;  %s1953_s15 = smov %s1662_s16 }
 0x179   : > { %p11_p0 = scmp.ge.s32.totalorder %s14_s21, 6   ;;  %s1954_s16 = smov %s1761_s28 }
 0x17a   : > { %s1955_s17 = smov %s1674_s19  ;;  %s1956_s18 = smov %s1678_s20 }
 0x17b   : > { %s1957_s19 = smov %s1960_s22  ;;  %s1958_s20 = smov %s1964_s23 }
 0x17c   :  { %13 = sbr.rel (!%p11_p0) target bundleno = 4 (0x4), region = 111 }

// kernel: sam_encode.25
= control target key start
LH: loop header
LB: loop body
LE: loop exit
PB: predicated region body
PF: predicated region fallthrough
CT: control target
= control target key end

     0   :  { %9 = vsyncpa [#allocation4], 0  ;;  %s2971_s0 = inlined_call_operand.vmem [shape: bf16[2,8,8,128], index: 0, kind: input, shape index: {}]   ;;  %s2972_s1 = inlined_call_operand.vmem [shape: bf16[1152,128], index: 1, kind: input, shape index: {}]   ;;  %s2973_s2 = inlined_call_operand.vmem [shape: f32[1,128], index: 2, kind: input, shape index: {}]   ;;  %s2974_s3 = inlined_call_operand.vmem [shape: f32[1,128], index: 3, kind: input, shape index: {}]   ;;  %s2975_s4 = inlined_call_operand.hbm [shape: f32[2,8,8,128], index: 4, kind: output, shape index: {}]  }
   0x1   :  { %11 = vsyncpa [#allocation4 + $0x1], 0  ;;  %s2336_s15 = smov 0   ;;  %s2338_s16 = smov 0  }
   0x2   :  { %s2340_s17 = smov 0   ;;  %s2342_s18 = smov 0  }
   0x3 LB: > { %s2357_s19 = sadd.s32 4294967295, %s2305_s18   ;;  %s1774_s20 = sadd.s32 4294967294, %s2305_s18   ;;  %s2305_s18 = sphi %s2342_s18, %s2989_s18   ;;  %s2301_s17 = sphi %s2340_s17, %s2988_s17   ;;  %s2297_s16 = sphi %s2338_s16, %s2987_s16   ;;  %s2293_s15 = sphi %s2336_s15, %s2986_s15  }
   0x4   : > { %s2361_s21 = sadd.s32 1, %s2305_s18   ;;  %s113_s22 = sadd.s32 1, %s2301_s17 }
   0x5   : > { %s110_s23 = ssub.s32 %s2305_s18, %s2361_s21  ;;  %p123_p0 = scmp.ne.s32.totalorder %s2301_s17, %s2297_s16 }
   0x6   : > { %p111_p1 = scmp.eq.s32.totalorder %s110_s23, 0  ;;  %p124_p2 = scmp.eq.s32.totalorder %s2357_s19, 1 }
   0x7   : > { %p129_p3 = scmp.ne.s32.totalorder %s2297_s16, %s2293_s15  ;;  %p130_p4 = scmp.eq.s32.totalorder %s1774_s20, 1 }
   0x8   : > { %s2372_s24 = scalar_select %p111_p1, %s2301_s17, %s113_s22  }
   0x9   : > { %p2374_p5 = por %p124_p2, %p123_p0  ;;  %p2378_p6 = por %p130_p4, %p129_p3 }
   0xa   : > { %p1777_p7 = scmp.ge.s32.totalorder %s2305_s18, 1  ;;  %p165_p8 = scmp.lt.s32.totalorder %s2305_s18, 3 }
   0xc   : > { %p166_p9 = pnand %p1777_p7, %p165_p8 }
   0xd   : > { %v2153_v0 = vld [vmem:[%s2972_s1 + $0x40] sm:$0xff] (!%p166_p9)   ;;  %v2307_v3 = vmov (!%p166_p9), 0   ;;  %v2157_v5 = vld [vmem:[%s2972_s1 + $0x48] sm:$0xff] (!%p166_p9)   ;;  %v2161_v9 = vld [vmem:[%s2972_s1 + $0x50] sm:$0xff] (!%p166_p9)   ;;  %p191_p10 = scmp.lt.s32.totalorder (!%p166_p9), %s2357_s19, 1  ;;  %vm306_vm0 = vcmask (!%p166_p9), 1043456  }
   0xe   : > { %169 = sbr.rel (%p166_p9) target bundleno = 690 (0x2b2), region = 36  ;;  %v2154_v1 = vld [vmem:[%s2972_s1 + $0xc0] sm:$0xff] (!%p166_p9)   ;;  %1899 = vmatprep.subr.bf16.mxu0 (!%p166_p9), %v2153_v0  ;;  %197 = vst [vmem:[#allocation2] sm:$0xf] (!%p166_p9), %v2307_v3  ;;  %198 = vst [vmem:[#allocation2 + $0x4] sm:$0x1] (!%p166_p9), %v2307_v3 }
   0xf   : > { %v2155_v2 = vld [vmem:[%s2972_s1] sm:$0xff] (!%p166_p9)   ;;  %199 = vst [vmem:[#allocation2 + $0x8] sm:$0xf] (!%p166_p9), %v2307_v3  ;;  %200 = vst [vmem:[#allocation2 + $0xc] sm:$0x1] (!%p166_p9), %v2307_v3  ;;  %1939 = vmatprep.subr.bf16.mxu1 (!%p166_p9), %v2154_v1  ;;  %v2158_v6 = vld [vmem:[%s2972_s1 + $0xc8] sm:$0xff] (!%p166_p9)  }
  0x10   : > { %201 = vst [vmem:[#allocation2 + $0x10] sm:$0xf] (!%p166_p9), %v2307_v3  ;;  %202 = vst [vmem:[#allocation2 + $0x14] sm:$0x1] (!%p166_p9), %v2307_v3  ;;  %v2156_v4 = vld [vmem:[%s2972_s1 + $0x80] sm:$0xff] (!%p166_p9)   ;;  %1900 = vmatpush3.bf16.msra.mxu0 (!%p166_p9), %v2155_v2  ;;  %v2159_v7 = vld [vmem:[%s2972_s1 + $0x8] sm:$0xff] (!%p166_p9)  }
  0x11   : > { %203 = vst [vmem:[#allocation2 + $0x18] sm:$0xf] (!%p166_p9), %v2307_v3  ;;  %204 = vst [vmem:[#allocation2 + $0x1c] sm:$0x1] (!%p166_p9), %v2307_v3  ;;  %1940 = vmatpush3.bf16.msra.mxu1 (!%p166_p9), %v2156_v4  ;;  %1901 = vmatprep.subr.bf16.mxu0 (!%p166_p9), %v2157_v5  ;;  %v2160_v8 = vld [vmem:[%s2972_s1 + $0x88] sm:$0xff] (!%p166_p9)   ;;  %v2162_v10 = vld [vmem:[%s2972_s1 + $0xd0] sm:$0xff] (!%p166_p9)  }
  0x12   : > { %205 = vst [vmem:[#allocation2 + $0x20] sm:$0xf] (!%p166_p9), %v2307_v3  ;;  %206 = vst [vmem:[#allocation2 + $0x24] sm:$0x1] (!%p166_p9), %v2307_v3  ;;  %1941 = vmatprep.subr.bf16.mxu1 (!%p166_p9), %v2158_v6  ;;  %v2163_v11 = vld [vmem:[%s2972_s1 + $0x10] sm:$0xff] (!%p166_p9)   ;;  %v2165_v13 = vld [vmem:[%s2972_s1 + $0x58] sm:$0xff] (!%p166_p9)  }
  0x13   : > { %207 = vst [vmem:[#allocation2 + $0x28] sm:$0xf] (!%p166_p9), %v2307_v3  ;;  %208 = vst [vmem:[#allocation2 + $0x2c] sm:$0x1] (!%p166_p9), %v2307_v3  ;;  %v2164_v12 = vld [vmem:[%s2972_s1 + $0x90] sm:$0xff] (!%p166_p9)   ;;  %v2166_v14 = vld [vmem:[%s2972_s1 + $0xd8] sm:$0xff] (!%p166_p9)  }
  0x14   : > { %209 = vst [vmem:[#allocation2 + $0x30] sm:$0xf] (!%p166_p9), %v2307_v3  ;;  %210 = vst [vmem:[#allocation2 + $0x34] sm:$0x1] (!%p166_p9), %v2307_v3  ;;  %1902 = vmatpush3.bf16.msra.mxu0 (!%p166_p9), %v2159_v7  ;;  %v2167_v15 = vld [vmem:[%s2972_s1 + $0x18] sm:$0xff] (!%p166_p9)   ;;  %v2169_v17 = vld [vmem:[%s2972_s1 + $0x60] sm:$0xff] (!%p166_p9)  }
  0x15   : > { %211 = vst [vmem:[#allocation2 + $0x38] sm:$0xf] %v2307_v3  ;;  %212 = vst [vmem:[#allocation2 + $0x3c] sm:$0x1] %v2307_v3  ;;  %1942 = vmatpush3.bf16.msra.mxu1 %v2160_v8  ;;  %1903 = vmatprep.subr.bf16.mxu0 %v2161_v9  ;;  %v2168_v16 = vld [vmem:[%s2972_s1 + $0x98] sm:$0xff]   ;;  %v2170_v18 = vld [vmem:[%s2972_s1 + $0xe0] sm:$0xff]  }
  0x16   : > { %213 = vst [vmem:[#allocation2 + $0x40] sm:$0xf] %v2307_v3  ;;  %214 = vst [vmem:[#allocation2 + $0x44] sm:$0x1] %v2307_v3  ;;  %1943 = vmatprep.subr.bf16.mxu1 %v2162_v10  ;;  %v2171_v19 = vld [vmem:[%s2972_s1 + $0x20] sm:$0xff]   ;;  %v2173_v21 = vld [vmem:[%s2972_s1 + $0x68] sm:$0xff]  }
  0x17   : > { %215 = vst [vmem:[#allocation2 + $0x48] sm:$0xf] %v2307_v3  ;;  %216 = vst [vmem:[#allocation2 + $0x4c] sm:$0x1] %v2307_v3  ;;  %v2172_v20 = vld [vmem:[%s2972_s1 + $0xa0] sm:$0xff]   ;;  %v2174_v22 = vld [vmem:[%s2972_s1 + $0xe8] sm:$0xff]  }
  0x18   : > { %1904 = vmatpush3.bf16.msra.mxu0 %v2163_v11  ;;  %v2175_v23 = vld [vmem:[%s2972_s1 + $0x28] sm:$0xff]   ;;  %s192_s13 = scalar_select %p191_p10, %s2357_s19, 1  ;;  %v2177_v25 = vld [vmem:[%s2972_s1 + $0x70] sm:$0xff]   ;;  %v2181_v29 = vld [vmem:[%s2972_s1 + $0x78] sm:$0xff]   ;;  %vm312_vm1 = vcmask 1040384   ;;  %vm511_vm6 = vcmask 1042432  }
  0x19   : > { %1944 = vmatpush3.bf16.msra.mxu1 %v2164_v12  ;;  %1905 = vmatprep.subr.bf16.mxu0 %v2165_v13  ;;  %v2176_v24 = vld [vmem:[%s2972_s1 + $0xa8] sm:$0xff]   ;;  %v2178_v26 = vld [vmem:[%s2972_s1 + $0xf0] sm:$0xff]   ;;  %v2182_v30 = vld [vmem:[%s2972_s1 + $0xf8] sm:$0xff]   ;;  %vm307_vm2 = vsmask.f32 7938  ;;  %vm512_vm7 = vcmask 1046532  }
  0x1a   : > { %1945 = vmatprep.subr.bf16.mxu1 %v2166_v14  ;;  %v2179_v27 = vld [vmem:[%s2972_s1 + $0x30] sm:$0xff]   ;;  %s1897_s5 = sshll.u32 %s192_s13, 5  ;;  %v2183_v31 = vld [vmem:[%s2972_s1 + $0x38] sm:$0xff]   ;;  %v309_v39 = vld [vmem:[#allocation2 + $0x8] sm:$0xf]  ;;  %s188_s23 = sand.u32 1, %s2297_s16  }
  0x1b   : > { %v2180_v28 = vld [vmem:[%s2972_s1 + $0xb0] sm:$0xff]   ;;  %s2479_s20 = scalar_lea.vmem %s2971_s0, %s1897_s5  ;;  %v2184_v32 = vld [vmem:[%s2972_s1 + $0xb8] sm:$0xff]   ;;  %vm313_vm3 = vsmask.f32 256  ;;  %vm2490_vm4 = vmand %vm306_vm0, %vm307_vm2  ;;  %vm380_vm8 = vsmask.f32 3328 }
  0x1c   : > { %1906 = vmatpush3.bf16.msra.mxu0 %v2167_v15  ;;  %v217_v33 = vld [vmem:[%s2479_s20] sm:$0xf]  ;;  %v218_v34 = vld [vmem:[%s2479_s20 + $0x4] sm:$0xf]  ;;  %v315_v43 = vld [vmem:[#allocation2 + $0xc] sm:$0x1] }
  0x1d   : > { %1946 = vmatpush3.bf16.msra.mxu1 %v2168_v16  ;;  %1907 = vmatprep.subr.bf16.mxu0 %v2169_v17  ;;  %v226_v35 = vshrl.u32 %v217_v33, 16  ;;  %v229_v36 = vshll.u32 %v217_v33, 16  ;;  %v234_v37 = vshrl.u32 %v218_v34, 16  ;;  %v237_v38 = vshll.u32 %v218_v34, 16  ;;  %v2494_v44 = vld [vmem:[#allocation2] sm:$0xf]  ;;  %vm2497_vm5 = vmand %vm312_vm1, %vm313_vm3 }
  0x1e   : > { %1947 = vmatprep.subr.bf16.mxu1 %v2170_v18  ;;  %v318_v46 = vld [vmem:[#allocation2 + $0x10] sm:$0xf]  ;;  %v321_v47 = vld [vmem:[#allocation2 + $0x14] sm:$0x1]  ;;  %v361_v52 = vld [vmem:[#allocation2 + $0x4] sm:$0x1] }
  0x1f   : > { %v228_v40 = vrot.slane %v226_v35, 7  ;;  %v236_v41 = vrot.slane %v234_v37, 7  ;;  %v384_v53 = vshrl.u32 %v2494_v44, 16  ;;  %v387_v54 = vshll.u32 %v2494_v44, 16  ;;  %v2187_v55 = vld [vmem:[%s2972_s1 + $0x140] sm:$0xff]   ;;  %vm2517_vm10 = vmor %vm511_vm6, %vm512_vm7  ;;  %s1778_s29 = sshll.u32 %s188_s23, 6 }
  0x20   : > { %1908 = vmatpush3.bf16.msra.mxu0 %v2171_v19  ;;  %v2188_v56 = vld [vmem:[%s2972_s1 + $0x1c0] sm:$0xff]   ;;  %v393_v63 = vshll.u32 %v361_v52, 16  ;;  %vm381_vm9 = vsmask.f32 7440  ;;  %v516_v2 = vrot.slane %v361_v52, 5  ;;  %v1781_v4 = vrot.slane %v2494_v44, 9 }
  0x21   : > { %1948 = vmatpush3.bf16.msra.mxu1 %v2172_v20  ;;  %1909 = vmatprep.subr.bf16.mxu0 %v2173_v21  ;;  %v231_v48 = vor.u32 %v229_v36, %v228_v40  ;;  %v232_v49 = vrot.slane %v228_v40, 4  ;;  %v239_v50 = vor.u32 %v237_v38, %v236_v41  ;;  %v240_v51 = vrot.slane %v236_v41, 4  ;;  %v219_v17 = vld [vmem:[%s2479_s20 + $0x8] sm:$0xf]  ;;  %vm2537_vm11 = vmor %vm380_vm8, %vm381_vm9  ;;  %v324_v35 = vld [vmem:[#allocation2 + $0x18] sm:$0xf] }
  0x22   : > { %1949 = vmatprep.subr.bf16.mxu1 %v2174_v22  ;;  %v386_v61 = vrot.slane %v384_v53, 4  ;;  %v389_v62 = vrot.slane %v387_v54, 5  ;;  %v395_v1 = vrot.slane %v393_v63, 5  ;;  %v517_v21 = vsel %vm2517_vm10, %v1781_v4, %v516_v2  ;;  %v220_v22 = vld [vmem:[%s2479_s20 + $0xc] sm:$0xf]  ;;  %v2219_v42 = vld [vmem:[%s2972_s1 + $0x200] sm:$0xff]  }
  0x23   : > { %v310_v57 = vsel %vm2490_vm4, %v231_v48, %v309_v39  ;;  %v316_v58 = vsel %vm2497_vm5, %v232_v49, %v315_v43  ;;  %v319_v59 = vsel %vm2490_vm4, %v239_v50, %v318_v46  ;;  %v322_v60 = vsel %vm2497_vm5, %v240_v51, %v321_v47  ;;  %v327_v36 = vld [vmem:[#allocation2 + $0x1c] sm:$0x1]  ;;  %v2192_v40 = vld [vmem:[%s2972_s1 + $0x1c8] sm:$0xff]   ;;  %v2189_v47 = vld [vmem:[%s2972_s1 + $0x100] sm:$0xff]   ;;  %s2904_s6 = scalar_lea.vmem [#allocation3], %s1778_s29  ;;  %s1898_s7 = sshll.u32 %s2357_s19, 10 }
  0x24   : > { %1910 = vmatpush3.bf16.msra.mxu0 %v2175_v23  ;;  %311 = vst [vmem:[#allocation2 + $0x8] sm:$0xf] %v310_v57  ;;  %317 = vst [vmem:[#allocation2 + $0xc] sm:$0x1] %v316_v58  ;;  %v390_v0 = vor.u32 %v389_v62, %v386_v61  ;;  %v253_v37 = vshll.u32 %v220_v22, 16  ;;  %v2191_v50 = vld [vmem:[%s2972_s1 + $0x148] sm:$0xff]   ;;  %s2923_s10 = scalar_lea.hbm %s2975_s4, %s1898_s7 }
  0x25   : > { %1950 = vmatpush3.bf16.msra.mxu1 %v2176_v24  ;;  %1911 = vmatprep.subr.bf16.mxu0 %v2177_v25  ;;  %320 = vst [vmem:[#allocation2 + $0x10] sm:$0xf] %v319_v59  ;;  %323 = vst [vmem:[#allocation2 + $0x14] sm:$0x1] %v322_v60  ;;  %v330_v48 = vld [vmem:[#allocation2 + $0x20] sm:$0xf] }
  0x26   : > { %1951 = vmatprep.subr.bf16.mxu1 %v2178_v26  ;;  %v391_v13 = vrot.slane %v390_v0, 4  ;;  %v2194_v51 = vld [vmem:[%s2972_s1 + $0x188] sm:$0xff]   ;;  %v2196_v59 = vld [vmem:[%s2972_s1 + $0x1d0] sm:$0xff]   ;;  %s1712_s8 = sshll.u32 %s2904_s6, 4  ;;  %s2930_s11 = scalar_lea.sflag [#allocation4], %s188_s23  ;;  %s2925_s8 = int_to_ptr.vmem [resolvable:$true] %s1712_s8 }
  0x27   : > { %v2193_v60 = vld [vmem:[%s2972_s1 + $0x108] sm:$0xff]   ;;  %v2195_v62 = vld [vmem:[%s2972_s1 + $0x150] sm:$0xff]   ;;  %s2243_s19 = scalar_lea.vmem %s2925_s8, 1024  ;;  %s2308_s12 = smov [#allocation3]  }
  0x28   : > { %1912 = vmatpush3.bf16.msra.mxu0 %v2179_v27  ;;  %v221_v63 = vld [vmem:[%s2479_s20 + $0x10] sm:$0xf]  ;;  %p2244_p11 = scmp.ne.s32.totalorder %s2925_s8, %s2243_s19  ;;  %s2247_s14 = sshll.u32 %s2308_s12, 4  ;;  %s2248_s14 = int_to_ptr.vmem [resolvable:$false] %s2247_s14 }
  0x29   : > { %1952 = vmatpush3.bf16.msra.mxu1 %v2180_v28  ;;  %1913 = vmatprep.subr.bf16.mxu0 %v2181_v29  ;;  %v2190_v28 = vld [vmem:[%s2972_s1 + $0x180] sm:$0xff]   ;;  %v242_v29 = vshrl.u32 %v219_v17, 16  ;;  %v258_v2 = vshrl.u32 %v221_v63, 16  ;;  %v261_v4 = vshll.u32 %v221_v63, 16  ;;  %s2249_s13 = scalar_lea.vmem %s2248_s14, 2048  ;;  %p2250_p0 = scmp.lt.s32.totalorder %s2925_s8, %s2248_s14 }
  0x2a   : > { %1953 = vmatprep.subr.bf16.mxu1 %v2182_v30  ;;  %v245_v30 = vshll.u32 %v219_v17, 16  ;;  %p2245_p12 = pnand %p2244_p11, %p2374_p5  ;;  %p2251_p1 = scmp.lt.s32.totalorder %s2249_s13, %s2243_s19 }
  0x2b   : > { %v2522_v5 = vld [vmem:[#allocation2 + $0x8] sm:$0xf]  ;;  %v363_v6 = vld [vmem:[#allocation2 + $0xc] sm:$0x1]  ;;  %v244_v41 = vrot.slane %v242_v29, 7 }
  0x2c   : > { %1914 = vmatpush3.bf16.msra.mxu0 %v2183_v31  ;;  %v2524_v7 = vld [vmem:[#allocation2 + $0x10] sm:$0xf]  ;;  %v2526_v8 = vld [vmem:[#allocation2 + $0x14] sm:$0x1]  ;;  %v398_v9 = vshrl.u32 %v2522_v5, 16  ;;  %v401_v10 = vshll.u32 %v2522_v5, 16  ;;  %v1791_v46 = vcombine.low %v2494_v44, %v2522_v5  ;;  %p2246_p13 = pneg %p2245_p12  ;;  %p2252_p2 = por %p2251_p1, %p2250_p0 }
  0x2d   : > { %1954 = vmatpush3.bf16.msra.mxu1 %v2184_v32  ;;  %1979 = vmatprep.subr.bf16.mxu0 %v2187_v55  ;;  %v407_v11 = vshll.u32 %v363_v6, 16  ;;  %v412_v12 = vshrl.u32 %v2524_v7, 16  ;;  %v415_v14 = vshll.u32 %v2524_v7, 16  ;;  %v520_v15 = vrot.slane %v363_v6, 5 }
  0x2e   : > { %2019 = vmatprep.subr.bf16.mxu1 %v2188_v56  ;;  %v1803_v16 = vcombine.low %v2522_v5, %v2524_v7  ;;  %v400_v19 = vrot.slane %v398_v9, 4  ;;  %v403_v20 = vrot.slane %v401_v10, 5  ;;  %v421_v25 = vshll.u32 %v2526_v8, 16  ;;  %p2253_p3 = pnand %p2252_p2, %p2246_p13 }
  0x2f   : > { %v409_v23 = vrot.slane %v407_v11, 5  ;;  %v414_v24 = vrot.slane %v412_v12, 4  ;;  %v1782_v26 = vrot.slane %v2522_v5, 9  ;;  %v250_v31 = vshrl.u32 %v220_v22, 16  ;;  %v333_v5 = vld [vmem:[#allocation2 + $0x24] sm:$0x1] }
  0x30   : > { %1343 = vmatprep.mubr.bf16.mxu1 %v1803_v16  ;;  %v404_v27 = vor.u32 %v403_v20, %v400_v19  ;;  %v396_v32 = vsel %vm2537_vm11, %v391_v13, %v395_v1  ;;  %v417_v33 = vrot.slane %v415_v14, 5  ;;  %v247_v52 = vor.u32 %v245_v30, %v244_v41  ;;  %v2198_v1 = vld [vmem:[%s2972_s1 + $0x190] sm:$0xff]   ;;  %v2200_v11 = vld [vmem:[%s2972_s1 + $0x1d8] sm:$0xff]   ;;  %v336_v16 = vld [vmem:[#allocation2 + $0x28] sm:$0xf] }
  0x31   : > { %v2553_v34 = vsel %vm2517_vm10, %v1782_v26, %v520_v15  ;;  %v252_v43 = vrot.slane %v250_v31, 7  ;;  %v248_v44 = vrot.slane %v244_v41, 4  ;;  %v2591_v0 = vrot.slane %v421_v25, 5  ;;  %v222_v13 = vld [vmem:[%s2479_s20 + $0x14] sm:$0xf]  ;;  %v2202_v20 = vld [vmem:[%s2972_s1 + $0x198] sm:$0xff]  }
  0x32   : > { %v405_v38 = vrot.slane %v404_v27, 4  ;;  %v1799_v39 = vcombine.low %v517_v21, %v2553_v34  ;;  %v418_v55 = vor.u32 %v417_v33, %v414_v24  ;;  %v325_v56 = vsel %vm2490_vm4, %v247_v52, %v324_v35  ;;  %v2197_v14 = vld [vmem:[%s2972_s1 + $0x110] sm:$0xff]   ;;  %v339_v19 = vld [vmem:[#allocation2 + $0x2c] sm:$0x1]  ;;  %v2204_v35 = vld [vmem:[%s2972_s1 + $0x1e0] sm:$0xff]  }
  0x33   : > { %v255_v53 = vor.u32 %v253_v37, %v252_v43  ;;  %v328_v57 = vsel %vm2497_vm5, %v248_v44, %v327_v36  ;;  %326 = vst [vmem:[#allocation2 + $0x18] sm:$0xf] %v325_v56  ;;  %v256_v61 = vrot.slane %v252_v43, 4  ;;  %v1783_v9 = vrot.slane %v2524_v7, 9  ;;  %v342_v33 = vld [vmem:[#allocation2 + $0x30] sm:$0xf] }
  0x34   : > { %v2566_v49 = vsel %vm2537_vm11, %v405_v38, %v409_v23  ;;  %1344 = vmatmul.mubr.bf16.vlgmr.msra.gmra.mrb[0].mxu1 %v1799_v39  ;;  %329 = vst [vmem:[#allocation2 + $0x1c] sm:$0x1] %v328_v57  ;;  %v2596_v6 = vrot.slane %v418_v55, 4  ;;  %v524_v10 = vrot.slane %v2526_v8, 5  ;;  %v260_v15 = vrot.slane %v258_v2, 7  ;;  %v2199_v8 = vld [vmem:[%s2972_s1 + $0x158] sm:$0xff]  }
  0x35   : > { %v1795_v54 = vcombine.low %v396_v32, %v2566_v49  ;;  %2020 = vmatpush3.bf16.msra.mxu1 %v2190_v28  ;;  %v331_v58 = vsel %vm2490_vm4, %v255_v53, %v330_v48  ;;  %v334_v12 = vsel %vm2497_vm5, %v256_v61, %v333_v5  ;;  %v266_v17 = vshrl.u32 %v222_v13, 16  ;;  %v2201_v32 = vld [vmem:[%s2972_s1 + $0x118] sm:$0xff]   ;;  %v2208_v61 = vld [vmem:[%s2972_s1 + $0x1e8] sm:$0xff]  }
  0x36   : > { %2021 = vmatprep.subr.bf16.mxu1 %v2192_v40  ;;  %332 = vst [vmem:[#allocation2 + $0x20] sm:$0xf] %v331_v58  ;;  %335 = vst [vmem:[#allocation2 + $0x24] sm:$0x1] %v334_v12  ;;  %v263_v21 = vor.u32 %v261_v4, %v260_v15  ;;  %v264_v22 = vrot.slane %v260_v15, 4  ;;  %v269_v24 = vshll.u32 %v222_v13, 16  ;;  %v2628_v36 = vsel %vm2517_vm10, %v1783_v9, %v524_v10 }
  0x37   : > { %1278 = vmatprep.mubr.bf16.mxu0 %v1795_v54  ;;  %v2615_v23 = vrot.slane %v266_v17, 7  ;;  %v2207_v4 = vld [vmem:[%s2972_s1 + $0x168] sm:$0xff]   ;;  %v345_v17 = vld [vmem:[#allocation2 + $0x34] sm:$0x1] }
  0x38   : > { %1279 = vmatmul.mubr.bf16.vlgmr.msra.gmra.mrb[0].mxu0 %v1791_v46  ;;  %v337_v39 = vsel %vm2490_vm4, %v263_v21, %v336_v16  ;;  %v340_v43 = vsel %vm2497_vm5, %v264_v22, %v339_v19  ;;  %v2203_v46 = vld [vmem:[%s2972_s1 + $0x160] sm:$0xff]   ;;  %v2210_v12 = vld [vmem:[%s2972_s1 + $0x1a8] sm:$0xff]  }
  0x39   : > { %1980 = vmatpush3.bf16.msra.mxu0 %v2189_v47  ;;  %2022 = vmatpush3.bf16.msra.mxu1 %v2194_v51  ;;  %338 = vst [vmem:[#allocation2 + $0x28] sm:$0xf] %v337_v39  ;;  %v2206_v47 = vld [vmem:[%s2972_s1 + $0x1a0] sm:$0xff]   ;;  %341 = vst [vmem:[#allocation2 + $0x2c] sm:$0x1] %v340_v43  ;;  %v271_v44 = vor.u32 %v269_v24, %v2615_v23  ;;  %v2214_v39 = vld [vmem:[%s2972_s1 + $0x1b0] sm:$0xff]  }
  0x3a   : > { %1981 = vmatprep.subr.bf16.mxu0 %v2191_v50  ;;  %2023 = vmatprep.subr.bf16.mxu1 %v2196_v59  ;;  %v366_v25 = vld [vmem:[#allocation2 + $0x18] sm:$0xf] }
  0x3b   : > { %v367_v26 = vld [vmem:[#allocation2 + $0x1c] sm:$0x1]  ;;  %v426_v28 = vshrl.u32 %v366_v25, 16  ;;  %v429_v29 = vshll.u32 %v366_v25, 16  ;;  %v1784_v37 = vrot.slane %v366_v25, 9  ;;  %v343_v59 = vsel %vm2490_vm4, %v271_v44, %v342_v33 }
  0x3c   : > { %v435_v30 = vshll.u32 %v367_v26, 16  ;;  %v528_v38 = vrot.slane %v367_v26, 5  ;;  %344 = vst [vmem:[#allocation2 + $0x30] sm:$0xf] %v343_v59  ;;  %v2671_v5 = vcombine.low %v2524_v7, %v366_v25  ;;  %v272_v7 = vrot.slane %v2615_v23, 4 }
  0x3d   : > { %1982 = vmatpush3.bf16.msra.mxu0 %v2193_v60  ;;  %2024 = vmatpush3.bf16.msra.mxu1 %v2198_v1  ;;  %v2617_v27 = vld [vmem:[#allocation2 + $0x20] sm:$0xf]  ;;  %v428_v40 = vrot.slane %v426_v28, 4  ;;  %v431_v41 = vrot.slane %v429_v29, 5  ;;  %v369_v50 = vld [vmem:[#allocation2 + $0x24] sm:$0x1] }
  0x3e   : > { %1983 = vmatprep.subr.bf16.mxu0 %v2195_v62  ;;  %2025 = vmatprep.subr.bf16.mxu1 %v2200_v11  ;;  %v1804_v31 = vcombine.low %v366_v25, %v2617_v27  ;;  %v2642_v48 = vsel %vm2517_vm10, %v1784_v37, %v528_v38  ;;  %v440_v51 = vshrl.u32 %v2617_v27, 16  ;;  %v443_v52 = vshll.u32 %v2617_v27, 16  ;;  %v2205_v60 = vld [vmem:[%s2972_s1 + $0x120] sm:$0xff]   ;;  %v2209_v11 = vld [vmem:[%s2972_s1 + $0x128] sm:$0xff]   ;;  %v348_v24 = vld [vmem:[#allocation2 + $0x38] sm:$0xf] }
  0x3f   : > { %v432_v53 = vor.u32 %v431_v41, %v428_v40  ;;  %v437_v54 = vrot.slane %v435_v30, 5  ;;  %v2649_v55 = vcombine.low %v2628_v36, %v2642_v48  ;;  %v449_v56 = vshll.u32 %v369_v50, 16  ;;  %v2211_v25 = vld [vmem:[%s2972_s1 + $0x170] sm:$0xff]   ;;  %v224_v37 = vld [vmem:[%s2479_s20 + $0x1c] sm:$0xf] }
  0x40   : > { %1351 = vmatprep.mubr.bf16.mxu1 %v1804_v31  ;;  %v442_v57 = vrot.slane %v440_v51, 4  ;;  %v445_v58 = vrot.slane %v443_v52, 5  ;;  %v2663_v62 = vsel %vm2537_vm11, %v2596_v6, %v2591_v0  ;;  %v1785_v1 = vrot.slane %v2617_v27, 9  ;;  %v223_v0 = vld [vmem:[%s2479_s20 + $0x18] sm:$0xf]  ;;  %v2213_v38 = vld [vmem:[%s2972_s1 + $0x130] sm:$0xff]  }
  0x41   : > { %1984 = vmatpush3.bf16.msra.mxu0 %v2197_v14  ;;  %2026 = vmatpush3.bf16.msra.mxu1 %v2202_v20  ;;  %v433_v63 = vrot.slane %v432_v53, 4  ;;  %v532_v2 = vrot.slane %v369_v50, 5  ;;  %v451_v10 = vrot.slane %v449_v56, 5  ;;  %v274_v13 = vshrl.u32 %v223_v0, 16  ;;  %v370_v15 = vld [vmem:[#allocation2 + $0x28] sm:$0xf] }
  0x42   : > { %1985 = vmatprep.subr.bf16.mxu0 %v2199_v8  ;;  %2027 = vmatprep.subr.bf16.mxu1 %v2204_v35  ;;  %v446_v9 = vor.u32 %v445_v58, %v442_v57  ;;  %v277_v16 = vshll.u32 %v223_v0, 16  ;;  %v2212_v8 = vld [vmem:[%s2972_s1 + $0x1f0] sm:$0xff]   ;;  %v371_v19 = vld [vmem:[#allocation2 + $0x2c] sm:$0x1]  ;;  %v454_v20 = vshrl.u32 %v370_v15, 16  ;;  %v457_v21 = vshll.u32 %v370_v15, 16 }
  0x43   : > { %1352 = vmatmul.mubr.bf16.gmra.mrb[4].mxu1 %v2649_v55  ;;  %v2676_v6 = vsel %vm2537_vm11, %v433_v63, %v437_v54  ;;  %v2694_v22 = vsel %vm2517_vm10, %v1785_v1, %v532_v2  ;;  %v1786_v23 = vrot.slane %v370_v15, 9  ;;  %v463_v28 = vshll.u32 %v371_v19, 16  ;;  %v351_v31 = vld [vmem:[#allocation2 + $0x3c] sm:$0x1]  ;;  %v2710_v41 = vld [vmem:[#allocation2 + $0x30] sm:$0xf] }
  0x44   : > { %v2687_v14 = vcombine.low %v2663_v62, %v2676_v6  ;;  %v447_v26 = vrot.slane %v446_v9, 4  ;;  %v536_v29 = vrot.slane %v371_v19, 5  ;;  %v276_v30 = vrot.slane %v274_v13, 7  ;;  %v2215_v53 = vld [vmem:[%s2972_s1 + $0x178] sm:$0xff]   ;;  %v354_v1 = vld [vmem:[#allocation2 + $0x40] sm:$0xf] }
  0x45   : > { %1986 = vmatpush3.bf16.msra.mxu0 %v2201_v32  ;;  %2028 = vmatpush3.bf16.msra.mxu1 %v2206_v47  ;;  %v456_v32 = vrot.slane %v454_v20, 4  ;;  %v459_v33 = vrot.slane %v457_v21, 5  ;;  %v346_v35 = vsel %vm2497_vm5, %v272_v7, %v345_v17  ;;  %v465_v40 = vrot.slane %v463_v28, 5  ;;  %v2218_v19 = vld [vmem:[%s2972_s1 + $0x1b8] sm:$0xff]  }
  0x46   : > { %1987 = vmatprep.subr.bf16.mxu0 %v2203_v46  ;;  %2029 = vmatprep.subr.bf16.mxu1 %v2208_v61  ;;  %v2714_v43 = vsel %vm2517_vm10, %v1786_v23, %v536_v29  ;;  %v279_v46 = vor.u32 %v277_v16, %v276_v30  ;;  %v280_v47 = vrot.slane %v276_v30, 4  ;;  %347 = vst [vmem:[#allocation2 + $0x34] sm:$0x1] %v346_v35  ;;  %v468_v44 = vshrl.u32 %v2710_v41, 16  ;;  %v2217_v16 = vld [vmem:[%s2972_s1 + $0x138] sm:$0xff]  }
  0x47   : > { %1286 = vmatprep.mubr.bf16.mxu0 %v2687_v14  ;;  %v460_v50 = vor.u32 %v459_v33, %v456_v32  ;;  %v1805_v51 = vcombine.low %v370_v15, %v2710_v41  ;;  %v2719_v52 = vcombine.low %v2694_v22, %v2714_v43  ;;  %v471_v57 = vshll.u32 %v2710_v41, 16 }
  0x48   : > { %1287 = vmatmul.mubr.bf16.gmra.mrb[4].mxu0 %v2671_v5  ;;  %v349_v54 = vsel %vm2490_vm4, %v279_v46, %v348_v24  ;;  %v352_v56 = vsel %vm2497_vm5, %v280_v47, %v351_v31  ;;  %v282_v58 = vshrl.u32 %v224_v37, 16  ;;  %v2732_v59 = vsel %vm2537_vm11, %v447_v26, %v451_v10 }
  0x49   : > { %1988 = vmatpush3.bf16.msra.mxu0 %v2205_v60  ;;  %2030 = vmatpush3.bf16.msra.mxu1 %v2210_v12  ;;  %v461_v60 = vrot.slane %v460_v50, 4  ;;  %350 = vst [vmem:[#allocation2 + $0x38] sm:$0xf] %v349_v54  ;;  %353 = vst [vmem:[#allocation2 + $0x3c] sm:$0x1] %v352_v56  ;;  %v470_v61 = vrot.slane %v468_v44, 4  ;;  %v2740_v0 = vcombine.low %v2617_v27, %v370_v15 }
  0x4a   : > { %1989 = vmatprep.subr.bf16.mxu0 %v2207_v4  ;;  %2031 = vmatprep.subr.bf16.mxu1 %v2212_v8  ;;  %v285_v63 = vshll.u32 %v224_v37, 16  ;;  %v473_v2 = vrot.slane %v471_v57, 5  ;;  %v284_v4 = vrot.slane %v282_v58, 7  ;;  %v2216_v12 = vld [vmem:[%s2972_s1 + $0x1f8] sm:$0xff]   ;;  %v1787_v17 = vrot.slane %v2710_v41, 9 }
  0x4b   : > { %1359 = vmatprep.mubr.bf16.mxu1 %v1805_v51  ;;  %v2737_v9 = vsel %vm2537_vm11, %v461_v60, %v465_v40  ;;  %v357_v44 = vld [vmem:[#allocation2 + $0x44] sm:$0x1]  ;;  %v1811_v58 = vcombine.low %v2553_v34, %v2628_v36  ;;  %v2796_v60 = vld [vmem:[#allocation2 + $0x48] sm:$0xf] }
  0x4c   : > { %1360 = vmatmul.mubr.bf16.gmra.mrb[8].mxu1 %v2719_v52  ;;  %v2744_v10 = vcombine.low %v2732_v59, %v2737_v9  ;;  %v474_v13 = vor.u32 %v473_v2, %v470_v61  ;;  %v288_v37 = vrot.slane %v284_v4, 4  ;;  %v567_v61 = vshrl.u32 %v2796_v60, 16  ;;  %v2220_v34 = vld [vmem:[%s2972_s1 + $0x208] sm:$0xff]  }
  0x4d   : > { %1990 = vmatpush3.bf16.msra.mxu0 %v2209_v11  ;;  %2032 = vmatpush3.bf16.msra.mxu1 %v2214_v39  ;;  %v287_v11 = vor.u32 %v285_v63, %v284_v4  ;;  %v373_v7 = vld [vmem:[#allocation2 + $0x34] sm:$0x1]  ;;  %v570_v63 = vshll.u32 %v2796_v60, 16 }
  0x4e   : > { %1991 = vmatprep.subr.bf16.mxu0 %v2211_v25  ;;  %1294 = vmatprep.mubr.bf16.mxu0 %v2744_v10  ;;  %v477_v27 = vshll.u32 %v373_v7, 16  ;;  %v540_v8 = vrot.slane %v373_v7, 5  ;;  %v475_v23 = vrot.slane %v474_v13, 4  ;;  %v569_v2 = vrot.slane %v567_v61, 4  ;;  %v2812_v7 = vld [vmem:[#allocation2 + $0x4c] sm:$0x1] }
  0x4f   : > { %v355_v15 = vsel %vm2490_vm4, %v287_v11, %v354_v1  ;;  %2033 = vmatprep.subr.bf16.mxu1 %v2216_v12  ;;  %v1807_v1 = vcombine.low %v2566_v49, %v2663_v62  ;;  %v572_v4 = vrot.slane %v570_v63, 5  ;;  %v1812_v11 = vcombine.low %v2642_v48, %v2694_v22  ;;  %v2221_v49 = vld [vmem:[%s2972_s1 + $0x210] sm:$0xff]   ;;  %v2222_v22 = vld [vmem:[%s2972_s1 + $0x218] sm:$0xff]  }
  0x50   : > { %1295 = vmatmul.mubr.bf16.gmra.mrb[8].mxu0 %v2740_v0  ;;  %356 = vst [vmem:[#allocation2 + $0x40] sm:$0xf] %v355_v15  ;;  %v374_v20 = vld [vmem:[#allocation2 + $0x38] sm:$0xf]  ;;  %v375_v21 = vld [vmem:[#allocation2 + $0x3c] sm:$0x1]  ;;  %v2765_v33 = vsel %vm2517_vm10, %v1787_v17, %v540_v8  ;;  %v1808_v48 = vcombine.low %v2676_v6, %v2732_v59 }
  0x51   : > { %1992 = vmatpush3.bf16.msra.mxu0 %v2213_v38  ;;  %2034 = vmatpush3.bf16.msra.mxu1 %v2218_v19  ;;  %v482_v24 = vshrl.u32 %v374_v20, 16  ;;  %v485_v25 = vshll.u32 %v374_v20, 16  ;;  %v491_v26 = vshll.u32 %v375_v21, 16  ;;  %v1788_v28 = vrot.slane %v374_v20, 9  ;;  %v2223_v59 = vld [vmem:[%s2972_s1 + $0x220] sm:$0xff]  }
  0x52   : > { %1993 = vmatprep.subr.bf16.mxu0 %v2215_v53  ;;  %v544_v29 = vrot.slane %v375_v21, 5  ;;  %2095 = vmatprep.subr.bf16.mxu1 %v2219_v42  ;;  %v479_v30 = vrot.slane %v477_v27, 5  ;;  %v358_v53 = vsel %vm2497_vm5, %v288_v37, %v357_v44  ;;  %v2789_v56 = vcombine.low %v2710_v41, %v374_v20  ;;  %v2224_v21 = vld [vmem:[%s2972_s1 + $0x228] sm:$0xff]  }
  0x53   : > { %v484_v31 = vrot.slane %v482_v24, 4  ;;  %v487_v32 = vrot.slane %v485_v25, 5  ;;  %v493_v39 = vrot.slane %v491_v26, 5  ;;  %359 = vst [vmem:[#allocation2 + $0x44] sm:$0x1] %v358_v53  ;;  %v1813_v8 = vcombine.low %v2714_v43, %v2765_v33  ;;  %v2225_v24 = vld [vmem:[%s2972_s1 + $0x230] sm:$0xff]  }
  0x54   : > { %v2769_v35 = vsel %vm2517_vm10, %v1788_v28, %v544_v29  ;;  %v2779_v47 = vsel %vm2537_vm11, %v475_v23, %v479_v30  ;;  %v584_v26 = vrot.slane %v2812_v7, 5  ;;  %v2226_v28 = vld [vmem:[%s2972_s1 + $0x238] sm:$0xff]  }
  0x55   : > { %1994 = vmatpush3.bf16.msra.mxu0 %v2217_v16  ;;  %v488_v38 = vor.u32 %v487_v32, %v484_v31  ;;  %v2775_v46 = vcombine.low %v2765_v33, %v2769_v35  ;;  %v573_v16 = vor.u32 %v572_v4, %v569_v2  ;;  %v1809_v23 = vcombine.low %v2737_v9, %v2779_v47 }
  0x56   : > { %2071 = vmatprep.subr.bf16.mxu0 %v2219_v42  ;;  %v1790_v9 = vrot.slane %v2796_v60, 9 }
  0x57   : > { %v2771_v40 = vld [vmem:[#allocation2 + $0x40] sm:$0xf]  ;;  %v489_v50 = vrot.slane %v488_v38, 4  ;;  %v574_v15 = vrot.slane %v573_v16, 4 }
  0x58   : > { %v1806_v51 = vcombine.low %v374_v20, %v2771_v40  ;;  %v547_v45 = vshrl.u32 %v2771_v40, 16  ;;  %v550_v41 = vshll.u32 %v2771_v40, 16  ;;  %v1789_v19 = vrot.slane %v2771_v40, 9 }
  0x59   : > { %v2786_v54 = vsel %vm2537_vm11, %v489_v50, %v493_v39  ;;  %v1815_v25 = vcombine.low %v2771_v40, %v2796_v60  ;;  %v585_v30 = vsel %vm2517_vm10, %v1790_v9, %v584_v26 }
  0x5a   : > { %1367 = vmatprep.mubr.bf16.mxu1 %v1806_v51  ;;  %v1798_v57 = vcombine.low %v2779_v47, %v2786_v54  ;;  %v549_v36 = vrot.slane %v547_v45, 4  ;;  %v377_v12 = vld [vmem:[#allocation2 + $0x44] sm:$0x1] }
  0x5b   : > { %1368 = vmatmul.mubr.bf16.gmra.mrb[12].mxu1 %v2775_v46  ;;  %v556_v13 = vshll.u32 %v377_v12, 16  ;;  %v564_v6 = vrot.slane %v377_v12, 5 }
  0x5c   : > { %1473 = vmatprep.mubr.bf16.mxu1 %v2687_v14  ;;  %1302 = vmatprep.mubr.bf16.mxu0 %v1798_v57  ;;  %v552_v14 = vrot.slane %v550_v41, 5 }
  0x5d   : > { %1303 = vmatmul.mubr.bf16.gmra.mrb[12].mxu0 %v2789_v56  ;;  %v558_v27 = vrot.slane %v556_v13, 5  ;;  %v565_v43 = vsel %vm2517_vm10, %v1789_v19, %v564_v6 }
  0x5e   : > { %1408 = vmatprep.mubr.bf16.mxu0 %v1811_v58  ;;  %v553_v62 = vor.u32 %v552_v14, %v549_v36  ;;  %v1814_v18 = vcombine.low %v2769_v35, %v565_v43  ;;  %v1817_v31 = vcombine.low %v565_v43, %v585_v30 }
  0x63   : > { %1474 = vmatmul.mubr.bf16.vlgmr.msra.gmra.mrb[16].mxu1 %v2671_v5  ;;  %v576_v5 = vshll.u32 %v2812_v7, 16 }
  0x64   : > { %2103 = vmatpush3.bf16.msra.mxu1 %v2219_v42  ;;  %1481 = vmatprep.mubr.bf16.mxu1 %v2744_v10  ;;  %v554_v10 = vrot.slane %v553_v62, 4 }
  0x65   : > { %2096 = vmatprep.subr.bf16.mxu1 %v2220_v34  ;;  %1409 = vmatmul.mubr.bf16.vlgmr.msra.gmra.mrb[16].mxu0 %v1807_v1  ;;  %v578_v17 = vrot.slane %v576_v5, 5 }
  0x66   : > { %2072 = vmatpush3.bf16.msra.mxu0 %v2219_v42  ;;  %1416 = vmatprep.mubr.bf16.mxu0 %v1812_v11  ;;  %v559_v20 = vsel %vm2537_vm11, %v554_v10, %v558_v27 }
  0x67   : > { %2073 = vmatprep.subr.bf16.mxu0 %v2220_v34  ;;  %v1810_v29 = vcombine.low %v2786_v54, %v559_v20 }
  0x68   : > { %2104 = vmatpush3.bf16.msra.mxu1 %v2220_v34 }
  0x69   : > { %2097 = vmatprep.subr.bf16.mxu1 %v2221_v49 }
  0x6a   : > { %2074 = vmatpush3.bf16.msra.mxu0 %v2220_v34 }
  0x6b   : > { %1482 = vmatmul.mubr.bf16.gmra.mrb[20].mxu1 %v2740_v0  ;;  %2075 = vmatprep.subr.bf16.mxu0 %v2221_v49  ;;  %v579_v0 = vsel %vm2537_vm11, %v574_v15, %v578_v17 }
  0x6c   : > { %2105 = vmatpush3.bf16.msra.mxu1 %v2221_v49  ;;  %1489 = vmatprep.mubr.bf16.mxu1 %v1798_v57  ;;  %v1816_v42 = vcombine.low %v559_v20, %v579_v0 }
  0x6d   : > { %2098 = vmatprep.subr.bf16.mxu1 %v2222_v22  ;;  %1417 = vmatmul.mubr.bf16.gmra.mrb[20].mxu0 %v1808_v48 }
  0x6e   : > { %2076 = vmatpush3.bf16.msra.mxu0 %v2221_v49  ;;  %1424 = vmatprep.mubr.bf16.mxu0 %v1813_v8 }
  0x6f   : > { %2077 = vmatprep.subr.bf16.mxu0 %v2222_v22 }
  0x70   : > { %2106 = vmatpush3.bf16.msra.mxu1 %v2222_v22 }
  0x71   : > { %2099 = vmatprep.subr.bf16.mxu1 %v2223_v59 }
  0x72   : > { %2078 = vmatpush3.bf16.msra.mxu0 %v2222_v22 }
  0x73   : > { %1490 = vmatmul.mubr.bf16.gmra.mrb[24].mxu1 %v2789_v56  ;;  %2079 = vmatprep.subr.bf16.mxu0 %v2223_v59 }
  0x74   : > { %2107 = vmatpush3.bf16.msra.mxu1 %v2223_v59  ;;  %1497 = vmatprep.mubr.bf16.mxu1 %v1816_v42 }
  0x75   : > { %2100 = vmatprep.subr.bf16.mxu1 %v2224_v21  ;;  %1425 = vmatmul.mubr.bf16.gmra.mrb[24].mxu0 %v1809_v23 }
  0x76   : > { %2080 = vmatpush3.bf16.msra.mxu0 %v2223_v59  ;;  %1432 = vmatprep.mubr.bf16.mxu0 %v1814_v18 }
  0x77   : > { %2081 = vmatprep.subr.bf16.mxu0 %v2224_v21 }
  0x78   : > { %2108 = vmatpush3.bf16.msra.mxu1 %v2224_v21 }
  0x79   : > { %2101 = vmatprep.subr.bf16.mxu1 %v2225_v24 }
  0x7a   : > { %2082 = vmatpush3.bf16.msra.mxu0 %v2224_v21 }
  0x7b   : > { %1498 = vmatmul.mubr.bf16.gmra.mrb[28].mxu1 %v1815_v25  ;;  %2083 = vmatprep.subr.bf16.mxu0 %v2225_v24 }
  0x7c   : > { %2109 = vmatpush3.bf16.msra.mxu1 %v2225_v24  ;;  %2091 = vmatprep.mubr.bf16.mxu1 %v2775_v46 }
  0x7d   : > { %2102 = vmatprep.subr.bf16.mxu1 %v2226_v28  ;;  %1433 = vmatmul.mubr.bf16.gmra.mrb[28].mxu0 %v1810_v29 }
  0x7e   : > { %2084 = vmatpush3.bf16.msra.mxu0 %v2225_v24  ;;  %2087 = vmatprep.mubr.bf16.mxu0 %v2649_v55 }
  0x7f   : > { %2085 = vmatprep.subr.bf16.mxu0 %v2226_v28 }
  0x80   : > { %2110 = vmatpush3.bf16.msra.mxu1 %v2226_v28 }
  0x82   : > { %2086 = vmatpush3.bf16.msra.mxu0 %v2226_v28 }
  0x83   : > { %2092 = vmatmul.mubr.bf16.vlgmr.msra.gmra.mrb[32].mxu1 %v1817_v31 }
  0x85   : > { %2088 = vmatmul.mubr.bf16.vlgmr.msra.gmra.mrb[32].mxu0 %v2719_v52 }
 0x107   : > { %v1955_v32 = vpop.f32.mrb[0].mxu1 }
 0x108   : > { %v1956_v33 = vpop.f32.mrb[1].mxu1 }
 0x109   : > { %v1957_v3 = vadd.f32 %v1956_v33, %v1955_v32  ;;  %v1958_v35 = vpop.f32.mrb[2].mxu1 }
 0x10a   : > { %v1959_v37 = vpop.f32.mrb[3].mxu1 }
 0x10b   : > { %v1915_v38 = vpop.f32.mrb[0].mxu0  ;;  %v1960_v39 = vadd.f32 %v1959_v37, %v1958_v35 }
 0x10c   : > { %v1916_v40 = vpop.f32.mrb[1].mxu0 }
 0x10d   : > { %v1917_v46 = vadd.f32 %v1916_v40, %v1915_v38  ;;  %v1918_v47 = vpop.f32.mrb[2].mxu0 }
 0x10e   : > { %v1919_v50 = vpop.f32.mrb[3].mxu0 }
 0x10f   : > { %v1346_v51 = vadd.f32 %v1957_v3, %v1917_v46  ;;  %v1920_v44 = vadd.f32 %v1919_v50, %v1918_v47 }
 0x111   : > { %v1349_v55 = vadd.f32 %v1960_v39, %v1920_v44 }
 0x116   : > { %v1961_v53 = vpop.f32.mrb[4].mxu1 }
 0x117   : > { %v1962_v54 = vpop.f32.mrb[5].mxu1 }
 0x118   : > { %v1963_v56 = vadd.f32 %v1962_v54, %v1961_v53  ;;  %v1964_v57 = vpop.f32.mrb[6].mxu1 }
 0x119   : > { %v1965_v58 = vpop.f32.mrb[7].mxu1 }
 0x11a   : > { %v1966_v52 = vadd.f32 %v1965_v58, %v1964_v57 }
 0x11b   : > { %v1921_v60 = vpop.f32.mrb[4].mxu0 }
 0x11c   : > { %v1922_v45 = vpop.f32.mrb[5].mxu0 }
 0x11d   : > { %v1923_v41 = vadd.f32 %v1922_v45, %v1921_v60  ;;  %v1924_v61 = vpop.f32.mrb[6].mxu0 }
 0x11e   : > { %v1925_v63 = vpop.f32.mrb[7].mxu0 }
 0x11f   : > { %v1354_v1 = vadd.f32 %v1963_v56, %v1923_v41  ;;  %v1926_v34 = vadd.f32 %v1925_v63, %v1924_v61  ;;  %v1967_v36 = vpop.f32.mrb[8].mxu1 }
 0x120   : > { %v1968_v2 = vpop.f32.mrb[9].mxu1 }
 0x121   : > { %v1357_v14 = vadd.f32 %v1966_v52, %v1926_v34  ;;  %v1969_v4 = vadd.f32 %v1968_v2, %v1967_v36  ;;  %v1970_v11 = vpop.f32.mrb[10].mxu1 }
 0x122   : > { %v1971_v12 = vpop.f32.mrb[11].mxu1 }
 0x123   : > { %v1972_v7 = vadd.f32 %v1971_v12, %v1970_v11  ;;  %v1927_v49 = vpop.f32.mrb[8].mxu0 }
 0x124   : > { %v1928_v62 = vpop.f32.mrb[9].mxu0 }
 0x125   : > { %v1929_v13 = vadd.f32 %v1928_v62, %v1927_v49  ;;  %v1930_v16 = vpop.f32.mrb[10].mxu0 }
 0x126   : > { %v1931_v5 = vpop.f32.mrb[11].mxu0 }
 0x127   : > { %v1362_v48 = vadd.f32 %v1969_v4, %v1929_v13  ;;  %v1932_v22 = vadd.f32 %v1931_v5, %v1930_v16 }
 0x129   : > { %v1365_v10 = vadd.f32 %v1972_v7, %v1932_v22 }
 0x12e   : > { %v1973_v27 = vpop.f32.mrb[12].mxu1 }
 0x12f   : > { %v1974_v15 = vpop.f32.mrb[13].mxu1 }
 0x130   : > { %v1975_v17 = vadd.f32 %v1974_v15, %v1973_v27  ;;  %v1976_v8 = vpop.f32.mrb[14].mxu1  ;;  %v1933_v19 = vpop.f32.mrb[12].mxu0 }
 0x131   : > { %v1977_v6 = vpop.f32.mrb[15].mxu1  ;;  %v1934_v59 = vpop.f32.mrb[13].mxu0 }
 0x132   : > { %v1978_v20 = vadd.f32 %v1977_v6, %v1976_v8  ;;  %v1935_v0 = vadd.f32 %v1934_v59, %v1933_v19  ;;  %v1936_v43 = vpop.f32.mrb[14].mxu0 }
 0x133   : > { %v1937_v21 = vpop.f32.mrb[15].mxu0 }
 0x134   : > { %v1370_v42 = vadd.f32 %v1975_v17, %v1935_v0  ;;  %v1938_v23 = vadd.f32 %v1937_v21, %v1936_v43 }
 0x136   : > { %v2035_v18 = vpop.f32.mrb[16].mxu1  ;;  %v1373_v24 = vadd.f32 %v1978_v20, %v1938_v23 }
 0x137   : > { %v2036_v25 = vpop.f32.mrb[17].mxu1 }
 0x138   : > { %v2037_v9 = vadd.f32 %v2036_v25, %v2035_v18  ;;  %v2038_v26 = vpop.f32.mrb[18].mxu1  ;;  %v1995_v28 = vpop.f32.mrb[16].mxu0 }
 0x139   : > { %v2039_v29 = vpop.f32.mrb[19].mxu1  ;;  %v1996_v30 = vpop.f32.mrb[17].mxu0 }
 0x13a   : > { %v2040_v31 = vadd.f32 %v2039_v29, %v2038_v26  ;;  %v1997_v32 = vadd.f32 %v1996_v30, %v1995_v28  ;;  %v1998_v33 = vpop.f32.mrb[18].mxu0 }
 0x13b   : > { %v1999_v3 = vpop.f32.mrb[19].mxu0 }
 0x13c   : > { %v1411_v35 = vadd.f32 %v1997_v32, %v1346_v51  ;;  %v2000_v37 = vadd.f32 %v1999_v3, %v1998_v33 }
 0x13e   : > { %v2041_v38 = vpop.f32.mrb[20].mxu1  ;;  %v1414_v39 = vadd.f32 %v2000_v37, %v1349_v55  ;;  %v1476_v46 = vadd.f32 %v2037_v9, %v1411_v35 }
 0x13f   : > { %v2042_v40 = vpop.f32.mrb[21].mxu1 }
 0x140   : > { %v2043_v47 = vadd.f32 %v2042_v40, %v2041_v38  ;;  %v2044_v50 = vpop.f32.mrb[22].mxu1  ;;  %v2001_v44 = vpop.f32.mrb[20].mxu0  ;;  %v1479_v54 = vadd.f32 %v2040_v31, %v1414_v39 }
 0x141   : > { %v2045_v53 = vpop.f32.mrb[23].mxu1  ;;  %v2002_v56 = vpop.f32.mrb[21].mxu0 }
 0x142   : > { %v2046_v57 = vadd.f32 %v2045_v53, %v2044_v50  ;;  %v2003_v58 = vadd.f32 %v2002_v56, %v2001_v44  ;;  %v2004_v52 = vpop.f32.mrb[22].mxu0 }
 0x143   : > { %v2005_v60 = vpop.f32.mrb[23].mxu0 }
 0x144   : > { %v1419_v45 = vadd.f32 %v2003_v58, %v1354_v1  ;;  %v2006_v41 = vadd.f32 %v2005_v60, %v2004_v52 }
 0x146   : > { %v2047_v61 = vpop.f32.mrb[24].mxu1  ;;  %v1422_v63 = vadd.f32 %v2006_v41, %v1357_v14  ;;  %v1484_v34 = vadd.f32 %v2043_v47, %v1419_v45 }
 0x147   : > { %v2048_v51 = vpop.f32.mrb[25].mxu1 }
 0x148   : > { %v2049_v36 = vadd.f32 %v2048_v51, %v2047_v61  ;;  %v2050_v55 = vpop.f32.mrb[26].mxu1  ;;  %v2007_v2 = vpop.f32.mrb[24].mxu0  ;;  %v1487_v11 = vadd.f32 %v2046_v57, %v1422_v63 }
 0x149   : > { %v2051_v4 = vpop.f32.mrb[27].mxu1  ;;  %v2008_v12 = vpop.f32.mrb[25].mxu0 }
 0x14a   : > { %v2052_v7 = vadd.f32 %v2051_v4, %v2050_v55  ;;  %v2009_v49 = vadd.f32 %v2008_v12, %v2007_v2  ;;  %v2010_v62 = vpop.f32.mrb[26].mxu0 }
 0x14b   : > { %v2011_v13 = vpop.f32.mrb[27].mxu0 }
 0x14c   : > { %v1427_v16 = vadd.f32 %v2009_v49, %v1362_v48  ;;  %v2012_v5 = vadd.f32 %v2011_v13, %v2010_v62 }
 0x14e   : > { %v2053_v22 = vpop.f32.mrb[28].mxu1  ;;  %v1430_v27 = vadd.f32 %v2012_v5, %v1365_v10  ;;  %v1492_v15 = vadd.f32 %v2049_v36, %v1427_v16 }
 0x14f   : > { %v2054_v1 = vpop.f32.mrb[29].mxu1 }
 0x150   : > { %v2055_v17 = vadd.f32 %v2054_v1, %v2053_v22  ;;  %v2056_v14 = vpop.f32.mrb[30].mxu1  ;;  %v2013_v8 = vpop.f32.mrb[28].mxu0  ;;  %v1495_v6 = vadd.f32 %v2052_v7, %v1430_v27 }
 0x151   : > { %v2057_v19 = vpop.f32.mrb[31].mxu1  ;;  %v2014_v59 = vpop.f32.mrb[29].mxu0 }
 0x152   : > { %v2058_v20 = vadd.f32 %v2057_v19, %v2056_v14  ;;  %v2015_v0 = vadd.f32 %v2014_v59, %v2013_v8  ;;  %v2016_v43 = vpop.f32.mrb[30].mxu0 }
 0x153   : > { %v2017_v21 = vpop.f32.mrb[31].mxu0 }
 0x154   : > { %v1435_v23 = vadd.f32 %v2015_v0, %v1370_v42  ;;  %v2018_v18 = vadd.f32 %v2017_v21, %v2016_v43 }
 0x156   : > { %v2093_v25 = vpop.f32.mrb[32].mxu1  ;;  %v1438_v9 = vadd.f32 %v2018_v18, %v1373_v24  ;;  %v1500_v48 = vadd.f32 %v2055_v17, %v1435_v23 }
 0x157   : > { %v1556_v26 = vpop.f32.mrb[33].mxu1 }
 0x158   : > { %v1557_v28 = vadd.f32 %v1556_v26, %v1492_v15  ;;  %v2094_v10 = vpop.f32.mrb[34].mxu1  ;;  %v2089_v29 = vpop.f32.mrb[32].mxu0  ;;  %v1565_v30 = vadd.f32 %v2093_v25, %v1500_v48  ;;  %v1503_v31 = vadd.f32 %v2058_v20, %v1438_v9 }
 0x159   : > { %v1559_v32 = vpop.f32.mrb[35].mxu1  ;;  %v1549_v33 = vadd.f32 %v2089_v29, %v1484_v34  ;;  %v1540_v3 = vpop.f32.mrb[33].mxu0 }
 0x15a   : > { %v1560_v35 = vadd.f32 %v1559_v32, %v1495_v6  ;;  %v1541_v37 = vadd.f32 %v1540_v3, %v1476_v46  ;;  %v2090_v38 = vpop.f32.mrb[34].mxu0  ;;  %v1568_v39 = vadd.f32 %v2094_v10, %v1503_v31  ;;  %v1891_v3 = vld [vmem:[%s2974_s3] ss:$0 sm:$0xff] }
 0x15b   : > { %v1552_v40 = vadd.f32 %v2090_v38, %v1487_v11  ;;  %v1543_v47 = vpop.f32.mrb[35].mxu0  ;;  %1575 = vadd.xlane.f32.xlu1 %v1549_v33 }
 0x15c   : > { %v1544_v42 = vadd.f32 %v1543_v47, %v1479_v54  ;;  %1571 = vadd.xlane.f32.xlu0 %v1541_v37 }
 0x15f   : > { %1577 = vadd.xlane.f32.xlu1 %v1552_v40 }
 0x160   : > { %1579 = vadd.xlane.f32.xlu0 %v1557_v28 }
 0x163   : > { %1581 = vadd.xlane.f32.xlu1 %v1560_v35 }
 0x164   : > { %1573 = vadd.xlane.f32.xlu0 %v1544_v42 }
 0x167   : > { %1585 = vadd.xlane.f32.xlu1 %v1568_v39 }
 0x168   : > { %1583 = vadd.xlane.f32.xlu0 %v1565_v30 }
 0x1e8   : > { %v1576_v24 = vpop.xlane.xlu1 %1575 }
 0x1e9   : > { %v1590_v50 = vmul.f32 0.0078125, %v1576_v24  ;;  %v1572_v44 = vpop.xlane.xlu0 %1571 }
 0x1ea   : > { %v1588_v53 = vmul.f32 0.0078125, %v1572_v44 }
 0x1eb   : > { %v2860_v56 = vsub.f32 %v1549_v33, %v1590_v50 }
 0x1ec   : > { %v1578_v46 = vpop.xlane.xlu1 %1577  ;;  %v2862_v57 = vsub.f32 %v1541_v37, %v1588_v53 }
 0x1ed   : > { %v1591_v58 = vmul.f32 0.0078125, %v1578_v46  ;;  %v1580_v52 = vpop.xlane.xlu0 %1579  ;;  %v1606_v54 = vmul.f32 %v2860_v56, %v2860_v56 }
 0x1ee   : > { %v1592_v60 = vmul.f32 0.0078125, %v1580_v52  ;;  %v1604_v34 = vmul.f32 %v2862_v57, %v2862_v57 }
 0x1ef   : > { %v2866_v45 = vsub.f32 %v1552_v40, %v1591_v58  ;;  %1616 = vadd.xlane.f32.xlu0 %v1606_v54 }
 0x1f0   : > { %v1582_v41 = vpop.xlane.xlu1 %1581  ;;  %v2868_v61 = vsub.f32 %v1557_v28, %v1592_v60 }
 0x1f1   : > { %v1574_v63 = vpop.xlane.xlu0 %1573  ;;  %v1607_v51 = vmul.f32 %v2866_v45, %v2866_v45  ;;  %v1593_v36 = vmul.f32 0.0078125, %v1582_v41 }
 0x1f2   : > { %v1589_v55 = vmul.f32 0.0078125, %v1574_v63  ;;  %v1608_v12 = vmul.f32 %v2868_v61, %v2868_v61 }
 0x1f3   : > { %1618 = vadd.xlane.f32.xlu1 %v1607_v51  ;;  %1612 = vadd.xlane.f32.xlu0 %v1604_v34  ;;  %v2878_v7 = vsub.f32 %v1560_v35, %v1593_v36 }
 0x1f4   : > { %v2874_v2 = vsub.f32 %v1544_v42, %v1589_v55  ;;  %v1586_v4 = vpop.xlane.xlu1 %1585 }
 0x1f5   : > { %v1584_v11 = vpop.xlane.xlu0 %1583  ;;  %v1595_v49 = vmul.f32 0.0078125, %v1586_v4  ;;  %v1609_v22 = vmul.f32 %v2878_v7, %v2878_v7 }
 0x1f6   : > { %v1594_v62 = vmul.f32 0.0078125, %v1584_v11  ;;  %v1605_v13 = vmul.f32 %v2874_v2, %v2874_v2 }
 0x1f7   : > { %1620 = vadd.xlane.f32.xlu0 %v1608_v12  ;;  %v2884_v5 = vsub.f32 %v1568_v39, %v1595_v49 }
 0x1f8   : > { %v2882_v16 = vsub.f32 %v1565_v30, %v1594_v62  ;;  %1614 = vadd.xlane.f32.xlu1 %v1605_v13  ;;  %v1890_v30 = vld [vmem:[%s2973_s2] ss:$0 sm:$0xff] }
 0x1f9   : > { %v1611_v1 = vmul.f32 %v2884_v5, %v2884_v5 }
 0x1fa   : > { %v1610_v27 = vmul.f32 %v2882_v16, %v2882_v16 }
 0x1fc   : > { %1622 = vadd.xlane.f32.xlu1 %v1609_v22  ;;  %1624 = vadd.xlane.f32.xlu0 %v1610_v27 }
 0x200   : > { %1626 = vadd.xlane.f32.xlu1 %v1611_v1 }
 0x27c   : > { %v1617_v15 = vpop.xlane.xlu0 %1616 }
 0x27d   : > { %v1630_v17 = vmul.f32 0.0078125, %v1617_v15 }
 0x27f   : > { %v1638_v14 = vadd.f32 1e-06, %v1630_v17 }
 0x280   : > { %v1619_v8 = vpop.xlane.xlu1 %1618  ;;  %v1613_v19 = vpop.xlane.xlu0 %1612 }
 0x281   : > { %2227 = vrsqrt.f32 %v1638_v14  ;;  %v1631_v6 = vmul.f32 0.0078125, %v1619_v8  ;;  %v1628_v59 = vmul.f32 0.0078125, %v1613_v19 }
 0x283   : > { %v1639_v20 = vadd.f32 1e-06, %v1631_v6  ;;  %v1636_v0 = vadd.f32 1e-06, %v1628_v59 }
 0x284   : > { %v1621_v43 = vpop.xlane.xlu0 %1620 }
 0x285   : > { %2229 = vrsqrt.f32 %v1639_v20  ;;  %v1632_v21 = vmul.f32 0.0078125, %v1621_v43  ;;  %v1615_v23 = vpop.xlane.xlu1 %1614 }
 0x286   : > { %2231 = vrsqrt.f32 %v1636_v0  ;;  %v1629_v18 = vmul.f32 0.0078125, %v1615_v23 }
 0x287   : > { %v1640_v25 = vadd.f32 1e-06, %v1632_v21 }
 0x288   : > { %v1637_v9 = vadd.f32 1e-06, %v1629_v18 }
 0x289   : > { %2233 = vrsqrt.f32 %v1640_v25  ;;  %v1623_v48 = vpop.xlane.xlu1 %1622  ;;  %v1625_v26 = vpop.xlane.xlu0 %1624 }
 0x28a   : > { %2235 = vrsqrt.f32 %v1637_v9  ;;  %v1633_v28 = vmul.f32 0.0078125, %v1623_v48  ;;  %v1634_v10 = vmul.f32 0.0078125, %v1625_v26 }
 0x28b   : > { %v2228_v29 = vpop.eup %2227 }
 0x28c   : > { %v1654_v31 = vmul.f32 %v2228_v29, %v2860_v56  ;;  %v1641_v32 = vadd.f32 1e-06, %v1633_v28  ;;  %v1642_v33 = vadd.f32 1e-06, %v1634_v10 }
 0x28d   : > { %v1627_v35 = vpop.xlane.xlu1 %1626 }
 0x28e   : > { %v1669_v37 = vmul.f32 %v1890_v30, %v1654_v31  ;;  %2237 = vrsqrt.f32 %v1641_v32  ;;  %v1635_v38 = vmul.f32 0.0078125, %v1627_v35 }
 0x28f   : > { %v2230_v39 = vpop.eup %2229  ;;  %2239 = vrsqrt.f32 %v1642_v33 }
 0x290   : > { %v2232_v40 = vpop.eup %2231  ;;  %v1684_v47 = vadd.f32 %v1891_v3, %v1669_v37  ;;  %v1655_v42 = vmul.f32 %v2230_v39, %v2866_v45  ;;  %v1643_v24 = vadd.f32 1e-06, %v1635_v38 }
 0x291   : > { %v1652_v50 = vmul.f32 %v2232_v40, %v2862_v57 }
 0x292   : > { %1692 = vst [vmem:[%s2904_s6 + $0x10] sm:$0xff] %v1684_v47  ;;  %v1670_v44 = vmul.f32 %v1890_v30, %v1655_v42  ;;  %2241 = vrsqrt.f32 %v1643_v24 }
 0x293   : > { %v2234_v53 = vpop.eup %2233  ;;  %v1667_v56 = vmul.f32 %v1890_v30, %v1652_v50 }
 0x294   : > { %v2236_v46 = vpop.eup %2235  ;;  %v1685_v58 = vadd.f32 %v1891_v3, %v1670_v44  ;;  %v1656_v52 = vmul.f32 %v2234_v53, %v2868_v61 }
 0x295   : > { %v1682_v54 = vadd.f32 %v1891_v3, %v1667_v56  ;;  %v1653_v60 = vmul.f32 %v2236_v46, %v2874_v2 }
 0x296   : > { %1693 = vst [vmem:[%s2904_s6 + $0x18] sm:$0xff] %v1685_v58  ;;  %v1671_v57 = vmul.f32 %v1890_v30, %v1656_v52 }
 0x297   : > { %1690 = vst [vmem:[%s2904_s6] sm:$0xff] %v1682_v54  ;;  %v1668_v45 = vmul.f32 %v1890_v30, %v1653_v60 }
 0x298   : > { %v2238_v41 = vpop.eup %2237  ;;  %v1686_v63 = vadd.f32 %v1891_v3, %v1671_v57 }
 0x299   : > { %v2240_v51 = vpop.eup %2239  ;;  %v1683_v34 = vadd.f32 %v1891_v3, %v1668_v45  ;;  %v1657_v36 = vmul.f32 %v2238_v41, %v2878_v7 }
 0x29a   : > { %1694 = vst [vmem:[%s2904_s6 + $0x20] sm:$0xff] %v1686_v63  ;;  %v1658_v61 = vmul.f32 %v2240_v51, %v2882_v16 }
 0x29b   : > { %1691 = vst [vmem:[%s2904_s6 + $0x8] sm:$0xff] %v1683_v34  ;;  %v1672_v55 = vmul.f32 %v1890_v30, %v1657_v36 }
 0x29c   : > { %v2242_v2 = vpop.eup %2241  ;;  %v1673_v4 = vmul.f32 %v1890_v30, %v1658_v61 }
 0x29d   : > { %v1687_v11 = vadd.f32 %v1891_v3, %v1672_v55  ;;  %v1659_v12 = vmul.f32 %v2242_v2, %v2884_v5 }
 0x29e   : > { %v1688_v49 = vadd.f32 %v1891_v3, %v1673_v4 }
 0x29f   : > { %1695 = vst [vmem:[%s2904_s6 + $0x28] sm:$0xff] %v1687_v11  ;;  %v1674_v62 = vmul.f32 %v1890_v30, %v1659_v12 }
 0x2a0   : > { %1696 = vst [vmem:[%s2904_s6 + $0x30] sm:$0xff] %v1688_v49 }
 0x2a1   : > { %v1689_v7 = vadd.f32 %v1891_v3, %v1674_v62 }
 0x2a3   : > { %1697 = vst [vmem:[%s2904_s6 + $0x38] sm:$0xff] %v1689_v7 }
 0x2a4   : > { %2256 = shalt.err (!%p2253_p3)
}
 0x2a5   : > { %s2257_s22 = scalar_lea.hbm %s2923_s10, 1024  ;;  %s2261_s28 = scalar_lea.hbm %s2975_s4, 2048 }
 0x2a6   : > { %p2258_p4 = scmp.ne.s32.totalorder %s2923_s10, %s2257_s22  ;;  %p2262_p9 = scmp.lt.u32.totalorder %s2923_s10, %s2975_s4 }
 0x2a7   : > { %p2263_p10 = scmp.lt.u32.totalorder %s2261_s28, %s2257_s22  ;;  %p2265_p12 = scmp.lt.u32.totalorder %s2257_s22, %s2923_s10 }
 0x2a8   : > { %p2259_p7 = pnand %p2258_p4, %p2374_p5 }
 0x2a9   : > { %p2264_p11 = por %p2263_p10, %p2262_p9 }
 0x2aa   : > { %p2260_p8 = pneg %p2259_p7 }
 0x2ab   : > { %p2266_p13 = por %p2265_p12, %p2264_p11 }
 0x2ad   : > { %p2267_p0 = pnand %p2266_p13, %p2260_p8 }
 0x2af   : > { %2270 = shalt.err (!%p2267_p0)
}
 0x2b0   : > { %s2309_s5 = smov 128   ;;  %s2310_s6 = smov 8  }
 0x2b1   : > { %2111 = dma.vmem_to_hbm [thread:$0]  (%p2374_p5), %s2925_s8, 1024, %s2923_s10, %s2930_s11, %s2309_s5, %s2309_s5, %s2310_s6  }
 0x2b2 PF: > { %p2117_p1 = scmp.ge.s32.totalorder %s2305_s18, 2  ;;  %s1727_s7 = sand.u32 1, %s2293_s15  }
 0x2b3   : > { %s1728_s9 = scalar_lea.sflag [#allocation4], %s1727_s7 }
 0x2b4   : > { %p2114_p2 = pnand %p2117_p1, %p2378_p6 }
 0x2b6   : > { %2288 = dma.done.wait (!%p2114_p2), %s1728_s9, 1024  }
 0x2b7   : > { %2290 = vsyncadd (!%p2114_p2), %s1728_s9, 4294966272  ;;  %p14_p3 = scmp.ge.s32.totalorder %s2361_s21, 4   ;;  %s2986_s15 = smov %s2297_s16 }
 0x2b8   : > { %s2987_s16 = smov %s2301_s17  ;;  %s2988_s17 = smov %s2372_s24 }
 0x2b9   : > { %s2989_s18 = smov %s2361_s21  ;;  %16 = sbr.rel (!%p14_p3) target bundleno = 3 (0x3), region = 72 }
 0x2c0   :  { %1733 = vsyncpa [#allocation4], 1 }
 0x2c1   :  { %1735 = vsyncpa [#allocation4 + $0x1], 1 }

</bundles_post_ra>
